<compile_context>
chip_gen: v7x
topology: tpu7x:2x2x1
jax: 0.10.0
libtpu: 0.0.40
codegen_flags: <defaults>
</compile_context>

<pallas_src>
import functools
import math

import jax
import jax.numpy as jnp
from jax import lax
from jax.experimental import pallas as pl
from jax.experimental.pallas import tpu as pltpu

# ---------------- config (mirrors TimmClassifier.__init__ kwargs) ----------------
CLASSES = 21
DURATION = 10                      # kwargs['duration']
FACTOR = int(DURATION / 5.0)       # self.factor
BACKBONE_OUT = 64                  # stand-in backbone num_features
MEL = dict(sample_rate=16000, window_size=64, hop_size=32,
           fmin=50.0, fmax=7500.0, mel_bins=32, power=2.0, top_db=80.0)
GEM_P = 3.0                        # GeM p (torch.ones(1) * 3), eval: fixed
GEM_EPS = 1e-6
AMIN = 1e-10                       # torchaudio AmplitudeToDB amin
INV_LN10 = 1.0 / math.log(10.0)

FRAME_CHUNK = 256                  # in-kernel frame-chunk width (lane axis, mult. of 128)
CLS_PAD = 128                      # lane-dense head output width (>= CLASSES)


def _round_up(v, m):
    return ((v + m - 1) // m) * m


# ---------------------------- Pallas kernel ----------------------------
def fused_forward_kernel(x_ref, band_ref, bias_ref, sel_ref, hw_ref, hb_ref, *rest,
                         F, T, TT, n_chunks, C, want_sums):
    """Per-sample: dB-normalize -> 3x3 conv stand-in + ReLU -> GeM -> linear head.

    x_ref   : (F, T)            per-sample mel power spectrogram (frames on lanes)
    band_ref: (3, C*F, F+2)     banded conv weights, one slab per column tap offset
    bias_ref: (C*F, 1)          conv bias, broadcast over rows (c, f)
    sel_ref : (C, C*F)          sums the (c, f) rows of the cubed activations per channel
    hw_ref  : (C, CLS_PAD)      head weights, lane-padded to 128
    hb_ref  : (1, CLS_PAD)      head bias, lane-padded
    outputs : logit (1, CLS_PAD) [+ raw GeM sums (1, C) when want_sums]
    scratch : pad_ref (F+2, T_pad+2) zero-bordered image for the 'same' conv halo
    """
    if want_sums:
        logit_ref, sum_ref, pad_ref = rest
    else:
        logit_ref, pad_ref = rest
        sum_ref = None

    # ---- AmplitudeToDB (power) + per-sample top_db clamp + (x + 80) / 80 ----
    # Note: top_db clamp uses the per-spectrogram max (torchaudio functional semantics).
    x = x_ref[...]                                             # (F, T)
    x_db = 10.0 * (jnp.log(jnp.maximum(x, AMIN)) * INV_LN10)   # 10 * log10(clamp(x, amin))
    x_db = jnp.maximum(x_db, jnp.max(x_db) - MEL['top_db'])
    img = (x_db + 80.0) / 80.0

    # ---- zero-padded image: 1-pixel halo for the 'same' conv, frames padded to T_pad ----
    pad_ref[...] = jnp.zeros_like(pad_ref)
    pad_ref[1:F + 1, 1:T + 1] = img

    bias = bias_ref[...]                                       # (C*F, 1)
    sel = sel_ref[...]                                         # (C, C*F)

    def conv_cubed(start, valid_cols=None):
        """max(conv + bias, eps)^3 for output frame columns [start, start + TT)."""
        y = jnp.dot(band_ref[0], pad_ref[:, pl.ds(start, TT)],
                    preferred_element_type=jnp.float32)        # (C*F, TT)
        y = y + jnp.dot(band_ref[1], pad_ref[:, pl.ds(start + 1, TT)],
                        preferred_element_type=jnp.float32)
        y = y + jnp.dot(band_ref[2], pad_ref[:, pl.ds(start + 2, TT)],
                        preferred_element_type=jnp.float32)
        y = jnp.maximum(y + bias, GEM_EPS)                     # bias + ReLU + GeM clamp
        y = y * y * y                                          # x**p, p = 3 (VPU only)
        if valid_cols is not None:                             # static: last chunk only
            col = lax.broadcasted_iota(jnp.int32, (1, TT), 1)
            y = jnp.where(col < valid_cols, y, 0.0)
        return y

    def body(c, carry):
        start = pl.multiple_of(c * TT, 128)
        return carry + jnp.dot(sel, conv_cubed(start),
                               preferred_element_type=jnp.float32)   # (C, TT)

    carry = lax.fori_loop(0, n_chunks - 1, body, jnp.zeros((C, TT), jnp.float32))

    # Statically peeled last chunk: the only one that can contain padded tail columns.
    last_start = (n_chunks - 1) * TT
    tail = T - last_start
    y_last = conv_cubed(last_start, valid_cols=tail if tail < TT else None)
    carry = carry + jnp.dot(sel, y_last, preferred_element_type=jnp.float32)

    # ---- GeM root + linear head on the tiny (1, C) pooled vector ----
    ones_row = jnp.ones((1, TT), jnp.float32)
    ch_sums = lax.dot_general(ones_row, carry, (((1,), (1,)), ((), ())),
                              preferred_element_type=jnp.float32)    # (1, C)
    pooled = ch_sums * (1.0 / (F * T))                               # GeM spatial mean
    pooled = jnp.exp(jnp.log(pooled) * (1.0 / GEM_P))                # ** (1/p), pooled > 0
    logit_ref[...] = (jnp.dot(pooled, hw_ref[...],
                              preferred_element_type=jnp.float32) + hb_ref[...])
    if want_sums:
        sum_ref[...] = ch_sums


# ---------------------------- plain-JAX glue ----------------------------
def _hann_window(n):
    k = jnp.arange(n, dtype=jnp.float32)
    return 0.5 - 0.5 * jnp.cos(2.0 * jnp.pi * k / n)          # periodic Hann


def _mel_fbanks(n_freqs, f_min, f_max, n_mels, sample_rate):
    """HTK-scale triangular mel filterbank, norm=None (torchaudio default)."""
    all_freqs = jnp.linspace(0.0, sample_rate / 2.0, n_freqs)

    def hz_to_mel(f):
        return 2595.0 * jnp.log10(1.0 + f / 700.0)

    def mel_to_hz(m):
        return 700.0 * (10.0 ** (m / 2595.0) - 1.0)

    m_pts = jnp.linspace(hz_to_mel(f_min), hz_to_mel(f_max), n_mels + 2)
    f_pts = mel_to_hz(m_pts)
    f_diff = f_pts[1:] - f_pts[:-1]
    slopes = f_pts[None, :] - all_freqs[:, None]
    down = -slopes[:, :-2] / f_diff[:-1]
    up = slopes[:, 2:] / f_diff[1:]
    return jnp.maximum(0.0, jnp.minimum(down, up))            # (n_freqs, n_mels)


def mel_spectrogram(x):
    """Power mel spectrogram -> (BS, n_mels, frames); frames sit on the lane axis."""
    # TODO(synk): FFT has no Pallas TPU primitive; STFT framing + rfft stay in JAX glue.
    n_fft, hop = MEL['window_size'], MEL['hop_size']
    pad = n_fft // 2
    xp = jnp.pad(x, ((0, 0), (pad, pad)), mode='reflect')
    n_frames = 1 + (xp.shape[-1] - n_fft) // hop
    idx = jnp.arange(n_frames)[:, None] * hop + jnp.arange(n_fft)[None, :]
    frames = xp[:, idx] * _hann_window(n_fft)[None, None, :]  # (BS, frames, n_fft)
    spec = jnp.abs(jnp.fft.rfft(frames, axis=-1)) ** MEL['power']
    fb = _mel_fbanks(n_fft // 2 + 1, MEL['fmin'], MEL['fmax'],
                     MEL['mel_bins'], MEL['sample_rate'])
    return jnp.einsum('btf,fm->bmt', spec, fb)                # (BS, n_mels, frames)


def _build_conv_operands(conv_w, conv_b, F, C):
    """Conv-as-banded-matmul operands (built once, outside the kernel).

    band[dw, c*F + f, r] = w[c, dh, dw] if r == f + dh (dh in 0..2) else 0, so that
    sum_dw band[dw] @ padded[:, t + dw : t + dw + TT] is the 'same' 3x3 conv output
    laid out as rows (c, f) x frame columns.
    """
    w3 = conv_w.reshape(3, 3, C)                              # (dh, dw, C)
    f_idx = jnp.arange(F)[:, None]
    r_idx = jnp.arange(F + 2)[None, :]
    dh = r_idx - f_idx                                        # (F, F+2)
    valid = ((dh >= 0) & (dh <= 2)).astype(jnp.float32)
    block = w3[jnp.clip(dh, 0, 2)] * valid[:, :, None, None]  # (F, F+2, 3, C)
    band = jnp.transpose(block, (2, 3, 0, 1)).reshape(3, C * F, F + 2)
    bias_col = jnp.repeat(conv_b[0], F)[:, None]              # (C*F, 1), rows (c, f)
    sel = jnp.kron(jnp.eye(C, dtype=jnp.float32),
                   jnp.ones((1, F), jnp.float32))             # (C, C*F)
    return band, bias_col, sel


# ---------------------------- kernel wrapper ----------------------------
def fused_forward(mel_power, params, want_sums=False):
    """mel power (BS, n_mels, frames) -> logits (BS, CLASSES) [+ raw GeM sums (BS, C)]."""
    # TODO(synk): the real timm backbone is an arbitrary external CNN; a deterministic
    # 3x3 conv + ReLU (fused with GeM + head) stands in for it.
    BS, F, T = mel_power.shape
    C = params['conv_w'].shape[1]
    TT = min(FRAME_CHUNK, _round_up(T, 128))
    n_chunks = -(-T // TT)
    T_pad = n_chunks * TT

    band, bias_col, sel = _build_conv_operands(params['conv_w'], params['conv_b'], F, C)
    hw = jnp.pad(params['head_w'], ((0, 0), (0, CLS_PAD - CLASSES)))
    hb = jnp.pad(params['head_b'], ((0, 0), (0, CLS_PAD - CLASSES)))

    kernel = functools.partial(fused_forward_kernel, F=F, T=T, TT=TT,
                               n_chunks=n_chunks, C=C, want_sums=want_sums)

    out_shape = [jax.ShapeDtypeStruct((BS, 1, CLS_PAD), jnp.float32)]
    out_specs = [pl.BlockSpec((None, 1, CLS_PAD), lambda b: (b, 0, 0))]
    if want_sums:
        out_shape.append(jax.ShapeDtypeStruct((BS, 1, C), jnp.float32))
        out_specs.append(pl.BlockSpec((None, 1, C), lambda b: (b, 0, 0)))

    res = pl.pallas_call(
        kernel,
        out_shape=tuple(out_shape) if want_sums else out_shape[0],
        grid_spec=pltpu.PrefetchScalarGridSpec(
            num_scalar_prefetch=0,
            grid=(BS,),                                        # batch only; "parallel"
            in_specs=[
                pl.BlockSpec((None, F, T), lambda b: (b, 0, 0)),        # mel power
                pl.BlockSpec((3, C * F, F + 2), lambda b: (0, 0, 0)),   # banded conv W
                pl.BlockSpec((C * F, 1), lambda b: (0, 0)),             # conv bias
                pl.BlockSpec((C, C * F), lambda b: (0, 0)),             # channel selector
                pl.BlockSpec((C, CLS_PAD), lambda b: (0, 0)),           # head W (padded)
                pl.BlockSpec((1, CLS_PAD), lambda b: (0, 0)),           # head b (padded)
            ],
            out_specs=tuple(out_specs) if want_sums else out_specs[0],
            scratch_shapes=[pltpu.VMEM((F + 2, T_pad + 2), jnp.float32)],
        ),
        compiler_params=pltpu.CompilerParams(
            dimension_semantics=("parallel",),
            vmem_limit_bytes=48 * 1024 * 1024),
    )(mel_power, band, bias_col, sel, hw, hb)

    if want_sums:
        logits, sums = res
        return logits[:, 0, :CLASSES], sums[:, 0, :]
    return res[:, 0, :CLASSES]


# ---------------------------- forward pass ----------------------------
def timm_classifier_forward(x, params, is_test=False, training=False):
    x = x[:, 0, :]                                            # drop audio channel dim
    if not is_test:
        bs, t = x.shape
        x = x.reshape(bs * FACTOR, t // FACTOR)               # split into 5 s segments
    mel = mel_spectrogram(x)                                  # (BS, n_mels, frames)
    if training:
        # torch training path regroups the FACTOR segments along time before GeM;
        # the GeM sum is additive, so combine the per-segment channel sums and
        # re-apply the root + head on the tiny (bs, C) result.
        _, sums = fused_forward(mel, params, want_sums=True)
        BS, F, T = mel.shape
        C = sums.shape[1]
        sums = sums.reshape(BS // FACTOR, FACTOR, C).sum(axis=1)
        pooled = (sums / (FACTOR * F * T)) ** (1.0 / GEM_P)
        logits = pooled @ params['head_w'] + params['head_b']
    else:
        logits = fused_forward(mel, params, want_sums=False)
    return {'logit': logits}


# ---------------------------- plain-JAX reference (for self-check) ----------------------------
def reference_logits(mel_power, params):
    x_db = 10.0 * jnp.log10(jnp.maximum(mel_power, AMIN))
    x_db = jnp.maximum(x_db, jnp.max(x_db, axis=(1, 2), keepdims=True) - MEL['top_db'])
    img = (x_db + 80.0) / 80.0
    BS, F, T = img.shape
    C = params['conv_w'].shape[1]
    w3 = params['conv_w'].reshape(3, 3, C)
    pad = jnp.pad(img, ((0, 0), (1, 1), (1, 1)))
    conv = jnp.zeros((BS, C, F, T), jnp.float32)
    for dh in range(3):
        for dw in range(3):
            conv = conv + (pad[:, dh:dh + F, dw:dw + T][:, None, :, :]
                           * w3[dh, dw][None, :, None, None])
    conv = jnp.maximum(conv + params['conv_b'][0][None, :, None, None], 0.0)
    pooled = jnp.mean(jnp.maximum(conv, GEM_EPS) ** GEM_P, axis=(2, 3)) ** (1.0 / GEM_P)
    return pooled @ params['head_w'] + params['head_b']


# ---------------------------- main ----------------------------
if __name__ == "__main__":
    key = jax.random.PRNGKey(0)
    k1, k2, k3, k4, kx = jax.random.split(key, 5)
    params = {
        'conv_w': jax.random.normal(k1, (9, BACKBONE_OUT), jnp.float32) * 0.1,
        'conv_b': jax.random.normal(k2, (1, BACKBONE_OUT), jnp.float32) * 0.01,
        'head_w': jax.random.normal(k3, (BACKBONE_OUT, CLASSES), jnp.float32) * 0.05,
        'head_b': jax.random.normal(k4, (1, CLASSES), jnp.float32) * 0.01,
    }
    # waveform: batch=2, 1 audio channel, 1024 samples (splits into FACTOR=2 segments of 512)
    x = jax.random.normal(kx, (2, 1, 1024), jnp.float32)

    fwd = jax.jit(functools.partial(timm_classifier_forward, is_test=False, training=False))
    out = fwd(x, params)
    logit = jax.block_until_ready(out['logit'])

    assert logit.shape == (2 * FACTOR, CLASSES), logit.shape
    assert bool(jnp.all(jnp.isfinite(logit)))

    # correctness check of the fused Pallas path against a plain-JAX reference
    seg = x[:, 0, :].reshape(2 * FACTOR, 1024 // FACTOR)
    ref = reference_logits(mel_spectrogram(seg), params)
    assert bool(jnp.allclose(logit, ref, rtol=2e-2, atol=2e-2)), \
        float(jnp.max(jnp.abs(logit - ref)))
    print("KERNEL_OK")
</pallas_src>

<mosaic_0001>
module attributes {stable_mosaic.version = 11 : i64} {
  func.func private @main(%arg0: i32) attributes {dimension_semantics = [#tpu.dimension_semantics<core_parallel>], iteration_bounds = array<i64: 2>, tpu.core_type = #tpu.core_type<sc_scalar_subcore>, window_params = []} {
    return
  }
}

module attributes {stable_mosaic.version = 11 : i64} {
  func.func private @main(%arg0: i32) attributes {dimension_semantics = [#tpu.dimension_semantics<core_parallel>], iteration_bounds = array<i64: 2>, tpu.core_type = #tpu.core_type<sc_scalar_subcore>, window_params = []} {
    return
  }
}

module attributes {stable_mosaic.version = 11 : i64} {
  func.func @fused_forward_kernel(%arg0: i32, %arg1: memref<1x32x17xf32, #tpu.memory_space<vmem>>, %arg2: memref<3x2048x34xf32, #tpu.memory_space<vmem>>, %arg3: memref<2048x1xf32, #tpu.memory_space<vmem>>, %arg4: memref<64x2048xf32, #tpu.memory_space<vmem>>, %arg5: memref<64x128xf32, #tpu.memory_space<vmem>>, %arg6: memref<1x128xf32, #tpu.memory_space<vmem>>, %arg7: memref<1x1x128xf32, #tpu.memory_space<vmem>>, %arg8: memref<34x130xf32, #tpu.memory_space<vmem>>) attributes {dimension_semantics = [#tpu.dimension_semantics<parallel>], iteration_bounds = array<i64: 4>, scalar_prefetch = 0 : i64, scratch_operands = 1 : i64, tpu.core_type = #tpu.core_type<tc>, window_params = [{transform_indices = @transform_0, window_bounds = array<i64: 1, 32, 17>}, {pipeline_mode = #tpu.pipeline_mode<synchronous>, transform_indices = @transform_1, window_bounds = array<i64: 3, 2048, 34>}, {pipeline_mode = #tpu.pipeline_mode<synchronous>, transform_indices = @transform_2, window_bounds = array<i64: 2048, 1>}, {pipeline_mode = #tpu.pipeline_mode<synchronous>, transform_indices = @transform_3, window_bounds = array<i64: 64, 2048>}, {pipeline_mode = #tpu.pipeline_mode<synchronous>, transform_indices = @transform_4, window_bounds = array<i64: 64, 128>}, {pipeline_mode = #tpu.pipeline_mode<synchronous>, transform_indices = @transform_5, window_bounds = array<i64: 1, 128>}, {transform_indices = @transform_6, window_bounds = array<i64: 1, 1, 128>}]} {
    %c0 = arith.constant 0 : index
    %c0_0 = arith.constant 0 : index
    %c0_1 = arith.constant 0 : index
    %0 = vector.load %arg1[%c0, %c0_0, %c0_1] : memref<1x32x17xf32, #tpu.memory_space<vmem>>, vector<1x32x17xf32>
    %1 = vector.shape_cast %0 : vector<1x32x17xf32> to vector<32x17xf32>
    %cst = arith.constant 1.000000e-10 : f32
    %2 = vector.broadcast %cst : f32 to vector<32x17xf32>
    %3 = arith.maximumf %1, %2 : vector<32x17xf32>
    %4 = math.log %3 : vector<32x17xf32>
    %cst_2 = arith.constant 0.434294492 : f32
    %5 = vector.broadcast %cst_2 : f32 to vector<32x17xf32>
    %6 = arith.mulf %4, %5 : vector<32x17xf32>
    %cst_3 = arith.constant 1.000000e+01 : f32
    %7 = vector.broadcast %cst_3 : f32 to vector<32x17xf32>
    %8 = arith.mulf %7, %6 : vector<32x17xf32>
    %9 = vector.shape_cast %8 : vector<32x17xf32> to vector<1x32x17xf32>
    %cst_4 = arith.constant dense<0xFF800000> : vector<1xf32>
    %10 = vector.multi_reduction <maximumf>, %9, %cst_4 [1, 2] : vector<1x32x17xf32> to vector<1xf32>
    %11 = vector.shape_cast %10 : vector<1xf32> to vector<1x1x1xf32>
    %12 = vector.extract %11[0, 0, 0] : f32 from vector<1x1x1xf32>
    %cst_5 = arith.constant 8.000000e+01 : f32
    %13 = arith.subf %12, %cst_5 : f32
    %14 = vector.broadcast %13 : f32 to vector<32x17xf32>
    %15 = arith.maximumf %8, %14 : vector<32x17xf32>
    %cst_6 = arith.constant 8.000000e+01 : f32
    %16 = vector.broadcast %cst_6 : f32 to vector<32x17xf32>
    %17 = arith.addf %15, %16 : vector<32x17xf32>
    %cst_7 = arith.constant 8.000000e+01 : f32
    %18 = vector.broadcast %cst_7 : f32 to vector<32x17xf32>
    %19 = arith.divf %17, %18 : vector<32x17xf32>
    %cst_8 = arith.constant 0.000000e+00 : f32
    %20 = vector.broadcast %cst_8 : f32 to vector<34x130xf32>
    %c0_9 = arith.constant 0 : index
    %c0_10 = arith.constant 0 : index
    %21 = vector.load %arg8[%c0_9, %c0_10] : memref<34x130xf32, #tpu.memory_space<vmem>>, vector<34x130xf32>
    tpu.vector_store %arg8[%c0_9, %c0_10], %20 {strides = array<i32>} : memref<34x130xf32, #tpu.memory_space<vmem>>, vector<34x130xf32>,
    %c1 = arith.constant 1 : index
    %c1_11 = arith.constant 1 : index
    %22 = vector.load %arg8[%c1, %c1_11] : memref<34x130xf32, #tpu.memory_space<vmem>>, vector<32x17xf32>
    tpu.vector_store %arg8[%c1, %c1_11], %19 {strides = array<i32>} : memref<34x130xf32, #tpu.memory_space<vmem>>, vector<32x17xf32>,
    %c0_12 = arith.constant 0 : index
    %c0_13 = arith.constant 0 : index
    %23 = vector.load %arg3[%c0_12, %c0_13] : memref<2048x1xf32, #tpu.memory_space<vmem>>, vector<2048x1xf32>
    %c0_14 = arith.constant 0 : index
    %c0_15 = arith.constant 0 : index
    %24 = vector.load %arg4[%c0_14, %c0_15] : memref<64x2048xf32, #tpu.memory_space<vmem>>, vector<64x2048xf32>
    %cst_16 = arith.constant 0.000000e+00 : f32
    %25 = vector.broadcast %cst_16 : f32 to vector<64x128xf32>
    %c0_i32 = arith.constant 0 : i32
    %c0_i32_17 = arith.constant 0 : i32
    %26 = arith.addi %c0_i32, %c0_i32_17 : i32
    %c1_i32 = arith.constant 1 : i32
    %27 = scf.for %arg9 = %c0_i32 to %26 step %c1_i32 iter_args(%arg10 = %25) -> (vector<64x128xf32>)  : i32 {
      %c128_i32 = arith.constant 128 : i32
      %72 = arith.muli %arg9, %c128_i32 : i32
      %73 = tpu.assume_multiple %72, 128 : i32
      %c0_51 = arith.constant 0 : index
      %c0_52 = arith.constant 0 : index
      %c0_53 = arith.constant 0 : index
      %74 = vector.load %arg2[%c0_51, %c0_52, %c0_53] : memref<3x2048x34xf32, #tpu.memory_space<vmem>>, vector<1x2048x34xf32>
      %75 = vector.shape_cast %74 : vector<1x2048x34xf32> to vector<2048x34xf32>
      %c0_54 = arith.constant 0 : index
      %76 = arith.index_cast %73 : i32 to index
      %77 = vector.load %arg8[%c0_54, %76] : memref<34x130xf32, #tpu.memory_space<vmem>>, vector<34x128xf32>
      %cst_55 = arith.constant dense<0.000000e+00> : vector<2048x128xf32>
      %78 = tpu.matmul %75, %77, %cst_55 {dimension_numbers = #tpu.dot_dimension_numbers<[1], [0], [0], [1], [0, 0, 1, 1], [], []>} : vector<2048x34xf32>, vector<34x128xf32>, vector<2048x128xf32> -> vector<2048x128xf32>
      %c1_56 = arith.constant 1 : index
      %c0_57 = arith.constant 0 : index
      %c0_58 = arith.constant 0 : index
      %79 = vector.load %arg2[%c1_56, %c0_57, %c0_58] : memref<3x2048x34xf32, #tpu.memory_space<vmem>>, vector<1x2048x34xf32>
      %80 = vector.shape_cast %79 : vector<1x2048x34xf32> to vector<2048x34xf32>
      %c1_i32_59 = arith.constant 1 : i32
      %81 = arith.addi %73, %c1_i32_59 : i32
      %c0_60 = arith.constant 0 : index
      %82 = arith.index_cast %81 : i32 to index
      %83 = vector.load %arg8[%c0_60, %82] : memref<34x130xf32, #tpu.memory_space<vmem>>, vector<34x128xf32>
      %cst_61 = arith.constant dense<0.000000e+00> : vector<2048x128xf32>
      %84 = tpu.matmul %80, %83, %cst_61 {dimension_numbers = #tpu.dot_dimension_numbers<[1], [0], [0], [1], [0, 0, 1, 1], [], []>} : vector<2048x34xf32>, vector<34x128xf32>, vector<2048x128xf32> -> vector<2048x128xf32>
      %85 = arith.addf %78, %84 : vector<2048x128xf32>
      %c2_62 = arith.constant 2 : index
      %c0_63 = arith.constant 0 : index
      %c0_64 = arith.constant 0 : index
      %86 = vector.load %arg2[%c2_62, %c0_63, %c0_64] : memref<3x2048x34xf32, #tpu.memory_space<vmem>>, vector<1x2048x34xf32>
      %87 = vector.shape_cast %86 : vector<1x2048x34xf32> to vector<2048x34xf32>
      %c2_i32 = arith.constant 2 : i32
      %88 = arith.addi %73, %c2_i32 : i32
      %c0_65 = arith.constant 0 : index
      %89 = arith.index_cast %88 : i32 to index
      %90 = vector.load %arg8[%c0_65, %89] : memref<34x130xf32, #tpu.memory_space<vmem>>, vector<34x128xf32>
      %cst_66 = arith.constant dense<0.000000e+00> : vector<2048x128xf32>
      %91 = tpu.matmul %87, %90, %cst_66 {dimension_numbers = #tpu.dot_dimension_numbers<[1], [0], [0], [1], [0, 0, 1, 1], [], []>} : vector<2048x34xf32>, vector<34x128xf32>, vector<2048x128xf32> -> vector<2048x128xf32>
      %92 = arith.addf %85, %91 : vector<2048x128xf32>
      %93 = vector.broadcast %23 : vector<2048x1xf32> to vector<2048x128xf32>
      %94 = arith.addf %92, %93 : vector<2048x128xf32>
      %cst_67 = arith.constant 9.99999997E-7 : f32
      %95 = vector.broadcast %cst_67 : f32 to vector<2048x128xf32>
      %96 = arith.maximumf %94, %95 : vector<2048x128xf32>
      %97 = arith.mulf %96, %96 : vector<2048x128xf32>
      %98 = arith.mulf %97, %96 : vector<2048x128xf32>
      %cst_68 = arith.constant dense<0.000000e+00> : vector<64x128xf32>
      %99 = tpu.matmul %24, %98, %cst_68 {dimension_numbers = #tpu.dot_dimension_numbers<[1], [0], [0], [1], [0, 0, 1, 1], [], []>} : vector<64x2048xf32>, vector<2048x128xf32>, vector<64x128xf32> -> vector<64x128xf32>
      %100 = arith.addf %arg10, %99 : vector<64x128xf32>
      scf.yield %100 : vector<64x128xf32>
    }
    %c0_i32_18 = arith.constant 0 : i32
    %c0_19 = arith.constant 0 : index
    %c0_20 = arith.constant 0 : index
    %c0_21 = arith.constant 0 : index
    %28 = vector.load %arg2[%c0_19, %c0_20, %c0_21] : memref<3x2048x34xf32, #tpu.memory_space<vmem>>, vector<1x2048x34xf32>
    %29 = vector.shape_cast %28 : vector<1x2048x34xf32> to vector<2048x34xf32>
    %c0_22 = arith.constant 0 : index
    %c0_23 = arith.constant 0 : index
    %30 = vector.load %arg8[%c0_22, %c0_23] : memref<34x130xf32, #tpu.memory_space<vmem>>, vector<34x128xf32>
    %cst_24 = arith.constant dense<0.000000e+00> : vector<2048x128xf32>
    %31 = tpu.matmul %29, %30, %cst_24 {dimension_numbers = #tpu.dot_dimension_numbers<[1], [0], [0], [1], [0, 0, 1, 1], [], []>} : vector<2048x34xf32>, vector<34x128xf32>, vector<2048x128xf32> -> vector<2048x128xf32>
    %c1_25 = arith.constant 1 : index
    %c0_26 = arith.constant 0 : index
    %c0_27 = arith.constant 0 : index
    %32 = vector.load %arg2[%c1_25, %c0_26, %c0_27] : memref<3x2048x34xf32, #tpu.memory_space<vmem>>, vector<1x2048x34xf32>
    %33 = vector.shape_cast %32 : vector<1x2048x34xf32> to vector<2048x34xf32>
    %c0_28 = arith.constant 0 : index
    %c1_29 = arith.constant 1 : index
    %34 = vector.load %arg8[%c0_28, %c1_29] : memref<34x130xf32, #tpu.memory_space<vmem>>, vector<34x128xf32>
    %cst_30 = arith.constant dense<0.000000e+00> : vector<2048x128xf32>
    %35 = tpu.matmul %33, %34, %cst_30 {dimension_numbers = #tpu.dot_dimension_numbers<[1], [0], [0], [1], [0, 0, 1, 1], [], []>} : vector<2048x34xf32>, vector<34x128xf32>, vector<2048x128xf32> -> vector<2048x128xf32>
    %36 = arith.addf %31, %35 : vector<2048x128xf32>
    %c2 = arith.constant 2 : index
    %c0_31 = arith.constant 0 : index
    %c0_32 = arith.constant 0 : index
    %37 = vector.load %arg2[%c2, %c0_31, %c0_32] : memref<3x2048x34xf32, #tpu.memory_space<vmem>>, vector<1x2048x34xf32>
    %38 = vector.shape_cast %37 : vector<1x2048x34xf32> to vector<2048x34xf32>
    %c0_33 = arith.constant 0 : index
    %c2_34 = arith.constant 2 : index
    %39 = vector.load %arg8[%c0_33, %c2_34] : memref<34x130xf32, #tpu.memory_space<vmem>>, vector<34x128xf32>
    %cst_35 = arith.constant dense<0.000000e+00> : vector<2048x128xf32>
    %40 = tpu.matmul %38, %39, %cst_35 {dimension_numbers = #tpu.dot_dimension_numbers<[1], [0], [0], [1], [0, 0, 1, 1], [], []>} : vector<2048x34xf32>, vector<34x128xf32>, vector<2048x128xf32> -> vector<2048x128xf32>
    %41 = arith.addf %36, %40 : vector<2048x128xf32>
    %42 = vector.broadcast %23 : vector<2048x1xf32> to vector<2048x128xf32>
    %43 = arith.addf %41, %42 : vector<2048x128xf32>
    %cst_36 = arith.constant 9.99999997E-7 : f32
    %44 = vector.broadcast %cst_36 : f32 to vector<2048x128xf32>
    %45 = arith.maximumf %43, %44 : vector<2048x128xf32>
    %46 = arith.mulf %45, %45 : vector<2048x128xf32>
    %47 = arith.mulf %46, %45 : vector<2048x128xf32>
    %48 = tpu.iota {dimensions = array<i32: 1>} : vector<1x128xi32>
    %c17_i32 = arith.constant 17 : i32
    %49 = vector.broadcast %c17_i32 : i32 to vector<1x128xi32>
    %50 = arith.cmpi slt, %48, %49 : vector<1x128xi32>
    %cst_37 = arith.constant 0.000000e+00 : f32
    %51 = vector.shape_cast %50 : vector<1x128xi1> to vector<1x128xi1>
    %52 = vector.broadcast %51 : vector<1x128xi1> to vector<2048x128xi1>
    %53 = vector.broadcast %cst_37 : f32 to vector<2048x128xf32>
    %54 = arith.select %52, %47, %53 : vector<2048x128xi1>, vector<2048x128xf32>
    %cst_38 = arith.constant dense<0.000000e+00> : vector<64x128xf32>
    %55 = tpu.matmul %24, %54, %cst_38 {dimension_numbers = #tpu.dot_dimension_numbers<[1], [0], [0], [1], [0, 0, 1, 1], [], []>} : vector<64x2048xf32>, vector<2048x128xf32>, vector<64x128xf32> -> vector<64x128xf32>
    %56 = arith.addf %27, %55 : vector<64x128xf32>
    %cst_39 = arith.constant 1.000000e+00 : f32
    %57 = vector.broadcast %cst_39 : f32 to vector<1x128xf32>
    %cst_40 = arith.constant dense<0.000000e+00> : vector<1x64xf32>
    %58 = tpu.matmul %57, %56, %cst_40 {dimension_numbers = #tpu.dot_dimension_numbers<[1], [1], [0], [0], [0, 0, 1, 0], [], []>} : vector<1x128xf32>, vector<64x128xf32>, vector<1x64xf32> -> vector<1x64xf32>
    %cst_41 = arith.constant 0.0018382353 : f32
    %59 = vector.broadcast %cst_41 : f32 to vector<1x64xf32>
    %60 = arith.mulf %58, %59 : vector<1x64xf32>
    %61 = math.log %60 : vector<1x64xf32>
    %cst_42 = arith.constant 0.333333343 : f32
    %62 = vector.broadcast %cst_42 : f32 to vector<1x64xf32>
    %63 = arith.mulf %61, %62 : vector<1x64xf32>
    %64 = math.exp %63 : vector<1x64xf32>
    %c0_43 = arith.constant 0 : index
    %c0_44 = arith.constant 0 : index
    %65 = vector.load %arg5[%c0_43, %c0_44] : memref<64x128xf32, #tpu.memory_space<vmem>>, vector<64x128xf32>
    %cst_45 = arith.constant dense<0.000000e+00> : vector<1x128xf32>
    %66 = tpu.matmul %64, %65, %cst_45 {dimension_numbers = #tpu.dot_dimension_numbers<[1], [0], [0], [1], [0, 0, 1, 1], [], []>} : vector<1x64xf32>, vector<64x128xf32>, vector<1x128xf32> -> vector<1x128xf32>
    %c0_46 = arith.constant 0 : index
    %c0_47 = arith.constant 0 : index
    %67 = vector.load %arg6[%c0_46, %c0_47] : memref<1x128xf32, #tpu.memory_space<vmem>>, vector<1x128xf32>
    %68 = arith.addf %66, %67 : vector<1x128xf32>
    %c0_48 = arith.constant 0 : index
    %c0_49 = arith.constant 0 : index
    %c0_50 = arith.constant 0 : index
    %69 = vector.load %arg7[%c0_48, %c0_49, %c0_50] : memref<1x1x128xf32, #tpu.memory_space<vmem>>, vector<1x1x128xf32>
    %70 = vector.shape_cast %69 : vector<1x1x128xf32> to vector<1x128xf32>
    %71 = vector.shape_cast %68 : vector<1x128xf32> to vector<1x1x128xf32>
    tpu.vector_store %arg7[%c0_48, %c0_49, %c0_50], %71 {strides = array<i32>} : memref<1x1x128xf32, #tpu.memory_space<vmem>>, vector<1x1x128xf32>,
    return
  }
  func.func @transform_0(%arg0: i32) -> (i32, i32, i32) {
    %c0_i32 = arith.constant 0 : i32
    %c0_i32_0 = arith.constant 0 : i32
    %c0_i32_1 = arith.constant 0 : i32
    return %arg0, %c0_i32, %c0_i32_0 : i32, i32, i32
  }
  func.func @transform_1(%arg0: i32) -> (i32, i32, i32) {
    %c0_i32 = arith.constant 0 : i32
    %c0_i32_0 = arith.constant 0 : i32
    %c0_i32_1 = arith.constant 0 : i32
    %c0_i32_2 = arith.constant 0 : i32
    return %c0_i32, %c0_i32_0, %c0_i32_1 : i32, i32, i32
  }
  func.func @transform_2(%arg0: i32) -> (i32, i32) {
    %c0_i32 = arith.constant 0 : i32
    %c0_i32_0 = arith.constant 0 : i32
    %c0_i32_1 = arith.constant 0 : i32
    return %c0_i32, %c0_i32_0 : i32, i32
  }
  func.func @transform_3(%arg0: i32) -> (i32, i32) {
    %c0_i32 = arith.constant 0 : i32
    %c0_i32_0 = arith.constant 0 : i32
    %c0_i32_1 = arith.constant 0 : i32
    return %c0_i32, %c0_i32_0 : i32, i32
  }
  func.func @transform_4(%arg0: i32) -> (i32, i32) {
    %c0_i32 = arith.constant 0 : i32
    %c0_i32_0 = arith.constant 0 : i32
    %c0_i32_1 = arith.constant 0 : i32
    return %c0_i32, %c0_i32_0 : i32, i32
  }
  func.func @transform_5(%arg0: i32) -> (i32, i32) {
    %c0_i32 = arith.constant 0 : i32
    %c0_i32_0 = arith.constant 0 : i32
    %c0_i32_1 = arith.constant 0 : i32
    return %c0_i32, %c0_i32_0 : i32, i32
  }
  func.func @transform_6(%arg0: i32) -> (i32, i32, i32) {
    %c0_i32 = arith.constant 0 : i32
    %c0_i32_0 = arith.constant 0 : i32
    %c0_i32_1 = arith.constant 0 : i32
    return %arg0, %c0_i32, %c0_i32_0 : i32, i32, i32
  }
}

</mosaic_0001>

<bundles_post_ra>
// kernel: squeeze.3
= control target key start
LH: loop header
LB: loop body
LE: loop exit
PB: predicated region body
PF: predicated region fallthrough
CT: control target
= control target key end

     0   :  { %s157_s0 = inlined_call_operand.vmem [shape: f32[2,1024], index: 0, kind: input, shape index: {}]   ;;  %s158_s1 = inlined_call_operand.vmem [shape: f32[4,512], index: 1, kind: output, shape index: {}]  }
   0x1   :  { %v101_v0 = vld [vmem:[%s157_s0 + $0xe] sm:$0x3]  ;;  %v102_v1 = vld [vmem:[%s157_s0 + $0xc] sm:$0x3]  ;;  %v103_v2 = vld [vmem:[%s157_s0 + $0xa] sm:$0x3] }
   0x2   :  { %8 = vst [vmem:[#allocation1 + $0x38] sm:$0x3] %v101_v0  ;;  %13 = vst [vmem:[#allocation1 + $0x30] sm:$0x3] %v102_v1  ;;  %v104_v3 = vld [vmem:[%s157_s0 + $0x8] sm:$0x3] }
   0x3   :  { %18 = vst [vmem:[#allocation1 + $0x28] sm:$0x3] %v103_v2  ;;  %v105_v4 = vld [vmem:[%s157_s0 + $0x6] sm:$0x3]  ;;  %v106_v5 = vld [vmem:[%s157_s0 + $0x4] sm:$0x3] }
   0x4   :  { %23 = vst [vmem:[#allocation1 + $0x20] sm:$0x3] %v104_v3  ;;  %28 = vst [vmem:[#allocation1 + $0x18] sm:$0x3] %v105_v4  ;;  %v107_v6 = vld [vmem:[%s157_s0 + $0x2] sm:$0x3] }
   0x5   :  { %33 = vst [vmem:[#allocation1 + $0x10] sm:$0x3] %v106_v5  ;;  %v38_v7 = vld [vmem:[%s157_s0] sm:$0x3]  ;;  %37 = vst [vmem:[#allocation1 + $0x8] sm:$0x3] %v107_v6 }
   0x6   :  { %39 = vst [vmem:[#allocation1] sm:$0x3] %v38_v7 }
   0x9   :  { %v63_v9 = vld [vmem:[#allocation1 + $0x30] sm:$0x3]   ;;  %v67_v10 = vld [vmem:[#allocation1 + $0x38] sm:$0x3]  }
   0xa   :  { %v59_v8 = vld [vmem:[#allocation1 + $0x28] sm:$0x3]   ;;  %65 = vst [vmem:[#allocation0 + $0x11] ss:$2 sm:$0x3] %v63_v9  }
   0xb   :  { %v51_v12 = vld [vmem:[#allocation1 + $0x18] sm:$0x3]   ;;  %v55_v13 = vld [vmem:[#allocation1 + $0x20] sm:$0x3]  }
   0xc   :  { %v47_v11 = vld [vmem:[#allocation1 + $0x10] sm:$0x3]   ;;  %61 = vst [vmem:[#allocation0 + $0x9] ss:$2 sm:$0x3] %v59_v8  }
   0xd   :  { %69 = vst [vmem:[#allocation0 + $0x19] ss:$2 sm:$0x3] %v67_v10   ;;  %v40_v14 = vld [vmem:[#allocation1] sm:$0x3]  }
   0xe   :  { %v43_v15 = vld [vmem:[#allocation1 + $0x8] sm:$0x3]   ;;  %49 = vst [vmem:[#allocation0 + $0x10] ss:$2 sm:$0x3] %v47_v11  }
   0xf   :  { %53 = vst [vmem:[#allocation0 + $0x18] ss:$2 sm:$0x3] %v51_v12   ;;  %57 = vst [vmem:[#allocation0 + $0x1] ss:$2 sm:$0x3] %v55_v13  }
  0x10   :  { %41 = vst [vmem:[#allocation0] ss:$2 sm:$0x3] %v40_v14   ;;  %45 = vst [vmem:[#allocation0 + $0x8] ss:$2 sm:$0x3] %v43_v15  }
  0x15   :  { %v82_v16 = vld [vmem:[#allocation0 + $0x10] sm:$0xf] }
  0x16   :  { %v88_v17 = vld [vmem:[#allocation0 + $0x18] sm:$0xf]  ;;  %109 = vst [vmem:[%s158_s1 + $0x8] sm:$0xf] %v82_v16 }
  0x17   :  { %v73_v18 = vld [vmem:[#allocation0] sm:$0xf]  ;;  %v77_v19 = vld [vmem:[#allocation0 + $0x8] sm:$0xf]  ;;  %110 = vst [vmem:[%s158_s1 + $0xc] sm:$0xf] %v88_v17 }
  0x18   :  { %75 = vst [vmem:[%s158_s1] sm:$0xf] %v73_v18  ;;  %108 = vst [vmem:[%s158_s1 + $0x4] sm:$0xf] %v77_v19 }

// kernel: timm_classifier_forward.1
= control target key start
LH: loop header
LB: loop body
LE: loop exit
PB: predicated region body
PF: predicated region fallthrough
CT: control target
= control target key end

     0   :  { %11 = vsyncpa [#allocation4], 0  ;;  %s24007_s0 = inlined_call_operand.vmem [shape: f32[4,32,17], index: 0, kind: input, shape index: {}]   ;;  %s24008_s1 = inlined_call_operand.vmem [shape: f32[3,2048,34], index: 1, kind: input, shape index: {}]   ;;  %s24009_s2 = inlined_call_operand.vmem [shape: f32[2048,1], index: 2, kind: input, shape index: {}]   ;;  %s24010_s3 = inlined_call_operand.vmem [shape: f32[64,2048], index: 3, kind: input, shape index: {}]   ;;  %s24011_s4 = inlined_call_operand.vmem [shape: f32[64,128], index: 4, kind: input, shape index: {}]   ;;  %s24012_s5 = inlined_call_operand.vmem [shape: f32[1,128], index: 5, kind: input, shape index: {}]   ;;  %s24013_s6 = inlined_call_operand.hbm [shape: f32[4,1,128], index: 6, kind: output, shape index: {}]  }
   0x1   :  { %13 = vsyncpa [#allocation4 + $0x1], 0  ;;  %s17003_s21 = smov 0   ;;  %s17005_s22 = smov 0  }
   0x2   :  { %s17007_s23 = smov 0   ;;  %s17009_s24 = smov 0  }
   0x3 LB: > { %s17024_s25 = sadd.s32 4294967295, %s16957_s24   ;;  %s11822_s26 = sadd.s32 4294967294, %s16957_s24   ;;  %s16957_s24 = sphi %s17009_s24, %s24854_s24   ;;  %s16953_s23 = sphi %s17007_s23, %s24853_s23   ;;  %s16949_s22 = sphi %s17005_s22, %s24852_s22   ;;  %s16945_s21 = sphi %s17003_s21, %s24851_s21  }
   0x4   : > { %s17028_s27 = sadd.s32 1, %s16957_s24   ;;  %s157_s28 = sadd.s32 1, %s16953_s23 }
   0x5   : > { %s154_s29 = ssub.s32 %s16957_s24, %s17028_s27  ;;  %p167_p0 = scmp.ne.s32.totalorder %s16953_s23, %s16949_s22 }
   0x6   : > { %p155_p1 = scmp.eq.s32.totalorder %s154_s29, 0  ;;  %p168_p2 = scmp.eq.s32.totalorder %s17024_s25, 3 }
   0x7   : > { %p173_p3 = scmp.ne.s32.totalorder %s16949_s22, %s16945_s21  ;;  %p174_p4 = scmp.eq.s32.totalorder %s11822_s26, 3 }
   0x8   : > { %s17039_s30 = scalar_select %p155_p1, %s16953_s23, %s157_s28  }
   0x9   : > { %p17041_p5 = por %p168_p2, %p167_p0  ;;  %p17045_p6 = por %p174_p4, %p173_p3 }
   0xa   : > { %p11825_p7 = scmp.ge.s32.totalorder %s16957_s24, 1  ;;  %p215_p8 = scmp.lt.s32.totalorder %s16957_s24, 5 }
   0xc   : > { %p216_p9 = pnand %p11825_p7, %p215_p8 }
   0xe   : > { %219 = sbr.rel (%p216_p9) target bundleno = 2269 (0x8dd), region = 44 }
  0x15   : > { %p244_p10 = scmp.lt.s32.totalorder %s17024_s25, 3  ;;  %vm273_vm0 = vcmask 138240   ;;  %v24014_v31 = vmov 0.0   ;;  %vm306_vm1 = vcmask 15360   ;;  %vm321_vm2 = vcmask 1040384   ;;  %s16960_s16 = smov 1  }
  0x16   : > { %305 = vst [vmem:[#allocation2] sm:$0xff] %v24014_v31  ;;  %308 = vst [vmem:[#allocation2 + $0x10] sm:$0xff] %v24014_v31  ;;  %vm315_vm3 = vcmask 9216   ;;  %v736_v59 = vld [vmem:[%s24008_s1] sm:$0xff]  ;;  %vm1299_vm4 = vcmask 277504   ;;  %v16961_v60 = vmov 0  }
  0x17   : > { %s245_s9 = scalar_select %p244_p10, %s17024_s25, 3  ;;  %310 = vst [vmem:[#allocation2 + $0x20] sm:$0xff] %v24014_v31  ;;  %312 = vst [vmem:[#allocation2 + $0x30] sm:$0xff] %v24014_v31  ;;  %15026 = vmatprep.mubr.msk.f32.mxu0 %vm1299_vm4, %v736_v59  ;;  %16881 = vset.pattern.permute.xlu1 %v16961_v60  ;;  %vm344_vm5 = vcmask 146441   ;;  %vm346_vm6 = vcmask 146440   ;;  %vm350_vm7 = vcmask 139272  }
  0x18   : > { %314 = vst [vmem:[#allocation2 + $0x40] sm:$0x3] %v24014_v31  ;;  %307 = vst.msk [vmem:[#allocation2 + $0x8] sm:$0xff] %vm306_vm1, %v24014_v31  ;;  %16882 = vset.pattern.permute.xlu0 %v16961_v60  ;;  %s16962_s19 = smov 127   ;;  %vm2068_vm8 = vcmask 1041408   ;;  %s16963_s11 = smov 126  }
  0x19   : > { %s13372_s10 = sshll.u32 %s245_s9, 5  ;;  %309 = vst.msk [vmem:[#allocation2 + $0x18] sm:$0xff] %vm306_vm1, %v24014_v31  ;;  %311 = vst.msk [vmem:[#allocation2 + $0x28] sm:$0xff] %vm306_vm1, %v24014_v31  ;;  %v760_v59 = vld [vmem:[%s24008_s1 + $0xc0] sm:$0xff]  ;;  %v359_v60 = vld [vmem:[%s24009_s2 + $0x38] sm:$0xff]  ;;  %vm1289_vm9 = vcmask 1039360  }
  0x1a   : > { %s248_s13 = scalar_lea.vmem %s24007_s0, %s13372_s10  ;;  %313 = vst.msk [vmem:[#allocation2 + $0x38] sm:$0xff] %vm306_vm1, %v24014_v31  ;;  %vm5808_vm10 = vcmask 1031168   ;;  %vm16965_vm13 = vmmov 0   ;;  %vm11679_vm14 = vcmask 523264   ;;  %s13369_s17 = sshll.u32 %s17024_s25, 4 }
  0x1b   : > { %v249_v0 = vld [vmem:[%s248_s13] sm:$0xff]  ;;  %v250_v1 = vld [vmem:[%s248_s13 + $0x8] sm:$0xff]  ;;  %v251_v2 = vld [vmem:[%s248_s13 + $0x10] sm:$0xff]  ;;  %316 = vst.msk [vmem:[#allocation2 + $0x48] sm:$0x3] %vm315_vm3, %v24014_v31  ;;  %s23965_s28 = scalar_lea.hbm %s24013_s6, %s13369_s17  ;;  %s16967_s25 = smov [#allocation3]  }
  0x1c   : > { %v252_v3 = vld [vmem:[%s248_s13 + $0x18] sm:$0xff]  ;;  %v253_v4 = vmax.f32 %v249_v0, 1e-10  ;;  %v254_v5 = vmax.f32 %v250_v1, 1e-10  ;;  %s16899_s10 = sshll.u32 %s16967_s25, 4  ;;  %s16900_s10 = int_to_ptr.vmem [resolvable:$false] %s16899_s10 }
  0x1d   : > { %v255_v6 = vmax.f32 %v251_v2, 1e-10  ;;  %v256_v7 = vmax.f32 %v252_v3, 1e-10  ;;  %s16901_s12 = scalar_lea.vmem %s16900_s10, 32 }
  0x1e   : > { %16883 = vlog2.f32 %v253_v4 }
  0x1f   : > { %16885 = vlog2.f32 %v254_v5  ;;  %v1254_v0 = vld [vmem:[#allocation2 + $0x8] sm:$0xff] }
  0x20   : > { %16887 = vlog2.f32 %v255_v6  ;;  %v1255_v6 = vld [vmem:[#allocation2 + $0x18] sm:$0xff] }
  0x21   : > { %16889 = vlog2.f32 %v256_v7 }
  0x28   : > { %v16884_v8 = vpop.eup %16883 }
  0x29   : > { %v16886_v9 = vpop.eup %16885  ;;  %v258_v10 = vmul.f32 0.6931472, %v16884_v8 }
  0x2a   : > { %v16888_v11 = vpop.eup %16887  ;;  %v260_v12 = vmul.f32 0.6931472, %v16886_v9 }
  0x2b   : > { %v16890_v13 = vpop.eup %16889  ;;  %v262_v14 = vmul.f32 0.6931472, %v16888_v11  ;;  %v265_v15 = vmul.f32 0.4342945, %v258_v10  ;;  %v1256_v10 = vld [vmem:[#allocation2 + $0x28] sm:$0xff]  ;;  %v1257_v11 = vld [vmem:[#allocation2 + $0x38] sm:$0xff] }
  0x2c   : > { %v264_v16 = vmul.f32 0.6931472, %v16890_v13  ;;  %v266_v17 = vmul.f32 0.4342945, %v260_v12  ;;  %v11829_v12 = vld [vmem:[%s24008_s1 + $0x800] sm:$0xff] }
  0x2d   : > { %v267_v18 = vmul.f32 0.4342945, %v262_v14  ;;  %v269_v19 = vmul.f32 10.0, %v265_v15  ;;  %14632 = vmatprep.mubr.msk.f32.mxu1 %vm1299_vm4, %v11829_v12  ;;  %v768_v12 = vld [vmem:[%s24008_s1 + $0x100] sm:$0xff] }
  0x2e   : > { %v268_v20 = vmul.f32 0.4342945, %v264_v16  ;;  %v270_v21 = vmul.f32 10.0, %v266_v17 }
  0x2f   : > { %v271_v22 = vmul.f32 10.0, %v267_v18  ;;  %v274_v23 = vsel %vm273_vm0, %v269_v19, -inf  ;;  %v1258_v18 = vld [vmem:[#allocation2 + $0x48] sm:$0x3] }
  0x30   : > { %v272_v24 = vmul.f32 10.0, %v268_v20  ;;  %v275_v25 = vsel %vm273_vm0, %v270_v21, -inf  ;;  %v738_v20 = vld [vmem:[%s24008_s1 + $0x10] sm:$0xff] }
  0x31   : > { %v276_v26 = vsel %vm273_vm0, %v271_v22, -inf  ;;  %v278_v27 = vmax.f32 %v274_v23, %v275_v25  ;;  %v741_v23 = vld [vmem:[%s24008_s1 + $0x28] sm:$0xff]  ;;  %v743_v25 = vld [vmem:[%s24008_s1 + $0x38] sm:$0xff] }
  0x32   : > { %v277_v28 = vsel %vm273_vm0, %v272_v24, -inf }
  0x33   : > { %v279_v29 = vmax.f32 %v276_v26, %v277_v28  ;;  %v744_v26 = vld [vmem:[%s24008_s1 + $0x40] sm:$0xff]  ;;  %v369_v28 = vld [vmem:[%s24009_s2 + $0x88] sm:$0xff] }
  0x35   : > { %v280_v30 = vmax.f32 %v278_v27, %v279_v29  ;;  %v368_v27 = vld [vmem:[%s24009_s2 + $0x80] sm:$0xff]  ;;  %v745_v29 = vld [vmem:[%s24008_s1 + $0x48] sm:$0xff] }
  0x37   : > { %281 = vmax.xlane.f32.xlu0 %v280_v30  ;;  %v746_v30 = vld [vmem:[%s24008_s1 + $0x50] sm:$0xff] }
  0xc4   : > { %v282_v32 = vpop.xlane.xlu0 %281 }
  0xc5   : > { %v283_v33 = vrot.slane %v282_v32, 4 }
  0xc7   : > { %v284_v34 = vmax.f32 %v282_v32, %v283_v33  ;;  %v352_v32 = vld [vmem:[%s24009_s2] sm:$0xff]  ;;  %v370_v33 = vld [vmem:[%s24009_s2 + $0x90] sm:$0xff] }
  0xc9   : > { %v285_v35 = vrot.slane %v284_v34, 2 }
  0xcb   : > { %v286_v36 = vmax.f32 %v284_v34, %v285_v35  ;;  %v747_v34 = vld [vmem:[%s24008_s1 + $0x58] sm:$0xff]  ;;  %v748_v35 = vld [vmem:[%s24008_s1 + $0x60] sm:$0xff] }
  0xcd   : > { %v287_v37 = vrot.slane %v286_v36, 1 }
  0xcf   : > { %v288_v38 = vmax.f32 %v286_v36, %v287_v37  ;;  %v353_v36 = vld [vmem:[%s24009_s2 + $0x8] sm:$0xff]  ;;  %v354_v37 = vld [vmem:[%s24009_s2 + $0x10] sm:$0xff] }
  0xd1   : > { %16792 = vpush %v288_v38  ;;  %v749_v38 = vld [vmem:[%s24008_s1 + $0x68] sm:$0xff] }
 0x102   : > { %s16793_s14 = spop %16792 }
 0x103   : > { %s11828_s15 = sadd.f32 -80.0, %s16793_s14 }
 0x105   : > { %v291_v39 = vstv %s11828_s15  ;;  %s242_s15 = sand.u32 1, %s16949_s22  }
 0x106   : > { %v292_v40 = vmax.f32 %v269_v19, %v291_v39  ;;  %v293_v41 = vmax.f32 %v270_v21, %v291_v39  ;;  %v294_v42 = vmax.f32 %v271_v22, %v291_v39  ;;  %v295_v43 = vmax.f32 %v272_v24, %v291_v39  ;;  %v737_v19 = vld [vmem:[%s24008_s1 + $0x8] sm:$0xff]  ;;  %v739_v21 = vld [vmem:[%s24008_s1 + $0x18] sm:$0xff]  ;;  %v740_v22 = vld [vmem:[%s24008_s1 + $0x20] sm:$0xff]  ;;  %s243_s18 = scalar_lea.vmem [#allocation3], %s242_s15  ;;  %s11755_s29 = scalar_lea.sflag [#allocation4], %s242_s15 }
 0x107   : > { %v742_v24 = vld [vmem:[%s24008_s1 + $0x30] sm:$0xff] }
 0x108   : > { %v296_v44 = vadd.f32 80.0, %v292_v40  ;;  %v297_v45 = vadd.f32 80.0, %v293_v41  ;;  %v298_v46 = vadd.f32 80.0, %v294_v42  ;;  %v299_v48 = vadd.f32 80.0, %v295_v43  ;;  %v750_v39 = vld [vmem:[%s24008_s1 + $0x70] sm:$0xff]  ;;  %v371_v40 = vld [vmem:[%s24009_s2 + $0x98] sm:$0xff] }
 0x109   : > { %v372_v41 = vld [vmem:[%s24009_s2 + $0xa0] sm:$0xff]  ;;  %v751_v42 = vld [vmem:[%s24008_s1 + $0x78] sm:$0xff] }
 0x10a   : > { %v302_v47 = vmul.f32 0.0125, %v297_v45  ;;  %v303_v49 = vmul.f32 0.0125, %v298_v46  ;;  %v301_v50 = vmul.f32 0.0125, %v296_v44 }
 0x10b   : > { %v304_v53 = vmul.f32 0.0125, %v299_v48  ;;  %v752_v43 = vld [vmem:[%s24008_s1 + $0x80] sm:$0xff]  ;;  %v355_v44 = vld [vmem:[%s24009_s2 + $0x18] sm:$0xff]  ;;  %v753_v46 = vld [vmem:[%s24008_s1 + $0x88] sm:$0xff] }
 0x10c   : > { %v323_v51 = vrot.slane %v302_v47, 7  ;;  %v322_v52 = vrot.slane %v301_v50, 7  ;;  %v325_v54 = vrot.slane %v303_v49, 7  ;;  %v356_v45 = vld [vmem:[%s24009_s2 + $0x20] sm:$0xff]  ;;  %v754_v47 = vld [vmem:[%s24008_s1 + $0x90] sm:$0xff]  ;;  %v373_v48 = vld [vmem:[%s24009_s2 + $0xa8] sm:$0xff] }
 0x10d   : > { %v327_v56 = vrot.slane %v304_v53, 7  ;;  %v374_v49 = vld [vmem:[%s24009_s2 + $0xb0] sm:$0xff]  ;;  %v755_v50 = vld [vmem:[%s24008_s1 + $0x98] sm:$0xff] }
 0x10e   : > { %329 = vrot.lane.b32.xlu0 %v322_v52, %s16960_s16  ;;  %v324_v55 = vsel %vm321_vm2, %v322_v52, %v323_v51  ;;  %v326_v57 = vsel %vm321_vm2, %v323_v51, %v325_v54  ;;  %v756_v51 = vld [vmem:[%s24008_s1 + $0xa0] sm:$0xff]  ;;  %v357_v52 = vld [vmem:[%s24009_s2 + $0x28] sm:$0xff]  ;;  %v358_v53 = vld [vmem:[%s24009_s2 + $0x30] sm:$0xff] }
 0x10f   : > { %331 = vrot.lane.b32.xlu1 %v324_v55, %s16960_s16  ;;  %v328_v58 = vsel %vm321_vm2, %v325_v54, %v327_v56  ;;  %v757_v54 = vld [vmem:[%s24008_s1 + $0xa8] sm:$0xff]  ;;  %v758_v55 = vld [vmem:[%s24008_s1 + $0xb0] sm:$0xff] }
 0x113   : > { %333 = vrot.lane.b32.xlu1 %v326_v57, %s16960_s16  ;;  %v376_v57 = vld [vmem:[%s24009_s2 + $0xc0] sm:$0xff] }
 0x117   : > { %335 = vrot.lane.b32.xlu1 %v328_v58, %s16960_s16  ;;  %v759_v58 = vld [vmem:[%s24008_s1 + $0xb8] sm:$0xff] }
 0x11b   : > { %337 = vrot.lane.b32.xlu1 %v327_v56, %s16960_s16  ;;  %v375_v56 = vld [vmem:[%s24009_s2 + $0xb8] sm:$0xff] }
 0x180   : > { %v330_v61 = vpop.permute.xlu0 %329 }
 0x181   : > { %345 = vst.msk [vmem:[#allocation2] sm:$0xfe] %vm344_vm5, %v330_v61  ;;  %v332_v62 = vpop.permute.xlu1 %331  ;;  %v360_v61 = vld [vmem:[%s24009_s2 + $0x40] sm:$0xff] }
 0x182   : > { %347 = vst.msk [vmem:[#allocation2 + $0x10] sm:$0xff] %vm346_vm6, %v332_v62  ;;  %v761_v62 = vld [vmem:[%s24008_s1 + $0xc8] sm:$0xff] }
 0x185   : > { %v334_v63 = vpop.permute.xlu1 %333 }
 0x186   : > { %348 = vst.msk [vmem:[#allocation2 + $0x20] sm:$0xff] %vm346_vm6, %v334_v63  ;;  %v762_v63 = vld [vmem:[%s24008_s1 + $0xd0] sm:$0xff] }
 0x188   : > { %v992_v1 = vld [vmem:[#allocation2] sm:$0xff] }
 0x189   : > { %v336_v2 = vpop.permute.xlu1 %335  ;;  %v16841_v3 = vpack.i.bf16 %v1254_v0, %v992_v1  ;;  %v993_v4 = vld [vmem:[#allocation2 + $0x10] sm:$0xff]  ;;  %v377_v0 = vld [vmem:[%s24009_s2 + $0xc8] sm:$0xff] }
 0x18a   : > { %349 = vst.msk [vmem:[#allocation2 + $0x30] sm:$0xff] %vm346_vm6, %v336_v2  ;;  %v17070_v5 = vpack.c.bf16 %v993_v4, %v992_v1  ;;  %v16846_v8 = vpack.i.bf16 %v1255_v6, %v993_v4  ;;  %v378_v1 = vld [vmem:[%s24009_s2 + $0xd0] sm:$0xff]  ;;  %v763_v2 = vld [vmem:[%s24008_s1 + $0xd8] sm:$0xff]  ;;  %v361_v4 = vld [vmem:[%s24009_s2 + $0x48] sm:$0xff] }
 0x18b   : > { %16842 = vrot.lane.b32.xlu1 %v16841_v3, %s16962_s19  ;;  %v362_v6 = vld [vmem:[%s24009_s2 + $0x50] sm:$0xff] }
 0x18c   : > { %15851 = vmatprep.subr.bf16.mxu0 %v17070_v5 }
 0x18d   : > { %15853 = vmatpush3.bf16.msra.mxu0 %v17070_v5  ;;  %v338_v7 = vpop.permute.xlu1 %337  ;;  %v994_v9 = vld [vmem:[#allocation2 + $0x20] sm:$0xff] }
 0x18e   : > { %351 = vst.msk [vmem:[#allocation2 + $0x40] sm:$0x1] %vm350_vm7, %v338_v7  ;;  %v16851_v13 = vpack.i.bf16 %v1256_v10, %v994_v9  ;;  %v765_v7 = vld [vmem:[%s24008_s1 + $0xe8] sm:$0xff]  ;;  %v380_v10 = vld [vmem:[%s24009_s2 + $0xe0] sm:$0xff] }
 0x18f   : > { %16847 = vrot.lane.b32.xlu1 %v16846_v8, %s16962_s19 }
 0x191   : > { %v995_v14 = vld [vmem:[#allocation2 + $0x30] sm:$0xff] }
 0x192   : > { %v16856_v15 = vpack.i.bf16 %v1257_v11, %v995_v14  ;;  %v17078_v16 = vpack.c.bf16 %v995_v14, %v994_v9  ;;  %v379_v9 = vld [vmem:[%s24009_s2 + $0xd8] sm:$0xff]  ;;  %v364_v14 = vld [vmem:[%s24009_s2 + $0x60] sm:$0xff] }
 0x193   : > { %16852 = vrot.lane.b32.xlu1 %v16851_v13, %s16962_s19  ;;  %v767_v11 = vld [vmem:[%s24008_s1 + $0xf8] sm:$0xff] }
 0x194   : > { %16857 = vrot.lane.b32.xlu0 %v16856_v15, %s16962_s19  ;;  %15855 = vmatprep.subr.bf16.mxu0 %v17078_v16 }
 0x195   : > { %15857 = vmatpush3.bf16.msra.mxu0 %v17078_v16  ;;  %v17082_v17 = vld [vmem:[#allocation2 + $0x40] sm:$0x3] }
 0x196   : > { %15024 = vmatprep.subr.msk.mxu0 %vm2068_vm8, %v17082_v17 }
 0x197   : > { %1285 = vrot.lane.b32.xlu1 %v17082_v17, %s16962_s19 }
 0x198   : > { %1287 = vrot.lane.b32.xlu0 %v1258_v18, %s16962_s19  ;;  %s11767_s19 = sshll.u32 %s243_s18, 4  ;;  %s23967_s19 = int_to_ptr.vmem [resolvable:$true] %s11767_s19 }
 0x199   : > { %15025 = vmatpush3.msk.msra.mxu0 %vm2068_vm8, %v17082_v17  ;;  %s16895_s9 = scalar_lea.vmem %s23967_s19, 16  ;;  %p16902_p0 = scmp.lt.s32.totalorder %s23967_s19, %s16900_s10 }
 0x19a   : > { %15027 = vmatmul.mubr.msk.f32.vlgmr.msra.gmra.mrb[0].mxu0 %vm1299_vm4, %v737_v19  ;;  %v381_v19 = vld [vmem:[%s24009_s2 + $0xe8] sm:$0xff]  ;;  %p16896_p11 = scmp.ne.s32.totalorder %s23967_s19, %s16895_s9  ;;  %p16903_p1 = scmp.lt.s32.totalorder %s16901_s12, %s16895_s9 }
 0x19b   : > { %16862 = vrot.lane.b32.xlu1 %v16841_v3, %s16963_s11  ;;  %15029 = vmatprep.mubr.msk.f32.mxu0 %vm1299_vm4, %v738_v20  ;;  %v764_v3 = vld [vmem:[%s24008_s1 + $0xe0] sm:$0xff]  ;;  %v382_v20 = vld [vmem:[%s24009_s2 + $0xf0] sm:$0xff] }
 0x19c   : > { %16867 = vrot.lane.b32.xlu0 %v16846_v8, %s16963_s11  ;;  %v766_v8 = vld [vmem:[%s24008_s1 + $0xf0] sm:$0xff]  ;;  %p16897_p12 = pnand %p16896_p11, %p17041_p5  ;;  %p16904_p2 = por %p16903_p1, %p16902_p0 }
 0x19e   : > { %15030 = vmatmul.mubr.msk.f32.gmra.mrb[2].mxu0 %vm1299_vm4, %v739_v21  ;;  %v771_v21 = vld [vmem:[%s24008_s1 + $0x118] sm:$0xff]  ;;  %p16898_p13 = pneg %p16897_p12 }
 0x19f   : > { %16872 = vrot.lane.b32.xlu1 %v16851_v13, %s16963_s11  ;;  %15032 = vmatprep.mubr.msk.f32.mxu0 %vm1299_vm4, %v740_v22  ;;  %v363_v13 = vld [vmem:[%s24009_s2 + $0x58] sm:$0xff]  ;;  %v772_v22 = vld [vmem:[%s24008_s1 + $0x120] sm:$0xff] }
 0x1a0   : > { %16877 = vrot.lane.b32.xlu0 %v16856_v15, %s16963_s11  ;;  %v769_v15 = vld [vmem:[%s24008_s1 + $0x108] sm:$0xff]  ;;  %p16905_p3 = pnand %p16904_p2, %p16898_p13 }
 0x1a2   : > { %15033 = vmatmul.mubr.msk.f32.gmra.mrb[4].mxu0 %vm1299_vm4, %v741_v23  ;;  %v365_v23 = vld [vmem:[%s24009_s2 + $0x68] sm:$0xff] }
 0x1a3   : > { %5804 = vrot.lane.b32.xlu1 %v17082_v17, %s16963_s11  ;;  %15035 = vmatprep.mubr.msk.f32.mxu0 %vm1299_vm4, %v742_v24  ;;  %v366_v24 = vld [vmem:[%s24009_s2 + $0x70] sm:$0xff] }
 0x1a4   : > { %5806 = vrot.lane.b32.xlu0 %v1258_v18, %s16963_s11  ;;  %v770_v18 = vld [vmem:[%s24008_s1 + $0x110] sm:$0xff] }
 0x1a6   : > { %15036 = vmatmul.mubr.msk.f32.gmra.mrb[6].mxu0 %vm1299_vm4, %v743_v25  ;;  %v773_v25 = vld [vmem:[%s24008_s1 + $0x128] sm:$0xff] }
 0x1a7   : > { %15038 = vmatprep.mubr.msk.f32.mxu0 %vm1299_vm4, %v744_v26  ;;  %8271 = vperm.xlu1 %16881, %v368_v27   ;;  %v774_v26 = vld [vmem:[%s24008_s1 + $0x130] sm:$0xff]  ;;  %v383_v27 = vld [vmem:[%s24009_s2 + $0xf8] sm:$0xff] }
 0x1a8   : > { %8276 = vperm.xlu0 %16882, %v369_v28   ;;  %v400_v28 = vld [vmem:[%s24009_s2 + $0x180] sm:$0xff] }
 0x1aa   : > { %15039 = vmatmul.mubr.msk.f32.gmra.mrb[8].mxu0 %vm1299_vm4, %v745_v29  ;;  %v775_v29 = vld [vmem:[%s24008_s1 + $0x138] sm:$0xff] }
 0x1ab   : > { %15041 = vmatprep.mubr.msk.f32.mxu0 %vm1299_vm4, %v746_v30  ;;  %8191 = vperm.xlu1 %16881, %v352_v32   ;;  %v776_v30 = vld [vmem:[%s24008_s1 + $0x140] sm:$0xff]  ;;  %v367_v32 = vld [vmem:[%s24009_s2 + $0x78] sm:$0xff] }
 0x1ac   : > { %8281 = vperm.xlu0 %16882, %v370_v33   ;;  %v384_v33 = vld [vmem:[%s24009_s2 + $0x100] sm:$0xff] }
 0x1ae   : > { %15042 = vmatmul.mubr.msk.f32.gmra.mrb[10].mxu0 %vm1299_vm4, %v747_v34  ;;  %v777_v34 = vld [vmem:[%s24008_s1 + $0x148] sm:$0xff] }
 0x1af   : > { %15044 = vmatprep.mubr.msk.f32.mxu0 %vm1299_vm4, %v748_v35  ;;  %8196 = vperm.xlu1 %16881, %v353_v36   ;;  %v778_v35 = vld [vmem:[%s24008_s1 + $0x150] sm:$0xff]  ;;  %v401_v36 = vld [vmem:[%s24009_s2 + $0x188] sm:$0xff] }
 0x1b0   : > { %8201 = vperm.xlu0 %16882, %v354_v37   ;;  %v402_v37 = vld [vmem:[%s24009_s2 + $0x190] sm:$0xff] }
 0x1b2   : > { %15045 = vmatmul.mubr.msk.f32.gmra.mrb[12].mxu0 %vm1299_vm4, %v749_v38  ;;  %v779_v38 = vld [vmem:[%s24008_s1 + $0x158] sm:$0xff] }
 0x1b3   : > { %15047 = vmatprep.mubr.msk.f32.mxu0 %vm1299_vm4, %v750_v39  ;;  %8286 = vperm.xlu1 %16881, %v371_v40   ;;  %v780_v39 = vld [vmem:[%s24008_s1 + $0x160] sm:$0xff]  ;;  %v385_v40 = vld [vmem:[%s24009_s2 + $0x108] sm:$0xff] }
 0x1b4   : > { %8291 = vperm.xlu0 %16882, %v372_v41   ;;  %v386_v41 = vld [vmem:[%s24009_s2 + $0x110] sm:$0xff] }
 0x1b6   : > { %15048 = vmatmul.mubr.msk.f32.gmra.mrb[14].mxu0 %vm1299_vm4, %v751_v42  ;;  %v781_v42 = vld [vmem:[%s24008_s1 + $0x168] sm:$0xff] }
 0x1b7   : > { %15050 = vmatprep.mubr.msk.f32.mxu0 %vm1299_vm4, %v752_v43  ;;  %8206 = vperm.xlu1 %16881, %v355_v44   ;;  %v782_v43 = vld [vmem:[%s24008_s1 + $0x170] sm:$0xff]  ;;  %v403_v44 = vld [vmem:[%s24009_s2 + $0x198] sm:$0xff] }
 0x1b8   : > { %8211 = vperm.xlu0 %16882, %v356_v45   ;;  %v404_v45 = vld [vmem:[%s24009_s2 + $0x1a0] sm:$0xff] }
 0x1ba   : > { %15051 = vmatmul.mubr.msk.f32.gmra.mrb[16].mxu0 %vm1299_vm4, %v753_v46  ;;  %v783_v46 = vld [vmem:[%s24008_s1 + $0x178] sm:$0xff] }
 0x1bb   : > { %15053 = vmatprep.mubr.msk.f32.mxu0 %vm1299_vm4, %v754_v47  ;;  %8296 = vperm.xlu1 %16881, %v373_v48   ;;  %v784_v47 = vld [vmem:[%s24008_s1 + $0x180] sm:$0xff]  ;;  %v387_v48 = vld [vmem:[%s24009_s2 + $0x118] sm:$0xff] }
 0x1bc   : > { %8301 = vperm.xlu0 %16882, %v374_v49   ;;  %v388_v49 = vld [vmem:[%s24009_s2 + $0x120] sm:$0xff] }
 0x1be   : > { %15054 = vmatmul.mubr.msk.f32.gmra.mrb[18].mxu0 %vm1299_vm4, %v755_v50  ;;  %v785_v50 = vld [vmem:[%s24008_s1 + $0x188] sm:$0xff] }
 0x1bf   : > { %15056 = vmatprep.mubr.msk.f32.mxu0 %vm1299_vm4, %v756_v51  ;;  %8216 = vperm.xlu1 %16881, %v357_v52   ;;  %v786_v51 = vld [vmem:[%s24008_s1 + $0x190] sm:$0xff]  ;;  %v405_v52 = vld [vmem:[%s24009_s2 + $0x1a8] sm:$0xff] }
 0x1c0   : > { %8221 = vperm.xlu0 %16882, %v358_v53   ;;  %v406_v53 = vld [vmem:[%s24009_s2 + $0x1b0] sm:$0xff] }
 0x1c2   : > { %15057 = vmatmul.mubr.msk.f32.gmra.mrb[20].mxu0 %vm1299_vm4, %v757_v54  ;;  %v787_v54 = vld [vmem:[%s24008_s1 + $0x198] sm:$0xff] }
 0x1c3   : > { %15059 = vmatprep.mubr.msk.f32.mxu0 %vm1299_vm4, %v758_v55  ;;  %8306 = vperm.xlu1 %16881, %v375_v56   ;;  %v788_v55 = vld [vmem:[%s24008_s1 + $0x1a0] sm:$0xff]  ;;  %v389_v56 = vld [vmem:[%s24009_s2 + $0x128] sm:$0xff] }
 0x1c4   : > { %8311 = vperm.xlu0 %16882, %v376_v57  }
 0x1c6   : > { %15060 = vmatmul.mubr.msk.f32.gmra.mrb[22].mxu0 %vm1299_vm4, %v759_v58  ;;  %v390_v58 = vld [vmem:[%s24009_s2 + $0x130] sm:$0xff] }
 0x1c7   : > { %15062 = vmatprep.mubr.msk.f32.mxu0 %vm1299_vm4, %v760_v59  ;;  %8226 = vperm.xlu1 %16881, %v359_v60   ;;  %v789_v59 = vld [vmem:[%s24008_s1 + $0x1a8] sm:$0xff] }
 0x1c8   : > { %8231 = vperm.xlu0 %16882, %v360_v61  }
 0x1ca   : > { %15063 = vmatmul.mubr.msk.f32.gmra.mrb[24].mxu0 %vm1299_vm4, %v761_v62  ;;  %v790_v62 = vld [vmem:[%s24008_s1 + $0x1b0] sm:$0xff] }
 0x1cb   : > { %15065 = vmatprep.mubr.msk.f32.mxu0 %vm1299_vm4, %v762_v63  ;;  %8316 = vperm.xlu1 %16881, %v377_v0   ;;  %v407_v63 = vld [vmem:[%s24009_s2 + $0x1b8] sm:$0xff] }
 0x1cc   : > { %8321 = vperm.xlu0 %16882, %v378_v1   ;;  %v408_v1 = vld [vmem:[%s24009_s2 + $0x1c0] sm:$0xff] }
 0x1ce   : > { %15066 = vmatmul.mubr.msk.f32.gmra.mrb[26].mxu0 %vm1299_vm4, %v763_v2 }
 0x1cf   : > { %15068 = vmatprep.mubr.msk.f32.mxu0 %vm1299_vm4, %v764_v3  ;;  %8236 = vperm.xlu1 %16881, %v361_v4   ;;  %v791_v4 = vld [vmem:[%s24008_s1 + $0x1b8] sm:$0xff] }
 0x1d0   : > { %8241 = vperm.xlu0 %16882, %v362_v6  }
 0x1d2   : > { %15069 = vmatmul.mubr.msk.f32.gmra.mrb[28].mxu0 %vm1299_vm4, %v765_v7 }
 0x1d3   : > { %15071 = vmatprep.mubr.msk.f32.mxu0 %vm1299_vm4, %v766_v8  ;;  %8326 = vperm.xlu1 %16881, %v379_v9   ;;  %v792_v8 = vld [vmem:[%s24008_s1 + $0x1c0] sm:$0xff] }
 0x1d4   : > { %8331 = vperm.xlu0 %16882, %v380_v10  }
 0x1d6   : > { %15072 = vmatmul.mubr.msk.f32.gmra.mrb[30].mxu0 %vm1299_vm4, %v767_v11  ;;  %v391_v11 = vld [vmem:[%s24009_s2 + $0x138] sm:$0xff] }
 0x1d7   : > { %15074 = vmatprep.mubr.msk.f32.mxu0 %vm1299_vm4, %v768_v12  ;;  %8246 = vperm.xlu1 %16881, %v363_v13  }
 0x1d8   : > { %8251 = vperm.xlu0 %16882, %v364_v14  }
 0x1da   : > { %15075 = vmatmul.mubr.msk.f32.gmra.mrb[32].mxu0 %vm1299_vm4, %v769_v15  ;;  %v392_v15 = vld [vmem:[%s24009_s2 + $0x140] sm:$0xff] }
 0x1db   : > { %15077 = vmatprep.mubr.msk.f32.mxu0 %vm1299_vm4, %v770_v18  ;;  %8336 = vperm.xlu1 %16881, %v381_v19  }
 0x1dc   : > { %8341 = vperm.xlu0 %16882, %v382_v20   ;;  %v793_v20 = vld [vmem:[%s24008_s1 + $0x1c8] sm:$0xff] }
 0x1de   : > { %15078 = vmatmul.mubr.msk.f32.gmra.mrb[34].mxu0 %vm1299_vm4, %v771_v21 }
 0x1df   : > { %15080 = vmatprep.mubr.msk.f32.mxu0 %vm1299_vm4, %v772_v22  ;;  %8256 = vperm.xlu1 %16881, %v365_v23   ;;  %v794_v22 = vld [vmem:[%s24008_s1 + $0x1d0] sm:$0xff] }
 0x1e0   : > { %8261 = vperm.xlu0 %16882, %v366_v24  }
 0x1e2   : > { %15081 = vmatmul.mubr.msk.f32.gmra.mrb[36].mxu0 %vm1299_vm4, %v773_v25  ;;  %v409_v25 = vld [vmem:[%s24009_s2 + $0x1c8] sm:$0xff] }
 0x1e3   : > { %15083 = vmatprep.mubr.msk.f32.mxu0 %vm1299_vm4, %v774_v26  ;;  %8346 = vperm.xlu1 %16881, %v383_v27  }
 0x1e4   : > { %8431 = vperm.xlu0 %16882, %v400_v28   ;;  %v410_v28 = vld [vmem:[%s24009_s2 + $0x1d0] sm:$0xff] }
 0x1e6   : > { %15084 = vmatmul.mubr.msk.f32.gmra.mrb[38].mxu0 %vm1299_vm4, %v775_v29  ;;  %v795_v29 = vld [vmem:[%s24008_s1 + $0x1d8] sm:$0xff] }
 0x1e7   : > { %15086 = vmatprep.mubr.msk.f32.mxu0 %vm1299_vm4, %v776_v30  ;;  %8266 = vperm.xlu1 %16881, %v367_v32   ;;  %v796_v30 = vld [vmem:[%s24008_s1 + $0x1e0] sm:$0xff] }
 0x1e8   : > { %8351 = vperm.xlu0 %16882, %v384_v33  }
 0x1ea   : > { %15087 = vmatmul.mubr.msk.f32.gmra.mrb[40].mxu0 %vm1299_vm4, %v777_v34  ;;  %v393_v34 = vld [vmem:[%s24009_s2 + $0x148] sm:$0xff] }
 0x1eb   : > { %15089 = vmatprep.mubr.msk.f32.mxu0 %vm1299_vm4, %v778_v35  ;;  %8436 = vperm.xlu1 %16881, %v401_v36  }
 0x1ec   : > { %8441 = vperm.xlu0 %16882, %v402_v37  }
 0x1ee   : > { %15090 = vmatmul.mubr.msk.f32.gmra.mrb[42].mxu0 %vm1299_vm4, %v779_v38  ;;  %v394_v38 = vld [vmem:[%s24009_s2 + $0x150] sm:$0xff] }
 0x1ef   : > { %15092 = vmatprep.mubr.msk.f32.mxu0 %vm1299_vm4, %v780_v39  ;;  %8356 = vperm.xlu1 %16881, %v385_v40  }
 0x1f0   : > { %8361 = vperm.xlu0 %16882, %v386_v41   ;;  %v11830_v41 = vld [vmem:[%s24008_s1 + $0x808] sm:$0xff] }
 0x1f2   : > { %15093 = vmatmul.mubr.msk.f32.gmra.mrb[44].mxu0 %vm1299_vm4, %v781_v42  ;;  %v797_v42 = vld [vmem:[%s24008_s1 + $0x1e8] sm:$0xff] }
 0x1f3   : > { %15095 = vmatprep.mubr.msk.f32.mxu0 %vm1299_vm4, %v782_v43  ;;  %8446 = vperm.xlu1 %16881, %v403_v44  }
 0x1f4   : > { %8451 = vperm.xlu0 %16882, %v404_v45  }
 0x1f6   : > { %15096 = vmatmul.mubr.msk.f32.gmra.mrb[46].mxu0 %vm1299_vm4, %v783_v46 }
 0x1f7   : > { %15098 = vmatprep.mubr.msk.f32.mxu0 %vm1299_vm4, %v784_v47  ;;  %8366 = vperm.xlu1 %16881, %v387_v48  }
 0x1f8   : > { %8371 = vperm.xlu0 %16882, %v388_v49  }
 0x1fa   : > { %15099 = vmatmul.mubr.msk.f32.gmra.mrb[48].mxu0 %vm1299_vm4, %v785_v50  ;;  %v798_v50 = vld [vmem:[%s24008_s1 + $0x1f0] sm:$0xff] }
 0x1fb   : > { %15101 = vmatprep.mubr.msk.f32.mxu0 %vm1299_vm4, %v786_v51  ;;  %8456 = vperm.xlu1 %16881, %v405_v52   ;;  %v11831_v51 = vld [vmem:[%s24008_s1 + $0x810] sm:$0xff] }
 0x1fc   : > { %8461 = vperm.xlu0 %16882, %v406_v53  }
 0x1fd   : > { %v16843_v57 = vpop.permute.xlu1 %16842 }
 0x1fe   : > { %15102 = vmatmul.mubr.msk.f32.gmra.mrb[50].mxu0 %vm1299_vm4, %v787_v54  ;;  %v16845_v60 = vunpack.i.h.bf16 %v16843_v57  ;;  %v16844_v61 = vunpack.i.l.bf16 %v16843_v57  ;;  %v11832_v54 = vld [vmem:[%s24008_s1 + $0x818] sm:$0xff] }
 0x1ff   : > { %15104 = vmatprep.mubr.msk.f32.mxu0 %vm1299_vm4, %v788_v55  ;;  %8376 = vperm.xlu1 %16881, %v389_v56   ;;  %v799_v55 = vld [vmem:[%s24008_s1 + $0x1f8] sm:$0xff] }
 0x200   : > { %8381 = vperm.xlu0 %16882, %v390_v58   ;;  %v1290_v6 = vsel %vm1289_vm9, %v16844_v61, %v16845_v60  ;;  %v11833_v58 = vld [vmem:[%s24008_s1 + $0x820] sm:$0xff] }
 0x201   : > { %v16848_v0 = vpop.permute.xlu1 %16847 }
 0x202   : > { %v16850_v2 = vunpack.i.h.bf16 %v16848_v0  ;;  %v16849_v3 = vunpack.i.l.bf16 %v16848_v0  ;;  %15105 = vmatmul.mubr.msk.f32.gmra.mrb[52].mxu0 %vm1299_vm4, %v789_v59  ;;  %v800_v59 = vld [vmem:[%s24008_s1 + $0x200] sm:$0xff] }
 0x203   : > { %15107 = vmatprep.mubr.msk.f32.mxu0 %vm1299_vm4, %v790_v62  ;;  %8466 = vperm.xlu1 %16881, %v407_v63   ;;  %v11834_v62 = vld [vmem:[%s24008_s1 + $0x828] sm:$0xff] }
 0x204   : > { %v1291_v7 = vsel %vm1289_vm9, %v16849_v3, %v16850_v2  ;;  %8471 = vperm.xlu0 %16882, %v408_v1   ;;  %v801_v63 = vld [vmem:[%s24008_s1 + $0x208] sm:$0xff]  ;;  %v802_v1 = vld [vmem:[%s24008_s1 + $0x210] sm:$0xff]  ;;  %v411_v2 = vld [vmem:[%s24009_s2 + $0x1d8] sm:$0xff] }
 0x205   : > { %v16853_v9 = vpop.permute.xlu1 %16852  ;;  %v15842_v10 = vpack.c.bf16 %v1291_v7, %v1290_v6  ;;  %v11836_v3 = vld [vmem:[%s24008_s1 + $0x838] sm:$0xff]  ;;  %v11837_v6 = vld [vmem:[%s24008_s1 + $0x840] sm:$0xff] }
 0x206   : > { %v16855_v12 = vunpack.i.h.bf16 %v16853_v9  ;;  %v16854_v13 = vunpack.i.l.bf16 %v16853_v9  ;;  %v16858_v14 = vpop.permute.xlu0 %16857  ;;  %15108 = vmatmul.mubr.msk.f32.gmra.mrb[54].mxu0 %vm1299_vm4, %v791_v4  ;;  %v803_v4 = vld [vmem:[%s24008_s1 + $0x218] sm:$0xff]  ;;  %v804_v7 = vld [vmem:[%s24008_s1 + $0x220] sm:$0xff]  ;;  %v11838_v9 = vld [vmem:[%s24008_s1 + $0x848] sm:$0xff] }
 0x207   : > { %v16860_v18 = vunpack.i.h.bf16 %v16858_v14  ;;  %v16859_v19 = vunpack.i.l.bf16 %v16858_v14  ;;  %15843 = vmatprep.subr.bf16.mxu1 %v15842_v10  ;;  %15110 = vmatprep.mubr.msk.f32.mxu0 %vm1299_vm4, %v792_v8  ;;  %v395_v8 = vld [vmem:[%s24009_s2 + $0x158] sm:$0xff]  ;;  %v413_v14 = vld [vmem:[%s24009_s2 + $0x1e8] sm:$0xff] }
 0x208   : > { %15845 = vmatpush3.bf16.msra.mxu1 %v15842_v10  ;;  %v1292_v21 = vsel %vm1289_vm9, %v16854_v13, %v16855_v12  ;;  %8386 = vperm.xlu1 %16881, %v391_v11   ;;  %v805_v10 = vld [vmem:[%s24008_s1 + $0x228] sm:$0xff]  ;;  %v11839_v11 = vld [vmem:[%s24008_s1 + $0x850] sm:$0xff]  ;;  %v396_v13 = vld [vmem:[%s24009_s2 + $0x160] sm:$0xff] }
 0x209   : > { %v1286_v23 = vpop.permute.xlu1 %1285  ;;  %v1293_v24 = vsel %vm1289_vm9, %v16859_v19, %v16860_v18  ;;  %8391 = vperm.xlu0 %16882, %v392_v15   ;;  %v806_v12 = vld [vmem:[%s24008_s1 + $0x230] sm:$0xff]  ;;  %v11840_v15 = vld [vmem:[%s24008_s1 + $0x858] sm:$0xff]  ;;  %v11841_v19 = vld [vmem:[%s24008_s1 + $0x860] sm:$0xff] }
 0x20a   : > { %v1288_v26 = vpop.permute.xlu0 %1287  ;;  %15111 = vmatmul.mubr.msk.f32.gmra.mrb[56].mxu0 %vm1299_vm4, %v793_v20  ;;  %v15846_v27 = vpack.c.bf16 %v1293_v24, %v1292_v21  ;;  %v807_v18 = vld [vmem:[%s24008_s1 + $0x238] sm:$0xff]  ;;  %v808_v20 = vld [vmem:[%s24008_s1 + $0x240] sm:$0xff]  ;;  %v414_v21 = vld [vmem:[%s24009_s2 + $0x1f0] sm:$0xff] }
 0x20b   : > { %15113 = vmatprep.mubr.msk.f32.mxu0 %vm1299_vm4, %v794_v22  ;;  %v1294_v32 = vsel %vm1289_vm9, %v1286_v23, %v1288_v26  ;;  %v397_v22 = vld [vmem:[%s24009_s2 + $0x168] sm:$0xff] }
 0x20c   : > { %15847 = vmatprep.subr.bf16.mxu1 %v15846_v27  ;;  %8476 = vperm.xlu1 %16881, %v409_v25   ;;  %v11842_v24 = vld [vmem:[%s24008_s1 + $0x868] sm:$0xff] }
 0x20d   : > { %v16863_v33 = vpop.permute.xlu1 %16862  ;;  %15849 = vmatpush3.bf16.msra.mxu1 %v15846_v27  ;;  %8481 = vperm.xlu0 %16882, %v410_v28   ;;  %v809_v26 = vld [vmem:[%s24008_s1 + $0x248] sm:$0xff]  ;;  %v11843_v27 = vld [vmem:[%s24008_s1 + $0x870] sm:$0xff] }
 0x20e   : > { %v16865_v35 = vunpack.i.h.bf16 %v16863_v33  ;;  %v16864_v36 = vunpack.i.l.bf16 %v16863_v33  ;;  %v16868_v37 = vpop.permute.xlu0 %16867  ;;  %14630 = vmatprep.subr.msk.mxu1 %vm2068_vm8, %v1294_v32  ;;  %15114 = vmatmul.mubr.msk.f32.gmra.mrb[58].mxu0 %vm1299_vm4, %v795_v29  ;;  %v810_v28 = vld [vmem:[%s24008_s1 + $0x250] sm:$0xff]  ;;  %v11844_v33 = vld [vmem:[%s24008_s1 + $0x878] sm:$0xff] }
 0x20f   : > { %v16870_v39 = vunpack.i.h.bf16 %v16868_v37  ;;  %v16869_v40 = vunpack.i.l.bf16 %v16868_v37  ;;  %15116 = vmatprep.mubr.msk.f32.mxu0 %vm1299_vm4, %v796_v30  ;;  %v398_v29 = vld [vmem:[%s24009_s2 + $0x170] sm:$0xff]  ;;  %v415_v30 = vld [vmem:[%s24009_s2 + $0x1f8] sm:$0xff]  ;;  %v812_v37 = vld [vmem:[%s24008_s1 + $0x260] sm:$0xff] }
 0x210   : > { %v5809_v43 = vsel %vm5808_vm10, %v16864_v36, %v16865_v35  ;;  %8396 = vperm.xlu1 %16881, %v393_v34   ;;  %v811_v35 = vld [vmem:[%s24008_s1 + $0x258] sm:$0xff]  ;;  %v11845_v36 = vld [vmem:[%s24008_s1 + $0x880] sm:$0xff] }
 0x211   : > { %v16873_v44 = vpop.permute.xlu1 %16872  ;;  %14631 = vmatpush3.msk.msra.mxu1 %vm2068_vm8, %v1294_v32  ;;  %v5810_v45 = vsel %vm5808_vm10, %v16869_v40, %v16870_v39  ;;  %8401 = vperm.xlu0 %16882, %v394_v38   ;;  %v432_v38 = vld [vmem:[%s24009_s2 + $0x280] sm:$0xff]  ;;  %v399_v39 = vld [vmem:[%s24009_s2 + $0x178] sm:$0xff] }
 0x212   : > { %v16875_v46 = vunpack.i.h.bf16 %v16873_v44  ;;  %v16874_v47 = vunpack.i.l.bf16 %v16873_v44  ;;  %v16878_v48 = vpop.permute.xlu0 %16877  ;;  %14633 = vmatmul.mubr.msk.f32.vlgmr.msra.gmra.mrb[0].mxu1 %vm1299_vm4, %v11830_v41  ;;  %16274 = vmatprep.subr.bf16.mxu1 %v17070_v5  ;;  %v15858_v49 = vpack.c.bf16 %v5810_v45, %v5809_v43  ;;  %v11846_v41 = vld [vmem:[%s24008_s1 + $0x888] sm:$0xff]  ;;  %v11847_v44 = vld [vmem:[%s24008_s1 + $0x890] sm:$0xff] }
 0x213   : > { %v16880_v52 = vunpack.i.h.bf16 %v16878_v48  ;;  %v16879_v53 = vunpack.i.l.bf16 %v16878_v48  ;;  %15117 = vmatmul.mubr.msk.f32.gmra.mrb[60].mxu0 %vm1299_vm4, %v797_v42  ;;  %16277 = vmatpush3.bf16.msra.mxu1 %v17070_v5  ;;  %v813_v43 = vld [vmem:[%s24008_s1 + $0x268] sm:$0xff]  ;;  %v814_v45 = vld [vmem:[%s24008_s1 + $0x270] sm:$0xff] }
 0x214   : > { %16275 = vmatprep.subr.bf16.mxu1 %v17078_v16  ;;  %15859 = vmatprep.subr.bf16.mxu0 %v15858_v49  ;;  %v5811_v56 = vsel %vm5808_vm10, %v16874_v47, %v16875_v46  ;;  %v416_v46 = vld [vmem:[%s24009_s2 + $0x200] sm:$0xff]  ;;  %v433_v47 = vld [vmem:[%s24009_s2 + $0x288] sm:$0xff] }
 0x215   : > { %15119 = vmatprep.mubr.msk.f32.mxu0 %vm1299_vm4, %v798_v50  ;;  %14635 = vmatprep.mubr.msk.f32.mxu1 %vm1299_vm4, %v11831_v51  ;;  %v5812_v57 = vsel %vm5808_vm10, %v16879_v53, %v16880_v52  ;;  %v5805_v60 = vpop.permute.xlu1 %5804  ;;  %v815_v51 = vld [vmem:[%s24008_s1 + $0x278] sm:$0xff]  ;;  %v11849_v52 = vld [vmem:[%s24008_s1 + $0x8a0] sm:$0xff] }
 0x216   : > { %15861 = vmatpush3.bf16.msra.mxu0 %v15858_v49  ;;  %14636 = vmatmul.mubr.msk.f32.gmra.mrb[2].mxu1 %vm1299_vm4, %v11832_v54  ;;  %v15862_v5 = vpack.c.bf16 %v5812_v57, %v5811_v56  ;;  %v5807_v61 = vpop.permute.xlu0 %5806  ;;  %v11848_v49 = vld [vmem:[%s24008_s1 + $0x898] sm:$0xff]  ;;  %v816_v53 = vld [vmem:[%s24008_s1 + $0x280] sm:$0xff]  ;;  %v434_v54 = vld [vmem:[%s24009_s2 + $0x290] sm:$0xff] }
 0x217   : > { %15120 = vmatmul.mubr.msk.f32.gmra.mrb[62].mxu0 %vm1299_vm4, %v799_v55  ;;  %16278 = vmatpush3.bf16.msra.mxu1 %v17078_v16  ;;  %v11835_v16 = vld [vmem:[%s24008_s1 + $0x830] sm:$0xff]  ;;  %v5813_v0 = vsel %vm5808_vm10, %v5805_v60, %v5807_v61  ;;  %v417_v55 = vld [vmem:[%s24009_s2 + $0x208] sm:$0xff] }
 0x218   : > { %16276 = vmatprep.subr.msk.mxu1 %vm2068_vm8, %v17082_v17  ;;  %15863 = vmatprep.subr.bf16.mxu0 %v15862_v5  ;;  %v11850_v57 = vld [vmem:[%s24008_s1 + $0x8a8] sm:$0xff]  ;;  %v818_v60 = vld [vmem:[%s24008_s1 + $0x290] sm:$0xff] }
 0x219   : > { %14638 = vmatprep.mubr.msk.f32.mxu1 %vm1299_vm4, %v11833_v58  ;;  %15122 = vmatprep.mubr.msk.f32.mxu0 %vm1299_vm4, %v800_v59  ;;  %v817_v58 = vld [vmem:[%s24008_s1 + $0x288] sm:$0xff]  ;;  %v11851_v59 = vld [vmem:[%s24008_s1 + $0x8b0] sm:$0xff] }
 0x21a   : > { %15865 = vmatpush3.bf16.msra.mxu0 %v15862_v5  ;;  %14639 = vmatmul.mubr.msk.f32.gmra.mrb[4].mxu1 %vm1299_vm4, %v11834_v62  ;;  %v418_v61 = vld [vmem:[%s24009_s2 + $0x210] sm:$0xff]  ;;  %v435_v62 = vld [vmem:[%s24009_s2 + $0x298] sm:$0xff] }
 0x21b   : > { %15123 = vmatmul.mubr.msk.f32.gmra.mrb[64].mxu0 %vm1299_vm4, %v801_v63  ;;  %15418 = vmatprep.subr.msk.mxu0 %vm2068_vm8, %v5813_v0 }
 0x21c   : > { %16279 = vmatpush3.msk.msra.mxu1 %vm2068_vm8, %v17082_v17  ;;  %14641 = vmatprep.mubr.msk.f32.mxu1 %vm1299_vm4, %v11835_v16  ;;  %v412_v17 = vld [vmem:[%s24009_s2 + $0x1e0] sm:$0xff]  ;;  %v11852_v16 = vld [vmem:[%s24008_s1 + $0x8b8] sm:$0xff] }
 0x21d   : > { %15125 = vmatprep.mubr.msk.f32.mxu0 %vm1299_vm4, %v802_v1  ;;  %8486 = vperm.xlu1 %16881, %v411_v2   ;;  %v819_v1 = vld [vmem:[%s24008_s1 + $0x298] sm:$0xff]  ;;  %v11853_v2 = vld [vmem:[%s24008_s1 + $0x8c0] sm:$0xff] }
 0x21e   : > { %15419 = vmatpush3.msk.msra.mxu0 %vm2068_vm8, %v5813_v0  ;;  %14642 = vmatmul.mubr.msk.f32.gmra.mrb[6].mxu1 %vm1299_vm4, %v11836_v3  ;;  %v820_v3 = vld [vmem:[%s24008_s1 + $0x2a0] sm:$0xff] }
 0x21f   : > { %15126 = vmatmul.mubr.msk.f32.gmra.mrb[66].mxu0 %vm1299_vm4, %v803_v4  ;;  %14644 = vmatprep.mubr.msk.f32.mxu1 %vm1299_vm4, %v11837_v6  ;;  %v436_v4 = vld [vmem:[%s24009_s2 + $0x2a0] sm:$0xff]  ;;  %v419_v6 = vld [vmem:[%s24009_s2 + $0x218] sm:$0xff] }
 0x220   : > { %15128 = vmatprep.mubr.msk.f32.mxu0 %vm1299_vm4, %v804_v7  ;;  %8491 = vperm.xlu0 %16882, %v412_v17   ;;  %v11854_v17 = vld [vmem:[%s24008_s1 + $0x8c8] sm:$0xff] }
 0x221   : > { %8406 = vperm.xlu1 %16881, %v395_v8  }
 0x222   : > { %14645 = vmatmul.mubr.msk.f32.gmra.mrb[8].mxu1 %vm1299_vm4, %v11838_v9  ;;  %v821_v9 = vld [vmem:[%s24008_s1 + $0x2a8] sm:$0xff] }
 0x223   : > { %15129 = vmatmul.mubr.msk.f32.gmra.mrb[68].mxu0 %vm1299_vm4, %v805_v10  ;;  %14647 = vmatprep.mubr.msk.f32.mxu1 %vm1299_vm4, %v11839_v11  ;;  %v11855_v10 = vld [vmem:[%s24008_s1 + $0x8d0] sm:$0xff] }
 0x224   : > { %15131 = vmatprep.mubr.msk.f32.mxu0 %vm1299_vm4, %v806_v12  ;;  %8411 = vperm.xlu0 %16882, %v396_v13   ;;  %v822_v11 = vld [vmem:[%s24008_s1 + $0x2b0] sm:$0xff]  ;;  %v420_v12 = vld [vmem:[%s24009_s2 + $0x220] sm:$0xff]  ;;  %v437_v13 = vld [vmem:[%s24009_s2 + $0x2a8] sm:$0xff] }
 0x225   : > { %8496 = vperm.xlu1 %16881, %v413_v14  }
 0x226   : > { %14648 = vmatmul.mubr.msk.f32.gmra.mrb[10].mxu1 %vm1299_vm4, %v11840_v15  ;;  %v17628_v23 = vpop.permute.xlu1 %8271  ;;  %v11856_v15 = vld [vmem:[%s24008_s1 + $0x8d8] sm:$0xff] }
 0x227   : > { %15132 = vmatmul.mubr.msk.f32.gmra.mrb[70].mxu0 %vm1299_vm4, %v807_v18  ;;  %14650 = vmatprep.mubr.msk.f32.mxu1 %vm1299_vm4, %v11841_v19  ;;  %v17635_v25 = vpop.permute.xlu0 %8276  ;;  %v823_v19 = vld [vmem:[%s24008_s1 + $0x2b8] sm:$0xff] }
 0x228   : > { %15134 = vmatprep.mubr.msk.f32.mxu0 %vm1299_vm4, %v808_v20  ;;  %8501 = vperm.xlu0 %16882, %v414_v21   ;;  %v11857_v20 = vld [vmem:[%s24008_s1 + $0x8e0] sm:$0xff] }
 0x229   : > { %8416 = vperm.xlu1 %16881, %v397_v22   ;;  %v824_v21 = vld [vmem:[%s24008_s1 + $0x2c0] sm:$0xff]  ;;  %v438_v22 = vld [vmem:[%s24009_s2 + $0x2b0] sm:$0xff] }
 0x22a   : > { %14651 = vmatmul.mubr.msk.f32.gmra.mrb[12].mxu1 %vm1299_vm4, %v11842_v24  ;;  %v17654_v32 = vpop.permute.xlu1 %8191  ;;  %v421_v24 = vld [vmem:[%s24009_s2 + $0x228] sm:$0xff] }
 0x22b   : > { %15135 = vmatmul.mubr.msk.f32.gmra.mrb[72].mxu0 %vm1299_vm4, %v809_v26  ;;  %14653 = vmatprep.mubr.msk.f32.mxu1 %vm1299_vm4, %v11843_v27  ;;  %v17661_v34 = vpop.permute.xlu0 %8281  ;;  %v11858_v27 = vld [vmem:[%s24008_s1 + $0x8e8] sm:$0xff] }
 0x22c   : > { %15137 = vmatprep.mubr.msk.f32.mxu0 %vm1299_vm4, %v810_v28  ;;  %8421 = vperm.xlu0 %16882, %v398_v29   ;;  %v825_v29 = vld [vmem:[%s24008_s1 + $0x2c8] sm:$0xff] }
 0x22d   : > { %8506 = vperm.xlu1 %16881, %v415_v30   ;;  %v11859_v30 = vld [vmem:[%s24008_s1 + $0x8f0] sm:$0xff] }
 0x22e   : > { %14654 = vmatmul.mubr.msk.f32.gmra.mrb[14].mxu1 %vm1299_vm4, %v11844_v33  ;;  %v17680_v40 = vpop.permute.xlu1 %8196  ;;  %v826_v33 = vld [vmem:[%s24008_s1 + $0x2d0] sm:$0xff] }
 0x22f   : > { %15138 = vmatmul.mubr.msk.f32.gmra.mrb[74].mxu0 %vm1299_vm4, %v811_v35  ;;  %14656 = vmatprep.mubr.msk.f32.mxu1 %vm1299_vm4, %v11845_v36  ;;  %v17687_v42 = vpop.permute.xlu0 %8201  ;;  %v422_v35 = vld [vmem:[%s24009_s2 + $0x230] sm:$0xff]  ;;  %v439_v36 = vld [vmem:[%s24009_s2 + $0x2b8] sm:$0xff] }
 0x230   : > { %15140 = vmatprep.mubr.msk.f32.mxu0 %vm1299_vm4, %v812_v37  ;;  %8591 = vperm.xlu0 %16882, %v432_v38   ;;  %v11860_v38 = vld [vmem:[%s24008_s1 + $0x8f8] sm:$0xff] }
 0x231   : > { %8426 = vperm.xlu1 %16881, %v399_v39  }
 0x232   : > { %14657 = vmatmul.mubr.msk.f32.gmra.mrb[16].mxu1 %vm1299_vm4, %v11846_v41  ;;  %v17706_v48 = vpop.permute.xlu1 %8286  ;;  %v827_v41 = vld [vmem:[%s24008_s1 + $0x2d8] sm:$0xff] }
 0x233   : > { %15141 = vmatmul.mubr.msk.f32.gmra.mrb[76].mxu0 %vm1299_vm4, %v813_v43  ;;  %14659 = vmatprep.mubr.msk.f32.mxu1 %vm1299_vm4, %v11847_v44  ;;  %v17713_v50 = vpop.permute.xlu0 %8291  ;;  %v11861_v43 = vld [vmem:[%s24008_s1 + $0x900] sm:$0xff] }
 0x234   : > { %15143 = vmatprep.mubr.msk.f32.mxu0 %vm1299_vm4, %v814_v45  ;;  %8511 = vperm.xlu0 %16882, %v416_v46   ;;  %v828_v44 = vld [vmem:[%s24008_s1 + $0x2e0] sm:$0xff]  ;;  %v423_v46 = vld [vmem:[%s24009_s2 + $0x238] sm:$0xff] }
 0x235   : > { %8596 = vperm.xlu1 %16881, %v433_v47   ;;  %v440_v45 = vld [vmem:[%s24009_s2 + $0x2c0] sm:$0xff] }
 0x236   : > { %14660 = vmatmul.mubr.msk.f32.gmra.mrb[18].mxu1 %vm1299_vm4, %v11848_v49  ;;  %v17732_v56 = vpop.permute.xlu1 %8206  ;;  %v11862_v49 = vld [vmem:[%s24008_s1 + $0x908] sm:$0xff] }
 0x237   : > { %15144 = vmatmul.mubr.msk.f32.gmra.mrb[78].mxu0 %vm1299_vm4, %v815_v51  ;;  %14662 = vmatprep.mubr.msk.f32.mxu1 %vm1299_vm4, %v11849_v52  ;;  %v17739_v5 = vpop.permute.xlu0 %8211  ;;  %v829_v52 = vld [vmem:[%s24008_s1 + $0x2e8] sm:$0xff] }
 0x238   : > { %15146 = vmatprep.mubr.msk.f32.mxu0 %vm1299_vm4, %v816_v53  ;;  %8601 = vperm.xlu0 %16882, %v434_v54   ;;  %v11863_v53 = vld [vmem:[%s24008_s1 + $0x910] sm:$0xff] }
 0x239   : > { %8516 = vperm.xlu1 %16881, %v417_v55   ;;  %v830_v54 = vld [vmem:[%s24008_s1 + $0x2f0] sm:$0xff]  ;;  %v424_v55 = vld [vmem:[%s24009_s2 + $0x240] sm:$0xff] }
 0x23a   : > { %14663 = vmatmul.mubr.msk.f32.gmra.mrb[20].mxu1 %vm1299_vm4, %v11850_v57  ;;  %v17758_v63 = vpop.permute.xlu1 %8296  ;;  %v441_v57 = vld [vmem:[%s24009_s2 + $0x2c8] sm:$0xff] }
 0x23b   : > { %15147 = vmatmul.mubr.msk.f32.gmra.mrb[80].mxu0 %vm1299_vm4, %v817_v58  ;;  %14665 = vmatprep.mubr.msk.f32.mxu1 %vm1299_vm4, %v11851_v59  ;;  %v17765_v0 = vpop.permute.xlu0 %8301  ;;  %v11864_v59 = vld [vmem:[%s24008_s1 + $0x918] sm:$0xff] }
 0x23c   : > { %15149 = vmatprep.mubr.msk.f32.mxu0 %vm1299_vm4, %v818_v60  ;;  %8521 = vperm.xlu0 %16882, %v418_v61   ;;  %v831_v61 = vld [vmem:[%s24008_s1 + $0x2f8] sm:$0xff] }
 0x23d   : > { %8606 = vperm.xlu1 %16881, %v435_v62   ;;  %v11865_v62 = vld [vmem:[%s24008_s1 + $0x920] sm:$0xff] }
 0x23e   : > { %14666 = vmatmul.mubr.msk.f32.gmra.mrb[22].mxu1 %vm1299_vm4, %v11852_v16  ;;  %v17784_v7 = vpop.permute.xlu1 %8216  ;;  %v832_v16 = vld [vmem:[%s24008_s1 + $0x300] sm:$0xff] }
 0x23f   : > { %15150 = vmatmul.mubr.msk.f32.gmra.mrb[82].mxu0 %vm1299_vm4, %v819_v1  ;;  %14668 = vmatprep.mubr.msk.f32.mxu1 %vm1299_vm4, %v11853_v2  ;;  %v17791_v8 = vpop.permute.xlu0 %8221  ;;  %v442_v1 = vld [vmem:[%s24009_s2 + $0x2d0] sm:$0xff]  ;;  %v425_v2 = vld [vmem:[%s24009_s2 + $0x248] sm:$0xff] }
 0x240   : > { %15152 = vmatprep.mubr.msk.f32.mxu0 %vm1299_vm4, %v820_v3  ;;  %8611 = vperm.xlu0 %16882, %v436_v4   ;;  %v11866_v4 = vld [vmem:[%s24008_s1 + $0x928] sm:$0xff] }
 0x241   : > { %8526 = vperm.xlu1 %16881, %v419_v6  }
 0x242   : > { %14669 = vmatmul.mubr.msk.f32.gmra.mrb[24].mxu1 %vm1299_vm4, %v11854_v17  ;;  %v17810_v14 = vpop.permute.xlu1 %8306  ;;  %v833_v17 = vld [vmem:[%s24008_s1 + $0x308] sm:$0xff] }
 0x243   : > { %15153 = vmatmul.mubr.msk.f32.gmra.mrb[84].mxu0 %vm1299_vm4, %v821_v9  ;;  %14671 = vmatprep.mubr.msk.f32.mxu1 %vm1299_vm4, %v11855_v10  ;;  %v17817_v18 = vpop.permute.xlu0 %8311  ;;  %v11867_v9 = vld [vmem:[%s24008_s1 + $0x930] sm:$0xff] }
 0x244   : > { %15155 = vmatprep.mubr.msk.f32.mxu0 %vm1299_vm4, %v822_v11  ;;  %8531 = vperm.xlu0 %16882, %v420_v12   ;;  %v834_v10 = vld [vmem:[%s24008_s1 + $0x310] sm:$0xff]  ;;  %v443_v12 = vld [vmem:[%s24009_s2 + $0x2d8] sm:$0xff] }
 0x245   : > { %8616 = vperm.xlu1 %16881, %v437_v13   ;;  %v426_v11 = vld [vmem:[%s24009_s2 + $0x250] sm:$0xff] }
 0x246   : > { %14672 = vmatmul.mubr.msk.f32.gmra.mrb[26].mxu1 %vm1299_vm4, %v11856_v15  ;;  %v17836_v26 = vpop.permute.xlu1 %8226  ;;  %v11868_v15 = vld [vmem:[%s24008_s1 + $0x938] sm:$0xff] }
 0x247   : > { %15156 = vmatmul.mubr.msk.f32.gmra.mrb[86].mxu0 %vm1299_vm4, %v823_v19  ;;  %14674 = vmatprep.mubr.msk.f32.mxu1 %vm1299_vm4, %v11857_v20  ;;  %v17843_v28 = vpop.permute.xlu0 %8231  ;;  %v835_v20 = vld [vmem:[%s24008_s1 + $0x318] sm:$0xff] }
 0x248   : > { %15158 = vmatprep.mubr.msk.f32.mxu0 %vm1299_vm4, %v824_v21  ;;  %8621 = vperm.xlu0 %16882, %v438_v22   ;;  %v11869_v21 = vld [vmem:[%s24008_s1 + $0x940] sm:$0xff] }
 0x249   : > { %8536 = vperm.xlu1 %16881, %v421_v24   ;;  %v836_v22 = vld [vmem:[%s24008_s1 + $0x320] sm:$0xff] }
 0x24a   : > { %14675 = vmatmul.mubr.msk.f32.gmra.mrb[28].mxu1 %vm1299_vm4, %v11858_v27  ;;  %v17862_v37 = vpop.permute.xlu1 %8316  ;;  %v444_v24 = vld [vmem:[%s24009_s2 + $0x2e0] sm:$0xff]  ;;  %v427_v27 = vld [vmem:[%s24009_s2 + $0x258] sm:$0xff] }
 0x24b   : > { %15159 = vmatmul.mubr.msk.f32.gmra.mrb[88].mxu0 %vm1299_vm4, %v825_v29  ;;  %14677 = vmatprep.mubr.msk.f32.mxu1 %vm1299_vm4, %v11859_v30  ;;  %v17869_v39 = vpop.permute.xlu0 %8321  ;;  %v11870_v30 = vld [vmem:[%s24008_s1 + $0x948] sm:$0xff] }
 0x24c   : > { %24018 = vst [vmem:[#allocation6_spill] sm:$0xff] %v17869_v39  ;;  %15161 = vmatprep.mubr.msk.f32.mxu0 %vm1299_vm4, %v826_v33  ;;  %8541 = vperm.xlu0 %16882, %v422_v35   ;;  %v837_v35 = vld [vmem:[%s24008_s1 + $0x328] sm:$0xff] }
 0x24d   : > { %8626 = vperm.xlu1 %16881, %v439_v36   ;;  %v11871_v36 = vld [vmem:[%s24008_s1 + $0x950] sm:$0xff] }
 0x24e   : > { %14678 = vmatmul.mubr.msk.f32.gmra.mrb[30].mxu1 %vm1299_vm4, %v11860_v38  ;;  %v17888_v47 = vpop.permute.xlu1 %8236  ;;  %v838_v38 = vld [vmem:[%s24008_s1 + $0x330] sm:$0xff] }
 0x24f   : > { %15162 = vmatmul.mubr.msk.f32.gmra.mrb[90].mxu0 %vm1299_vm4, %v827_v41  ;;  %14680 = vmatprep.mubr.msk.f32.mxu1 %vm1299_vm4, %v11861_v43  ;;  %v17895_v51 = vpop.permute.xlu0 %8241  ;;  %v428_v41 = vld [vmem:[%s24009_s2 + $0x260] sm:$0xff]  ;;  %v445_v43 = vld [vmem:[%s24009_s2 + $0x2e8] sm:$0xff] }
 0x250   : > { %15164 = vmatprep.mubr.msk.f32.mxu0 %vm1299_vm4, %v828_v44  ;;  %8631 = vperm.xlu0 %16882, %v440_v45   ;;  %v11872_v45 = vld [vmem:[%s24008_s1 + $0x958] sm:$0xff] }
 0x251   : > { %8546 = vperm.xlu1 %16881, %v423_v46  }
 0x252   : > { %14681 = vmatmul.mubr.msk.f32.gmra.mrb[32].mxu1 %vm1299_vm4, %v11862_v49  ;;  %v17914_v58 = vpop.permute.xlu1 %8326  ;;  %v839_v49 = vld [vmem:[%s24008_s1 + $0x338] sm:$0xff] }
 0x253   : > { %24019 = vst [vmem:[#allocation7_spill] sm:$0xff] %v17914_v58  ;;  %15165 = vmatmul.mubr.msk.f32.gmra.mrb[92].mxu0 %vm1299_vm4, %v829_v52  ;;  %14683 = vmatprep.mubr.msk.f32.mxu1 %vm1299_vm4, %v11863_v53  ;;  %v17921_v60 = vpop.permute.xlu0 %8331  ;;  %v11873_v52 = vld [vmem:[%s24008_s1 + $0x960] sm:$0xff]  ;;  %v567_v58 = vld [vmem:[%s24009_s2 + $0x6b8] sm:$0xff] }
 0x254   : > { %24020 = vst [vmem:[#allocation8_spill] sm:$0xff] %v17921_v60  ;;  %15167 = vmatprep.mubr.msk.f32.mxu0 %vm1299_vm4, %v830_v54  ;;  %8551 = vperm.xlu0 %16882, %v424_v55   ;;  %v840_v53 = vld [vmem:[%s24008_s1 + $0x340] sm:$0xff]  ;;  %v446_v54 = vld [vmem:[%s24009_s2 + $0x2f0] sm:$0xff]  ;;  %v429_v55 = vld [vmem:[%s24009_s2 + $0x268] sm:$0xff] }
 0x255   : > { %8636 = vperm.xlu1 %16881, %v441_v57  }
 0x256   : > { %14684 = vmatmul.mubr.msk.f32.gmra.mrb[34].mxu1 %vm1299_vm4, %v11864_v59  ;;  %v17940_v3 = vpop.permute.xlu1 %8246  ;;  %v11874_v59 = vld [vmem:[%s24008_s1 + $0x968] sm:$0xff] }
 0x257   : > { %15168 = vmatmul.mubr.msk.f32.gmra.mrb[94].mxu0 %vm1299_vm4, %v831_v61  ;;  %14686 = vmatprep.mubr.msk.f32.mxu1 %vm1299_vm4, %v11865_v62  ;;  %v17947_v6 = vpop.permute.xlu0 %8251  ;;  %v841_v62 = vld [vmem:[%s24008_s1 + $0x348] sm:$0xff] }
 0x258   : > { %15170 = vmatprep.mubr.msk.f32.mxu0 %vm1299_vm4, %v832_v16  ;;  %8641 = vperm.xlu0 %16882, %v442_v1   ;;  %v11875_v16 = vld [vmem:[%s24008_s1 + $0x970] sm:$0xff] }
 0x259   : > { %8556 = vperm.xlu1 %16881, %v425_v2   ;;  %v842_v1 = vld [vmem:[%s24008_s1 + $0x350] sm:$0xff] }
 0x25a   : > { %14687 = vmatmul.mubr.msk.f32.gmra.mrb[36].mxu1 %vm1299_vm4, %v11866_v4  ;;  %v17966_v13 = vpop.permute.xlu1 %8336  ;;  %v430_v2 = vld [vmem:[%s24009_s2 + $0x270] sm:$0xff]  ;;  %v447_v4 = vld [vmem:[%s24009_s2 + $0x2f8] sm:$0xff] }
 0x25b   : > { %24021 = vst [vmem:[#allocation9_spill] sm:$0xff] %v17966_v13  ;;  %15171 = vmatmul.mubr.msk.f32.gmra.mrb[96].mxu0 %vm1299_vm4, %v833_v17  ;;  %14689 = vmatprep.mubr.msk.f32.mxu1 %vm1299_vm4, %v11867_v9  ;;  %v17973_v19 = vpop.permute.xlu0 %8341  ;;  %v11876_v9 = vld [vmem:[%s24008_s1 + $0x978] sm:$0xff] }
 0x25c   : > { %24022 = vst [vmem:[#allocation10_spill] sm:$0xff] %v17973_v19  ;;  %15173 = vmatprep.mubr.msk.f32.mxu0 %vm1299_vm4, %v834_v10  ;;  %8561 = vperm.xlu0 %16882, %v426_v11   ;;  %v843_v11 = vld [vmem:[%s24008_s1 + $0x358] sm:$0xff]  ;;  %v11983_v19 = vld [vmem:[%s24008_s1 + $0xcd0] sm:$0xff] }
 0x25d   : > { %8646 = vperm.xlu1 %16881, %v443_v12   ;;  %v11877_v12 = vld [vmem:[%s24008_s1 + $0x980] sm:$0xff] }
 0x25e   : > { %14690 = vmatmul.mubr.msk.f32.gmra.mrb[38].mxu1 %vm1299_vm4, %v11868_v15  ;;  %v17992_v29 = vpop.permute.xlu1 %8256  ;;  %v844_v15 = vld [vmem:[%s24008_s1 + $0x360] sm:$0xff] }
 0x25f   : > { %15174 = vmatmul.mubr.msk.f32.gmra.mrb[98].mxu0 %vm1299_vm4, %v835_v20  ;;  %14692 = vmatprep.mubr.msk.f32.mxu1 %vm1299_vm4, %v11869_v21  ;;  %v17999_v33 = vpop.permute.xlu0 %8261  ;;  %v464_v20 = vld [vmem:[%s24009_s2 + $0x380] sm:$0xff]  ;;  %v431_v21 = vld [vmem:[%s24009_s2 + $0x278] sm:$0xff] }
 0x260   : > { %15176 = vmatprep.mubr.msk.f32.mxu0 %vm1299_vm4, %v836_v22  ;;  %8651 = vperm.xlu0 %16882, %v444_v24   ;;  %v11878_v24 = vld [vmem:[%s24008_s1 + $0x988] sm:$0xff] }
 0x261   : > { %8566 = vperm.xlu1 %16881, %v427_v27  }
 0x262   : > { %14693 = vmatmul.mubr.msk.f32.gmra.mrb[40].mxu1 %vm1299_vm4, %v11870_v30  ;;  %v18018_v44 = vpop.permute.xlu1 %8346  ;;  %v845_v30 = vld [vmem:[%s24008_s1 + $0x368] sm:$0xff] }
 0x263   : > { %24023 = vst [vmem:[#allocation11_spill] sm:$0xff] %v18018_v44  ;;  %15177 = vmatmul.mubr.msk.f32.gmra.mrb[100].mxu0 %vm1299_vm4, %v837_v35  ;;  %14695 = vmatprep.mubr.msk.f32.mxu1 %vm1299_vm4, %v11871_v36  ;;  %v18025_v46 = vpop.permute.xlu0 %8431  ;;  %v11879_v35 = vld [vmem:[%s24008_s1 + $0x990] sm:$0xff] }
 0x264   : > { %24024 = vst [vmem:[#allocation12_spill] sm:$0xff] %v18025_v46  ;;  %15179 = vmatprep.mubr.msk.f32.mxu0 %vm1299_vm4, %v838_v38  ;;  %8571 = vperm.xlu0 %16882, %v428_v41   ;;  %v846_v36 = vld [vmem:[%s24008_s1 + $0x370] sm:$0xff]  ;;  %v448_v38 = vld [vmem:[%s24009_s2 + $0x300] sm:$0xff]  ;;  %v465_v41 = vld [vmem:[%s24009_s2 + $0x388] sm:$0xff] }
 0x265   : > { %8656 = vperm.xlu1 %16881, %v445_v43   ;;  %v11965_v46 = vld [vmem:[%s24008_s1 + $0xc40] sm:$0xff] }
 0x266   : > { %14696 = vmatmul.mubr.msk.f32.gmra.mrb[42].mxu1 %vm1299_vm4, %v11872_v45  ;;  %v18044_v57 = vpop.permute.xlu1 %8266  ;;  %v11880_v45 = vld [vmem:[%s24008_s1 + $0x998] sm:$0xff] }
 0x267   : > { %15180 = vmatmul.mubr.msk.f32.gmra.mrb[102].mxu0 %vm1299_vm4, %v839_v49  ;;  %14698 = vmatprep.mubr.msk.f32.mxu1 %vm1299_vm4, %v11873_v52  ;;  %v18051_v61 = vpop.permute.xlu0 %8351  ;;  %v847_v52 = vld [vmem:[%s24008_s1 + $0x378] sm:$0xff] }
 0x268   : > { %24025 = vst [vmem:[#allocation13_spill] sm:$0xff] %v18051_v61  ;;  %15182 = vmatprep.mubr.msk.f32.mxu0 %vm1299_vm4, %v840_v53  ;;  %8661 = vperm.xlu0 %16882, %v446_v54   ;;  %v11881_v53 = vld [vmem:[%s24008_s1 + $0x9a0] sm:$0xff] }
 0x269   : > { %8576 = vperm.xlu1 %16881, %v429_v55   ;;  %v848_v54 = vld [vmem:[%s24008_s1 + $0x380] sm:$0xff]  ;;  %v466_v55 = vld [vmem:[%s24009_s2 + $0x390] sm:$0xff] }
 0x26a   : > { %14699 = vmatmul.mubr.msk.f32.gmra.mrb[44].mxu1 %vm1299_vm4, %v11874_v59  ;;  %v18070_v17 = vpop.permute.xlu1 %8436  ;;  %v449_v59 = vld [vmem:[%s24009_s2 + $0x308] sm:$0xff] }
 0x26b   : > { %24026 = vst [vmem:[#allocation14_spill] sm:$0xff] %v18070_v17  ;;  %15183 = vmatmul.mubr.msk.f32.gmra.mrb[104].mxu0 %vm1299_vm4, %v841_v62  ;;  %14701 = vmatprep.mubr.msk.f32.mxu1 %vm1299_vm4, %v11875_v16  ;;  %v18077_v10 = vpop.permute.xlu0 %8441  ;;  %v11882_v16 = vld [vmem:[%s24008_s1 + $0x9a8] sm:$0xff] }
 0x26c   : > { %24027 = vst [vmem:[#allocation15_spill] sm:$0xff] %v18077_v10  ;;  %15185 = vmatprep.mubr.msk.f32.mxu0 %vm1299_vm4, %v842_v1  ;;  %8581 = vperm.xlu0 %16882, %v430_v2   ;;  %v849_v2 = vld [vmem:[%s24008_s1 + $0x388] sm:$0xff] }
 0x26d   : > { %8666 = vperm.xlu1 %16881, %v447_v4   ;;  %v11883_v4 = vld [vmem:[%s24008_s1 + $0x9b0] sm:$0xff] }
 0x26e   : > { %14702 = vmatmul.mubr.msk.f32.gmra.mrb[46].mxu1 %vm1299_vm4, %v11876_v9  ;;  %v18096_v22 = vpop.permute.xlu1 %8356  ;;  %v850_v9 = vld [vmem:[%s24008_s1 + $0x390] sm:$0xff] }
 0x26f   : > { %24028 = vst [vmem:[#allocation16_spill] sm:$0xff] %v18096_v22  ;;  %15186 = vmatmul.mubr.msk.f32.gmra.mrb[106].mxu0 %vm1299_vm4, %v843_v11  ;;  %14704 = vmatprep.mubr.msk.f32.mxu1 %vm1299_vm4, %v11877_v12  ;;  %v18103_v27 = vpop.permute.xlu0 %8361  ;;  %v450_v11 = vld [vmem:[%s24009_s2 + $0x310] sm:$0xff]  ;;  %v467_v12 = vld [vmem:[%s24009_s2 + $0x398] sm:$0xff] }
 0x270   : > { %24029 = vst [vmem:[#allocation17_spill] sm:$0xff] %v18103_v27  ;;  %15188 = vmatprep.mubr.msk.f32.mxu0 %vm1299_vm4, %v844_v15  ;;  %8751 = vperm.xlu0 %16882, %v464_v20   ;;  %v11884_v20 = vld [vmem:[%s24008_s1 + $0x9b8] sm:$0xff] }
 0x271   : > { %8586 = vperm.xlu1 %16881, %v431_v21   ;;  %v547_v22 = vld [vmem:[%s24009_s2 + $0x618] sm:$0xff] }
 0x272   : > { %14705 = vmatmul.mubr.msk.f32.gmra.mrb[48].mxu1 %vm1299_vm4, %v11878_v24  ;;  %v18122_v43 = vpop.permute.xlu1 %8446  ;;  %v851_v24 = vld [vmem:[%s24008_s1 + $0x398] sm:$0xff] }
 0x273   : > { %24030 = vst [vmem:[#allocation18_spill] sm:$0xff] %v18122_v43  ;;  %15189 = vmatmul.mubr.msk.f32.gmra.mrb[108].mxu0 %vm1299_vm4, %v845_v30  ;;  %14707 = vmatprep.mubr.msk.f32.mxu1 %vm1299_vm4, %v11879_v35  ;;  %v18129_v49 = vpop.permute.xlu0 %8451  ;;  %v11885_v30 = vld [vmem:[%s24008_s1 + $0x9c0] sm:$0xff]  ;;  %v539_v43 = vld [vmem:[%s24009_s2 + $0x5d8] sm:$0xff] }
 0x274   : > { %24031 = vst [vmem:[#allocation19_spill] sm:$0xff] %v18129_v49  ;;  %15191 = vmatprep.mubr.msk.f32.mxu0 %vm1299_vm4, %v846_v36  ;;  %8671 = vperm.xlu0 %16882, %v448_v38   ;;  %v852_v35 = vld [vmem:[%s24008_s1 + $0x3a0] sm:$0xff]  ;;  %v451_v38 = vld [vmem:[%s24009_s2 + $0x318] sm:$0xff] }
 0x275   : > { %8756 = vperm.xlu1 %16881, %v465_v41   ;;  %v468_v36 = vld [vmem:[%s24009_s2 + $0x3a0] sm:$0xff] }
 0x276   : > { %14708 = vmatmul.mubr.msk.f32.gmra.mrb[50].mxu1 %vm1299_vm4, %v11880_v45  ;;  %v18148_v62 = vpop.permute.xlu1 %8366  ;;  %v11886_v45 = vld [vmem:[%s24008_s1 + $0x9c8] sm:$0xff] }
 0x277   : > { %24032 = vst [vmem:[#allocation20_spill] sm:$0xff] %v18148_v62  ;;  %15192 = vmatmul.mubr.msk.f32.gmra.mrb[110].mxu0 %vm1299_vm4, %v847_v52  ;;  %14710 = vmatprep.mubr.msk.f32.mxu1 %vm1299_vm4, %v11881_v53  ;;  %v18155_v1 = vpop.permute.xlu0 %8371  ;;  %v853_v52 = vld [vmem:[%s24008_s1 + $0x3a8] sm:$0xff]  ;;  %v11887_v53 = vld [vmem:[%s24008_s1 + $0x9d0] sm:$0xff] }
 0x278   : > { %24033 = vst [vmem:[#allocation21_spill] sm:$0xff] %v18155_v1  ;;  %15194 = vmatprep.mubr.msk.f32.mxu0 %vm1299_vm4, %v848_v54  ;;  %8761 = vperm.xlu0 %16882, %v466_v55   ;;  %v854_v54 = vld [vmem:[%s24008_s1 + $0x3b0] sm:$0xff]  ;;  %v452_v55 = vld [vmem:[%s24009_s2 + $0x320] sm:$0xff] }
 0x279   : > { %8676 = vperm.xlu1 %16881, %v449_v59   ;;  %v11977_v1 = vld [vmem:[%s24008_s1 + $0xca0] sm:$0xff] }
 0x27a   : > { %14711 = vmatmul.mubr.msk.f32.gmra.mrb[52].mxu1 %vm1299_vm4, %v11882_v16  ;;  %v18174_v15 = vpop.permute.xlu1 %8456  ;;  %v469_v16 = vld [vmem:[%s24009_s2 + $0x3a8] sm:$0xff] }
 0x27b   : > { %24034 = vst [vmem:[#allocation22_spill] sm:$0xff] %v18174_v15  ;;  %15195 = vmatmul.mubr.msk.f32.gmra.mrb[112].mxu0 %vm1299_vm4, %v849_v2  ;;  %14713 = vmatprep.mubr.msk.f32.mxu1 %vm1299_vm4, %v11883_v4  ;;  %v18181_v21 = vpop.permute.xlu0 %8461  ;;  %v11888_v2 = vld [vmem:[%s24008_s1 + $0x9d8] sm:$0xff] }
 0x27c   : > { %24035 = vst [vmem:[#allocation23_spill] sm:$0xff] %v18181_v21  ;;  %15197 = vmatprep.mubr.msk.f32.mxu0 %vm1299_vm4, %v850_v9  ;;  %8681 = vperm.xlu0 %16882, %v450_v11   ;;  %v855_v4 = vld [vmem:[%s24008_s1 + $0x3b8] sm:$0xff]  ;;  %v11889_v9 = vld [vmem:[%s24008_s1 + $0x9e0] sm:$0xff] }
 0x27d   : > { %8766 = vperm.xlu1 %16881, %v467_v12   ;;  %v856_v12 = vld [vmem:[%s24008_s1 + $0x3c0] sm:$0xff] }
 0x27e   : > { %14714 = vmatmul.mubr.msk.f32.gmra.mrb[54].mxu1 %vm1299_vm4, %v11884_v20  ;;  %v18200_v41 = vpop.permute.xlu1 %8376  ;;  %v470_v20 = vld [vmem:[%s24009_s2 + $0x3b0] sm:$0xff] }
 0x27f   : > { %24036 = vst [vmem:[#allocation24_spill] sm:$0xff] %v18200_v41  ;;  %15198 = vmatmul.mubr.msk.f32.gmra.mrb[114].mxu0 %vm1299_vm4, %v851_v24  ;;  %14716 = vmatprep.mubr.msk.f32.mxu1 %vm1299_vm4, %v11885_v30  ;;  %v18220_v59 = vpop.permute.xlu0 %8381  ;;  %v453_v24 = vld [vmem:[%s24009_s2 + $0x328] sm:$0xff] }
 0x280   : > { %15200 = vmatprep.mubr.msk.f32.mxu0 %vm1299_vm4, %v852_v35  ;;  %8771 = vperm.xlu0 %16882, %v468_v36   ;;  %24037 = vst [vmem:[#allocation25_spill] sm:$0xff] %v18220_v59  ;;  %v11890_v30 = vld [vmem:[%s24008_s1 + $0x9e8] sm:$0xff] }
 0x281   : > { %8686 = vperm.xlu1 %16881, %v451_v38   ;;  %v857_v36 = vld [vmem:[%s24008_s1 + $0x3c8] sm:$0xff]  ;;  %v11891_v38 = vld [vmem:[%s24008_s1 + $0x9f0] sm:$0xff] }
 0x282   : > { %14717 = vmatmul.mubr.msk.f32.gmra.mrb[56].mxu1 %vm1299_vm4, %v11886_v45  ;;  %v18238_v11 = vpop.permute.xlu1 %8466  ;;  %v858_v45 = vld [vmem:[%s24008_s1 + $0x3d0] sm:$0xff] }
 0x283   : > { %15201 = vmatmul.mubr.msk.f32.gmra.mrb[116].mxu0 %vm1299_vm4, %v853_v52  ;;  %14719 = vmatprep.mubr.msk.f32.mxu1 %vm1299_vm4, %v11887_v53  ;;  %24038 = vst [vmem:[#allocation26_spill] sm:$0xff] %v18238_v11  ;;  %v18255_v35 = vpop.permute.xlu0 %8471  ;;  %v454_v52 = vld [vmem:[%s24009_s2 + $0x330] sm:$0xff]  ;;  %v471_v53 = vld [vmem:[%s24009_s2 + $0x3b8] sm:$0xff] }
 0x284   : > { %15203 = vmatprep.mubr.msk.f32.mxu0 %vm1299_vm4, %v854_v54  ;;  %8691 = vperm.xlu0 %16882, %v452_v55   ;;  %24039 = vst [vmem:[#allocation27_spill] sm:$0xff] %v18255_v35  ;;  %v11892_v55 = vld [vmem:[%s24008_s1 + $0x9f8] sm:$0xff] }
 0x285   : > { %8776 = vperm.xlu1 %16881, %v469_v16   ;;  %v859_v16 = vld [vmem:[%s24008_s1 + $0x3d8] sm:$0xff] }
 0x286   : > { %14720 = vmatmul.mubr.msk.f32.gmra.mrb[58].mxu1 %vm1299_vm4, %v11888_v2  ;;  %v11893_v2 = vld [vmem:[%s24008_s1 + $0xa00] sm:$0xff] }
 0x287   : > { %15204 = vmatmul.mubr.msk.f32.gmra.mrb[118].mxu0 %vm1299_vm4, %v855_v4  ;;  %14722 = vmatprep.mubr.msk.f32.mxu1 %vm1299_vm4, %v11889_v9  ;;  %v18274_v54 = vpop.permute.xlu1 %8386  ;;  %v860_v4 = vld [vmem:[%s24008_s1 + $0x3e0] sm:$0xff] }
 0x288   : > { %15206 = vmatprep.mubr.msk.f32.mxu0 %vm1299_vm4, %v856_v12  ;;  %8781 = vperm.xlu0 %16882, %v470_v20   ;;  %24040 = vst [vmem:[#allocation28_spill] sm:$0xff] %v18274_v54  ;;  %v472_v9 = vld [vmem:[%s24009_s2 + $0x3c0] sm:$0xff]  ;;  %v18294_v12 = vpop.permute.xlu0 %8391  ;;  %v455_v20 = vld [vmem:[%s24009_s2 + $0x338] sm:$0xff]  ;;  %v561_v54 = vld [vmem:[%s24009_s2 + $0x688] sm:$0xff] }
 0x289   : > { %8696 = vperm.xlu1 %16881, %v453_v24   ;;  %24041 = vst [vmem:[#allocation29_spill] sm:$0xff] %v18294_v12  ;;  %v11894_v24 = vld [vmem:[%s24008_s1 + $0xa08] sm:$0xff] }
 0x28a   : > { %14723 = vmatmul.mubr.msk.f32.gmra.mrb[60].mxu1 %vm1299_vm4, %v11890_v30  ;;  %v861_v30 = vld [vmem:[%s24008_s1 + $0x3e8] sm:$0xff] }
 0x28b   : > { %15207 = vmatmul.mubr.msk.f32.gmra.mrb[120].mxu0 %vm1299_vm4, %v857_v36  ;;  %14725 = vmatprep.mubr.msk.f32.mxu1 %vm1299_vm4, %v11891_v38  ;;  %v11895_v36 = vld [vmem:[%s24008_s1 + $0xa10] sm:$0xff]  ;;  %v18312_v38 = vpop.permute.xlu1 %8476 }
 0x28c   : > { %15209 = vmatprep.mubr.msk.f32.mxu0 %vm1299_vm4, %v858_v45  ;;  %8701 = vperm.xlu0 %16882, %v454_v52   ;;  %24042 = vst [vmem:[#allocation30_spill] sm:$0xff] %v18312_v38  ;;  %v862_v45 = vld [vmem:[%s24008_s1 + $0x3f0] sm:$0xff]  ;;  %v456_v52 = vld [vmem:[%s24009_s2 + $0x340] sm:$0xff] }
 0x28d   : > { %8786 = vperm.xlu1 %16881, %v471_v53   ;;  %v473_v53 = vld [vmem:[%s24009_s2 + $0x3c8] sm:$0xff] }
 0x28e   : > { %14726 = vmatmul.mubr.msk.f32.gmra.mrb[62].mxu1 %vm1299_vm4, %v11892_v55  ;;  %v11896_v55 = vld [vmem:[%s24008_s1 + $0xa18] sm:$0xff] }
 0x28f   : > { %15210 = vmatmul.mubr.msk.f32.gmra.mrb[122].mxu0 %vm1299_vm4, %v859_v16  ;;  %14728 = vmatprep.mubr.msk.f32.mxu1 %vm1299_vm4, %v11893_v2  ;;  %v18329_v16 = vpop.permute.xlu0 %8481  ;;  %v863_v2 = vld [vmem:[%s24008_s1 + $0x3f8] sm:$0xff] }
 0x290   : > { %15212 = vmatprep.mubr.msk.f32.mxu0 %vm1299_vm4, %v860_v4  ;;  %8791 = vperm.xlu0 %16882, %v472_v9   ;;  %24043 = vst [vmem:[#allocation31_spill] sm:$0xff] %v18329_v16  ;;  %v11897_v4 = vld [vmem:[%s24008_s1 + $0xa20] sm:$0xff] }
 0x291   : > { %8706 = vperm.xlu1 %16881, %v455_v20   ;;  %v864_v9 = vld [vmem:[%s24008_s1 + $0x400] sm:$0xff]  ;;  %v474_v20 = vld [vmem:[%s24009_s2 + $0x3d0] sm:$0xff] }
 0x292   : > { %14729 = vmatmul.mubr.msk.f32.gmra.mrb[64].mxu1 %vm1299_vm4, %v11894_v24  ;;  %v18345_v24 = vpop.permute.xlu1 %8396 }
 0x293   : > { %15213 = vmatmul.mubr.msk.f32.gmra.mrb[124].mxu0 %vm1299_vm4, %v861_v30  ;;  %14731 = vmatprep.mubr.msk.f32.mxu1 %vm1299_vm4, %v11895_v36  ;;  %24044 = vst [vmem:[#allocation32_spill] sm:$0xff] %v18345_v24  ;;  %v457_v30 = vld [vmem:[%s24009_s2 + $0x348] sm:$0xff] }
 0x294   : > { %15215 = vmatprep.mubr.msk.f32.mxu0 %vm1299_vm4, %v862_v45  ;;  %8711 = vperm.xlu0 %16882, %v456_v52   ;;  %v11898_v36 = vld [vmem:[%s24008_s1 + $0xa28] sm:$0xff]  ;;  %v11899_v52 = vld [vmem:[%s24008_s1 + $0xa30] sm:$0xff] }
 0x295   : > { %8796 = vperm.xlu1 %16881, %v473_v53   ;;  %v865_v45 = vld [vmem:[%s24008_s1 + $0x408] sm:$0xff]  ;;  %v866_v53 = vld [vmem:[%s24008_s1 + $0x410] sm:$0xff] }
 0x296   : > { %14732 = vmatmul.mubr.msk.f32.gmra.mrb[66].mxu1 %vm1299_vm4, %v11896_v55  ;;  %v18365_v55 = vpop.permute.xlu0 %8401 }
 0x297   : > { %15216 = vmatmul.mubr.msk.f32.gmra.mrb[126].mxu0 %vm1299_vm4, %v863_v2  ;;  %14734 = vmatprep.mubr.msk.f32.mxu1 %vm1299_vm4, %v11897_v4  ;;  %24045 = vst [vmem:[#allocation33_spill] sm:$0xff] %v18365_v55  ;;  %v458_v2 = vld [vmem:[%s24009_s2 + $0x350] sm:$0xff]  ;;  %v475_v4 = vld [vmem:[%s24009_s2 + $0x3d8] sm:$0xff] }
 0x298   : > { %15218 = vmatprep.mubr.msk.f32.mxu0 %vm1299_vm4, %v864_v9  ;;  %8801 = vperm.xlu0 %16882, %v474_v20   ;;  %v11900_v9 = vld [vmem:[%s24008_s1 + $0xa38] sm:$0xff]  ;;  %v11971_v55 = vld [vmem:[%s24008_s1 + $0xc70] sm:$0xff] }
 0x299   : > { %8716 = vperm.xlu1 %16881, %v457_v30   ;;  %v867_v20 = vld [vmem:[%s24008_s1 + $0x418] sm:$0xff]  ;;  %v11901_v30 = vld [vmem:[%s24008_s1 + $0xa40] sm:$0xff] }
 0x29a   : > { %14735 = vmatmul.mubr.msk.f32.gmra.mrb[68].mxu1 %vm1299_vm4, %v11898_v36 }
 0x29b   : > { %15219 = vmatmul.mubr.msk.f32.gmra.mrb[128].mxu0 %vm1299_vm4, %v865_v45  ;;  %14737 = vmatprep.mubr.msk.f32.mxu1 %vm1299_vm4, %v11899_v52  ;;  %v868_v45 = vld [vmem:[%s24008_s1 + $0x420] sm:$0xff] }
 0x29c   : > { %15221 = vmatprep.mubr.msk.f32.mxu0 %vm1299_vm4, %v866_v53  ;;  %v18386_v36 = vpop.permute.xlu1 %8486  ;;  %8721 = vperm.xlu0 %16882, %v458_v2   ;;  %v476_v52 = vld [vmem:[%s24009_s2 + $0x3e0] sm:$0xff]  ;;  %v459_v53 = vld [vmem:[%s24009_s2 + $0x358] sm:$0xff]  ;;  %v11902_v2 = vld [vmem:[%s24008_s1 + $0xa48] sm:$0xff] }
 0x29d   : > { %24046 = vst [vmem:[#allocation34_spill] sm:$0xff] %v18386_v36  ;;  %8806 = vperm.xlu1 %16881, %v475_v4   ;;  %v869_v4 = vld [vmem:[%s24008_s1 + $0x428] sm:$0xff] }
 0x29e   : > { %14738 = vmatmul.mubr.msk.f32.gmra.mrb[70].mxu1 %vm1299_vm4, %v11900_v9  ;;  %v11903_v9 = vld [vmem:[%s24008_s1 + $0xa50] sm:$0xff] }
 0x29f   : > { %15222 = vmatmul.mubr.msk.f32.gmra.mrb[130].mxu0 %vm1299_vm4, %v867_v20  ;;  %14740 = vmatprep.mubr.msk.f32.mxu1 %vm1299_vm4, %v11901_v30  ;;  %v18403_v31 = vpop.permute.xlu0 %8491  ;;  %v870_v20 = vld [vmem:[%s24008_s1 + $0x430] sm:$0xff]  ;;  %v460_v30 = vld [vmem:[%s24009_s2 + $0x360] sm:$0xff] }
 0x2a0   : > { %24047 = vst [vmem:[#allocation35_spill] sm:$0xff] %v18403_v31  ;;  %15224 = vmatprep.mubr.msk.f32.mxu0 %vm1299_vm4, %v868_v45  ;;  %v18412_v16 = vpop.permute.xlu1 %8406  ;;  %8811 = vperm.xlu0 %16882, %v476_v52   ;;  %v477_v45 = vld [vmem:[%s24009_s2 + $0x3e8] sm:$0xff]  ;;  %v11904_v52 = vld [vmem:[%s24008_s1 + $0xa58] sm:$0xff] }
 0x2a1   : > { %24048 = vst [vmem:[#allocation36_spill] sm:$0xff] %v18412_v16  ;;  %8726 = vperm.xlu1 %16881, %v459_v53   ;;  %v871_v53 = vld [vmem:[%s24008_s1 + $0x438] sm:$0xff] }
 0x2a2   : > { %14741 = vmatmul.mubr.msk.f32.gmra.mrb[72].mxu1 %vm1299_vm4, %v11902_v2  ;;  %v11905_v2 = vld [vmem:[%s24008_s1 + $0xa60] sm:$0xff] }
 0x2a3   : > { %15225 = vmatmul.mubr.msk.f32.gmra.mrb[132].mxu0 %vm1299_vm4, %v869_v4  ;;  %14743 = vmatprep.mubr.msk.f32.mxu1 %vm1299_vm4, %v11903_v9  ;;  %v18429_v31 = vpop.permute.xlu0 %8411  ;;  %v872_v4 = vld [vmem:[%s24008_s1 + $0x440] sm:$0xff]  ;;  %v478_v9 = vld [vmem:[%s24009_s2 + $0x3f0] sm:$0xff] }
 0x2a4   : > { %24049 = vst [vmem:[#allocation37_spill] sm:$0xff] %v18429_v31  ;;  %15227 = vmatprep.mubr.msk.f32.mxu0 %vm1299_vm4, %v870_v20  ;;  %v18438_v36 = vpop.permute.xlu1 %8496  ;;  %8731 = vperm.xlu0 %16882, %v460_v30   ;;  %v461_v20 = vld [vmem:[%s24009_s2 + $0x368] sm:$0xff] }
 0x2a5   : > { %24050 = vst [vmem:[#allocation38_spill] sm:$0xff] %v18438_v36  ;;  %8816 = vperm.xlu1 %16881, %v477_v45   ;;  %v11906_v30 = vld [vmem:[%s24008_s1 + $0xa68] sm:$0xff] }
 0x2a6   : > { %14744 = vmatmul.mubr.msk.f32.gmra.mrb[74].mxu1 %vm1299_vm4, %v11904_v52  ;;  %v873_v45 = vld [vmem:[%s24008_s1 + $0x448] sm:$0xff]  ;;  %v11907_v52 = vld [vmem:[%s24008_s1 + $0xa70] sm:$0xff] }
 0x2a7   : > { %15228 = vmatmul.mubr.msk.f32.gmra.mrb[134].mxu0 %vm1299_vm4, %v871_v53  ;;  %14746 = vmatprep.mubr.msk.f32.mxu1 %vm1299_vm4, %v11905_v2  ;;  %v18455_v36 = vpop.permute.xlu0 %8501  ;;  %v874_v53 = vld [vmem:[%s24008_s1 + $0x450] sm:$0xff] }
 0x2a8   : > { %24051 = vst [vmem:[#allocation39_spill] sm:$0xff] %v18455_v36  ;;  %15230 = vmatprep.mubr.msk.f32.mxu0 %vm1299_vm4, %v872_v4  ;;  %v18464_v35 = vpop.permute.xlu1 %8416  ;;  %8821 = vperm.xlu0 %16882, %v478_v9   ;;  %v462_v2 = vld [vmem:[%s24009_s2 + $0x370] sm:$0xff]  ;;  %v479_v4 = vld [vmem:[%s24009_s2 + $0x3f8] sm:$0xff] }
 0x2a9   : > { %24052 = vst [vmem:[#allocation40_spill] sm:$0xff] %v18464_v35  ;;  %8736 = vperm.xlu1 %16881, %v461_v20   ;;  %v11908_v9 = vld [vmem:[%s24008_s1 + $0xa78] sm:$0xff]  ;;  %v525_v35 = vld [vmem:[%s24009_s2 + $0x568] sm:$0xff] }
 0x2aa   : > { %14747 = vmatmul.mubr.msk.f32.gmra.mrb[76].mxu1 %vm1299_vm4, %v11906_v30  ;;  %v875_v20 = vld [vmem:[%s24008_s1 + $0x458] sm:$0xff]  ;;  %v11909_v30 = vld [vmem:[%s24008_s1 + $0xa80] sm:$0xff] }
 0x2ab   : > { %15231 = vmatmul.mubr.msk.f32.gmra.mrb[136].mxu0 %vm1299_vm4, %v873_v45  ;;  %14749 = vmatprep.mubr.msk.f32.mxu1 %vm1299_vm4, %v11907_v52  ;;  %v18481_v36 = vpop.permute.xlu0 %8421  ;;  %v876_v45 = vld [vmem:[%s24008_s1 + $0x460] sm:$0xff] }
 0x2ac   : > { %24053 = vst [vmem:[#allocation41_spill] sm:$0xff] %v18481_v36  ;;  %15233 = vmatprep.mubr.msk.f32.mxu0 %vm1299_vm4, %v874_v53  ;;  %v18490_v38 = vpop.permute.xlu1 %8506  ;;  %8741 = vperm.xlu0 %16882, %v462_v2   ;;  %v496_v52 = vld [vmem:[%s24009_s2 + $0x480] sm:$0xff]  ;;  %v463_v53 = vld [vmem:[%s24009_s2 + $0x378] sm:$0xff]  ;;  %v11910_v2 = vld [vmem:[%s24008_s1 + $0xa88] sm:$0xff] }
 0x2ad   : > { %24054 = vst [vmem:[#allocation42_spill] sm:$0xff] %v18490_v38  ;;  %8826 = vperm.xlu1 %16881, %v479_v4   ;;  %v877_v4 = vld [vmem:[%s24008_s1 + $0x468] sm:$0xff] }
 0x2ae   : > { %14750 = vmatmul.mubr.msk.f32.gmra.mrb[78].mxu1 %vm1299_vm4, %v11908_v9  ;;  %v11911_v9 = vld [vmem:[%s24008_s1 + $0xa90] sm:$0xff] }
 0x2af   : > { %15234 = vmatmul.mubr.msk.f32.gmra.mrb[138].mxu0 %vm1299_vm4, %v875_v20  ;;  %14752 = vmatprep.mubr.msk.f32.mxu1 %vm1299_vm4, %v11909_v30  ;;  %v18507_v38 = vpop.permute.xlu0 %8591  ;;  %v878_v20 = vld [vmem:[%s24008_s1 + $0x470] sm:$0xff]  ;;  %v480_v30 = vld [vmem:[%s24009_s2 + $0x400] sm:$0xff] }
 0x2b0   : > { %24055 = vst [vmem:[#allocation43_spill] sm:$0xff] %v18507_v38  ;;  %15236 = vmatprep.mubr.msk.f32.mxu0 %vm1299_vm4, %v876_v45  ;;  %v18516_v21 = vpop.permute.xlu1 %8426  ;;  %8911 = vperm.xlu0 %16882, %v496_v52   ;;  %v497_v45 = vld [vmem:[%s24009_s2 + $0x488] sm:$0xff]  ;;  %v11912_v52 = vld [vmem:[%s24008_s1 + $0xa98] sm:$0xff] }
 0x2b1   : > { %24056 = vst [vmem:[#allocation44_spill] sm:$0xff] %v18516_v21  ;;  %8746 = vperm.xlu1 %16881, %v463_v53   ;;  %v879_v53 = vld [vmem:[%s24008_s1 + $0x478] sm:$0xff] }
 0x2b2   : > { %14753 = vmatmul.mubr.msk.f32.gmra.mrb[80].mxu1 %vm1299_vm4, %v11910_v2  ;;  %v11913_v2 = vld [vmem:[%s24008_s1 + $0xaa0] sm:$0xff] }
 0x2b3   : > { %15237 = vmatmul.mubr.msk.f32.gmra.mrb[140].mxu0 %vm1299_vm4, %v877_v4  ;;  %14755 = vmatprep.mubr.msk.f32.mxu1 %vm1299_vm4, %v11911_v9  ;;  %v18533_v38 = vpop.permute.xlu0 %8511  ;;  %v880_v4 = vld [vmem:[%s24008_s1 + $0x480] sm:$0xff]  ;;  %v498_v9 = vld [vmem:[%s24009_s2 + $0x490] sm:$0xff] }
 0x2b4   : > { %24057 = vst [vmem:[#allocation45_spill] sm:$0xff] %v18533_v38  ;;  %15239 = vmatprep.mubr.msk.f32.mxu0 %vm1299_vm4, %v878_v20  ;;  %v18542_v11 = vpop.permute.xlu1 %8596  ;;  %8831 = vperm.xlu0 %16882, %v480_v30   ;;  %v481_v20 = vld [vmem:[%s24009_s2 + $0x408] sm:$0xff] }
 0x2b5   : > { %24058 = vst [vmem:[#allocation46_spill] sm:$0xff] %v18542_v11  ;;  %8916 = vperm.xlu1 %16881, %v497_v45   ;;  %v11914_v30 = vld [vmem:[%s24008_s1 + $0xaa8] sm:$0xff] }
 0x2b6   : > { %14756 = vmatmul.mubr.msk.f32.gmra.mrb[82].mxu1 %vm1299_vm4, %v11912_v52  ;;  %v881_v45 = vld [vmem:[%s24008_s1 + $0x488] sm:$0xff]  ;;  %v11915_v52 = vld [vmem:[%s24008_s1 + $0xab0] sm:$0xff] }
 0x2b7   : > { %15240 = vmatmul.mubr.msk.f32.gmra.mrb[142].mxu0 %vm1299_vm4, %v879_v53  ;;  %14758 = vmatprep.mubr.msk.f32.mxu1 %vm1299_vm4, %v11913_v2  ;;  %v18559_v11 = vpop.permute.xlu0 %8601  ;;  %v882_v53 = vld [vmem:[%s24008_s1 + $0x490] sm:$0xff] }
 0x2b8   : > { %24059 = vst [vmem:[#allocation47_spill] sm:$0xff] %v18559_v11  ;;  %15242 = vmatprep.mubr.msk.f32.mxu0 %vm1299_vm4, %v880_v4  ;;  %v18568_v38 = vpop.permute.xlu1 %8516  ;;  %8921 = vperm.xlu0 %16882, %v498_v9   ;;  %v482_v2 = vld [vmem:[%s24009_s2 + $0x410] sm:$0xff]  ;;  %v499_v4 = vld [vmem:[%s24009_s2 + $0x498] sm:$0xff] }
 0x2b9   : > { %24060 = vst [vmem:[#allocation48_spill] sm:$0xff] %v18568_v38  ;;  %8836 = vperm.xlu1 %16881, %v481_v20   ;;  %v11916_v9 = vld [vmem:[%s24008_s1 + $0xab8] sm:$0xff] }
 0x2ba   : > { %14759 = vmatmul.mubr.msk.f32.gmra.mrb[84].mxu1 %vm1299_vm4, %v11914_v30  ;;  %v883_v20 = vld [vmem:[%s24008_s1 + $0x498] sm:$0xff]  ;;  %v11917_v30 = vld [vmem:[%s24008_s1 + $0xac0] sm:$0xff] }
 0x2bb   : > { %15243 = vmatmul.mubr.msk.f32.gmra.mrb[144].mxu0 %vm1299_vm4, %v881_v45  ;;  %14761 = vmatprep.mubr.msk.f32.mxu1 %vm1299_vm4, %v11915_v52  ;;  %v18585_v11 = vpop.permute.xlu0 %8521  ;;  %v884_v45 = vld [vmem:[%s24008_s1 + $0x4a0] sm:$0xff] }
 0x2bc   : > { %24061 = vst [vmem:[#allocation49_spill] sm:$0xff] %v18585_v11  ;;  %15245 = vmatprep.mubr.msk.f32.mxu0 %vm1299_vm4, %v882_v53  ;;  %v18594_v38 = vpop.permute.xlu1 %8606  ;;  %8841 = vperm.xlu0 %16882, %v482_v2   ;;  %v500_v52 = vld [vmem:[%s24009_s2 + $0x4a0] sm:$0xff]  ;;  %v483_v53 = vld [vmem:[%s24009_s2 + $0x418] sm:$0xff]  ;;  %v11918_v2 = vld [vmem:[%s24008_s1 + $0xac8] sm:$0xff] }
 0x2bd   : > { %24062 = vst [vmem:[#allocation50_spill] sm:$0xff] %v18594_v38  ;;  %8926 = vperm.xlu1 %16881, %v499_v4   ;;  %v885_v4 = vld [vmem:[%s24008_s1 + $0x4a8] sm:$0xff] }
 0x2be   : > { %14762 = vmatmul.mubr.msk.f32.gmra.mrb[86].mxu1 %vm1299_vm4, %v11916_v9  ;;  %v11919_v9 = vld [vmem:[%s24008_s1 + $0xad0] sm:$0xff] }
 0x2bf   : > { %15246 = vmatmul.mubr.msk.f32.gmra.mrb[146].mxu0 %vm1299_vm4, %v883_v20  ;;  %14764 = vmatprep.mubr.msk.f32.mxu1 %vm1299_vm4, %v11917_v30  ;;  %v18611_v38 = vpop.permute.xlu0 %8611  ;;  %v886_v20 = vld [vmem:[%s24008_s1 + $0x4b0] sm:$0xff]  ;;  %v484_v30 = vld [vmem:[%s24009_s2 + $0x420] sm:$0xff] }
 0x2c0   : > { %24063 = vst [vmem:[#allocation51_spill] sm:$0xff] %v18611_v38  ;;  %15248 = vmatprep.mubr.msk.f32.mxu0 %vm1299_vm4, %v884_v45  ;;  %v18620_v11 = vpop.permute.xlu1 %8526  ;;  %8931 = vperm.xlu0 %16882, %v500_v52   ;;  %v501_v45 = vld [vmem:[%s24009_s2 + $0x4a8] sm:$0xff]  ;;  %v11920_v52 = vld [vmem:[%s24008_s1 + $0xad8] sm:$0xff] }
 0x2c1   : > { %24064 = vst [vmem:[#allocation52_spill] sm:$0xff] %v18620_v11  ;;  %8846 = vperm.xlu1 %16881, %v483_v53   ;;  %v887_v53 = vld [vmem:[%s24008_s1 + $0x4b8] sm:$0xff] }
 0x2c2   : > { %14765 = vmatmul.mubr.msk.f32.gmra.mrb[88].mxu1 %vm1299_vm4, %v11918_v2  ;;  %v11921_v2 = vld [vmem:[%s24008_s1 + $0xae0] sm:$0xff] }
 0x2c3   : > { %15249 = vmatmul.mubr.msk.f32.gmra.mrb[148].mxu0 %vm1299_vm4, %v885_v4  ;;  %14767 = vmatprep.mubr.msk.f32.mxu1 %vm1299_vm4, %v11919_v9  ;;  %v18637_v38 = vpop.permute.xlu0 %8531  ;;  %v888_v4 = vld [vmem:[%s24008_s1 + $0x4c0] sm:$0xff]  ;;  %v502_v9 = vld [vmem:[%s24009_s2 + $0x4b0] sm:$0xff] }
 0x2c4   : > { %24065 = vst [vmem:[#allocation53_spill] sm:$0xff] %v18637_v38  ;;  %15251 = vmatprep.mubr.msk.f32.mxu0 %vm1299_vm4, %v886_v20  ;;  %v18646_v11 = vpop.permute.xlu1 %8616  ;;  %8851 = vperm.xlu0 %16882, %v484_v30   ;;  %v485_v20 = vld [vmem:[%s24009_s2 + $0x428] sm:$0xff] }
 0x2c5   : > { %24066 = vst [vmem:[#allocation54_spill] sm:$0xff] %v18646_v11  ;;  %8936 = vperm.xlu1 %16881, %v501_v45   ;;  %v11922_v30 = vld [vmem:[%s24008_s1 + $0xae8] sm:$0xff] }
 0x2c6   : > { %14768 = vmatmul.mubr.msk.f32.gmra.mrb[90].mxu1 %vm1299_vm4, %v11920_v52  ;;  %v889_v45 = vld [vmem:[%s24008_s1 + $0x4c8] sm:$0xff]  ;;  %v11923_v52 = vld [vmem:[%s24008_s1 + $0xaf0] sm:$0xff] }
 0x2c7   : > { %15252 = vmatmul.mubr.msk.f32.gmra.mrb[150].mxu0 %vm1299_vm4, %v887_v53  ;;  %14770 = vmatprep.mubr.msk.f32.mxu1 %vm1299_vm4, %v11921_v2  ;;  %v18663_v11 = vpop.permute.xlu0 %8621  ;;  %v890_v53 = vld [vmem:[%s24008_s1 + $0x4d0] sm:$0xff] }
 0x2c8   : > { %24067 = vst [vmem:[#allocation55_spill] sm:$0xff] %v18663_v11  ;;  %15254 = vmatprep.mubr.msk.f32.mxu0 %vm1299_vm4, %v888_v4  ;;  %v18672_v38 = vpop.permute.xlu1 %8536  ;;  %8941 = vperm.xlu0 %16882, %v502_v9   ;;  %v486_v2 = vld [vmem:[%s24009_s2 + $0x430] sm:$0xff]  ;;  %v503_v4 = vld [vmem:[%s24009_s2 + $0x4b8] sm:$0xff] }
 0x2c9   : > { %24068 = vst [vmem:[#allocation56_spill] sm:$0xff] %v18672_v38  ;;  %8856 = vperm.xlu1 %16881, %v485_v20   ;;  %v11924_v9 = vld [vmem:[%s24008_s1 + $0xaf8] sm:$0xff] }
 0x2ca   : > { %14771 = vmatmul.mubr.msk.f32.gmra.mrb[92].mxu1 %vm1299_vm4, %v11922_v30  ;;  %v891_v20 = vld [vmem:[%s24008_s1 + $0x4d8] sm:$0xff]  ;;  %v11925_v30 = vld [vmem:[%s24008_s1 + $0xb00] sm:$0xff] }
 0x2cb   : > { %15255 = vmatmul.mubr.msk.f32.gmra.mrb[152].mxu0 %vm1299_vm4, %v889_v45  ;;  %14773 = vmatprep.mubr.msk.f32.mxu1 %vm1299_vm4, %v11923_v52  ;;  %v18689_v11 = vpop.permute.xlu0 %8541  ;;  %v892_v45 = vld [vmem:[%s24008_s1 + $0x4e0] sm:$0xff] }
 0x2cc   : > { %24069 = vst [vmem:[#allocation57_spill] sm:$0xff] %v18689_v11  ;;  %15257 = vmatprep.mubr.msk.f32.mxu0 %vm1299_vm4, %v890_v53  ;;  %v18698_v38 = vpop.permute.xlu1 %8626  ;;  %8861 = vperm.xlu0 %16882, %v486_v2   ;;  %v504_v52 = vld [vmem:[%s24009_s2 + $0x4c0] sm:$0xff]  ;;  %v487_v53 = vld [vmem:[%s24009_s2 + $0x438] sm:$0xff]  ;;  %v11926_v2 = vld [vmem:[%s24008_s1 + $0xb08] sm:$0xff] }
 0x2cd   : > { %24070 = vst [vmem:[#allocation58_spill] sm:$0xff] %v18698_v38  ;;  %8946 = vperm.xlu1 %16881, %v503_v4   ;;  %v893_v4 = vld [vmem:[%s24008_s1 + $0x4e8] sm:$0xff] }
 0x2ce   : > { %14774 = vmatmul.mubr.msk.f32.gmra.mrb[94].mxu1 %vm1299_vm4, %v11924_v9  ;;  %v11927_v9 = vld [vmem:[%s24008_s1 + $0xb10] sm:$0xff] }
 0x2cf   : > { %15258 = vmatmul.mubr.msk.f32.gmra.mrb[154].mxu0 %vm1299_vm4, %v891_v20  ;;  %14776 = vmatprep.mubr.msk.f32.mxu1 %vm1299_vm4, %v11925_v30  ;;  %v18715_v38 = vpop.permute.xlu0 %8631  ;;  %v894_v20 = vld [vmem:[%s24008_s1 + $0x4f0] sm:$0xff]  ;;  %v488_v30 = vld [vmem:[%s24009_s2 + $0x440] sm:$0xff] }
 0x2d0   : > { %24071 = vst [vmem:[#allocation59_spill] sm:$0xff] %v18715_v38  ;;  %15260 = vmatprep.mubr.msk.f32.mxu0 %vm1299_vm4, %v892_v45  ;;  %v18724_v11 = vpop.permute.xlu1 %8546  ;;  %8951 = vperm.xlu0 %16882, %v504_v52   ;;  %v505_v45 = vld [vmem:[%s24009_s2 + $0x4c8] sm:$0xff]  ;;  %v11928_v52 = vld [vmem:[%s24008_s1 + $0xb18] sm:$0xff] }
 0x2d1   : > { %24072 = vst [vmem:[#allocation60_spill] sm:$0xff] %v18724_v11  ;;  %8866 = vperm.xlu1 %16881, %v487_v53   ;;  %v895_v53 = vld [vmem:[%s24008_s1 + $0x4f8] sm:$0xff] }
 0x2d2   : > { %14777 = vmatmul.mubr.msk.f32.gmra.mrb[96].mxu1 %vm1299_vm4, %v11926_v2  ;;  %v11929_v2 = vld [vmem:[%s24008_s1 + $0xb20] sm:$0xff] }
 0x2d3   : > { %15261 = vmatmul.mubr.msk.f32.gmra.mrb[156].mxu0 %vm1299_vm4, %v893_v4  ;;  %14779 = vmatprep.mubr.msk.f32.mxu1 %vm1299_vm4, %v11927_v9  ;;  %v18741_v38 = vpop.permute.xlu0 %8551  ;;  %v896_v4 = vld [vmem:[%s24008_s1 + $0x500] sm:$0xff]  ;;  %v506_v9 = vld [vmem:[%s24009_s2 + $0x4d0] sm:$0xff] }
 0x2d4   : > { %24073 = vst [vmem:[#allocation61_spill] sm:$0xff] %v18741_v38  ;;  %15263 = vmatprep.mubr.msk.f32.mxu0 %vm1299_vm4, %v894_v20  ;;  %v18750_v11 = vpop.permute.xlu1 %8636  ;;  %8871 = vperm.xlu0 %16882, %v488_v30   ;;  %v489_v20 = vld [vmem:[%s24009_s2 + $0x448] sm:$0xff] }
 0x2d5   : > { %24074 = vst [vmem:[#allocation62_spill] sm:$0xff] %v18750_v11  ;;  %8956 = vperm.xlu1 %16881, %v505_v45   ;;  %v11930_v30 = vld [vmem:[%s24008_s1 + $0xb28] sm:$0xff] }
 0x2d6   : > { %14780 = vmatmul.mubr.msk.f32.gmra.mrb[98].mxu1 %vm1299_vm4, %v11928_v52  ;;  %v897_v45 = vld [vmem:[%s24008_s1 + $0x508] sm:$0xff]  ;;  %v11931_v52 = vld [vmem:[%s24008_s1 + $0xb30] sm:$0xff] }
 0x2d7   : > { %15264 = vmatmul.mubr.msk.f32.gmra.mrb[158].mxu0 %vm1299_vm4, %v895_v53  ;;  %14782 = vmatprep.mubr.msk.f32.mxu1 %vm1299_vm4, %v11929_v2  ;;  %v18767_v11 = vpop.permute.xlu0 %8641  ;;  %v898_v53 = vld [vmem:[%s24008_s1 + $0x510] sm:$0xff] }
 0x2d8   : > { %24075 = vst [vmem:[#allocation63_spill] sm:$0xff] %v18767_v11  ;;  %15266 = vmatprep.mubr.msk.f32.mxu0 %vm1299_vm4, %v896_v4  ;;  %v18776_v38 = vpop.permute.xlu1 %8556  ;;  %8961 = vperm.xlu0 %16882, %v506_v9   ;;  %v490_v2 = vld [vmem:[%s24009_s2 + $0x450] sm:$0xff]  ;;  %v507_v4 = vld [vmem:[%s24009_s2 + $0x4d8] sm:$0xff] }
 0x2d9   : > { %24076 = vst [vmem:[#allocation64_spill] sm:$0xff] %v18776_v38  ;;  %8876 = vperm.xlu1 %16881, %v489_v20   ;;  %v11932_v9 = vld [vmem:[%s24008_s1 + $0xb38] sm:$0xff] }
 0x2da   : > { %14783 = vmatmul.mubr.msk.f32.gmra.mrb[100].mxu1 %vm1299_vm4, %v11930_v30  ;;  %v899_v20 = vld [vmem:[%s24008_s1 + $0x518] sm:$0xff]  ;;  %v11933_v30 = vld [vmem:[%s24008_s1 + $0xb40] sm:$0xff] }
 0x2db   : > { %15267 = vmatmul.mubr.msk.f32.gmra.mrb[160].mxu0 %vm1299_vm4, %v897_v45  ;;  %14785 = vmatprep.mubr.msk.f32.mxu1 %vm1299_vm4, %v11931_v52  ;;  %v18793_v11 = vpop.permute.xlu0 %8561  ;;  %v900_v45 = vld [vmem:[%s24008_s1 + $0x520] sm:$0xff] }
 0x2dc   : > { %24077 = vst [vmem:[#allocation65_spill] sm:$0xff] %v18793_v11  ;;  %15269 = vmatprep.mubr.msk.f32.mxu0 %vm1299_vm4, %v898_v53  ;;  %v18802_v38 = vpop.permute.xlu1 %8646  ;;  %8881 = vperm.xlu0 %16882, %v490_v2   ;;  %v508_v52 = vld [vmem:[%s24009_s2 + $0x4e0] sm:$0xff]  ;;  %v491_v53 = vld [vmem:[%s24009_s2 + $0x458] sm:$0xff]  ;;  %v11934_v2 = vld [vmem:[%s24008_s1 + $0xb48] sm:$0xff] }
 0x2dd   : > { %24078 = vst [vmem:[#allocation66_spill] sm:$0xff] %v18802_v38  ;;  %8966 = vperm.xlu1 %16881, %v507_v4   ;;  %v901_v4 = vld [vmem:[%s24008_s1 + $0x528] sm:$0xff] }
 0x2de   : > { %14786 = vmatmul.mubr.msk.f32.gmra.mrb[102].mxu1 %vm1299_vm4, %v11932_v9  ;;  %v11935_v9 = vld [vmem:[%s24008_s1 + $0xb50] sm:$0xff] }
 0x2df   : > { %15270 = vmatmul.mubr.msk.f32.gmra.mrb[162].mxu0 %vm1299_vm4, %v899_v20  ;;  %14788 = vmatprep.mubr.msk.f32.mxu1 %vm1299_vm4, %v11933_v30  ;;  %v18828_v11 = vpop.permute.xlu0 %8651  ;;  %v902_v20 = vld [vmem:[%s24008_s1 + $0x530] sm:$0xff]  ;;  %v492_v30 = vld [vmem:[%s24009_s2 + $0x460] sm:$0xff] }
 0x2e0   : > { %15272 = vmatprep.mubr.msk.f32.mxu0 %vm1299_vm4, %v900_v45  ;;  %v18826_v38 = vpop.permute.xlu1 %8566  ;;  %24080 = vst [vmem:[#allocation68_spill] sm:$0xff] %v18828_v11  ;;  %8971 = vperm.xlu0 %16882, %v508_v52   ;;  %v509_v45 = vld [vmem:[%s24009_s2 + $0x4e8] sm:$0xff]  ;;  %v11936_v52 = vld [vmem:[%s24008_s1 + $0xb58] sm:$0xff] }
 0x2e1   : > { %24079 = vst [vmem:[#allocation67_spill] sm:$0xff] %v18826_v38  ;;  %8886 = vperm.xlu1 %16881, %v491_v53   ;;  %v903_v53 = vld [vmem:[%s24008_s1 + $0x538] sm:$0xff]  ;;  %v493_v11 = vld [vmem:[%s24009_s2 + $0x468] sm:$0xff] }
 0x2e2   : > { %14789 = vmatmul.mubr.msk.f32.gmra.mrb[104].mxu1 %vm1299_vm4, %v11934_v2  ;;  %v11937_v2 = vld [vmem:[%s24008_s1 + $0xb60] sm:$0xff] }
 0x2e3   : > { %15273 = vmatmul.mubr.msk.f32.gmra.mrb[164].mxu0 %vm1299_vm4, %v901_v4  ;;  %14791 = vmatprep.mubr.msk.f32.mxu1 %vm1299_vm4, %v11935_v9  ;;  %v904_v4 = vld [vmem:[%s24008_s1 + $0x540] sm:$0xff]  ;;  %v18864_v38 = vpop.permute.xlu0 %8571 }
 0x2e4   : > { %15275 = vmatprep.mubr.msk.f32.mxu0 %vm1299_vm4, %v902_v20  ;;  %8891 = vperm.xlu0 %16882, %v492_v30   ;;  %v18855_v9 = vpop.permute.xlu1 %8656  ;;  %v510_v20 = vld [vmem:[%s24009_s2 + $0x4f0] sm:$0xff]  ;;  %24082 = vst [vmem:[#allocation70_spill] sm:$0xff] %v18864_v38  ;;  %v11938_v30 = vld [vmem:[%s24008_s1 + $0xb68] sm:$0xff] }
 0x2e5   : > { %24081 = vst [vmem:[#allocation69_spill] sm:$0xff] %v18855_v9  ;;  %8976 = vperm.xlu1 %16881, %v509_v45   ;;  %v905_v45 = vld [vmem:[%s24008_s1 + $0x548] sm:$0xff] }
 0x2e6   : > { %14792 = vmatmul.mubr.msk.f32.gmra.mrb[106].mxu1 %vm1299_vm4, %v11936_v52  ;;  %v11939_v52 = vld [vmem:[%s24008_s1 + $0xb70] sm:$0xff] }
 0x2e7   : > { %15276 = vmatmul.mubr.msk.f32.gmra.mrb[166].mxu0 %vm1299_vm4, %v903_v53  ;;  %14794 = vmatprep.mubr.msk.f32.mxu1 %vm1299_vm4, %v11937_v2  ;;  %v906_v53 = vld [vmem:[%s24008_s1 + $0x550] sm:$0xff]  ;;  %v18902_v38 = vpop.permute.xlu0 %8661 }
 0x2e8   : > { %15278 = vmatprep.mubr.msk.f32.mxu0 %vm1299_vm4, %v904_v4  ;;  %8981 = vperm.xlu0 %16882, %v510_v20   ;;  %v494_v2 = vld [vmem:[%s24009_s2 + $0x470] sm:$0xff]  ;;  %v511_v4 = vld [vmem:[%s24009_s2 + $0x4f8] sm:$0xff]  ;;  %v18893_v9 = vpop.permute.xlu1 %8576  ;;  %24084 = vst [vmem:[#allocation72_spill] sm:$0xff] %v18902_v38  ;;  %v529_v38 = vld [vmem:[%s24009_s2 + $0x588] sm:$0xff] }
 0x2e9   : > { %8896 = vperm.xlu1 %16881, %v493_v11   ;;  %v11940_v20 = vld [vmem:[%s24008_s1 + $0xb78] sm:$0xff]  ;;  %24083 = vst [vmem:[#allocation71_spill] sm:$0xff] %v18893_v9 }
 0x2ea   : > { %14795 = vmatmul.mubr.msk.f32.gmra.mrb[108].mxu1 %vm1299_vm4, %v11938_v30  ;;  %v907_v11 = vld [vmem:[%s24008_s1 + $0x558] sm:$0xff]  ;;  %v11941_v30 = vld [vmem:[%s24008_s1 + $0xb80] sm:$0xff] }
 0x2eb   : > { %15279 = vmatmul.mubr.msk.f32.gmra.mrb[168].mxu0 %vm1299_vm4, %v905_v45  ;;  %14797 = vmatprep.mubr.msk.f32.mxu1 %vm1299_vm4, %v11939_v52  ;;  %v908_v45 = vld [vmem:[%s24008_s1 + $0x560] sm:$0xff]  ;;  %v18938_v9 = vpop.permute.xlu0 %8581 }
 0x2ec   : > { %15281 = vmatprep.mubr.msk.f32.mxu0 %vm1299_vm4, %v906_v53  ;;  %8901 = vperm.xlu0 %16882, %v494_v2   ;;  %v528_v52 = vld [vmem:[%s24009_s2 + $0x580] sm:$0xff]  ;;  %v495_v53 = vld [vmem:[%s24009_s2 + $0x478] sm:$0xff]  ;;  %v11942_v2 = vld [vmem:[%s24008_s1 + $0xb88] sm:$0xff]  ;;  %24086 = vst [vmem:[#allocation74_spill] sm:$0xff] %v18938_v9 }
 0x2ed   : > { %8986 = vperm.xlu1 %16881, %v511_v4   ;;  %v909_v4 = vld [vmem:[%s24008_s1 + $0x568] sm:$0xff] }
 0x2ee   : > { %14798 = vmatmul.mubr.msk.f32.gmra.mrb[110].mxu1 %vm1299_vm4, %v11940_v20  ;;  %v11943_v20 = vld [vmem:[%s24008_s1 + $0xb90] sm:$0xff] }
 0x2ef   : > { %15282 = vmatmul.mubr.msk.f32.gmra.mrb[170].mxu0 %vm1299_vm4, %v907_v11  ;;  %14800 = vmatprep.mubr.msk.f32.mxu1 %vm1299_vm4, %v11941_v30  ;;  %v910_v11 = vld [vmem:[%s24008_s1 + $0x570] sm:$0xff]  ;;  %v18929_v30 = vpop.permute.xlu1 %8666  ;;  %v18976_v9 = vpop.permute.xlu0 %8751 }
 0x2f0   : > { %15284 = vmatprep.mubr.msk.f32.mxu0 %vm1299_vm4, %v908_v45  ;;  %9071 = vperm.xlu0 %16882, %v528_v52   ;;  %24085 = vst [vmem:[#allocation73_spill] sm:$0xff] %v18929_v30  ;;  %v512_v45 = vld [vmem:[%s24009_s2 + $0x500] sm:$0xff]  ;;  %v11944_v52 = vld [vmem:[%s24008_s1 + $0xb98] sm:$0xff]  ;;  %24088 = vst [vmem:[#allocation76_spill] sm:$0xff] %v18976_v9 }
 0x2f1   : > { %8906 = vperm.xlu1 %16881, %v495_v53   ;;  %v911_v53 = vld [vmem:[%s24008_s1 + $0x578] sm:$0xff] }
 0x2f2   : > { %14801 = vmatmul.mubr.msk.f32.gmra.mrb[112].mxu1 %vm1299_vm4, %v11942_v2  ;;  %v11945_v2 = vld [vmem:[%s24008_s1 + $0xba0] sm:$0xff] }
 0x2f3   : > { %15285 = vmatmul.mubr.msk.f32.gmra.mrb[172].mxu0 %vm1299_vm4, %v909_v4  ;;  %14803 = vmatprep.mubr.msk.f32.mxu1 %vm1299_vm4, %v11943_v20  ;;  %v912_v4 = vld [vmem:[%s24008_s1 + $0x580] sm:$0xff]  ;;  %v530_v20 = vld [vmem:[%s24009_s2 + $0x590] sm:$0xff]  ;;  %v18967_v30 = vpop.permute.xlu1 %8586  ;;  %v19009_v9 = vpop.permute.xlu0 %8671 }
 0x2f4   : > { %15287 = vmatprep.mubr.msk.f32.mxu0 %vm1299_vm4, %v910_v11  ;;  %8991 = vperm.xlu0 %16882, %v512_v45   ;;  %v513_v11 = vld [vmem:[%s24009_s2 + $0x508] sm:$0xff]  ;;  %24087 = vst [vmem:[#allocation75_spill] sm:$0xff] %v18967_v30  ;;  %24090 = vst [vmem:[#allocation78_spill] sm:$0xff] %v19009_v9  ;;  %v515_v30 = vld [vmem:[%s24009_s2 + $0x518] sm:$0xff] }
 0x2f5   : > { %9076 = vperm.xlu1 %16881, %v529_v38   ;;  %v11946_v45 = vld [vmem:[%s24008_s1 + $0xba8] sm:$0xff] }
 0x2f6   : > { %14804 = vmatmul.mubr.msk.f32.gmra.mrb[114].mxu1 %vm1299_vm4, %v11944_v52  ;;  %v913_v38 = vld [vmem:[%s24008_s1 + $0x588] sm:$0xff]  ;;  %v11947_v52 = vld [vmem:[%s24008_s1 + $0xbb0] sm:$0xff] }
 0x2f7   : > { %15288 = vmatmul.mubr.msk.f32.gmra.mrb[174].mxu0 %vm1299_vm4, %v911_v53  ;;  %14806 = vmatprep.mubr.msk.f32.mxu1 %vm1299_vm4, %v11945_v2  ;;  %v914_v53 = vld [vmem:[%s24008_s1 + $0x590] sm:$0xff]  ;;  %v19050_v9 = vpop.permute.xlu0 %8761 }
 0x2f8   : > { %15290 = vmatprep.mubr.msk.f32.mxu0 %vm1299_vm4, %v912_v4  ;;  %9081 = vperm.xlu0 %16882, %v530_v20   ;;  %v514_v2 = vld [vmem:[%s24009_s2 + $0x510] sm:$0xff]  ;;  %v531_v4 = vld [vmem:[%s24009_s2 + $0x598] sm:$0xff]  ;;  %24092 = vst [vmem:[#allocation80_spill] sm:$0xff] %v19050_v9 }
 0x2f9   : > { %8996 = vperm.xlu1 %16881, %v513_v11   ;;  %v11948_v20 = vld [vmem:[%s24008_s1 + $0xbb8] sm:$0xff] }
 0x2fa   : > { %14807 = vmatmul.mubr.msk.f32.gmra.mrb[116].mxu1 %vm1299_vm4, %v11946_v45  ;;  %v915_v11 = vld [vmem:[%s24008_s1 + $0x598] sm:$0xff]  ;;  %v11949_v45 = vld [vmem:[%s24008_s1 + $0xbc0] sm:$0xff] }
 0x2fb   : > { %15291 = vmatmul.mubr.msk.f32.gmra.mrb[176].mxu0 %vm1299_vm4, %v913_v38  ;;  %14809 = vmatprep.mubr.msk.f32.mxu1 %vm1299_vm4, %v11947_v52  ;;  %v916_v38 = vld [vmem:[%s24008_s1 + $0x5a0] sm:$0xff]  ;;  %v19003_v52 = vpop.permute.xlu1 %8756  ;;  %v19083_v9 = vpop.permute.xlu0 %8681 }
 0x2fc   : > { %15293 = vmatprep.mubr.msk.f32.mxu0 %vm1299_vm4, %v914_v53  ;;  %9001 = vperm.xlu0 %16882, %v514_v2   ;;  %24089 = vst [vmem:[#allocation77_spill] sm:$0xff] %v19003_v52  ;;  %v532_v53 = vld [vmem:[%s24009_s2 + $0x5a0] sm:$0xff]  ;;  %v11950_v2 = vld [vmem:[%s24008_s1 + $0xbc8] sm:$0xff]  ;;  %24094 = vst [vmem:[#allocation82_spill] sm:$0xff] %v19083_v9 }
 0x2fd   : > { %9086 = vperm.xlu1 %16881, %v531_v4   ;;  %v917_v4 = vld [vmem:[%s24008_s1 + $0x5a8] sm:$0xff] }
 0x2fe   : > { %14810 = vmatmul.mubr.msk.f32.gmra.mrb[118].mxu1 %vm1299_vm4, %v11948_v20  ;;  %v11951_v20 = vld [vmem:[%s24008_s1 + $0xbd0] sm:$0xff] }
 0x2ff   : > { %15294 = vmatmul.mubr.msk.f32.gmra.mrb[178].mxu0 %vm1299_vm4, %v915_v11  ;;  %14812 = vmatprep.mubr.msk.f32.mxu1 %vm1299_vm4, %v11949_v45  ;;  %v918_v11 = vld [vmem:[%s24008_s1 + $0x5b0] sm:$0xff]  ;;  %v516_v45 = vld [vmem:[%s24009_s2 + $0x520] sm:$0xff]  ;;  %v19041_v52 = vpop.permute.xlu1 %8676  ;;  %v19124_v9 = vpop.permute.xlu0 %8771 }
 0x300   : > { %15296 = vmatprep.mubr.msk.f32.mxu0 %vm1299_vm4, %v916_v38  ;;  %9091 = vperm.xlu0 %16882, %v532_v53   ;;  %v533_v38 = vld [vmem:[%s24009_s2 + $0x5a8] sm:$0xff]  ;;  %v11952_v53 = vld [vmem:[%s24008_s1 + $0xbd8] sm:$0xff]  ;;  %24091 = vst [vmem:[#allocation79_spill] sm:$0xff] %v19041_v52  ;;  %24096 = vst [vmem:[#allocation84_spill] sm:$0xff] %v19124_v9 }
 0x301   : > { %9006 = vperm.xlu1 %16881, %v515_v30   ;;  %v919_v30 = vld [vmem:[%s24008_s1 + $0x5b8] sm:$0xff]  ;;  %v537_v9 = vld [vmem:[%s24009_s2 + $0x5c8] sm:$0xff] }
 0x302   : > { %14813 = vmatmul.mubr.msk.f32.gmra.mrb[120].mxu1 %vm1299_vm4, %v11950_v2  ;;  %v11953_v2 = vld [vmem:[%s24008_s1 + $0xbe0] sm:$0xff]  ;;  %v535_v52 = vld [vmem:[%s24009_s2 + $0x5b8] sm:$0xff] }
 0x303   : > { %15297 = vmatmul.mubr.msk.f32.gmra.mrb[180].mxu0 %vm1299_vm4, %v917_v4  ;;  %14815 = vmatprep.mubr.msk.f32.mxu1 %vm1299_vm4, %v11951_v20  ;;  %v920_v4 = vld [vmem:[%s24008_s1 + $0x5c0] sm:$0xff]  ;;  %v534_v20 = vld [vmem:[%s24009_s2 + $0x5b0] sm:$0xff]  ;;  %v19165_v10 = vpop.permute.xlu0 %8691 }
 0x304   : > { %15299 = vmatprep.mubr.msk.f32.mxu0 %vm1299_vm4, %v918_v11  ;;  %9011 = vperm.xlu0 %16882, %v516_v45   ;;  %v517_v11 = vld [vmem:[%s24009_s2 + $0x528] sm:$0xff]  ;;  %24098 = vst [vmem:[#allocation86_spill] sm:$0xff] %v19165_v10 }
 0x305   : > { %9096 = vperm.xlu1 %16881, %v533_v38   ;;  %v11954_v45 = vld [vmem:[%s24008_s1 + $0xbe8] sm:$0xff] }
 0x306   : > { %14816 = vmatmul.mubr.msk.f32.gmra.mrb[122].mxu1 %vm1299_vm4, %v11952_v53  ;;  %v921_v38 = vld [vmem:[%s24008_s1 + $0x5c8] sm:$0xff]  ;;  %v11955_v53 = vld [vmem:[%s24008_s1 + $0xbf0] sm:$0xff] }
 0x307   : > { %15300 = vmatmul.mubr.msk.f32.gmra.mrb[182].mxu0 %vm1299_vm4, %v919_v30  ;;  %14818 = vmatprep.mubr.msk.f32.mxu1 %vm1299_vm4, %v11953_v2  ;;  %v922_v30 = vld [vmem:[%s24008_s1 + $0x5d0] sm:$0xff]  ;;  %v19077_v2 = vpop.permute.xlu1 %8766  ;;  %v19210_v17 = vpop.permute.xlu0 %8781 }
 0x308   : > { %15302 = vmatprep.mubr.msk.f32.mxu0 %vm1299_vm4, %v920_v4  ;;  %9101 = vperm.xlu0 %16882, %v534_v20   ;;  %24093 = vst [vmem:[#allocation81_spill] sm:$0xff] %v19077_v2  ;;  %v518_v4 = vld [vmem:[%s24009_s2 + $0x530] sm:$0xff]  ;;  %v11956_v20 = vld [vmem:[%s24008_s1 + $0xbf8] sm:$0xff]  ;;  %24100 = vst [vmem:[#allocation88_spill] sm:$0xff] %v19210_v17 }
 0x309   : > { %9016 = vperm.xlu1 %16881, %v517_v11   ;;  %v923_v11 = vld [vmem:[%s24008_s1 + $0x5d8] sm:$0xff] }
 0x30a   : > { %14819 = vmatmul.mubr.msk.f32.gmra.mrb[124].mxu1 %vm1299_vm4, %v11954_v45  ;;  %v11957_v45 = vld [vmem:[%s24008_s1 + $0xc00] sm:$0xff]  ;;  %v523_v17 = vld [vmem:[%s24009_s2 + $0x558] sm:$0xff] }
 0x30b   : > { %15303 = vmatmul.mubr.msk.f32.gmra.mrb[184].mxu0 %vm1299_vm4, %v921_v38  ;;  %14821 = vmatprep.mubr.msk.f32.mxu1 %vm1299_vm4, %v11955_v53  ;;  %v924_v38 = vld [vmem:[%s24008_s1 + $0x5e0] sm:$0xff]  ;;  %v19115_v2 = vpop.permute.xlu1 %8686  ;;  %v19251_v31 = vpop.permute.xlu0 %8701 }
 0x30c   : > { %15305 = vmatprep.mubr.msk.f32.mxu0 %vm1299_vm4, %v922_v30  ;;  %9021 = vperm.xlu0 %16882, %v518_v4   ;;  %v536_v53 = vld [vmem:[%s24009_s2 + $0x5c0] sm:$0xff]  ;;  %v519_v30 = vld [vmem:[%s24009_s2 + $0x538] sm:$0xff]  ;;  %v11958_v4 = vld [vmem:[%s24008_s1 + $0xc08] sm:$0xff]  ;;  %24095 = vst [vmem:[#allocation83_spill] sm:$0xff] %v19115_v2 }
 0x30d   : > { %9106 = vperm.xlu1 %16881, %v535_v52   ;;  %v925_v52 = vld [vmem:[%s24008_s1 + $0x5e8] sm:$0xff]  ;;  %24102 = vst [vmem:[#allocation90_spill] sm:$0xff] %v19251_v31 }
 0x30e   : > { %14822 = vmatmul.mubr.msk.f32.gmra.mrb[126].mxu1 %vm1299_vm4, %v11956_v20  ;;  %v11959_v20 = vld [vmem:[%s24008_s1 + $0xc10] sm:$0xff] }
 0x30f   : > { %15306 = vmatmul.mubr.msk.f32.gmra.mrb[186].mxu0 %vm1299_vm4, %v923_v11  ;;  %14824 = vmatprep.mubr.msk.f32.mxu1 %vm1299_vm4, %v11957_v45  ;;  %v19126_v11 = vpop.f32.mrb[0].mxu1  ;;  %v926_v45 = vld [vmem:[%s24008_s1 + $0x5f0] sm:$0xff]  ;;  %v19296_v16 = vpop.permute.xlu0 %8791 }
 0x310   : > { %15308 = vmatprep.mubr.msk.f32.mxu0 %vm1299_vm4, %v924_v38  ;;  %9111 = vperm.xlu0 %16882, %v536_v53   ;;  %v520_v38 = vld [vmem:[%s24009_s2 + $0x540] sm:$0xff]  ;;  %v19134_v2 = vpop.f32.mrb[1].mxu1  ;;  %v11960_v53 = vld [vmem:[%s24008_s1 + $0xc18] sm:$0xff]  ;;  %24104 = vst [vmem:[#allocation92_spill] sm:$0xff] %v19296_v16 }
 0x311   : > { %9026 = vperm.xlu1 %16881, %v519_v30   ;;  %v927_v30 = vld [vmem:[%s24008_s1 + $0x5f8] sm:$0xff]  ;;  %v19152_v49 = vpop.f32.mrb[2].mxu1 }
 0x312   : > { %14825 = vmatmul.mubr.msk.f32.gmra.mrb[128].mxu1 %vm1299_vm4, %v11958_v4  ;;  %v11961_v4 = vld [vmem:[%s24008_s1 + $0xc20] sm:$0xff]  ;;  %v19162_v15 = vpop.f32.mrb[3].mxu1  ;;  %v543_v16 = vld [vmem:[%s24009_s2 + $0x5f8] sm:$0xff] }
 0x313   : > { %15309 = vmatmul.mubr.msk.f32.gmra.mrb[188].mxu0 %vm1299_vm4, %v925_v52  ;;  %14827 = vmatprep.mubr.msk.f32.mxu1 %vm1299_vm4, %v11959_v20  ;;  %v928_v52 = vld [vmem:[%s24008_s1 + $0x600] sm:$0xff]  ;;  %v19157_v20 = vpop.permute.xlu1 %8776  ;;  %v19182_v10 = vpop.f32.mrb[4].mxu1 }
 0x314   : > { %15311 = vmatprep.mubr.msk.f32.mxu0 %vm1299_vm4, %v926_v45  ;;  %9031 = vperm.xlu0 %16882, %v520_v38   ;;  %24097 = vst [vmem:[#allocation85_spill] sm:$0xff] %v19157_v20  ;;  %v538_v45 = vld [vmem:[%s24009_s2 + $0x5d0] sm:$0xff]  ;;  %v521_v38 = vld [vmem:[%s24009_s2 + $0x548] sm:$0xff]  ;;  %v19337_v59 = vpop.permute.xlu0 %8711 }
 0x315   : > { %9116 = vperm.xlu1 %16881, %v537_v9   ;;  %v11962_v9 = vld [vmem:[%s24008_s1 + $0xc28] sm:$0xff]  ;;  %v11963_v20 = vld [vmem:[%s24008_s1 + $0xc30] sm:$0xff]  ;;  %24106 = vst [vmem:[#allocation94_spill] sm:$0xff] %v19337_v59 }
 0x316   : > { %14828 = vmatmul.mubr.msk.f32.gmra.mrb[130].mxu1 %vm1299_vm4, %v11960_v53  ;;  %v929_v53 = vld [vmem:[%s24008_s1 + $0x608] sm:$0xff] }
 0x317   : > { %15312 = vmatmul.mubr.msk.f32.gmra.mrb[190].mxu0 %vm1299_vm4, %v927_v30  ;;  %14830 = vmatprep.mubr.msk.f32.mxu1 %vm1299_vm4, %v11961_v4  ;;  %v930_v30 = vld [vmem:[%s24008_s1 + $0x610] sm:$0xff] }
 0x318   : > { %15314 = vmatprep.mubr.msk.f32.mxu0 %vm1299_vm4, %v928_v52  ;;  %9121 = vperm.xlu0 %16882, %v538_v45   ;;  %v522_v4 = vld [vmem:[%s24009_s2 + $0x550] sm:$0xff]  ;;  %v19190_v52 = vpop.f32.mrb[5].mxu1  ;;  %v11964_v45 = vld [vmem:[%s24008_s1 + $0xc38] sm:$0xff]  ;;  %v19382_v41 = vpop.permute.xlu0 %8801 }
 0x319   : > { %9036 = vperm.xlu1 %16881, %v521_v38   ;;  %v19201_v38 = vpop.permute.xlu1 %8696  ;;  %24108 = vst [vmem:[#allocation96_spill] sm:$0xff] %v19382_v41  ;;  %v545_v41 = vld [vmem:[%s24009_s2 + $0x608] sm:$0xff] }
 0x31a   : > { %14831 = vmatmul.mubr.msk.f32.gmra.mrb[132].mxu1 %vm1299_vm4, %v11962_v9  ;;  %24099 = vst [vmem:[#allocation87_spill] sm:$0xff] %v19201_v38  ;;  %v931_v9 = vld [vmem:[%s24008_s1 + $0x618] sm:$0xff] }
 0x31b   : > { %15315 = vmatmul.mubr.msk.f32.gmra.mrb[192].mxu0 %vm1299_vm4, %v929_v53  ;;  %14833 = vmatprep.mubr.msk.f32.mxu1 %vm1299_vm4, %v11963_v20  ;;  %v19212_v20 = vpop.f32.mrb[6].mxu1  ;;  %v932_v53 = vld [vmem:[%s24008_s1 + $0x620] sm:$0xff] }
 0x31c   : > { %15317 = vmatprep.mubr.msk.f32.mxu0 %vm1299_vm4, %v930_v30  ;;  %9041 = vperm.xlu0 %16882, %v522_v4   ;;  %v540_v30 = vld [vmem:[%s24009_s2 + $0x5e0] sm:$0xff]  ;;  %v19220_v38 = vpop.f32.mrb[7].mxu1  ;;  %v933_v4 = vld [vmem:[%s24008_s1 + $0x628] sm:$0xff]  ;;  %v19423_v61 = vpop.permute.xlu0 %8721 }
 0x31d   : > { %9126 = vperm.xlu1 %16881, %v539_v43   ;;  %v11966_v43 = vld [vmem:[%s24008_s1 + $0xc48] sm:$0xff]  ;;  %v19238_v36 = vpop.f32.mrb[8].mxu1  ;;  %24110 = vst [vmem:[#allocation98_spill] sm:$0xff] %v19423_v61 }
 0x31e   : > { %14834 = vmatmul.mubr.msk.f32.gmra.mrb[134].mxu1 %vm1299_vm4, %v11964_v45  ;;  %v11967_v45 = vld [vmem:[%s24008_s1 + $0xc50] sm:$0xff]  ;;  %v19248_v21 = vpop.f32.mrb[9].mxu1 }
 0x31f   : > { %15318 = vmatmul.mubr.msk.f32.gmra.mrb[194].mxu0 %vm1299_vm4, %v931_v9  ;;  %14836 = vmatprep.mubr.msk.f32.mxu1 %vm1299_vm4, %v11965_v46  ;;  %v12599_v46 = vld [vmem:[%s24008_s1 + $0x1000] sm:$0xff]  ;;  %v19243_v9 = vpop.permute.xlu1 %8786  ;;  %v19268_v31 = vpop.f32.mrb[10].mxu1 }
 0x320   : > { %15320 = vmatprep.mubr.msk.f32.mxu0 %vm1299_vm4, %v932_v53  ;;  %9131 = vperm.xlu0 %16882, %v540_v30   ;;  %24101 = vst [vmem:[#allocation89_spill] sm:$0xff] %v19243_v9  ;;  %v524_v53 = vld [vmem:[%s24009_s2 + $0x560] sm:$0xff]  ;;  %v541_v30 = vld [vmem:[%s24009_s2 + $0x5e8] sm:$0xff]  ;;  %v19468_v44 = vpop.permute.xlu0 %8811 }
 0x321   : > { %9046 = vperm.xlu1 %16881, %v523_v17   ;;  %v11968_v17 = vld [vmem:[%s24008_s1 + $0xc58] sm:$0xff]  ;;  %v11969_v9 = vld [vmem:[%s24008_s1 + $0xc60] sm:$0xff]  ;;  %24112 = vst [vmem:[#allocation100_spill] sm:$0xff] %v19468_v44  ;;  %v565_v44 = vld [vmem:[%s24009_s2 + $0x6a8] sm:$0xff] }
 0x322   : > { %14837 = vmatmul.mubr.msk.f32.gmra.mrb[136].mxu1 %vm1299_vm4, %v11966_v43  ;;  %v12600_v43 = vld [vmem:[%s24008_s1 + $0x1008] sm:$0xff] }
 0x323   : > { %15321 = vmatmul.mubr.msk.f32.gmra.mrb[196].mxu0 %vm1299_vm4, %v933_v4  ;;  %14839 = vmatprep.mubr.msk.f32.mxu1 %vm1299_vm4, %v11967_v45  ;;  %v12601_v4 = vld [vmem:[%s24008_s1 + $0x1010] sm:$0xff] }
 0x324   : > { %15420 = vmatprep.mubr.msk.f32.mxu0 %vm1299_vm4, %v12599_v46  ;;  %9051 = vperm.xlu0 %16882, %v524_v53   ;;  %v542_v45 = vld [vmem:[%s24009_s2 + $0x5f0] sm:$0xff]  ;;  %v19276_v46 = vpop.f32.mrb[11].mxu1  ;;  %v11970_v53 = vld [vmem:[%s24008_s1 + $0xc68] sm:$0xff]  ;;  %v19509_v39 = vpop.permute.xlu0 %8731 }
 0x325   : > { %9136 = vperm.xlu1 %16881, %v541_v30   ;;  %v19287_v30 = vpop.permute.xlu1 %8706  ;;  %24116 = vst [vmem:[#allocation104_spill] sm:$0xff] %v19509_v39 }
 0x326   : > { %14840 = vmatmul.mubr.msk.f32.gmra.mrb[138].mxu1 %vm1299_vm4, %v11968_v17  ;;  %24103 = vst [vmem:[#allocation91_spill] sm:$0xff] %v19287_v30  ;;  %v12602_v17 = vld [vmem:[%s24008_s1 + $0x1018] sm:$0xff] }
 0x327   : > { %15421 = vmatmul.mubr.msk.f32.vlgmr.msra.gmra.mrb[0].mxu0 %vm1299_vm4, %v12600_v43  ;;  %14842 = vmatprep.mubr.msk.f32.mxu1 %vm1299_vm4, %v11969_v9  ;;  %v19298_v9 = vpop.f32.mrb[12].mxu1  ;;  %v12603_v43 = vld [vmem:[%s24008_s1 + $0x1020] sm:$0xff] }
 0x328   : > { %15423 = vmatprep.mubr.msk.f32.mxu0 %vm1299_vm4, %v12601_v4  ;;  %9141 = vperm.xlu0 %16882, %v542_v45   ;;  %v526_v4 = vld [vmem:[%s24009_s2 + $0x570] sm:$0xff]  ;;  %v19306_v30 = vpop.f32.mrb[13].mxu1  ;;  %v12604_v45 = vld [vmem:[%s24008_s1 + $0x1028] sm:$0xff] }
 0x329   : > { %9056 = vperm.xlu1 %16881, %v525_v35   ;;  %v11972_v35 = vld [vmem:[%s24008_s1 + $0xc78] sm:$0xff]  ;;  %v19324_v12 = vpop.f32.mrb[14].mxu1 }
 0x32a   : > { %14843 = vmatmul.mubr.msk.f32.gmra.mrb[140].mxu1 %vm1299_vm4, %v11970_v53  ;;  %v11973_v53 = vld [vmem:[%s24008_s1 + $0xc80] sm:$0xff]  ;;  %v19334_v24 = vpop.f32.mrb[15].mxu1 }
 0x32b   : > { %15424 = vmatmul.mubr.msk.f32.gmra.mrb[2].mxu0 %vm1299_vm4, %v12602_v17  ;;  %14845 = vmatprep.mubr.msk.f32.mxu1 %vm1299_vm4, %v11971_v55  ;;  %v12605_v55 = vld [vmem:[%s24008_s1 + $0x1030] sm:$0xff]  ;;  %v19329_v17 = vpop.permute.xlu1 %8796  ;;  %v19354_v59 = vpop.f32.mrb[16].mxu1 }
 0x32c   : > { %15426 = vmatprep.mubr.msk.f32.mxu0 %vm1299_vm4, %v12603_v43  ;;  %9061 = vperm.xlu0 %16882, %v526_v4   ;;  %24105 = vst [vmem:[#allocation93_spill] sm:$0xff] %v19329_v17  ;;  %v560_v43 = vld [vmem:[%s24009_s2 + $0x680] sm:$0xff]  ;;  %v527_v4 = vld [vmem:[%s24009_s2 + $0x578] sm:$0xff]  ;;  %v11975_v17 = vld [vmem:[%s24008_s1 + $0xc90] sm:$0xff] }
 0x32d   : > { %9146 = vperm.xlu1 %16881, %v543_v16   ;;  %v11974_v16 = vld [vmem:[%s24008_s1 + $0xc88] sm:$0xff] }
 0x32e   : > { %14846 = vmatmul.mubr.msk.f32.gmra.mrb[142].mxu1 %vm1299_vm4, %v11972_v35  ;;  %v12606_v35 = vld [vmem:[%s24008_s1 + $0x1038] sm:$0xff] }
 0x32f   : > { %15427 = vmatmul.mubr.msk.f32.gmra.mrb[4].mxu0 %vm1299_vm4, %v12604_v45  ;;  %14848 = vmatprep.mubr.msk.f32.mxu1 %vm1299_vm4, %v11973_v53  ;;  %v12607_v45 = vld [vmem:[%s24008_s1 + $0x1040] sm:$0xff] }
 0x330   : > { %15429 = vmatprep.mubr.msk.f32.mxu0 %vm1299_vm4, %v12605_v55  ;;  %9231 = vperm.xlu0 %16882, %v560_v43   ;;  %v544_v53 = vld [vmem:[%s24009_s2 + $0x600] sm:$0xff]  ;;  %v19362_v55 = vpop.f32.mrb[17].mxu1  ;;  %v11976_v43 = vld [vmem:[%s24008_s1 + $0xc98] sm:$0xff] }
 0x331   : > { %9066 = vperm.xlu1 %16881, %v527_v4   ;;  %v19373_v4 = vpop.permute.xlu1 %8716 }
 0x332   : > { %14849 = vmatmul.mubr.msk.f32.gmra.mrb[144].mxu1 %vm1299_vm4, %v11974_v16  ;;  %24107 = vst [vmem:[#allocation95_spill] sm:$0xff] %v19373_v4  ;;  %v12608_v16 = vld [vmem:[%s24008_s1 + $0x1048] sm:$0xff] }
 0x333   : > { %15430 = vmatmul.mubr.msk.f32.gmra.mrb[6].mxu0 %vm1299_vm4, %v12606_v35  ;;  %14851 = vmatprep.mubr.msk.f32.mxu1 %vm1299_vm4, %v11975_v17  ;;  %v19384_v17 = vpop.f32.mrb[18].mxu1  ;;  %v12609_v35 = vld [vmem:[%s24008_s1 + $0x1050] sm:$0xff] }
 0x334   : > { %15432 = vmatprep.mubr.msk.f32.mxu0 %vm1299_vm4, %v12607_v45  ;;  %9151 = vperm.xlu0 %16882, %v544_v53   ;;  %v562_v45 = vld [vmem:[%s24009_s2 + $0x690] sm:$0xff]  ;;  %v19392_v4 = vpop.f32.mrb[19].mxu1  ;;  %v12610_v53 = vld [vmem:[%s24008_s1 + $0x1058] sm:$0xff] }
 0x335   : > { %9236 = vperm.xlu1 %16881, %v561_v54   ;;  %v11978_v54 = vld [vmem:[%s24008_s1 + $0xca8] sm:$0xff]  ;;  %v19410_v27 = vpop.f32.mrb[20].mxu1 }
 0x336   : > { %14852 = vmatmul.mubr.msk.f32.gmra.mrb[146].mxu1 %vm1299_vm4, %v11976_v43  ;;  %v11979_v43 = vld [vmem:[%s24008_s1 + $0xcb0] sm:$0xff]  ;;  %v19420_v62 = vpop.f32.mrb[21].mxu1 }
 0x337   : > { %15433 = vmatmul.mubr.msk.f32.gmra.mrb[8].mxu0 %vm1299_vm4, %v12608_v16  ;;  %14854 = vmatprep.mubr.msk.f32.mxu1 %vm1299_vm4, %v11977_v1  ;;  %v12611_v1 = vld [vmem:[%s24008_s1 + $0x1060] sm:$0xff]  ;;  %v19415_v16 = vpop.permute.xlu1 %8806  ;;  %v19440_v61 = vpop.f32.mrb[22].mxu1 }
 0x338   : > { %15435 = vmatprep.mubr.msk.f32.mxu0 %vm1299_vm4, %v12609_v35  ;;  %9241 = vperm.xlu0 %16882, %v562_v45   ;;  %24109 = vst [vmem:[#allocation97_spill] sm:$0xff] %v19415_v16  ;;  %v546_v35 = vld [vmem:[%s24009_s2 + $0x610] sm:$0xff]  ;;  %v563_v45 = vld [vmem:[%s24009_s2 + $0x698] sm:$0xff]  ;;  %v11981_v16 = vld [vmem:[%s24008_s1 + $0xcc0] sm:$0xff] }
 0x339   : > { %9156 = vperm.xlu1 %16881, %v545_v41   ;;  %v11980_v41 = vld [vmem:[%s24008_s1 + $0xcb8] sm:$0xff] }
 0x33a   : > { %14855 = vmatmul.mubr.msk.f32.gmra.mrb[148].mxu1 %vm1299_vm4, %v11978_v54  ;;  %v12612_v54 = vld [vmem:[%s24008_s1 + $0x1068] sm:$0xff] }
 0x33b   : > { %15436 = vmatmul.mubr.msk.f32.gmra.mrb[10].mxu0 %vm1299_vm4, %v12610_v53  ;;  %14857 = vmatprep.mubr.msk.f32.mxu1 %vm1299_vm4, %v11979_v43  ;;  %v12613_v53 = vld [vmem:[%s24008_s1 + $0x1070] sm:$0xff]  ;;  %v564_v43 = vld [vmem:[%s24009_s2 + $0x6a0] sm:$0xff] }
 0x33c   : > { %15438 = vmatprep.mubr.msk.f32.mxu0 %vm1299_vm4, %v12611_v1  ;;  %9161 = vperm.xlu0 %16882, %v546_v35   ;;  %v19448_v1 = vpop.f32.mrb[23].mxu1  ;;  %v11982_v35 = vld [vmem:[%s24008_s1 + $0xcc8] sm:$0xff] }
 0x33d   : > { %9246 = vperm.xlu1 %16881, %v563_v45   ;;  %v19459_v45 = vpop.permute.xlu1 %8726 }
 0x33e   : > { %14858 = vmatmul.mubr.msk.f32.gmra.mrb[150].mxu1 %vm1299_vm4, %v11980_v41  ;;  %24111 = vst [vmem:[#allocation99_spill] sm:$0xff] %v19459_v45  ;;  %v12614_v41 = vld [vmem:[%s24008_s1 + $0x1078] sm:$0xff] }
 0x33f   : > { %15439 = vmatmul.mubr.msk.f32.gmra.mrb[12].mxu0 %vm1299_vm4, %v12612_v54  ;;  %14860 = vmatprep.mubr.msk.f32.mxu1 %vm1299_vm4, %v11981_v16  ;;  %v19470_v16 = vpop.f32.mrb[24].mxu1  ;;  %v12615_v54 = vld [vmem:[%s24008_s1 + $0x1080] sm:$0xff] }
 0x340   : > { %15441 = vmatprep.mubr.msk.f32.mxu0 %vm1299_vm4, %v12613_v53  ;;  %9251 = vperm.xlu0 %16882, %v564_v43   ;;  %v548_v53 = vld [vmem:[%s24009_s2 + $0x620] sm:$0xff]  ;;  %v19478_v45 = vpop.f32.mrb[25].mxu1  ;;  %v12616_v43 = vld [vmem:[%s24008_s1 + $0x1088] sm:$0xff] }
 0x341   : > { %9166 = vperm.xlu1 %16881, %v547_v22   ;;  %v11984_v22 = vld [vmem:[%s24008_s1 + $0xcd8] sm:$0xff]  ;;  %v19496_v60 = vpop.f32.mrb[26].mxu1 }
 0x342   : > { %14861 = vmatmul.mubr.msk.f32.gmra.mrb[152].mxu1 %vm1299_vm4, %v11982_v35  ;;  %v11985_v35 = vld [vmem:[%s24008_s1 + $0xce0] sm:$0xff]  ;;  %24113 = vst [vmem:[#allocation101_spill] sm:$0xff] %v19496_v60  ;;  %v19506_v13 = vpop.f32.mrb[27].mxu1 }
 0x343   : > { %15442 = vmatmul.mubr.msk.f32.gmra.mrb[14].mxu0 %vm1299_vm4, %v12614_v41  ;;  %14863 = vmatprep.mubr.msk.f32.mxu1 %vm1299_vm4, %v11983_v19  ;;  %v12617_v19 = vld [vmem:[%s24008_s1 + $0x1090] sm:$0xff]  ;;  %v19501_v41 = vpop.permute.xlu1 %8816  ;;  %24115 = vst [vmem:[#allocation103_spill] sm:$0xff] %v19506_v13  ;;  %v19526_v39 = vpop.f32.mrb[28].mxu1 }
 0x344   : > { %15444 = vmatprep.mubr.msk.f32.mxu0 %vm1299_vm4, %v12615_v54  ;;  %9171 = vperm.xlu0 %16882, %v548_v53   ;;  %24114 = vst [vmem:[#allocation102_spill] sm:$0xff] %v19501_v41  ;;  %v566_v54 = vld [vmem:[%s24009_s2 + $0x6b0] sm:$0xff]  ;;  %v549_v53 = vld [vmem:[%s24009_s2 + $0x628] sm:$0xff]  ;;  %24117 = vst [vmem:[#allocation105_spill] sm:$0xff] %v19526_v39  ;;  %v19554_v39 = vpop.permute.xlu0 %8821 }
 0x345   : > { %9256 = vperm.xlu1 %16881, %v565_v44   ;;  %v11986_v44 = vld [vmem:[%s24008_s1 + $0xce8] sm:$0xff]  ;;  %v11987_v41 = vld [vmem:[%s24008_s1 + $0xcf0] sm:$0xff]  ;;  %24120 = vst [vmem:[#allocation108_spill] sm:$0xff] %v19554_v39  ;;  %v551_v39 = vld [vmem:[%s24009_s2 + $0x638] sm:$0xff] }
 0x346   : > { %14864 = vmatmul.mubr.msk.f32.gmra.mrb[154].mxu1 %vm1299_vm4, %v11984_v22  ;;  %v12618_v22 = vld [vmem:[%s24008_s1 + $0x1098] sm:$0xff] }
 0x347   : > { %15445 = vmatmul.mubr.msk.f32.gmra.mrb[16].mxu0 %vm1299_vm4, %v12616_v43  ;;  %14866 = vmatprep.mubr.msk.f32.mxu1 %vm1299_vm4, %v11985_v35  ;;  %v12619_v43 = vld [vmem:[%s24008_s1 + $0x10a0] sm:$0xff]  ;;  %v550_v35 = vld [vmem:[%s24009_s2 + $0x630] sm:$0xff] }
 0x348   : > { %15447 = vmatprep.mubr.msk.f32.mxu0 %vm1299_vm4, %v12617_v19  ;;  %9261 = vperm.xlu0 %16882, %v566_v54   ;;  %v19534_v19 = vpop.f32.mrb[29].mxu1  ;;  %v11988_v54 = vld [vmem:[%s24008_s1 + $0xcf8] sm:$0xff]  ;;  %v19595_v13 = vpop.permute.xlu0 %8741 }
 0x349   : > { %9176 = vperm.xlu1 %16881, %v549_v53   ;;  %24118 = vst [vmem:[#allocation106_spill] sm:$0xff] %v19534_v19  ;;  %v19545_v53 = vpop.permute.xlu1 %8736  ;;  %v11989_v19 = vld [vmem:[%s24008_s1 + $0xd00] sm:$0xff]  ;;  %24126 = vst [vmem:[#allocation114_spill] sm:$0xff] %v19595_v13 }
 0x34a   : > { %14867 = vmatmul.mubr.msk.f32.gmra.mrb[156].mxu1 %vm1299_vm4, %v11986_v44  ;;  %24119 = vst [vmem:[#allocation107_spill] sm:$0xff] %v19545_v53  ;;  %v12620_v44 = vld [vmem:[%s24008_s1 + $0x10a8] sm:$0xff] }
 0x34b   : > { %15448 = vmatmul.mubr.msk.f32.gmra.mrb[18].mxu0 %vm1299_vm4, %v12618_v22  ;;  %14869 = vmatprep.mubr.msk.f32.mxu1 %vm1299_vm4, %v11987_v41  ;;  %v19556_v41 = vpop.f32.mrb[30].mxu1  ;;  %v12621_v22 = vld [vmem:[%s24008_s1 + $0x10b0] sm:$0xff] }
 0x34c   : > { %15450 = vmatprep.mubr.msk.f32.mxu0 %vm1299_vm4, %v12619_v43  ;;  %9181 = vperm.xlu0 %16882, %v550_v35   ;;  %24121 = vst [vmem:[#allocation109_spill] sm:$0xff] %v19556_v41  ;;  %v568_v43 = vld [vmem:[%s24009_s2 + $0x6c0] sm:$0xff]  ;;  %v19564_v53 = vpop.f32.mrb[31].mxu1  ;;  %v12622_v35 = vld [vmem:[%s24008_s1 + $0x10b8] sm:$0xff] }
 0x34d   : > { %9266 = vperm.xlu1 %16881, %v567_v58   ;;  %24122 = vst [vmem:[#allocation110_spill] sm:$0xff] %v19564_v53  ;;  %v11990_v58 = vld [vmem:[%s24008_s1 + $0xd08] sm:$0xff]  ;;  %v19582_v53 = vpop.f32.mrb[32].mxu1 }
 0x34e   : > { %14870 = vmatmul.mubr.msk.f32.gmra.mrb[158].mxu1 %vm1299_vm4, %v11988_v54  ;;  %v11991_v54 = vld [vmem:[%s24008_s1 + $0xd10] sm:$0xff]  ;;  %24123 = vst [vmem:[#allocation111_spill] sm:$0xff] %v19582_v53  ;;  %v19592_v41 = vpop.f32.mrb[33].mxu1 }
 0x34f   : > { %15451 = vmatmul.mubr.msk.f32.gmra.mrb[20].mxu0 %vm1299_vm4, %v12620_v44  ;;  %14872 = vmatprep.mubr.msk.f32.mxu1 %vm1299_vm4, %v11989_v19  ;;  %v12623_v19 = vld [vmem:[%s24008_s1 + $0x10c0] sm:$0xff]  ;;  %v19587_v44 = vpop.permute.xlu1 %8826  ;;  %24125 = vst [vmem:[#allocation113_spill] sm:$0xff] %v19592_v41  ;;  %v19612_v13 = vpop.f32.mrb[34].mxu1  ;;  %v553_v41 = vld [vmem:[%s24009_s2 + $0x648] sm:$0xff] }
 0x350   : > { %15453 = vmatprep.mubr.msk.f32.mxu0 %vm1299_vm4, %v12621_v22  ;;  %9271 = vperm.xlu0 %16882, %v568_v43   ;;  %24124 = vst [vmem:[#allocation112_spill] sm:$0xff] %v19587_v44  ;;  %v552_v22 = vld [vmem:[%s24009_s2 + $0x640] sm:$0xff]  ;;  %v569_v43 = vld [vmem:[%s24009_s2 + $0x6c8] sm:$0xff]  ;;  %24127 = vst [vmem:[#allocation115_spill] sm:$0xff] %v19612_v13  ;;  %v19640_v13 = vpop.permute.xlu0 %8911 }
 0x351   : > { %9186 = vperm.xlu1 %16881, %v551_v39   ;;  %v11992_v39 = vld [vmem:[%s24008_s1 + $0xd18] sm:$0xff]  ;;  %v11993_v44 = vld [vmem:[%s24008_s1 + $0xd20] sm:$0xff]  ;;  %24130 = vst [vmem:[#allocation118_spill] sm:$0xff] %v19640_v13 }
 0x352   : > { %14873 = vmatmul.mubr.msk.f32.gmra.mrb[160].mxu1 %vm1299_vm4, %v11990_v58  ;;  %v12624_v58 = vld [vmem:[%s24008_s1 + $0x10c8] sm:$0xff]  ;;  %v571_v13 = vld [vmem:[%s24009_s2 + $0x6d8] sm:$0xff] }
 0x353   : > { %15454 = vmatmul.mubr.msk.f32.gmra.mrb[22].mxu0 %vm1299_vm4, %v12622_v35  ;;  %14875 = vmatprep.mubr.msk.f32.mxu1 %vm1299_vm4, %v11991_v54  ;;  %v12625_v35 = vld [vmem:[%s24008_s1 + $0x10d0] sm:$0xff] }
 0x354   : > { %15456 = vmatprep.mubr.msk.f32.mxu0 %vm1299_vm4, %v12623_v19  ;;  %9191 = vperm.xlu0 %16882, %v552_v22   ;;  %v570_v54 = vld [vmem:[%s24009_s2 + $0x6d0] sm:$0xff]  ;;  %v19620_v19 = vpop.f32.mrb[35].mxu1  ;;  %v11994_v22 = vld [vmem:[%s24008_s1 + $0xd28] sm:$0xff]  ;;  %v19681_v53 = vpop.permute.xlu0 %8831 }
 0x355   : > { %9276 = vperm.xlu1 %16881, %v569_v43   ;;  %24128 = vst [vmem:[#allocation116_spill] sm:$0xff] %v19620_v19  ;;  %v19631_v43 = vpop.permute.xlu1 %8746  ;;  %v11995_v19 = vld [vmem:[%s24008_s1 + $0xd30] sm:$0xff]  ;;  %24136 = vst [vmem:[#allocation124_spill] sm:$0xff] %v19681_v53 }
 0x356   : > { %14876 = vmatmul.mubr.msk.f32.gmra.mrb[162].mxu1 %vm1299_vm4, %v11992_v39  ;;  %24129 = vst [vmem:[#allocation117_spill] sm:$0xff] %v19631_v43  ;;  %v12626_v39 = vld [vmem:[%s24008_s1 + $0x10d8] sm:$0xff] }
 0x357   : > { %15457 = vmatmul.mubr.msk.f32.gmra.mrb[24].mxu0 %vm1299_vm4, %v12624_v58  ;;  %14878 = vmatprep.mubr.msk.f32.mxu1 %vm1299_vm4, %v11993_v44  ;;  %v19642_v44 = vpop.f32.mrb[36].mxu1  ;;  %v12627_v58 = vld [vmem:[%s24008_s1 + $0x10e0] sm:$0xff] }
 0x358   : > { %15459 = vmatprep.mubr.msk.f32.mxu0 %vm1299_vm4, %v12625_v35  ;;  %9281 = vperm.xlu0 %16882, %v570_v54   ;;  %24131 = vst [vmem:[#allocation119_spill] sm:$0xff] %v19642_v44  ;;  %v554_v35 = vld [vmem:[%s24009_s2 + $0x650] sm:$0xff]  ;;  %v19650_v43 = vpop.f32.mrb[37].mxu1  ;;  %v12628_v54 = vld [vmem:[%s24008_s1 + $0x10e8] sm:$0xff] }
 0x359   : > { %9196 = vperm.xlu1 %16881, %v553_v41   ;;  %24132 = vst [vmem:[#allocation120_spill] sm:$0xff] %v19650_v43  ;;  %v11996_v41 = vld [vmem:[%s24008_s1 + $0xd38] sm:$0xff]  ;;  %v19668_v43 = vpop.f32.mrb[38].mxu1 }
 0x35a   : > { %14879 = vmatmul.mubr.msk.f32.gmra.mrb[164].mxu1 %vm1299_vm4, %v11994_v22  ;;  %v11997_v22 = vld [vmem:[%s24008_s1 + $0xd40] sm:$0xff]  ;;  %24133 = vst [vmem:[#allocation121_spill] sm:$0xff] %v19668_v43  ;;  %v19678_v44 = vpop.f32.mrb[39].mxu1 }
 0x35b   : > { %15460 = vmatmul.mubr.msk.f32.gmra.mrb[26].mxu0 %vm1299_vm4, %v12626_v39  ;;  %14881 = vmatprep.mubr.msk.f32.mxu1 %vm1299_vm4, %v11995_v19  ;;  %v12629_v19 = vld [vmem:[%s24008_s1 + $0x10f0] sm:$0xff]  ;;  %v19673_v39 = vpop.permute.xlu1 %8916  ;;  %24135 = vst [vmem:[#allocation123_spill] sm:$0xff] %v19678_v44  ;;  %v19698_v53 = vpop.f32.mrb[40].mxu1  ;;  %v573_v44 = vld [vmem:[%s24009_s2 + $0x6e8] sm:$0xff] }
 0x35c   : > { %15462 = vmatprep.mubr.msk.f32.mxu0 %vm1299_vm4, %v12627_v58  ;;  %9201 = vperm.xlu0 %16882, %v554_v35   ;;  %24134 = vst [vmem:[#allocation122_spill] sm:$0xff] %v19673_v39  ;;  %v572_v58 = vld [vmem:[%s24009_s2 + $0x6e0] sm:$0xff]  ;;  %v555_v35 = vld [vmem:[%s24009_s2 + $0x658] sm:$0xff]  ;;  %v11999_v39 = vld [vmem:[%s24008_s1 + $0xd50] sm:$0xff] }
 0x35d   : > { %9286 = vperm.xlu1 %16881, %v571_v13   ;;  %v11998_v13 = vld [vmem:[%s24008_s1 + $0xd48] sm:$0xff]  ;;  %24137 = vst [vmem:[#allocation125_spill] sm:$0xff] %v19698_v53  ;;  %v19726_v53 = vpop.permute.xlu0 %8921 }
 0x35e   : > { %14882 = vmatmul.mubr.msk.f32.gmra.mrb[166].mxu1 %vm1299_vm4, %v11996_v41  ;;  %v12630_v41 = vld [vmem:[%s24008_s1 + $0x10f8] sm:$0xff]  ;;  %24140 = vst [vmem:[#allocation128_spill] sm:$0xff] %v19726_v53  ;;  %v557_v53 = vld [vmem:[%s24009_s2 + $0x668] sm:$0xff] }
 0x35f   : > { %15463 = vmatmul.mubr.msk.f32.gmra.mrb[28].mxu0 %vm1299_vm4, %v12628_v54  ;;  %14884 = vmatprep.mubr.msk.f32.mxu1 %vm1299_vm4, %v11997_v22  ;;  %v12631_v54 = vld [vmem:[%s24008_s1 + $0x1100] sm:$0xff] }
 0x360   : > { %15465 = vmatprep.mubr.msk.f32.mxu0 %vm1299_vm4, %v12629_v19  ;;  %9291 = vperm.xlu0 %16882, %v572_v58   ;;  %v556_v22 = vld [vmem:[%s24009_s2 + $0x660] sm:$0xff]  ;;  %v19706_v19 = vpop.f32.mrb[41].mxu1  ;;  %v12000_v58 = vld [vmem:[%s24008_s1 + $0xd58] sm:$0xff] }
 0x361   : > { %9206 = vperm.xlu1 %16881, %v555_v35   ;;  %24138 = vst [vmem:[#allocation126_spill] sm:$0xff] %v19706_v19  ;;  %v19717_v35 = vpop.permute.xlu1 %8836  ;;  %v12001_v19 = vld [vmem:[%s24008_s1 + $0xd60] sm:$0xff]  ;;  %v19767_v43 = vpop.permute.xlu0 %8841 }
 0x362   : > { %14885 = vmatmul.mubr.msk.f32.gmra.mrb[168].mxu1 %vm1299_vm4, %v11998_v13  ;;  %24139 = vst [vmem:[#allocation127_spill] sm:$0xff] %v19717_v35  ;;  %v12632_v13 = vld [vmem:[%s24008_s1 + $0x1108] sm:$0xff]  ;;  %24146 = vst [vmem:[#allocation134_spill] sm:$0xff] %v19767_v43 }
 0x363   : > { %15466 = vmatmul.mubr.msk.f32.gmra.mrb[30].mxu0 %vm1299_vm4, %v12630_v41  ;;  %14887 = vmatprep.mubr.msk.f32.mxu1 %vm1299_vm4, %v11999_v39  ;;  %v19728_v39 = vpop.f32.mrb[42].mxu1  ;;  %v12633_v41 = vld [vmem:[%s24008_s1 + $0x1110] sm:$0xff] }
 0x364   : > { %15468 = vmatprep.mubr.msk.f32.mxu0 %vm1299_vm4, %v12631_v54  ;;  %9211 = vperm.xlu0 %16882, %v556_v22   ;;  %24141 = vst [vmem:[#allocation129_spill] sm:$0xff] %v19728_v39  ;;  %v574_v54 = vld [vmem:[%s24009_s2 + $0x6f0] sm:$0xff]  ;;  %v19736_v35 = vpop.f32.mrb[43].mxu1  ;;  %v12634_v22 = vld [vmem:[%s24008_s1 + $0x1118] sm:$0xff] }
 0x365   : > { %9296 = vperm.xlu1 %16881, %v573_v44   ;;  %24142 = vst [vmem:[#allocation130_spill] sm:$0xff] %v19736_v35  ;;  %v12002_v44 = vld [vmem:[%s24008_s1 + $0xd68] sm:$0xff]  ;;  %v19754_v35 = vpop.f32.mrb[44].mxu1 }
 0x366   : > { %14888 = vmatmul.mubr.msk.f32.gmra.mrb[170].mxu1 %vm1299_vm4, %v12000_v58  ;;  %v12003_v58 = vld [vmem:[%s24008_s1 + $0xd70] sm:$0xff]  ;;  %24143 = vst [vmem:[#allocation131_spill] sm:$0xff] %v19754_v35  ;;  %v19764_v39 = vpop.f32.mrb[45].mxu1 }
 0x367   : > { %15469 = vmatmul.mubr.msk.f32.gmra.mrb[32].mxu0 %vm1299_vm4, %v12632_v13  ;;  %14890 = vmatprep.mubr.msk.f32.mxu1 %vm1299_vm4, %v12001_v19  ;;  %v12635_v19 = vld [vmem:[%s24008_s1 + $0x1120] sm:$0xff]  ;;  %v19759_v13 = vpop.permute.xlu1 %8926  ;;  %24145 = vst [vmem:[#allocation133_spill] sm:$0xff] %v19764_v39  ;;  %v19784_v43 = vpop.f32.mrb[46].mxu1  ;;  %v559_v39 = vld [vmem:[%s24009_s2 + $0x678] sm:$0xff] }
 0x368   : > { %15471 = vmatprep.mubr.msk.f32.mxu0 %vm1299_vm4, %v12633_v41  ;;  %9301 = vperm.xlu0 %16882, %v574_v54   ;;  %24144 = vst [vmem:[#allocation132_spill] sm:$0xff] %v19759_v13  ;;  %v558_v41 = vld [vmem:[%s24009_s2 + $0x670] sm:$0xff]  ;;  %v575_v54 = vld [vmem:[%s24009_s2 + $0x6f8] sm:$0xff]  ;;  %v12005_v13 = vld [vmem:[%s24008_s1 + $0xd80] sm:$0xff] }
 0x369   : > { %9216 = vperm.xlu1 %16881, %v557_v53   ;;  %v12004_v53 = vld [vmem:[%s24008_s1 + $0xd78] sm:$0xff]  ;;  %24147 = vst [vmem:[#allocation135_spill] sm:$0xff] %v19784_v43  ;;  %v19812_v43 = vpop.permute.xlu0 %8931 }
 0x36a   : > { %14891 = vmatmul.mubr.msk.f32.gmra.mrb[172].mxu1 %vm1299_vm4, %v12002_v44  ;;  %v12636_v44 = vld [vmem:[%s24008_s1 + $0x1128] sm:$0xff]  ;;  %24150 = vst [vmem:[#allocation138_spill] sm:$0xff] %v19812_v43 }
 0x36b   : > { %15472 = vmatmul.mubr.msk.f32.gmra.mrb[34].mxu0 %vm1299_vm4, %v12634_v22  ;;  %14893 = vmatprep.mubr.msk.f32.mxu1 %vm1299_vm4, %v12003_v58  ;;  %v12637_v22 = vld [vmem:[%s24008_s1 + $0x1130] sm:$0xff]  ;;  %v592_v58 = vld [vmem:[%s24009_s2 + $0x780] sm:$0xff]  ;;  %v593_v43 = vld [vmem:[%s24009_s2 + $0x788] sm:$0xff] }
 0x36c   : > { %15474 = vmatprep.mubr.msk.f32.mxu0 %vm1299_vm4, %v12635_v19  ;;  %9221 = vperm.xlu0 %16882, %v558_v41   ;;  %v19792_v19 = vpop.f32.mrb[47].mxu1  ;;  %v12006_v41 = vld [vmem:[%s24008_s1 + $0xd88] sm:$0xff] }
 0x36d   : > { %9306 = vperm.xlu1 %16881, %v575_v54   ;;  %24148 = vst [vmem:[#allocation136_spill] sm:$0xff] %v19792_v19  ;;  %v19803_v54 = vpop.permute.xlu1 %8846  ;;  %v12007_v19 = vld [vmem:[%s24008_s1 + $0xd90] sm:$0xff]  ;;  %v19853_v35 = vpop.permute.xlu0 %8851 }
 0x36e   : > { %14894 = vmatmul.mubr.msk.f32.gmra.mrb[174].mxu1 %vm1299_vm4, %v12004_v53  ;;  %24149 = vst [vmem:[#allocation137_spill] sm:$0xff] %v19803_v54  ;;  %v12638_v53 = vld [vmem:[%s24008_s1 + $0x1138] sm:$0xff]  ;;  %24156 = vst [vmem:[#allocation144_spill] sm:$0xff] %v19853_v35 }
 0x36f   : > { %15475 = vmatmul.mubr.msk.f32.gmra.mrb[36].mxu0 %vm1299_vm4, %v12636_v44  ;;  %14896 = vmatprep.mubr.msk.f32.mxu1 %vm1299_vm4, %v12005_v13  ;;  %v19814_v13 = vpop.f32.mrb[48].mxu1  ;;  %v12639_v44 = vld [vmem:[%s24008_s1 + $0x1140] sm:$0xff] }
 0x370   : > { %15477 = vmatprep.mubr.msk.f32.mxu0 %vm1299_vm4, %v12637_v22  ;;  %9391 = vperm.xlu0 %16882, %v592_v58   ;;  %24151 = vst [vmem:[#allocation139_spill] sm:$0xff] %v19814_v13  ;;  %v576_v22 = vld [vmem:[%s24009_s2 + $0x700] sm:$0xff]  ;;  %v19822_v54 = vpop.f32.mrb[49].mxu1  ;;  %v12640_v58 = vld [vmem:[%s24008_s1 + $0x1148] sm:$0xff] }
 0x371   : > { %9226 = vperm.xlu1 %16881, %v559_v39   ;;  %24152 = vst [vmem:[#allocation140_spill] sm:$0xff] %v19822_v54  ;;  %v12008_v39 = vld [vmem:[%s24008_s1 + $0xd98] sm:$0xff]  ;;  %v19840_v54 = vpop.f32.mrb[50].mxu1 }
 0x372   : > { %14897 = vmatmul.mubr.msk.f32.gmra.mrb[176].mxu1 %vm1299_vm4, %v12006_v41  ;;  %v12009_v41 = vld [vmem:[%s24008_s1 + $0xda0] sm:$0xff]  ;;  %24153 = vst [vmem:[#allocation141_spill] sm:$0xff] %v19840_v54  ;;  %v19850_v13 = vpop.f32.mrb[51].mxu1 }
 0x373   : > { %15478 = vmatmul.mubr.msk.f32.gmra.mrb[38].mxu0 %vm1299_vm4, %v12638_v53  ;;  %14899 = vmatprep.mubr.msk.f32.mxu1 %vm1299_vm4, %v12007_v19  ;;  %v12641_v19 = vld [vmem:[%s24008_s1 + $0x1150] sm:$0xff]  ;;  %v19845_v53 = vpop.permute.xlu1 %8936  ;;  %24155 = vst [vmem:[#allocation143_spill] sm:$0xff] %v19850_v13  ;;  %v19870_v35 = vpop.f32.mrb[52].mxu1  ;;  %v595_v13 = vld [vmem:[%s24009_s2 + $0x798] sm:$0xff] }
 0x374   : > { %15480 = vmatprep.mubr.msk.f32.mxu0 %vm1299_vm4, %v12639_v44  ;;  %9311 = vperm.xlu0 %16882, %v576_v22   ;;  %24154 = vst [vmem:[#allocation142_spill] sm:$0xff] %v19845_v53  ;;  %v594_v44 = vld [vmem:[%s24009_s2 + $0x790] sm:$0xff]  ;;  %v577_v22 = vld [vmem:[%s24009_s2 + $0x708] sm:$0xff]  ;;  %24157 = vst [vmem:[#allocation145_spill] sm:$0xff] %v19870_v35  ;;  %v19898_v35 = vpop.permute.xlu0 %8941 }
 0x375   : > { %9396 = vperm.xlu1 %16881, %v593_v43   ;;  %v12010_v43 = vld [vmem:[%s24008_s1 + $0xda8] sm:$0xff]  ;;  %v12011_v53 = vld [vmem:[%s24008_s1 + $0xdb0] sm:$0xff]  ;;  %24160 = vst [vmem:[#allocation148_spill] sm:$0xff] %v19898_v35  ;;  %v579_v35 = vld [vmem:[%s24009_s2 + $0x718] sm:$0xff] }
 0x376   : > { %14900 = vmatmul.mubr.msk.f32.gmra.mrb[178].mxu1 %vm1299_vm4, %v12008_v39  ;;  %v12642_v39 = vld [vmem:[%s24008_s1 + $0x1158] sm:$0xff] }
 0x377   : > { %15481 = vmatmul.mubr.msk.f32.gmra.mrb[40].mxu0 %vm1299_vm4, %v12640_v58  ;;  %14902 = vmatprep.mubr.msk.f32.mxu1 %vm1299_vm4, %v12009_v41  ;;  %v12643_v58 = vld [vmem:[%s24008_s1 + $0x1160] sm:$0xff]  ;;  %v578_v41 = vld [vmem:[%s24009_s2 + $0x710] sm:$0xff] }
 0x378   : > { %15483 = vmatprep.mubr.msk.f32.mxu0 %vm1299_vm4, %v12641_v19  ;;  %9401 = vperm.xlu0 %16882, %v594_v44   ;;  %v19878_v19 = vpop.f32.mrb[53].mxu1  ;;  %v12012_v44 = vld [vmem:[%s24008_s1 + $0xdb8] sm:$0xff]  ;;  %v19939_v54 = vpop.permute.xlu0 %8861 }
 0x379   : > { %9316 = vperm.xlu1 %16881, %v577_v22   ;;  %24158 = vst [vmem:[#allocation146_spill] sm:$0xff] %v19878_v19  ;;  %v19889_v22 = vpop.permute.xlu1 %8856  ;;  %v12013_v19 = vld [vmem:[%s24008_s1 + $0xdc0] sm:$0xff]  ;;  %24166 = vst [vmem:[#allocation154_spill] sm:$0xff] %v19939_v54 }
 0x37a   : > { %14903 = vmatmul.mubr.msk.f32.gmra.mrb[180].mxu1 %vm1299_vm4, %v12010_v43  ;;  %24159 = vst [vmem:[#allocation147_spill] sm:$0xff] %v19889_v22  ;;  %v12644_v43 = vld [vmem:[%s24008_s1 + $0x1168] sm:$0xff] }
 0x37b   : > { %15484 = vmatmul.mubr.msk.f32.gmra.mrb[42].mxu0 %vm1299_vm4, %v12642_v39  ;;  %14905 = vmatprep.mubr.msk.f32.mxu1 %vm1299_vm4, %v12011_v53  ;;  %v19900_v53 = vpop.f32.mrb[54].mxu1  ;;  %v12645_v39 = vld [vmem:[%s24008_s1 + $0x1170] sm:$0xff] }
 0x37c   : > { %15486 = vmatprep.mubr.msk.f32.mxu0 %vm1299_vm4, %v12643_v58  ;;  %9321 = vperm.xlu0 %16882, %v578_v41   ;;  %24161 = vst [vmem:[#allocation149_spill] sm:$0xff] %v19900_v53  ;;  %v596_v58 = vld [vmem:[%s24009_s2 + $0x7a0] sm:$0xff]  ;;  %v19908_v22 = vpop.f32.mrb[55].mxu1  ;;  %v12646_v41 = vld [vmem:[%s24008_s1 + $0x1178] sm:$0xff] }
 0x37d   : > { %9406 = vperm.xlu1 %16881, %v595_v13   ;;  %24162 = vst [vmem:[#allocation150_spill] sm:$0xff] %v19908_v22  ;;  %v12014_v13 = vld [vmem:[%s24008_s1 + $0xdc8] sm:$0xff]  ;;  %v19926_v22 = vpop.f32.mrb[56].mxu1 }
 0x37e   : > { %14906 = vmatmul.mubr.msk.f32.gmra.mrb[182].mxu1 %vm1299_vm4, %v12012_v44  ;;  %v12015_v44 = vld [vmem:[%s24008_s1 + $0xdd0] sm:$0xff]  ;;  %24163 = vst [vmem:[#allocation151_spill] sm:$0xff] %v19926_v22  ;;  %v19936_v53 = vpop.f32.mrb[57].mxu1 }
 0x37f   : > { %15487 = vmatmul.mubr.msk.f32.gmra.mrb[44].mxu0 %vm1299_vm4, %v12644_v43  ;;  %14908 = vmatprep.mubr.msk.f32.mxu1 %vm1299_vm4, %v12013_v19  ;;  %v12647_v19 = vld [vmem:[%s24008_s1 + $0x1180] sm:$0xff]  ;;  %v19931_v43 = vpop.permute.xlu1 %8946  ;;  %24165 = vst [vmem:[#allocation153_spill] sm:$0xff] %v19936_v53  ;;  %v19956_v54 = vpop.f32.mrb[58].mxu1  ;;  %v581_v53 = vld [vmem:[%s24009_s2 + $0x728] sm:$0xff] }
 0x380   : > { %15489 = vmatprep.mubr.msk.f32.mxu0 %vm1299_vm4, %v12645_v39  ;;  %9411 = vperm.xlu0 %16882, %v596_v58   ;;  %24164 = vst [vmem:[#allocation152_spill] sm:$0xff] %v19931_v43  ;;  %v580_v39 = vld [vmem:[%s24009_s2 + $0x720] sm:$0xff]  ;;  %v597_v58 = vld [vmem:[%s24009_s2 + $0x7a8] sm:$0xff]  ;;  %24167 = vst [vmem:[#allocation155_spill] sm:$0xff] %v19956_v54  ;;  %v19984_v54 = vpop.permute.xlu0 %8951 }
 0x381   : > { %9326 = vperm.xlu1 %16881, %v579_v35   ;;  %v12016_v35 = vld [vmem:[%s24008_s1 + $0xdd8] sm:$0xff]  ;;  %v12017_v43 = vld [vmem:[%s24008_s1 + $0xde0] sm:$0xff]  ;;  %24170 = vst [vmem:[#allocation158_spill] sm:$0xff] %v19984_v54 }
 0x382   : > { %14909 = vmatmul.mubr.msk.f32.gmra.mrb[184].mxu1 %vm1299_vm4, %v12014_v13  ;;  %v12648_v13 = vld [vmem:[%s24008_s1 + $0x1188] sm:$0xff]  ;;  %v599_v54 = vld [vmem:[%s24009_s2 + $0x7b8] sm:$0xff] }
 0x383   : > { %15490 = vmatmul.mubr.msk.f32.gmra.mrb[46].mxu0 %vm1299_vm4, %v12646_v41  ;;  %14911 = vmatprep.mubr.msk.f32.mxu1 %vm1299_vm4, %v12015_v44  ;;  %v12649_v41 = vld [vmem:[%s24008_s1 + $0x1190] sm:$0xff] }
 0x384   : > { %15492 = vmatprep.mubr.msk.f32.mxu0 %vm1299_vm4, %v12647_v19  ;;  %9331 = vperm.xlu0 %16882, %v580_v39   ;;  %v598_v44 = vld [vmem:[%s24009_s2 + $0x7b0] sm:$0xff]  ;;  %v19964_v19 = vpop.f32.mrb[59].mxu1  ;;  %v12018_v39 = vld [vmem:[%s24008_s1 + $0xde8] sm:$0xff]  ;;  %v20025_v22 = vpop.permute.xlu0 %8871 }
 0x385   : > { %9416 = vperm.xlu1 %16881, %v597_v58   ;;  %24168 = vst [vmem:[#allocation156_spill] sm:$0xff] %v19964_v19  ;;  %v19975_v58 = vpop.permute.xlu1 %8866  ;;  %v12019_v19 = vld [vmem:[%s24008_s1 + $0xdf0] sm:$0xff]  ;;  %24176 = vst [vmem:[#allocation164_spill] sm:$0xff] %v20025_v22 }
 0x386   : > { %14912 = vmatmul.mubr.msk.f32.gmra.mrb[186].mxu1 %vm1299_vm4, %v12016_v35  ;;  %24169 = vst [vmem:[#allocation157_spill] sm:$0xff] %v19975_v58  ;;  %v12650_v35 = vld [vmem:[%s24008_s1 + $0x1198] sm:$0xff] }
 0x387   : > { %15493 = vmatmul.mubr.msk.f32.gmra.mrb[48].mxu0 %vm1299_vm4, %v12648_v13  ;;  %14914 = vmatprep.mubr.msk.f32.mxu1 %vm1299_vm4, %v12017_v43  ;;  %v19986_v43 = vpop.f32.mrb[60].mxu1  ;;  %v12651_v13 = vld [vmem:[%s24008_s1 + $0x11a0] sm:$0xff] }
 0x388   : > { %15495 = vmatprep.mubr.msk.f32.mxu0 %vm1299_vm4, %v12649_v41  ;;  %9421 = vperm.xlu0 %16882, %v598_v44   ;;  %24171 = vst [vmem:[#allocation159_spill] sm:$0xff] %v19986_v43  ;;  %v582_v41 = vld [vmem:[%s24009_s2 + $0x730] sm:$0xff]  ;;  %v19994_v58 = vpop.f32.mrb[61].mxu1  ;;  %v12652_v44 = vld [vmem:[%s24008_s1 + $0x11a8] sm:$0xff] }
 0x389   : > { %9336 = vperm.xlu1 %16881, %v581_v53   ;;  %24172 = vst [vmem:[#allocation160_spill] sm:$0xff] %v19994_v58  ;;  %v12020_v53 = vld [vmem:[%s24008_s1 + $0xdf8] sm:$0xff]  ;;  %v20012_v58 = vpop.f32.mrb[62].mxu1 }
 0x38a   : > { %14915 = vmatmul.mubr.msk.f32.gmra.mrb[188].mxu1 %vm1299_vm4, %v12018_v39  ;;  %v12021_v39 = vld [vmem:[%s24008_s1 + $0xe00] sm:$0xff]  ;;  %24173 = vst [vmem:[#allocation161_spill] sm:$0xff] %v20012_v58  ;;  %v20022_v43 = vpop.f32.mrb[63].mxu1 }
 0x38b   : > { %15496 = vmatmul.mubr.msk.f32.gmra.mrb[50].mxu0 %vm1299_vm4, %v12650_v35  ;;  %14917 = vmatprep.mubr.msk.f32.mxu1 %vm1299_vm4, %v12019_v19  ;;  %v12653_v19 = vld [vmem:[%s24008_s1 + $0x11b0] sm:$0xff]  ;;  %v20017_v35 = vpop.permute.xlu1 %8956  ;;  %24175 = vst [vmem:[#allocation163_spill] sm:$0xff] %v20022_v43  ;;  %v20042_v22 = vpop.f32.mrb[64].mxu1  ;;  %v601_v43 = vld [vmem:[%s24009_s2 + $0x7c8] sm:$0xff] }
 0x38c   : > { %15498 = vmatprep.mubr.msk.f32.mxu0 %vm1299_vm4, %v12651_v13  ;;  %9341 = vperm.xlu0 %16882, %v582_v41   ;;  %24174 = vst [vmem:[#allocation162_spill] sm:$0xff] %v20017_v35  ;;  %v600_v13 = vld [vmem:[%s24009_s2 + $0x7c0] sm:$0xff]  ;;  %v583_v41 = vld [vmem:[%s24009_s2 + $0x738] sm:$0xff]  ;;  %v12023_v35 = vld [vmem:[%s24008_s1 + $0xe10] sm:$0xff] }
 0x38d   : > { %9426 = vperm.xlu1 %16881, %v599_v54   ;;  %v12022_v54 = vld [vmem:[%s24008_s1 + $0xe08] sm:$0xff]  ;;  %24177 = vst [vmem:[#allocation165_spill] sm:$0xff] %v20042_v22  ;;  %v20070_v22 = vpop.permute.xlu0 %8961 }
 0x38e   : > { %14918 = vmatmul.mubr.msk.f32.gmra.mrb[190].mxu1 %vm1299_vm4, %v12020_v53  ;;  %v12654_v53 = vld [vmem:[%s24008_s1 + $0x11b8] sm:$0xff]  ;;  %24180 = vst [vmem:[#allocation168_spill] sm:$0xff] %v20070_v22  ;;  %v585_v22 = vld [vmem:[%s24009_s2 + $0x748] sm:$0xff] }
 0x38f   : > { %15499 = vmatmul.mubr.msk.f32.gmra.mrb[52].mxu0 %vm1299_vm4, %v12652_v44  ;;  %14920 = vmatprep.mubr.msk.f32.mxu1 %vm1299_vm4, %v12021_v39  ;;  %v12655_v44 = vld [vmem:[%s24008_s1 + $0x11c0] sm:$0xff] }
 0x390   : > { %15501 = vmatprep.mubr.msk.f32.mxu0 %vm1299_vm4, %v12653_v19  ;;  %9431 = vperm.xlu0 %16882, %v600_v13   ;;  %v584_v39 = vld [vmem:[%s24009_s2 + $0x740] sm:$0xff]  ;;  %v20050_v19 = vpop.f32.mrb[65].mxu1  ;;  %v12024_v13 = vld [vmem:[%s24008_s1 + $0xe18] sm:$0xff] }
 0x391   : > { %9346 = vperm.xlu1 %16881, %v583_v41   ;;  %24178 = vst [vmem:[#allocation166_spill] sm:$0xff] %v20050_v19  ;;  %v20061_v41 = vpop.permute.xlu1 %8876  ;;  %v12025_v19 = vld [vmem:[%s24008_s1 + $0xe20] sm:$0xff]  ;;  %v20111_v58 = vpop.permute.xlu0 %8881 }
 0x392   : > { %14921 = vmatmul.mubr.msk.f32.gmra.mrb[192].mxu1 %vm1299_vm4, %v12022_v54  ;;  %24179 = vst [vmem:[#allocation167_spill] sm:$0xff] %v20061_v41  ;;  %v12656_v54 = vld [vmem:[%s24008_s1 + $0x11c8] sm:$0xff]  ;;  %24186 = vst [vmem:[#allocation174_spill] sm:$0xff] %v20111_v58 }
 0x393   : > { %15502 = vmatmul.mubr.msk.f32.gmra.mrb[54].mxu0 %vm1299_vm4, %v12654_v53  ;;  %14923 = vmatprep.mubr.msk.f32.mxu1 %vm1299_vm4, %v12023_v35  ;;  %v20072_v35 = vpop.f32.mrb[66].mxu1  ;;  %v12657_v53 = vld [vmem:[%s24008_s1 + $0x11d0] sm:$0xff] }
 0x394   : > { %15504 = vmatprep.mubr.msk.f32.mxu0 %vm1299_vm4, %v12655_v44  ;;  %9351 = vperm.xlu0 %16882, %v584_v39   ;;  %24181 = vst [vmem:[#allocation169_spill] sm:$0xff] %v20072_v35  ;;  %v602_v44 = vld [vmem:[%s24009_s2 + $0x7d0] sm:$0xff]  ;;  %v20080_v41 = vpop.f32.mrb[67].mxu1  ;;  %v12658_v39 = vld [vmem:[%s24008_s1 + $0x11d8] sm:$0xff] }
 0x395   : > { %9436 = vperm.xlu1 %16881, %v601_v43   ;;  %24182 = vst [vmem:[#allocation170_spill] sm:$0xff] %v20080_v41  ;;  %v12026_v43 = vld [vmem:[%s24008_s1 + $0xe28] sm:$0xff]  ;;  %v20098_v41 = vpop.f32.mrb[68].mxu1 }
 0x396   : > { %14924 = vmatmul.mubr.msk.f32.gmra.mrb[194].mxu1 %vm1299_vm4, %v12024_v13  ;;  %v12027_v13 = vld [vmem:[%s24008_s1 + $0xe30] sm:$0xff]  ;;  %24183 = vst [vmem:[#allocation171_spill] sm:$0xff] %v20098_v41  ;;  %v20108_v35 = vpop.f32.mrb[69].mxu1 }
 0x397   : > { %15505 = vmatmul.mubr.msk.f32.gmra.mrb[56].mxu0 %vm1299_vm4, %v12656_v54  ;;  %14926 = vmatprep.mubr.msk.f32.mxu1 %vm1299_vm4, %v12025_v19  ;;  %v12659_v19 = vld [vmem:[%s24008_s1 + $0x11e0] sm:$0xff]  ;;  %v20103_v54 = vpop.permute.xlu1 %8966  ;;  %24185 = vst [vmem:[#allocation173_spill] sm:$0xff] %v20108_v35  ;;  %v20128_v58 = vpop.f32.mrb[70].mxu1  ;;  %v587_v35 = vld [vmem:[%s24009_s2 + $0x758] sm:$0xff] }
 0x398   : > { %15507 = vmatprep.mubr.msk.f32.mxu0 %vm1299_vm4, %v12657_v53  ;;  %9441 = vperm.xlu0 %16882, %v602_v44   ;;  %24184 = vst [vmem:[#allocation172_spill] sm:$0xff] %v20103_v54  ;;  %v586_v53 = vld [vmem:[%s24009_s2 + $0x750] sm:$0xff]  ;;  %v603_v44 = vld [vmem:[%s24009_s2 + $0x7d8] sm:$0xff]  ;;  %v12029_v54 = vld [vmem:[%s24008_s1 + $0xe40] sm:$0xff] }
 0x399   : > { %9356 = vperm.xlu1 %16881, %v585_v22   ;;  %v12028_v22 = vld [vmem:[%s24008_s1 + $0xe38] sm:$0xff]  ;;  %24187 = vst [vmem:[#allocation175_spill] sm:$0xff] %v20128_v58  ;;  %v20156_v58 = vpop.permute.xlu0 %8971 }
 0x39a   : > { %14927 = vmatmul.mubr.msk.f32.gmra.mrb[196].mxu1 %vm1299_vm4, %v12026_v43  ;;  %v12660_v43 = vld [vmem:[%s24008_s1 + $0x11e8] sm:$0xff]  ;;  %24190 = vst [vmem:[#allocation178_spill] sm:$0xff] %v20156_v58 }
 0x39b   : > { %15508 = vmatmul.mubr.msk.f32.gmra.mrb[58].mxu0 %vm1299_vm4, %v12658_v39  ;;  %14929 = vmatprep.mubr.msk.f32.mxu1 %vm1299_vm4, %v12027_v13  ;;  %v12661_v39 = vld [vmem:[%s24008_s1 + $0x11f0] sm:$0xff]  ;;  %v604_v13 = vld [vmem:[%s24009_s2 + $0x7e0] sm:$0xff]  ;;  %v605_v58 = vld [vmem:[%s24009_s2 + $0x7e8] sm:$0xff] }
 0x39c   : > { %15510 = vmatprep.mubr.msk.f32.mxu0 %vm1299_vm4, %v12659_v19  ;;  %9361 = vperm.xlu0 %16882, %v586_v53   ;;  %v20136_v19 = vpop.f32.mrb[71].mxu1  ;;  %v12030_v53 = vld [vmem:[%s24008_s1 + $0xe48] sm:$0xff] }
 0x39d   : > { %9446 = vperm.xlu1 %16881, %v603_v44   ;;  %24188 = vst [vmem:[#allocation176_spill] sm:$0xff] %v20136_v19  ;;  %v20147_v44 = vpop.permute.xlu1 %8886  ;;  %v12031_v19 = vld [vmem:[%s24008_s1 + $0xe50] sm:$0xff]  ;;  %v20197_v41 = vpop.permute.xlu0 %8891 }
 0x39e   : > { %14930 = vmatmul.mubr.msk.f32.gmra.mrb[198].mxu1 %vm1299_vm4, %v12028_v22  ;;  %24189 = vst [vmem:[#allocation177_spill] sm:$0xff] %v20147_v44  ;;  %v12662_v22 = vld [vmem:[%s24008_s1 + $0x11f8] sm:$0xff]  ;;  %24196 = vst [vmem:[#allocation184_spill] sm:$0xff] %v20197_v41 }
 0x39f   : > { %15511 = vmatmul.mubr.msk.f32.gmra.mrb[60].mxu0 %vm1299_vm4, %v12660_v43  ;;  %14932 = vmatprep.mubr.msk.f32.mxu1 %vm1299_vm4, %v12029_v54  ;;  %v20158_v54 = vpop.f32.mrb[72].mxu1  ;;  %v12663_v43 = vld [vmem:[%s24008_s1 + $0x1200] sm:$0xff] }
 0x3a0   : > { %15513 = vmatprep.mubr.msk.f32.mxu0 %vm1299_vm4, %v12661_v39  ;;  %9451 = vperm.xlu0 %16882, %v604_v13   ;;  %24191 = vst [vmem:[#allocation179_spill] sm:$0xff] %v20158_v54  ;;  %v588_v39 = vld [vmem:[%s24009_s2 + $0x760] sm:$0xff]  ;;  %v20166_v44 = vpop.f32.mrb[73].mxu1  ;;  %v12664_v13 = vld [vmem:[%s24008_s1 + $0x1208] sm:$0xff] }
 0x3a1   : > { %9366 = vperm.xlu1 %16881, %v587_v35   ;;  %24192 = vst [vmem:[#allocation180_spill] sm:$0xff] %v20166_v44  ;;  %v12032_v35 = vld [vmem:[%s24008_s1 + $0xe58] sm:$0xff]  ;;  %v20184_v44 = vpop.f32.mrb[74].mxu1 }
 0x3a2   : > { %14933 = vmatmul.mubr.msk.f32.gmra.mrb[200].mxu1 %vm1299_vm4, %v12030_v53  ;;  %v12033_v53 = vld [vmem:[%s24008_s1 + $0xe60] sm:$0xff]  ;;  %24193 = vst [vmem:[#allocation181_spill] sm:$0xff] %v20184_v44  ;;  %v20194_v54 = vpop.f32.mrb[75].mxu1 }
 0x3a3   : > { %15514 = vmatmul.mubr.msk.f32.gmra.mrb[62].mxu0 %vm1299_vm4, %v12662_v22  ;;  %14935 = vmatprep.mubr.msk.f32.mxu1 %vm1299_vm4, %v12031_v19  ;;  %v20186_v22 = vpop.permute.xlu1 %8976  ;;  %v12665_v19 = vld [vmem:[%s24008_s1 + $0x1210] sm:$0xff]  ;;  %24195 = vst [vmem:[#allocation183_spill] sm:$0xff] %v20194_v54  ;;  %v20214_v41 = vpop.f32.mrb[76].mxu1  ;;  %v607_v54 = vld [vmem:[%s24009_s2 + $0x7f8] sm:$0xff] }
 0x3a4   : > { %15516 = vmatprep.mubr.msk.f32.mxu0 %vm1299_vm4, %v12663_v43  ;;  %9371 = vperm.xlu0 %16882, %v588_v39   ;;  %24194 = vst [vmem:[#allocation182_spill] sm:$0xff] %v20186_v22  ;;  %v606_v43 = vld [vmem:[%s24009_s2 + $0x7f0] sm:$0xff]  ;;  %v589_v39 = vld [vmem:[%s24009_s2 + $0x768] sm:$0xff]  ;;  %24197 = vst [vmem:[#allocation185_spill] sm:$0xff] %v20214_v41  ;;  %v20242_v41 = vpop.permute.xlu0 %8981 }
 0x3a5   : > { %9456 = vperm.xlu1 %16881, %v605_v58   ;;  %v12034_v58 = vld [vmem:[%s24008_s1 + $0xe68] sm:$0xff]  ;;  %v12035_v22 = vld [vmem:[%s24008_s1 + $0xe70] sm:$0xff]  ;;  %24200 = vst [vmem:[#allocation188_spill] sm:$0xff] %v20242_v41 }
 0x3a6   : > { %14936 = vmatmul.mubr.msk.f32.gmra.mrb[202].mxu1 %vm1299_vm4, %v12032_v35  ;;  %v12666_v35 = vld [vmem:[%s24008_s1 + $0x1218] sm:$0xff] }
 0x3a7   : > { %15517 = vmatmul.mubr.msk.f32.gmra.mrb[64].mxu0 %vm1299_vm4, %v12664_v13  ;;  %14938 = vmatprep.mubr.msk.f32.mxu1 %vm1299_vm4, %v12033_v53  ;;  %v12667_v13 = vld [vmem:[%s24008_s1 + $0x1220] sm:$0xff]  ;;  %v590_v53 = vld [vmem:[%s24009_s2 + $0x770] sm:$0xff] }
 0x3a8   : > { %15519 = vmatprep.mubr.msk.f32.mxu0 %vm1299_vm4, %v12665_v19  ;;  %9461 = vperm.xlu0 %16882, %v606_v43   ;;  %v20222_v19 = vpop.f32.mrb[77].mxu1  ;;  %v20229_v43 = vpop.permute.xlu1 %8896 }
 0x3a9   : > { %9376 = vperm.xlu1 %16881, %v589_v39   ;;  %24198 = vst [vmem:[#allocation186_spill] sm:$0xff] %v20222_v19  ;;  %24199 = vst [vmem:[#allocation187_spill] sm:$0xff] %v20229_v43  ;;  %v12036_v39 = vld [vmem:[%s24008_s1 + $0xe78] sm:$0xff]  ;;  %v12037_v19 = vld [vmem:[%s24008_s1 + $0xe80] sm:$0xff] }
 0x3aa   : > { %14939 = vmatmul.mubr.msk.f32.gmra.mrb[204].mxu1 %vm1299_vm4, %v12034_v58  ;;  %v12668_v58 = vld [vmem:[%s24008_s1 + $0x1228] sm:$0xff] }
 0x3ab   : > { %15520 = vmatmul.mubr.msk.f32.gmra.mrb[66].mxu0 %vm1299_vm4, %v12666_v35  ;;  %14941 = vmatprep.mubr.msk.f32.mxu1 %vm1299_vm4, %v12035_v22  ;;  %v20244_v35 = vpop.f32.mrb[78].mxu1  ;;  %v12669_v22 = vld [vmem:[%s24008_s1 + $0x1230] sm:$0xff] }
 0x3ac   : > { %15522 = vmatprep.mubr.msk.f32.mxu0 %vm1299_vm4, %v12667_v13  ;;  %9381 = vperm.xlu0 %16882, %v590_v53   ;;  %24201 = vst [vmem:[#allocation189_spill] sm:$0xff] %v20244_v35  ;;  %v20249_v43 = vpop.f32.mrb[79].mxu1  ;;  %v591_v13 = vld [vmem:[%s24009_s2 + $0x778] sm:$0xff]  ;;  %v12038_v53 = vld [vmem:[%s24008_s1 + $0xe88] sm:$0xff] }
 0x3ad   : > { %9466 = vperm.xlu1 %16881, %v607_v54   ;;  %24202 = vst [vmem:[#allocation190_spill] sm:$0xff] %v20249_v43  ;;  %v12670_v54 = vld [vmem:[%s24008_s1 + $0x1238] sm:$0xff]  ;;  %v20267_v41 = vpop.f32.mrb[80].mxu1  ;;  %v20269_v43 = vpop.permute.xlu1 %8986 }
 0x3ae   : > { %14942 = vmatmul.mubr.msk.f32.gmra.mrb[206].mxu1 %vm1299_vm4, %v12036_v39  ;;  %v12039_v39 = vld [vmem:[%s24008_s1 + $0xe90] sm:$0xff]  ;;  %24203 = vst [vmem:[#allocation191_spill] sm:$0xff] %v20267_v41  ;;  %24204 = vst [vmem:[#allocation192_spill] sm:$0xff] %v20269_v43  ;;  %v12672_v43 = vld [vmem:[%s24008_s1 + $0x1248] sm:$0xff] }
 0x3af   : > { %15523 = vmatmul.mubr.msk.f32.gmra.mrb[68].mxu0 %vm1299_vm4, %v12668_v58  ;;  %14944 = vmatprep.mubr.msk.f32.mxu1 %vm1299_vm4, %v12037_v19  ;;  %v12671_v19 = vld [vmem:[%s24008_s1 + $0x1240] sm:$0xff]  ;;  %v20274_v58 = vpop.f32.mrb[81].mxu1 }
 0x3b0   : > { %15525 = vmatprep.mubr.msk.f32.mxu0 %vm1299_vm4, %v12669_v22  ;;  %24205 = vst [vmem:[#allocation193_spill] sm:$0xff] %v20274_v58  ;;  %v12040_v22 = vld [vmem:[%s24008_s1 + $0xe98] sm:$0xff]  ;;  %v20289_v58 = vpop.f32.mrb[82].mxu1 }
 0x3b1   : > { %9386 = vperm.xlu1 %16881, %v591_v13   ;;  %v12041_v13 = vld [vmem:[%s24008_s1 + $0xea0] sm:$0xff]  ;;  %24206 = vst [vmem:[#allocation194_spill] sm:$0xff] %v20289_v58 }
 0x3b2   : > { %14945 = vmatmul.mubr.msk.f32.gmra.mrb[208].mxu1 %vm1299_vm4, %v12038_v53  ;;  %v12673_v53 = vld [vmem:[%s24008_s1 + $0x1250] sm:$0xff] }
 0x3b3   : > { %15526 = vmatmul.mubr.msk.f32.gmra.mrb[70].mxu0 %vm1299_vm4, %v12670_v54  ;;  %14947 = vmatprep.mubr.msk.f32.mxu1 %vm1299_vm4, %v12039_v39  ;;  %v20294_v54 = vpop.f32.mrb[83].mxu1  ;;  %v12042_v39 = vld [vmem:[%s24008_s1 + $0xea8] sm:$0xff] }
 0x3b4   : > { %15528 = vmatprep.mubr.msk.f32.mxu0 %vm1299_vm4, %v12671_v19  ;;  %24207 = vst [vmem:[#allocation195_spill] sm:$0xff] %v20294_v54  ;;  %v12674_v19 = vld [vmem:[%s24008_s1 + $0x1258] sm:$0xff]  ;;  %v12043_v54 = vld [vmem:[%s24008_s1 + $0xeb0] sm:$0xff]  ;;  %v20309_v58 = vpop.f32.mrb[84].mxu1 }
 0x3b5   : > { %24208 = vst [vmem:[#allocation196_spill] sm:$0xff] %v20309_v58 }
 0x3b6   : > { %14948 = vmatmul.mubr.msk.f32.gmra.mrb[210].mxu1 %vm1299_vm4, %v12040_v22  ;;  %v20314_v22 = vpop.f32.mrb[85].mxu1 }
 0x3b7   : > { %15529 = vmatmul.mubr.msk.f32.gmra.mrb[72].mxu0 %vm1299_vm4, %v12672_v43  ;;  %14950 = vmatprep.mubr.msk.f32.mxu1 %vm1299_vm4, %v12041_v13  ;;  %v12675_v43 = vld [vmem:[%s24008_s1 + $0x1260] sm:$0xff]  ;;  %24209 = vst [vmem:[#allocation197_spill] sm:$0xff] %v20314_v22  ;;  %v12044_v13 = vld [vmem:[%s24008_s1 + $0xeb8] sm:$0xff]  ;;  %v20329_v58 = vpop.f32.mrb[86].mxu1 }
 0x3b8   : > { %15531 = vmatprep.mubr.msk.f32.mxu0 %vm1299_vm4, %v12673_v53  ;;  %v12676_v53 = vld [vmem:[%s24008_s1 + $0x1268] sm:$0xff]  ;;  %v12045_v22 = vld [vmem:[%s24008_s1 + $0xec0] sm:$0xff]  ;;  %24210 = vst [vmem:[#allocation198_spill] sm:$0xff] %v20329_v58 }
 0x3ba   : > { %14951 = vmatmul.mubr.msk.f32.gmra.mrb[212].mxu1 %vm1299_vm4, %v12042_v39  ;;  %v20334_v39 = vpop.f32.mrb[87].mxu1 }
 0x3bb   : > { %15532 = vmatmul.mubr.msk.f32.gmra.mrb[74].mxu0 %vm1299_vm4, %v12674_v19  ;;  %14953 = vmatprep.mubr.msk.f32.mxu1 %vm1299_vm4, %v12043_v54  ;;  %v12677_v54 = vld [vmem:[%s24008_s1 + $0x1270] sm:$0xff]  ;;  %24211 = vst [vmem:[#allocation199_spill] sm:$0xff] %v20334_v39  ;;  %v12046_v19 = vld [vmem:[%s24008_s1 + $0xec8] sm:$0xff]  ;;  %v20349_v58 = vpop.f32.mrb[88].mxu1 }
 0x3bc   : > { %15534 = vmatprep.mubr.msk.f32.mxu0 %vm1299_vm4, %v12675_v43  ;;  %v12678_v43 = vld [vmem:[%s24008_s1 + $0x1278] sm:$0xff]  ;;  %v12047_v39 = vld [vmem:[%s24008_s1 + $0xed0] sm:$0xff]  ;;  %24212 = vst [vmem:[#allocation200_spill] sm:$0xff] %v20349_v58 }
 0x3be   : > { %14954 = vmatmul.mubr.msk.f32.gmra.mrb[214].mxu1 %vm1299_vm4, %v12044_v13  ;;  %v20354_v13 = vpop.f32.mrb[89].mxu1 }
 0x3bf   : > { %15535 = vmatmul.mubr.msk.f32.gmra.mrb[76].mxu0 %vm1299_vm4, %v12676_v53  ;;  %14956 = vmatprep.mubr.msk.f32.mxu1 %vm1299_vm4, %v12045_v22  ;;  %v12679_v22 = vld [vmem:[%s24008_s1 + $0x1280] sm:$0xff]  ;;  %24213 = vst [vmem:[#allocation201_spill] sm:$0xff] %v20354_v13  ;;  %v12048_v53 = vld [vmem:[%s24008_s1 + $0xed8] sm:$0xff]  ;;  %v20369_v58 = vpop.f32.mrb[90].mxu1 }
 0x3c0   : > { %15537 = vmatprep.mubr.msk.f32.mxu0 %vm1299_vm4, %v12677_v54  ;;  %v12680_v54 = vld [vmem:[%s24008_s1 + $0x1288] sm:$0xff]  ;;  %v12049_v13 = vld [vmem:[%s24008_s1 + $0xee0] sm:$0xff]  ;;  %24214 = vst [vmem:[#allocation202_spill] sm:$0xff] %v20369_v58 }
 0x3c2   : > { %14957 = vmatmul.mubr.msk.f32.gmra.mrb[216].mxu1 %vm1299_vm4, %v12046_v19  ;;  %v20374_v19 = vpop.f32.mrb[91].mxu1 }
 0x3c3   : > { %15538 = vmatmul.mubr.msk.f32.gmra.mrb[78].mxu0 %vm1299_vm4, %v12678_v43  ;;  %14959 = vmatprep.mubr.msk.f32.mxu1 %vm1299_vm4, %v12047_v39  ;;  %v12681_v39 = vld [vmem:[%s24008_s1 + $0x1290] sm:$0xff]  ;;  %24215 = vst [vmem:[#allocation203_spill] sm:$0xff] %v20374_v19  ;;  %v12050_v43 = vld [vmem:[%s24008_s1 + $0xee8] sm:$0xff]  ;;  %v20389_v58 = vpop.f32.mrb[92].mxu1 }
 0x3c4   : > { %15540 = vmatprep.mubr.msk.f32.mxu0 %vm1299_vm4, %v12679_v22  ;;  %v12682_v22 = vld [vmem:[%s24008_s1 + $0x1298] sm:$0xff]  ;;  %v12051_v19 = vld [vmem:[%s24008_s1 + $0xef0] sm:$0xff]  ;;  %24216 = vst [vmem:[#allocation204_spill] sm:$0xff] %v20389_v58 }
 0x3c6   : > { %14960 = vmatmul.mubr.msk.f32.gmra.mrb[218].mxu1 %vm1299_vm4, %v12048_v53  ;;  %v20394_v53 = vpop.f32.mrb[93].mxu1 }
 0x3c7   : > { %15541 = vmatmul.mubr.msk.f32.gmra.mrb[80].mxu0 %vm1299_vm4, %v12680_v54  ;;  %14962 = vmatprep.mubr.msk.f32.mxu1 %vm1299_vm4, %v12049_v13  ;;  %v12683_v13 = vld [vmem:[%s24008_s1 + $0x12a0] sm:$0xff]  ;;  %24217 = vst [vmem:[#allocation205_spill] sm:$0xff] %v20394_v53  ;;  %v12052_v54 = vld [vmem:[%s24008_s1 + $0xef8] sm:$0xff]  ;;  %v20409_v58 = vpop.f32.mrb[94].mxu1 }
 0x3c8   : > { %15543 = vmatprep.mubr.msk.f32.mxu0 %vm1299_vm4, %v12681_v39  ;;  %v12684_v39 = vld [vmem:[%s24008_s1 + $0x12a8] sm:$0xff]  ;;  %v12053_v53 = vld [vmem:[%s24008_s1 + $0xf00] sm:$0xff]  ;;  %24218 = vst [vmem:[#allocation206_spill] sm:$0xff] %v20409_v58 }
 0x3ca   : > { %14963 = vmatmul.mubr.msk.f32.gmra.mrb[220].mxu1 %vm1299_vm4, %v12050_v43  ;;  %v20414_v43 = vpop.f32.mrb[95].mxu1 }
 0x3cb   : > { %15544 = vmatmul.mubr.msk.f32.gmra.mrb[82].mxu0 %vm1299_vm4, %v12682_v22  ;;  %14965 = vmatprep.mubr.msk.f32.mxu1 %vm1299_vm4, %v12051_v19  ;;  %v12685_v19 = vld [vmem:[%s24008_s1 + $0x12b0] sm:$0xff]  ;;  %24219 = vst [vmem:[#allocation207_spill] sm:$0xff] %v20414_v43  ;;  %v12054_v22 = vld [vmem:[%s24008_s1 + $0xf08] sm:$0xff]  ;;  %v20429_v58 = vpop.f32.mrb[96].mxu1 }
 0x3cc   : > { %15546 = vmatprep.mubr.msk.f32.mxu0 %vm1299_vm4, %v12683_v13  ;;  %v12686_v13 = vld [vmem:[%s24008_s1 + $0x12b8] sm:$0xff]  ;;  %v12055_v43 = vld [vmem:[%s24008_s1 + $0xf10] sm:$0xff]  ;;  %24220 = vst [vmem:[#allocation208_spill] sm:$0xff] %v20429_v58 }
 0x3ce   : > { %14966 = vmatmul.mubr.msk.f32.gmra.mrb[222].mxu1 %vm1299_vm4, %v12052_v54  ;;  %v20434_v54 = vpop.f32.mrb[97].mxu1 }
 0x3cf   : > { %15547 = vmatmul.mubr.msk.f32.gmra.mrb[84].mxu0 %vm1299_vm4, %v12684_v39  ;;  %14968 = vmatprep.mubr.msk.f32.mxu1 %vm1299_vm4, %v12053_v53  ;;  %v12687_v53 = vld [vmem:[%s24008_s1 + $0x12c0] sm:$0xff]  ;;  %24221 = vst [vmem:[#allocation209_spill] sm:$0xff] %v20434_v54  ;;  %v12056_v39 = vld [vmem:[%s24008_s1 + $0xf18] sm:$0xff]  ;;  %v20449_v58 = vpop.f32.mrb[98].mxu1 }
 0x3d0   : > { %15549 = vmatprep.mubr.msk.f32.mxu0 %vm1299_vm4, %v12685_v19  ;;  %v12688_v19 = vld [vmem:[%s24008_s1 + $0x12c8] sm:$0xff]  ;;  %v12057_v54 = vld [vmem:[%s24008_s1 + $0xf20] sm:$0xff]  ;;  %24222 = vst [vmem:[#allocation210_spill] sm:$0xff] %v20449_v58 }
 0x3d2   : > { %14969 = vmatmul.mubr.msk.f32.gmra.mrb[224].mxu1 %vm1299_vm4, %v12054_v22  ;;  %v20454_v22 = vpop.f32.mrb[99].mxu1 }
 0x3d3   : > { %15550 = vmatmul.mubr.msk.f32.gmra.mrb[86].mxu0 %vm1299_vm4, %v12686_v13  ;;  %14971 = vmatprep.mubr.msk.f32.mxu1 %vm1299_vm4, %v12055_v43  ;;  %v12689_v43 = vld [vmem:[%s24008_s1 + $0x12d0] sm:$0xff]  ;;  %24223 = vst [vmem:[#allocation211_spill] sm:$0xff] %v20454_v22  ;;  %v12058_v13 = vld [vmem:[%s24008_s1 + $0xf28] sm:$0xff]  ;;  %v20469_v58 = vpop.f32.mrb[100].mxu1 }
 0x3d4   : > { %15552 = vmatprep.mubr.msk.f32.mxu0 %vm1299_vm4, %v12687_v53  ;;  %v12690_v53 = vld [vmem:[%s24008_s1 + $0x12d8] sm:$0xff]  ;;  %v12059_v22 = vld [vmem:[%s24008_s1 + $0xf30] sm:$0xff]  ;;  %24224 = vst [vmem:[#allocation212_spill] sm:$0xff] %v20469_v58 }
 0x3d6   : > { %14972 = vmatmul.mubr.msk.f32.gmra.mrb[226].mxu1 %vm1299_vm4, %v12056_v39  ;;  %v20474_v39 = vpop.f32.mrb[101].mxu1 }
 0x3d7   : > { %15553 = vmatmul.mubr.msk.f32.gmra.mrb[88].mxu0 %vm1299_vm4, %v12688_v19  ;;  %14974 = vmatprep.mubr.msk.f32.mxu1 %vm1299_vm4, %v12057_v54  ;;  %v12691_v54 = vld [vmem:[%s24008_s1 + $0x12e0] sm:$0xff]  ;;  %24225 = vst [vmem:[#allocation213_spill] sm:$0xff] %v20474_v39  ;;  %v12060_v19 = vld [vmem:[%s24008_s1 + $0xf38] sm:$0xff]  ;;  %v20489_v58 = vpop.f32.mrb[102].mxu1 }
 0x3d8   : > { %15555 = vmatprep.mubr.msk.f32.mxu0 %vm1299_vm4, %v12689_v43  ;;  %v12692_v43 = vld [vmem:[%s24008_s1 + $0x12e8] sm:$0xff]  ;;  %v12061_v39 = vld [vmem:[%s24008_s1 + $0xf40] sm:$0xff]  ;;  %24226 = vst [vmem:[#allocation214_spill] sm:$0xff] %v20489_v58 }
 0x3da   : > { %14975 = vmatmul.mubr.msk.f32.gmra.mrb[228].mxu1 %vm1299_vm4, %v12058_v13  ;;  %v20494_v13 = vpop.f32.mrb[103].mxu1 }
 0x3db   : > { %15556 = vmatmul.mubr.msk.f32.gmra.mrb[90].mxu0 %vm1299_vm4, %v12690_v53  ;;  %14977 = vmatprep.mubr.msk.f32.mxu1 %vm1299_vm4, %v12059_v22  ;;  %v12693_v22 = vld [vmem:[%s24008_s1 + $0x12f0] sm:$0xff]  ;;  %24227 = vst [vmem:[#allocation215_spill] sm:$0xff] %v20494_v13  ;;  %v12062_v53 = vld [vmem:[%s24008_s1 + $0xf48] sm:$0xff]  ;;  %v20509_v58 = vpop.f32.mrb[104].mxu1 }
 0x3dc   : > { %15558 = vmatprep.mubr.msk.f32.mxu0 %vm1299_vm4, %v12691_v54  ;;  %v12694_v54 = vld [vmem:[%s24008_s1 + $0x12f8] sm:$0xff]  ;;  %v12063_v13 = vld [vmem:[%s24008_s1 + $0xf50] sm:$0xff]  ;;  %24228 = vst [vmem:[#allocation216_spill] sm:$0xff] %v20509_v58 }
 0x3de   : > { %14978 = vmatmul.mubr.msk.f32.gmra.mrb[230].mxu1 %vm1299_vm4, %v12060_v19  ;;  %v20514_v19 = vpop.f32.mrb[105].mxu1 }
 0x3df   : > { %15559 = vmatmul.mubr.msk.f32.gmra.mrb[92].mxu0 %vm1299_vm4, %v12692_v43  ;;  %14980 = vmatprep.mubr.msk.f32.mxu1 %vm1299_vm4, %v12061_v39  ;;  %v12695_v39 = vld [vmem:[%s24008_s1 + $0x1300] sm:$0xff]  ;;  %24229 = vst [vmem:[#allocation217_spill] sm:$0xff] %v20514_v19  ;;  %v12064_v43 = vld [vmem:[%s24008_s1 + $0xf58] sm:$0xff]  ;;  %v20529_v58 = vpop.f32.mrb[106].mxu1 }
 0x3e0   : > { %15561 = vmatprep.mubr.msk.f32.mxu0 %vm1299_vm4, %v12693_v22  ;;  %v12696_v22 = vld [vmem:[%s24008_s1 + $0x1308] sm:$0xff]  ;;  %v12065_v19 = vld [vmem:[%s24008_s1 + $0xf60] sm:$0xff]  ;;  %24230 = vst [vmem:[#allocation218_spill] sm:$0xff] %v20529_v58 }
 0x3e2   : > { %14981 = vmatmul.mubr.msk.f32.gmra.mrb[232].mxu1 %vm1299_vm4, %v12062_v53  ;;  %v20534_v53 = vpop.f32.mrb[107].mxu1 }
 0x3e3   : > { %15562 = vmatmul.mubr.msk.f32.gmra.mrb[94].mxu0 %vm1299_vm4, %v12694_v54  ;;  %14983 = vmatprep.mubr.msk.f32.mxu1 %vm1299_vm4, %v12063_v13  ;;  %v12697_v13 = vld [vmem:[%s24008_s1 + $0x1310] sm:$0xff]  ;;  %24231 = vst [vmem:[#allocation219_spill] sm:$0xff] %v20534_v53  ;;  %v12066_v54 = vld [vmem:[%s24008_s1 + $0xf68] sm:$0xff]  ;;  %v20549_v58 = vpop.f32.mrb[108].mxu1 }
 0x3e4   : > { %15564 = vmatprep.mubr.msk.f32.mxu0 %vm1299_vm4, %v12695_v39  ;;  %v12698_v39 = vld [vmem:[%s24008_s1 + $0x1318] sm:$0xff]  ;;  %v12067_v53 = vld [vmem:[%s24008_s1 + $0xf70] sm:$0xff]  ;;  %24232 = vst [vmem:[#allocation220_spill] sm:$0xff] %v20549_v58 }
 0x3e6   : > { %14984 = vmatmul.mubr.msk.f32.gmra.mrb[234].mxu1 %vm1299_vm4, %v12064_v43  ;;  %v20554_v43 = vpop.f32.mrb[109].mxu1 }
 0x3e7   : > { %15565 = vmatmul.mubr.msk.f32.gmra.mrb[96].mxu0 %vm1299_vm4, %v12696_v22  ;;  %14986 = vmatprep.mubr.msk.f32.mxu1 %vm1299_vm4, %v12065_v19  ;;  %v12699_v19 = vld [vmem:[%s24008_s1 + $0x1320] sm:$0xff]  ;;  %24233 = vst [vmem:[#allocation221_spill] sm:$0xff] %v20554_v43  ;;  %v12068_v22 = vld [vmem:[%s24008_s1 + $0xf78] sm:$0xff]  ;;  %v20569_v58 = vpop.f32.mrb[110].mxu1 }
 0x3e8   : > { %15567 = vmatprep.mubr.msk.f32.mxu0 %vm1299_vm4, %v12697_v13  ;;  %v12700_v13 = vld [vmem:[%s24008_s1 + $0x1328] sm:$0xff]  ;;  %v12069_v43 = vld [vmem:[%s24008_s1 + $0xf80] sm:$0xff]  ;;  %24234 = vst [vmem:[#allocation222_spill] sm:$0xff] %v20569_v58 }
 0x3ea   : > { %14987 = vmatmul.mubr.msk.f32.gmra.mrb[236].mxu1 %vm1299_vm4, %v12066_v54  ;;  %v20574_v54 = vpop.f32.mrb[111].mxu1 }
 0x3eb   : > { %15568 = vmatmul.mubr.msk.f32.gmra.mrb[98].mxu0 %vm1299_vm4, %v12698_v39  ;;  %14989 = vmatprep.mubr.msk.f32.mxu1 %vm1299_vm4, %v12067_v53  ;;  %v12701_v53 = vld [vmem:[%s24008_s1 + $0x1330] sm:$0xff]  ;;  %24235 = vst [vmem:[#allocation223_spill] sm:$0xff] %v20574_v54  ;;  %v12070_v39 = vld [vmem:[%s24008_s1 + $0xf88] sm:$0xff]  ;;  %v20589_v58 = vpop.f32.mrb[112].mxu1 }
 0x3ec   : > { %15570 = vmatprep.mubr.msk.f32.mxu0 %vm1299_vm4, %v12699_v19  ;;  %v12702_v19 = vld [vmem:[%s24008_s1 + $0x1338] sm:$0xff]  ;;  %v12071_v54 = vld [vmem:[%s24008_s1 + $0xf90] sm:$0xff]  ;;  %24236 = vst [vmem:[#allocation224_spill] sm:$0xff] %v20589_v58 }
 0x3ee   : > { %14990 = vmatmul.mubr.msk.f32.gmra.mrb[238].mxu1 %vm1299_vm4, %v12068_v22  ;;  %v20594_v22 = vpop.f32.mrb[113].mxu1 }
 0x3ef   : > { %15571 = vmatmul.mubr.msk.f32.gmra.mrb[100].mxu0 %vm1299_vm4, %v12700_v13  ;;  %14992 = vmatprep.mubr.msk.f32.mxu1 %vm1299_vm4, %v12069_v43  ;;  %v12703_v43 = vld [vmem:[%s24008_s1 + $0x1340] sm:$0xff]  ;;  %24237 = vst [vmem:[#allocation225_spill] sm:$0xff] %v20594_v22  ;;  %v12072_v13 = vld [vmem:[%s24008_s1 + $0xf98] sm:$0xff]  ;;  %v20609_v58 = vpop.f32.mrb[114].mxu1 }
 0x3f0   : > { %15573 = vmatprep.mubr.msk.f32.mxu0 %vm1299_vm4, %v12701_v53  ;;  %v12704_v53 = vld [vmem:[%s24008_s1 + $0x1348] sm:$0xff]  ;;  %v12073_v22 = vld [vmem:[%s24008_s1 + $0xfa0] sm:$0xff]  ;;  %24238 = vst [vmem:[#allocation226_spill] sm:$0xff] %v20609_v58 }
 0x3f2   : > { %14993 = vmatmul.mubr.msk.f32.gmra.mrb[240].mxu1 %vm1299_vm4, %v12070_v39  ;;  %v20614_v39 = vpop.f32.mrb[115].mxu1 }
 0x3f3   : > { %15574 = vmatmul.mubr.msk.f32.gmra.mrb[102].mxu0 %vm1299_vm4, %v12702_v19  ;;  %14995 = vmatprep.mubr.msk.f32.mxu1 %vm1299_vm4, %v12071_v54  ;;  %v12705_v54 = vld [vmem:[%s24008_s1 + $0x1350] sm:$0xff]  ;;  %24239 = vst [vmem:[#allocation227_spill] sm:$0xff] %v20614_v39  ;;  %v12074_v19 = vld [vmem:[%s24008_s1 + $0xfa8] sm:$0xff]  ;;  %v20629_v58 = vpop.f32.mrb[116].mxu1 }
 0x3f4   : > { %15576 = vmatprep.mubr.msk.f32.mxu0 %vm1299_vm4, %v12703_v43  ;;  %v12706_v43 = vld [vmem:[%s24008_s1 + $0x1358] sm:$0xff]  ;;  %v12075_v39 = vld [vmem:[%s24008_s1 + $0xfb0] sm:$0xff]  ;;  %24240 = vst [vmem:[#allocation228_spill] sm:$0xff] %v20629_v58 }
 0x3f5   : > { %v12076_v58 = vld [vmem:[%s24008_s1 + $0xfb8] sm:$0xff] }
 0x3f6   : > { %14996 = vmatmul.mubr.msk.f32.gmra.mrb[242].mxu1 %vm1299_vm4, %v12072_v13  ;;  %v20634_v13 = vpop.f32.mrb[117].mxu1 }
 0x3f7   : > { %15577 = vmatmul.mubr.msk.f32.gmra.mrb[104].mxu0 %vm1299_vm4, %v12704_v53  ;;  %14998 = vmatprep.mubr.msk.f32.mxu1 %vm1299_vm4, %v12073_v22  ;;  %v12707_v22 = vld [vmem:[%s24008_s1 + $0x1360] sm:$0xff]  ;;  %24241 = vst [vmem:[#allocation229_spill] sm:$0xff] %v20634_v13  ;;  %v12708_v13 = vld [vmem:[%s24008_s1 + $0x1368] sm:$0xff] }
 0x3f8   : > { %15579 = vmatprep.mubr.msk.f32.mxu0 %vm1299_vm4, %v12705_v54 }
 0x3fa   : > { %v15422_v53 = vpop.f32.mrb[0].mxu0  ;;  %14999 = vmatmul.mubr.msk.f32.gmra.mrb[244].mxu1 %vm1299_vm4, %v12074_v19  ;;  %v20651_v19 = vpop.f32.mrb[118].mxu1 }
 0x3fb   : > { %v16280_v54 = vadd.f32 %v15422_v53, %v19126_v11  ;;  %v6654_v41 = vpop.f32.mrb[1].mxu0  ;;  %15580 = vmatmul.mubr.msk.f32.gmra.mrb[106].mxu0 %vm1299_vm4, %v12706_v43  ;;  %15001 = vmatprep.mubr.msk.f32.mxu1 %vm1299_vm4, %v12075_v39  ;;  %v12077_v11 = vld [vmem:[%s24008_s1 + $0xfc0] sm:$0xff]  ;;  %24242 = vst [vmem:[#allocation230_spill] sm:$0xff] %v20651_v19  ;;  %v12709_v43 = vld [vmem:[%s24008_s1 + $0x1370] sm:$0xff]  ;;  %v20657_v53 = vpop.f32.mrb[119].mxu1 }
 0x3fc   : > { %v16281_v35 = vadd.f32 %v6654_v41, %v19134_v2  ;;  %15582 = vmatprep.mubr.msk.f32.mxu0 %vm1299_vm4, %v12707_v22  ;;  %24243 = vst [vmem:[#allocation231_spill] sm:$0xff] %v20657_v53 }
 0x3fd   : > { %v9470_v39 = vadd.f32 %v16280_v54, %v17680_v40  ;;  %v12078_v40 = vld [vmem:[%s24008_s1 + $0xfc8] sm:$0xff] }
 0x3fe   : > { %v9469_v2 = vadd.f32 %v16281_v35, %v17654_v32  ;;  %v15425_v41 = vpop.f32.mrb[2].mxu0  ;;  %15002 = vmatmul.mubr.msk.f32.gmra.mrb[246].mxu1 %vm1299_vm4, %v12076_v58  ;;  %v12710_v32 = vld [vmem:[%s24008_s1 + $0x1378] sm:$0xff]  ;;  %v20675_v35 = vpop.f32.mrb[120].mxu1 }
 0x3ff   : > { %v9726_v22 = vmax.f32 %v9470_v39, 1e-06  ;;  %v16282_v44 = vadd.f32 %v15425_v41, %v19152_v49  ;;  %v6664_v60 = vpop.f32.mrb[3].mxu0  ;;  %15583 = vmatmul.mubr.msk.f32.gmra.mrb[108].mxu0 %vm1299_vm4, %v12708_v13  ;;  %15004 = vmatprep.mubr.msk.f32.mxu1 %vm1299_vm4, %v12077_v11  ;;  %v12079_v49 = vld [vmem:[%s24008_s1 + $0xfd0] sm:$0xff]  ;;  %24244 = vst [vmem:[#allocation232_spill] sm:$0xff] %v20675_v35  ;;  %v12711_v11 = vld [vmem:[%s24008_s1 + $0x1380] sm:$0xff] }
 0x400   : > { %v9725_v54 = vmax.f32 %v9469_v2, 1e-06  ;;  %v16283_v53 = vadd.f32 %v6664_v60, %v19162_v15  ;;  %15585 = vmatprep.mubr.msk.f32.mxu0 %vm1299_vm4, %v12709_v43  ;;  %v20681_v60 = vpop.f32.mrb[121].mxu1 }
 0x401   : > { %v9982_v58 = vmul.f32 %v9726_v22, %v9726_v22  ;;  %v9472_v13 = vadd.f32 %v16282_v44, %v17732_v56  ;;  %v12080_v56 = vld [vmem:[%s24008_s1 + $0xfd8] sm:$0xff] }
 0x402   : > { %v9981_v15 = vmul.f32 %v9725_v54, %v9725_v54  ;;  %v9471_v39 = vadd.f32 %v16283_v53, %v17687_v42  ;;  %v15428_v43 = vpop.f32.mrb[4].mxu0  ;;  %15005 = vmatmul.mubr.msk.f32.gmra.mrb[248].mxu1 %vm1299_vm4, %v12078_v40  ;;  %v20703_v40 = vpop.f32.mrb[122].mxu1 }
 0x403   : > { %v20685_v2 = vmul.f32 %v9982_v58, %v9726_v22  ;;  %v9728_v41 = vmax.f32 %v9472_v13, 1e-06  ;;  %v16284_v35 = vadd.f32 %v15428_v43, %v19182_v10  ;;  %v6674_v19 = vpop.f32.mrb[5].mxu0  ;;  %15586 = vmatmul.mubr.msk.f32.gmra.mrb[110].mxu0 %vm1299_vm4, %v12710_v32  ;;  %15007 = vmatprep.mubr.msk.f32.mxu1 %vm1299_vm4, %v12079_v49  ;;  %v12712_v10 = vld [vmem:[%s24008_s1 + $0x1388] sm:$0xff]  ;;  %v12081_v22 = vld [vmem:[%s24008_s1 + $0xfe0] sm:$0xff] }
 0x404   : > { %v20693_v44 = vmul.f32 %v9981_v15, %v9725_v54  ;;  %v9727_v42 = vmax.f32 %v9471_v39, 1e-06  ;;  %v16285_v53 = vadd.f32 %v6674_v19, %v19190_v52  ;;  %15588 = vmatprep.mubr.msk.f32.mxu0 %vm1299_vm4, %v12711_v11  ;;  %v12713_v54 = vld [vmem:[%s24008_s1 + $0x1390] sm:$0xff]  ;;  %v20709_v52 = vpop.f32.mrb[123].mxu1  ;;  %v12082_v43 = vld [vmem:[%s24008_s1 + $0xfe8] sm:$0xff] }
 0x405   : > { %v9984_v32 = vmul.f32 %v9728_v41, %v9728_v41  ;;  %v9474_v49 = vadd.f32 %v16284_v35, %v17784_v7 }
 0x406   : > { %v9983_v58 = vmul.f32 %v9727_v42, %v9727_v42  ;;  %v9473_v13 = vadd.f32 %v16285_v53, %v17739_v5  ;;  %v15431_v11 = vpop.f32.mrb[6].mxu0  ;;  %15008 = vmatmul.mubr.msk.f32.gmra.mrb[250].mxu1 %vm1299_vm4, %v12080_v56  ;;  %v20733_v56 = vpop.f32.mrb[124].mxu1 }
 0x407   : > { %v20715_v15 = vmul.f32 %v9984_v32, %v9728_v41  ;;  %v9730_v39 = vmax.f32 %v9474_v49, 1e-06  ;;  %v16286_v7 = vadd.f32 %v15431_v11, %v19212_v20  ;;  %v6684_v35 = vpop.f32.mrb[7].mxu0  ;;  %15589 = vmatmul.mubr.msk.f32.gmra.mrb[112].mxu0 %vm1299_vm4, %v12712_v10  ;;  %15010 = vmatprep.mubr.msk.f32.mxu1 %vm1299_vm4, %v12081_v22  ;;  %v12714_v20 = vld [vmem:[%s24008_s1 + $0x1398] sm:$0xff]  ;;  %v12083_v41 = vld [vmem:[%s24008_s1 + $0xff0] sm:$0xff] }
 0x408   : > { %v20723_v19 = vmul.f32 %v9983_v58, %v9727_v42  ;;  %v9729_v5 = vmax.f32 %v9473_v13, 1e-06  ;;  %v16287_v53 = vadd.f32 %v6684_v35, %v19220_v38  ;;  %15591 = vmatprep.mubr.msk.f32.mxu0 %vm1299_vm4, %v12713_v54  ;;  %v12715_v42 = vld [vmem:[%s24008_s1 + $0x13a0] sm:$0xff]  ;;  %v20739_v38 = vpop.f32.mrb[125].mxu1  ;;  %v12084_v35 = vld [vmem:[%s24008_s1 + $0xff8] sm:$0xff] }
 0x409   : > { %v9986_v10 = vmul.f32 %v9730_v39, %v9730_v39  ;;  %v9476_v22 = vadd.f32 %v16286_v7, %v17836_v26 }
 0x40a   : > { %v9985_v49 = vmul.f32 %v9729_v5, %v9729_v5  ;;  %v9475_v54 = vadd.f32 %v16287_v53, %v17791_v8  ;;  %v15434_v58 = vpop.f32.mrb[8].mxu0  ;;  %15011 = vmatmul.mubr.msk.f32.gmra.mrb[252].mxu1 %vm1299_vm4, %v12082_v43  ;;  %v20763_v43 = vpop.f32.mrb[126].mxu1 }
 0x40b   : > { %v20745_v13 = vmul.f32 %v9986_v10, %v9730_v39  ;;  %v9732_v11 = vmax.f32 %v9476_v22, 1e-06  ;;  %v16288_v26 = vadd.f32 %v15434_v58, %v19238_v36  ;;  %v6694_v7 = vpop.f32.mrb[9].mxu0  ;;  %15592 = vmatmul.mubr.msk.f32.gmra.mrb[114].mxu0 %vm1299_vm4, %v12714_v20  ;;  %15013 = vmatprep.mubr.msk.f32.mxu1 %vm1299_vm4, %v12083_v41  ;;  %v12716_v36 = vld [vmem:[%s24008_s1 + $0x13a8] sm:$0xff]  ;;  %v934_v39 = vld [vmem:[%s24008_s1 + $0x630] sm:$0xff] }
 0x40c   : > { %v20753_v32 = vmul.f32 %v9985_v49, %v9729_v5  ;;  %v9731_v8 = vmax.f32 %v9475_v54, 1e-06  ;;  %v16289_v53 = vadd.f32 %v6694_v7, %v19248_v21  ;;  %15594 = vmatprep.mubr.msk.f32.mxu0 %vm1299_vm4, %v12715_v42  ;;  %v12717_v5 = vld [vmem:[%s24008_s1 + $0x13b0] sm:$0xff]  ;;  %v20769_v21 = vpop.f32.mrb[127].mxu1  ;;  %v935_v7 = vld [vmem:[%s24008_s1 + $0x638] sm:$0xff] }
 0x40d   : > { %v9988_v20 = vmul.f32 %v9732_v11, %v9732_v11  ;;  %v9478_v41 = vadd.f32 %v16288_v26, %v17888_v47 }
 0x40e   : > { %v9987_v22 = vmul.f32 %v9731_v8, %v9731_v8  ;;  %v9477_v42 = vadd.f32 %v16289_v53, %v17843_v28  ;;  %v15437_v49 = vpop.f32.mrb[10].mxu0  ;;  %15014 = vmatmul.mubr.msk.f32.gmra.mrb[254].mxu1 %vm1299_vm4, %v12084_v35  ;;  %v20793_v35 = vpop.f32.mrb[128].mxu1 }
 0x40f   : > { %v20775_v54 = vmul.f32 %v9988_v20, %v9732_v11  ;;  %v9734_v58 = vmax.f32 %v9478_v41, 1e-06  ;;  %v16290_v47 = vadd.f32 %v15437_v49, %v19268_v31  ;;  %v6704_v26 = vpop.f32.mrb[11].mxu0  ;;  %15595 = vmatmul.mubr.msk.f32.gmra.mrb[116].mxu0 %vm1299_vm4, %v12716_v36  ;;  %15323 = vmatprep.mubr.msk.f32.mxu1 %vm1299_vm4, %v934_v39  ;;  %v12718_v31 = vld [vmem:[%s24008_s1 + $0x13b8] sm:$0xff]  ;;  %v936_v11 = vld [vmem:[%s24008_s1 + $0x640] sm:$0xff] }
 0x410   : > { %v20783_v10 = vmul.f32 %v9987_v22, %v9731_v8  ;;  %v9733_v28 = vmax.f32 %v9477_v42, 1e-06  ;;  %v16291_v53 = vadd.f32 %v6704_v26, %v19276_v46  ;;  %15597 = vmatprep.mubr.msk.f32.mxu0 %vm1299_vm4, %v12717_v5  ;;  %v12719_v8 = vld [vmem:[%s24008_s1 + $0x13c0] sm:$0xff]  ;;  %v20799_v46 = vpop.f32.mrb[129].mxu1  ;;  %v937_v26 = vld [vmem:[%s24008_s1 + $0x648] sm:$0xff] }
 0x411   : > { %v9990_v36 = vmul.f32 %v9734_v58, %v9734_v58  ;;  %v9480_v39 = vadd.f32 %v16290_v47, %v17940_v3 }
 0x412   : > { %v9989_v41 = vmul.f32 %v9733_v28, %v9733_v28  ;;  %v9479_v5 = vadd.f32 %v16291_v53, %v17895_v51  ;;  %v15440_v22 = vpop.f32.mrb[12].mxu0  ;;  %15324 = vmatmul.mubr.msk.f32.vlgmr.msra.gmra.mrb[198].mxu1 %vm1299_vm4, %v935_v7  ;;  %v20823_v7 = vpop.f32.mrb[130].mxu1 }
 0x413   : > { %v20805_v42 = vmul.f32 %v9990_v36, %v9734_v58  ;;  %v9736_v49 = vmax.f32 %v9480_v39, 1e-06  ;;  %v16292_v3 = vadd.f32 %v15440_v22, %v19298_v9  ;;  %v6714_v47 = vpop.f32.mrb[13].mxu0  ;;  %15598 = vmatmul.mubr.msk.f32.gmra.mrb[118].mxu0 %vm1299_vm4, %v12718_v31  ;;  %15326 = vmatprep.mubr.msk.f32.mxu1 %vm1299_vm4, %v936_v11  ;;  %v12720_v9 = vld [vmem:[%s24008_s1 + $0x13c8] sm:$0xff]  ;;  %v938_v58 = vld [vmem:[%s24008_s1 + $0x650] sm:$0xff] }
 0x414   : > { %v20813_v20 = vmul.f32 %v9989_v41, %v9733_v28  ;;  %v9735_v51 = vmax.f32 %v9479_v5, 1e-06  ;;  %v16293_v53 = vadd.f32 %v6714_v47, %v19306_v30  ;;  %15600 = vmatprep.mubr.msk.f32.mxu0 %vm1299_vm4, %v12719_v8  ;;  %v12721_v28 = vld [vmem:[%s24008_s1 + $0x13d0] sm:$0xff]  ;;  %v20829_v30 = vpop.f32.mrb[131].mxu1  ;;  %v939_v47 = vld [vmem:[%s24008_s1 + $0x658] sm:$0xff] }
 0x415   : > { %v9992_v31 = vmul.f32 %v9736_v49, %v9736_v49  ;;  %v9482_v11 = vadd.f32 %v16292_v3, %v17992_v29 }
 0x416   : > { %v9991_v39 = vmul.f32 %v9735_v51, %v9735_v51  ;;  %v9481_v8 = vadd.f32 %v16293_v53, %v17947_v6  ;;  %v15443_v41 = vpop.f32.mrb[14].mxu0  ;;  %15327 = vmatmul.mubr.msk.f32.gmra.mrb[200].mxu1 %vm1299_vm4, %v937_v26  ;;  %v20853_v26 = vpop.f32.mrb[132].mxu1 }
 0x417   : > { %v20835_v5 = vmul.f32 %v9992_v31, %v9736_v49  ;;  %v9738_v22 = vmax.f32 %v9482_v11, 1e-06  ;;  %v16294_v29 = vadd.f32 %v15443_v41, %v19324_v12  ;;  %v6724_v3 = vpop.f32.mrb[15].mxu0  ;;  %15601 = vmatmul.mubr.msk.f32.gmra.mrb[120].mxu0 %vm1299_vm4, %v12720_v9  ;;  %15329 = vmatprep.mubr.msk.f32.mxu1 %vm1299_vm4, %v938_v58  ;;  %v12722_v12 = vld [vmem:[%s24008_s1 + $0x13d8] sm:$0xff]  ;;  %v940_v49 = vld [vmem:[%s24008_s1 + $0x660] sm:$0xff]  ;;  %24245 = vst [vmem:[#allocation233_spill] sm:$0xff] %v20853_v26 }
 0x418   : > { %v20843_v36 = vmul.f32 %v9991_v39, %v9735_v51  ;;  %v9737_v6 = vmax.f32 %v9481_v8, 1e-06  ;;  %v16295_v53 = vadd.f32 %v6724_v3, %v19334_v24  ;;  %15603 = vmatprep.mubr.msk.f32.mxu0 %vm1299_vm4, %v12721_v28  ;;  %v12723_v51 = vld [vmem:[%s24008_s1 + $0x13e0] sm:$0xff]  ;;  %v20859_v24 = vpop.f32.mrb[133].mxu1  ;;  %v10493_v8 = vlaneseq  ;;  %v941_v31 = vld [vmem:[%s24008_s1 + $0x668] sm:$0xff] }
 0x419   : > { %v9994_v9 = vmul.f32 %v9738_v22, %v9738_v22  ;;  %v9484_v58 = vadd.f32 %v16294_v29, %v18044_v57  ;;  %24246 = vst [vmem:[#allocation234_spill] sm:$0xff] %v20859_v24 }
 0x41a   : > { %v9993_v11 = vmul.f32 %v9737_v6, %v9737_v6  ;;  %v9483_v28 = vadd.f32 %v16295_v53, %v17999_v33  ;;  %v15446_v39 = vpop.f32.mrb[16].mxu0  ;;  %15330 = vmatmul.mubr.msk.f32.gmra.mrb[202].mxu1 %vm1299_vm4, %v939_v47  ;;  %v20883_v53 = vpop.f32.mrb[134].mxu1 }
 0x41b   : > { %v20865_v41 = vmul.f32 %v9994_v9, %v9738_v22  ;;  %v9740_v3 = vmax.f32 %v9484_v58, 1e-06  ;;  %v16296_v57 = vadd.f32 %v15446_v39, %v19354_v59  ;;  %v6734_v29 = vpop.f32.mrb[17].mxu0  ;;  %15604 = vmatmul.mubr.msk.f32.gmra.mrb[122].mxu0 %vm1299_vm4, %v12722_v12  ;;  %15332 = vmatprep.mubr.msk.f32.mxu1 %vm1299_vm4, %v940_v49  ;;  %v12724_v59 = vld [vmem:[%s24008_s1 + $0x13e8] sm:$0xff]  ;;  %v942_v22 = vld [vmem:[%s24008_s1 + $0x670] sm:$0xff]  ;;  %24247 = vst [vmem:[#allocation235_spill] sm:$0xff] %v20883_v53 }
 0x41c   : > { %v20873_v24 = vmul.f32 %v9993_v11, %v9737_v6  ;;  %v9739_v33 = vmax.f32 %v9483_v28, 1e-06  ;;  %v16297_v47 = vadd.f32 %v6734_v29, %v19362_v55  ;;  %15606 = vmatprep.mubr.msk.f32.mxu0 %vm1299_vm4, %v12723_v51  ;;  %v12725_v6 = vld [vmem:[%s24008_s1 + $0x13f0] sm:$0xff]  ;;  %v20889_v55 = vpop.f32.mrb[135].mxu1  ;;  %v10494_v28 = vand.u32 127, %v10493_v8  ;;  %v943_v9 = vld [vmem:[%s24008_s1 + $0x678] sm:$0xff] }
 0x41d   : > { %v9996_v12 = vmul.f32 %v9740_v3, %v9740_v3  ;;  %v9486_v49 = vadd.f32 %v16296_v57, %v17635_v25  ;;  %24248 = vst [vmem:[#allocation236_spill] sm:$0xff] %v20889_v55  ;;  %v944_v8 = vld [vmem:[%s24008_s1 + $0x680] sm:$0xff] }
 0x41e   : > { %v9995_v58 = vmul.f32 %v9739_v33, %v9739_v33  ;;  %v9485_v51 = vadd.f32 %v16297_v47, %v17628_v23  ;;  %v15449_v11 = vpop.f32.mrb[18].mxu0  ;;  %15333 = vmatmul.mubr.msk.f32.gmra.mrb[204].mxu1 %vm1299_vm4, %v941_v31  ;;  %vm10495_vm11 = vcmp.lt.s32.totalorder %v10494_v28, 17 }
 0x41f   : > { %v20895_v39 = vmul.f32 %v9996_v12, %v9740_v3  ;;  %v9742_v29 = vmax.f32 %v9486_v49, 1e-06  ;;  %v16298_v25 = vadd.f32 %v15449_v11, %v19384_v17  ;;  %v6744_v57 = vpop.f32.mrb[19].mxu0  ;;  %15607 = vmatmul.mubr.msk.f32.gmra.mrb[124].mxu0 %vm1299_vm4, %v12724_v59  ;;  %15335 = vmatprep.mubr.msk.f32.mxu1 %vm1299_vm4, %v942_v22  ;;  %v12726_v17 = vld [vmem:[%s24008_s1 + $0x13f8] sm:$0xff]  ;;  %v20913_v3 = vpop.f32.mrb[136].mxu1  ;;  %vm20944_vm12 = vmpackc.low %vm10495_vm11, %vm10495_vm11 }
 0x420   : > { %v20903_v55 = vmul.f32 %v9995_v58, %v9739_v33  ;;  %v9741_v23 = vmax.f32 %v9485_v51, 1e-06  ;;  %v16299_v31 = vadd.f32 %v6744_v57, %v19392_v4  ;;  %15609 = vmatprep.mubr.msk.f32.mxu0 %vm1299_vm4, %v12725_v6  ;;  %24249 = vst [vmem:[#allocation237_spill] sm:$0xff] %v20913_v3  ;;  %v12727_v33 = vld [vmem:[%s24008_s1 + $0x1400] sm:$0xff]  ;;  %v20919_v4 = vpop.f32.mrb[137].mxu1 }
 0x421   : > { %v9998_v47 = vmul.f32 %v9742_v29, %v9742_v29  ;;  %v9488_v59 = vadd.f32 %v16298_v25, %v17706_v48  ;;  %24250 = vst [vmem:[#allocation238_spill] sm:$0xff] %v20919_v4  ;;  %v945_v25 = vld [vmem:[%s24008_s1 + $0x688] sm:$0xff]  ;;  %v24393_v3 = vld [vmem:[#allocation171_spill] sm:$0xff] }
 0x422   : > { %v9997_v12 = vmul.f32 %v9741_v23, %v9741_v23  ;;  %v9487_v49 = vadd.f32 %v16299_v31, %v17661_v34  ;;  %v15452_v6 = vpop.f32.mrb[20].mxu0  ;;  %15336 = vmatmul.mubr.msk.f32.gmra.mrb[206].mxu1 %vm1299_vm4, %v943_v9  ;;  %v12728_v9 = vld [vmem:[%s24008_s1 + $0x1408] sm:$0xff] }
 0x423   : > { %v10254_v58 = vmul.f32 %v9998_v47, %v9742_v29  ;;  %v9744_v51 = vmax.f32 %v9488_v59, 1e-06  ;;  %v16300_v48 = vadd.f32 %v15452_v6, %v19410_v27  ;;  %v6754_v11 = vpop.f32.mrb[21].mxu0  ;;  %15610 = vmatmul.mubr.msk.f32.gmra.mrb[126].mxu0 %vm1299_vm4, %v12726_v17  ;;  %15338 = vmatprep.mubr.msk.f32.mxu1 %vm1299_vm4, %v944_v8  ;;  %v946_v27 = vld [vmem:[%s24008_s1 + $0x690] sm:$0xff]  ;;  %v20939_v29 = vpop.f32.mrb[138].mxu1 }
 0x424   : > { %v10253_v57 = vmul.f32 %v9997_v12, %v9741_v23  ;;  %v9743_v22 = vmax.f32 %v9487_v49, 1e-06  ;;  %v16301_v34 = vadd.f32 %v6754_v11, %v19420_v62  ;;  %15612 = vmatprep.mubr.msk.f32.mxu0 %vm1299_vm4, %v12727_v33  ;;  %24251 = vst [vmem:[#allocation239_spill] sm:$0xff] %v20939_v29  ;;  %v12729_v62 = vld [vmem:[%s24008_s1 + $0x1410] sm:$0xff]  ;;  %v20951_v8 = vpop.f32.mrb[139].mxu1 }
 0x425   : > { %v10000_v31 = vmul.f32 %v9744_v51, %v9744_v51  ;;  %v9490_v17 = vadd.f32 %v16300_v48, %v17758_v63  ;;  %24254 = vst [vmem:[#allocation240_spill] sm:$0xff] %v20951_v8  ;;  %v947_v48 = vld [vmem:[%s24008_s1 + $0x698] sm:$0xff]  ;;  %v24387_v29 = vld [vmem:[#allocation169_spill] sm:$0xff] }
 0x426   : > { %v15866_v47 = vpack.c.bf16 %v10254_v58, %v10253_v57  ;;  %v9999_v59 = vmul.f32 %v9743_v22, %v9743_v22  ;;  %v9489_v33 = vadd.f32 %v16301_v34, %v17713_v50  ;;  %v15455_v12 = vpop.f32.mrb[22].mxu0  ;;  %15339 = vmatmul.mubr.msk.f32.gmra.mrb[208].mxu1 %vm1299_vm4, %v945_v25  ;;  %v20971_v25 = vpop.f32.mrb[140].mxu1  ;;  %v12731_v34 = vld [vmem:[%s24008_s1 + $0x1420] sm:$0xff]  ;;  %v654_v23 = vld [vmem:[%s24010_s3 + $0x170] sm:$0xff] }
 0x427   : > { %v10256_v63 = vmul.f32 %v10000_v31, %v9744_v51  ;;  %v9746_v28 = vmax.f32 %v9490_v17, 1e-06  ;;  %v16302_v49 = vadd.f32 %v15455_v12, %v19440_v61  ;;  %v6764_v6 = vpop.f32.mrb[23].mxu0  ;;  %15613 = vmatmul.mubr.msk.f32.gmra.mrb[128].mxu0 %vm1299_vm4, %v12728_v9  ;;  %15341 = vmatprep.mubr.msk.f32.mxu1 %vm1299_vm4, %v946_v27  ;;  %v12730_v61 = vld [vmem:[%s24008_s1 + $0x1418] sm:$0xff]  ;;  %v948_v51 = vld [vmem:[%s24008_s1 + $0x6a0] sm:$0xff]  ;;  %24255 = vst [vmem:[#allocation241_spill] sm:$0xff] %v20971_v25 }
 0x428   : > { %v10255_v58 = vmul.f32 %v9999_v59, %v9743_v22  ;;  %v9745_v11 = vmax.f32 %v9489_v33, 1e-06  ;;  %v16303_v50 = vadd.f32 %v6764_v6, %v19448_v1  ;;  %15868 = vmatprep.subr.msk.bf16.mxu1 %vm20944_vm12, %v15866_v47  ;;  %15615 = vmatprep.mubr.msk.f32.mxu0 %vm1299_vm4, %v12729_v62  ;;  %v24256_v1 = vpack.c.bf16 %v20685_v2, %v20693_v44  ;;  %v20982_v9 = vpop.f32.mrb[141].mxu1  ;;  %v949_v59 = vld [vmem:[%s24008_s1 + $0x6a8] sm:$0xff] }
 0x429   : > { %v10002_v57 = vmul.f32 %v9746_v28, %v9746_v28  ;;  %v9492_v22 = vadd.f32 %v16302_v49, %v17810_v14  ;;  %24257 = vst [vmem:[#allocation242_spill] sm:$0xff] %v20982_v9  ;;  %v24381_v25 = vld [vmem:[#allocation165_spill] sm:$0xff] }
 0x42a   : > { %15871 = vmatpush3.bf16.msk.msra.mxu1 %vm20944_vm12, %v24256_v1  ;;  %v15872_v27 = vpack.c.bf16 %v10256_v63, %v10255_v58  ;;  %v10001_v31 = vmul.f32 %v9745_v11, %v9745_v11  ;;  %v9491_v17 = vadd.f32 %v16303_v50, %v17765_v0  ;;  %v15458_v62 = vpop.f32.mrb[24].mxu0  ;;  %v950_v63 = vld [vmem:[%s24008_s1 + $0x6b0] sm:$0xff]  ;;  %v951_v1 = vld [vmem:[%s24008_s1 + $0x6b8] sm:$0xff] }
 0x42b   : > { %15342 = vmatmul.mubr.msk.f32.gmra.mrb[210].mxu1 %vm1299_vm4, %v947_v48  ;;  %v10258_v14 = vmul.f32 %v10002_v57, %v9746_v28  ;;  %v9748_v47 = vmax.f32 %v9492_v22, 1e-06  ;;  %v16304_v2 = vadd.f32 %v15458_v62, %v19470_v16  ;;  %v6774_v44 = vpop.f32.mrb[25].mxu0  ;;  %15616 = vmatmul.mubr.msk.f32.gmra.mrb[130].mxu0 %vm1299_vm4, %v12730_v61  ;;  %v12732_v16 = vld [vmem:[%s24008_s1 + $0x1428] sm:$0xff]  ;;  %v21002_v28 = vpop.f32.mrb[142].mxu1  ;;  %v12733_v48 = vld [vmem:[%s24008_s1 + $0x1430] sm:$0xff] }
 0x42c   : > { %15344 = vmatprep.mubr.msk.f32.mxu1 %vm1299_vm4, %v948_v51  ;;  %v10257_v33 = vmul.f32 %v10001_v31, %v9745_v11  ;;  %v9747_v12 = vmax.f32 %v9491_v17, 1e-06  ;;  %v16305_v0 = vadd.f32 %v6774_v44, %v19478_v45  ;;  %15874 = vmatprep.subr.msk.bf16.mxu1 %vm20944_vm12, %v15872_v27  ;;  %24258 = vst [vmem:[#allocation243_spill] sm:$0xff] %v21002_v28  ;;  %v21013_v58 = vpop.f32.mrb[143].mxu1  ;;  %v24261_v22 = vld [vmem:[#allocation101_spill] sm:$0xff]  ;;  %v24262_v31 = vld [vmem:[#allocation103_spill] sm:$0xff] }
 0x42d   : > { %15618 = vmatprep.mubr.msk.f32.mxu0 %vm1299_vm4, %v12731_v34  ;;  %v10004_v49 = vmul.f32 %v9748_v47, %v9748_v47  ;;  %v9494_v6 = vadd.f32 %v16304_v2, %v17862_v37  ;;  %v24259_v45 = vpack.c.bf16 %v20715_v15, %v20723_v19  ;;  %24260 = vst [vmem:[#allocation244_spill] sm:$0xff] %v21013_v58  ;;  %v12734_v17 = vld [vmem:[%s24008_s1 + $0x1438] sm:$0xff]  ;;  %v952_v62 = vld [vmem:[%s24008_s1 + $0x6c0] sm:$0xff]  ;;  %v24375_v28 = vld [vmem:[#allocation161_spill] sm:$0xff] }
 0x42e   : > { %v15878_v11 = vpack.c.bf16 %v10258_v14, %v10257_v33  ;;  %v10003_v50 = vmul.f32 %v9747_v12, %v9747_v12  ;;  %v9493_v61 = vadd.f32 %v16305_v0, %v17817_v18  ;;  %v15461_v51 = vpop.f32.mrb[26].mxu0  ;;  %v21033_v14 = vpop.f32.mrb[144].mxu1  ;;  %v24264_v2 = vld [vmem:[#allocation7_spill] sm:$0xff] }
 0x42f   : > { %15877 = vmatpush3.bf16.msk.msra.mxu1 %vm20944_vm12, %v24259_v45  ;;  %v10260_v37 = vmul.f32 %v10004_v49, %v9748_v47  ;;  %v9750_v57 = vmax.f32 %v9494_v6, 1e-06  ;;  %v16306_v19 = vadd.f32 %v15461_v51, %v24261_v22  ;;  %v6784_v15 = vpop.f32.mrb[27].mxu0  ;;  %15619 = vmatmul.mubr.msk.f32.gmra.mrb[132].mxu0 %vm1299_vm4, %v12732_v16  ;;  %24263 = vst [vmem:[#allocation101_spill] sm:$0xff] %v21033_v14  ;;  %v12735_v33 = vld [vmem:[%s24008_s1 + $0x1440] sm:$0xff] }
 0x430   : > { %15345 = vmatmul.mubr.msk.f32.gmra.mrb[212].mxu1 %vm1299_vm4, %v949_v59  ;;  %v10259_v34 = vmul.f32 %v10003_v50, %v9747_v12  ;;  %v9749_v27 = vmax.f32 %v9493_v61, 1e-06  ;;  %v16307_v18 = vadd.f32 %v6784_v15, %v24262_v31  ;;  %15880 = vmatprep.subr.msk.bf16.mxu1 %vm20944_vm12, %v15878_v11  ;;  %v24265_v59 = vpack.c.bf16 %v20745_v13, %v20753_v32  ;;  %v21044_v12 = vpop.f32.mrb[145].mxu1  ;;  %v24268_v11 = vld [vmem:[#allocation105_spill] sm:$0xff]  ;;  %v24369_v14 = vld [vmem:[#allocation159_spill] sm:$0xff] }
 0x431   : > { %15347 = vmatprep.mubr.msk.f32.mxu1 %vm1299_vm4, %v950_v63  ;;  %15621 = vmatprep.mubr.msk.f32.mxu0 %vm1299_vm4, %v12733_v48  ;;  %v10006_v47 = vmul.f32 %v9750_v57, %v9750_v57  ;;  %v9496_v44 = vadd.f32 %v16306_v19, %v24264_v2  ;;  %24266 = vst [vmem:[#allocation103_spill] sm:$0xff] %v21044_v12  ;;  %v24267_v63 = vld [vmem:[#allocation6_spill] sm:$0xff]  ;;  %v953_v50 = vld [vmem:[%s24008_s1 + $0x6c8] sm:$0xff]  ;;  %v21064_v15 = vpop.f32.mrb[146].mxu1 }
 0x432   : > { %v15884_v0 = vpack.c.bf16 %v10260_v37, %v10259_v34  ;;  %v10005_v16 = vmul.f32 %v9749_v27, %v9749_v27  ;;  %v9495_v49 = vadd.f32 %v16307_v18, %v24267_v63  ;;  %v15464_v6 = vpop.f32.mrb[28].mxu0  ;;  %v24269_v37 = vld [vmem:[#allocation106_spill] sm:$0xff]  ;;  %24270 = vst [vmem:[#allocation7_spill] sm:$0xff] %v21064_v15  ;;  %v24271_v34 = vld [vmem:[#allocation9_spill] sm:$0xff]  ;;  %v24272_v31 = vpack.c.bf16 %v20775_v54, %v20783_v10  ;;  %v24274_v2 = vld [vmem:[#allocation8_spill] sm:$0xff] }
 0x433   : > { %15883 = vmatpush3.bf16.msk.msra.mxu1 %vm20944_vm12, %v24265_v59  ;;  %v10262_v45 = vmul.f32 %v10006_v47, %v9750_v57  ;;  %v9752_v48 = vmax.f32 %v9496_v44, 1e-06  ;;  %v16308_v32 = vadd.f32 %v15464_v6, %v24268_v11  ;;  %v6794_v13 = vpop.f32.mrb[29].mxu0  ;;  %15622 = vmatmul.mubr.msk.f32.gmra.mrb[134].mxu0 %vm1299_vm4, %v12734_v17  ;;  %v12736_v57 = vld [vmem:[%s24008_s1 + $0x1448] sm:$0xff]  ;;  %v954_v19 = vld [vmem:[%s24008_s1 + $0x6d0] sm:$0xff]  ;;  %v21075_v17 = vpop.f32.mrb[147].mxu1 }
 0x434   : > { %15348 = vmatmul.mubr.msk.f32.gmra.mrb[214].mxu1 %vm1299_vm4, %v951_v1  ;;  %v10261_v61 = vmul.f32 %v10005_v16, %v9749_v27  ;;  %v9751_v51 = vmax.f32 %v9495_v49, 1e-06  ;;  %v16309_v22 = vadd.f32 %v6794_v13, %v24269_v37  ;;  %15886 = vmatprep.subr.msk.bf16.mxu1 %vm20944_vm12, %v15884_v0  ;;  %v12737_v18 = vld [vmem:[%s24008_s1 + $0x1450] sm:$0xff]  ;;  %24273 = vst [vmem:[#allocation6_spill] sm:$0xff] %v21075_v17  ;;  %v955_v63 = vld [vmem:[%s24008_s1 + $0x6d8] sm:$0xff]  ;;  %v21095_v13 = vpop.f32.mrb[148].mxu1 }
 0x435   : > { %15350 = vmatprep.mubr.msk.f32.mxu1 %vm1299_vm4, %v952_v62  ;;  %15624 = vmatprep.mubr.msk.f32.mxu0 %vm1299_vm4, %v12735_v33  ;;  %v10008_v1 = vmul.f32 %v9752_v48, %v9752_v48  ;;  %v9498_v27 = vadd.f32 %v16308_v32, %v24271_v34  ;;  %v24275_v16 = vld [vmem:[#allocation109_spill] sm:$0xff]  ;;  %v956_v32 = vld [vmem:[%s24008_s1 + $0x6e0] sm:$0xff]  ;;  %24277 = vst [vmem:[#allocation105_spill] sm:$0xff] %v21095_v13  ;;  %v24281_v34 = vld [vmem:[#allocation10_spill] sm:$0xff] }
 0x436   : > { %v15890_v62 = vpack.c.bf16 %v10262_v45, %v10261_v61  ;;  %v10007_v47 = vmul.f32 %v9751_v51, %v9751_v51  ;;  %v9497_v44 = vadd.f32 %v16309_v22, %v24274_v2  ;;  %v15467_v59 = vpop.f32.mrb[30].mxu0  ;;  %v24276_v45 = vld [vmem:[#allocation110_spill] sm:$0xff]  ;;  %v24278_v61 = vld [vmem:[#allocation11_spill] sm:$0xff]  ;;  %v24279_v37 = vpack.c.bf16 %v20805_v42, %v20813_v20  ;;  %v957_v2 = vld [vmem:[%s24008_s1 + $0x6e8] sm:$0xff] }
 0x437   : > { %15889 = vmatpush3.bf16.msk.msra.mxu1 %vm20944_vm12, %v24272_v31  ;;  %v10264_v33 = vmul.f32 %v10008_v1, %v9752_v48  ;;  %v9754_v0 = vmax.f32 %v9498_v27, 1e-06  ;;  %v16310_v10 = vadd.f32 %v15467_v59, %v24275_v16  ;;  %v6804_v54 = vpop.f32.mrb[31].mxu0  ;;  %15625 = vmatmul.mubr.msk.f32.gmra.mrb[136].mxu0 %vm1299_vm4, %v12736_v57  ;;  %v12738_v48 = vld [vmem:[%s24008_s1 + $0x1458] sm:$0xff]  ;;  %v12739_v22 = vld [vmem:[%s24008_s1 + $0x1460] sm:$0xff]  ;;  %v21106_v57 = vpop.f32.mrb[149].mxu1 }
 0x438   : > { %15351 = vmatmul.mubr.msk.f32.gmra.mrb[216].mxu1 %vm1299_vm4, %v953_v50  ;;  %v10263_v49 = vmul.f32 %v10007_v47, %v9751_v51  ;;  %v9753_v6 = vmax.f32 %v9497_v44, 1e-06  ;;  %v16311_v11 = vadd.f32 %v6804_v54, %v24276_v45  ;;  %15892 = vmatprep.subr.msk.bf16.mxu1 %vm20944_vm12, %v15890_v62  ;;  %24280 = vst [vmem:[#allocation106_spill] sm:$0xff] %v21106_v57  ;;  %v24282_v47 = vld [vmem:[#allocation111_spill] sm:$0xff]  ;;  %v21126_v54 = vpop.f32.mrb[150].mxu1  ;;  %v24346_v13 = vld [vmem:[#allocation146_spill] sm:$0xff] }
 0x439   : > { %15353 = vmatprep.mubr.msk.f32.mxu1 %vm1299_vm4, %v954_v19  ;;  %15627 = vmatprep.mubr.msk.f32.mxu0 %vm1299_vm4, %v12737_v18  ;;  %v10010_v50 = vmul.f32 %v9754_v0, %v9754_v0  ;;  %v9500_v51 = vadd.f32 %v16310_v10, %v24278_v61  ;;  %v958_v10 = vld [vmem:[%s24008_s1 + $0x6f0] sm:$0xff]  ;;  %24284 = vst [vmem:[#allocation9_spill] sm:$0xff] %v21126_v54 }
 0x43a   : > { %v15896_v19 = vpack.c.bf16 %v10264_v33, %v10263_v49  ;;  %v10009_v1 = vmul.f32 %v9753_v6, %v9753_v6  ;;  %v9499_v27 = vadd.f32 %v16311_v11, %v24281_v34  ;;  %v15470_v31 = vpop.f32.mrb[32].mxu0  ;;  %v24283_v33 = vld [vmem:[#allocation113_spill] sm:$0xff]  ;;  %v24285_v49 = vld [vmem:[#allocation16_spill] sm:$0xff]  ;;  %v24286_v45 = vpack.c.bf16 %v20835_v5, %v20843_v36  ;;  %v959_v34 = vld [vmem:[%s24008_s1 + $0x6f8] sm:$0xff] }
 0x43b   : > { %15895 = vmatpush3.bf16.msk.msra.mxu1 %vm20944_vm12, %v24279_v37  ;;  %v10266_v18 = vmul.f32 %v10010_v50, %v9754_v0  ;;  %v9756_v62 = vmax.f32 %v9500_v51, 1e-06  ;;  %v16312_v20 = vadd.f32 %v15470_v31, %v24282_v47  ;;  %v6814_v42 = vpop.f32.mrb[33].mxu0  ;;  %15628 = vmatmul.mubr.msk.f32.gmra.mrb[138].mxu0 %vm1299_vm4, %v12738_v48  ;;  %v12740_v0 = vld [vmem:[%s24008_s1 + $0x1468] sm:$0xff]  ;;  %v12741_v11 = vld [vmem:[%s24008_s1 + $0x1470] sm:$0xff]  ;;  %v21137_v48 = vpop.f32.mrb[151].mxu1 }
 0x43c   : > { %15354 = vmatmul.mubr.msk.f32.gmra.mrb[218].mxu1 %vm1299_vm4, %v955_v63  ;;  %v10265_v44 = vmul.f32 %v10009_v1, %v9753_v6  ;;  %v9755_v59 = vmax.f32 %v9499_v27, 1e-06  ;;  %v16313_v16 = vadd.f32 %v6814_v42, %v24283_v33  ;;  %15898 = vmatprep.subr.msk.bf16.mxu1 %vm20944_vm12, %v15896_v19  ;;  %24287 = vst [vmem:[#allocation8_spill] sm:$0xff] %v21137_v48  ;;  %v24288_v61 = vld [vmem:[#allocation13_spill] sm:$0xff]  ;;  %v24289_v1 = vld [vmem:[#allocation115_spill] sm:$0xff]  ;;  %v21157_v42 = vpop.f32.mrb[152].mxu1 }
 0x43d   : > { %15356 = vmatprep.mubr.msk.f32.mxu1 %vm1299_vm4, %v956_v32  ;;  %15630 = vmatprep.mubr.msk.f32.mxu0 %vm1299_vm4, %v12739_v22  ;;  %v10012_v63 = vmul.f32 %v9756_v62, %v9756_v62  ;;  %v9502_v6 = vadd.f32 %v16312_v20, %v24285_v49  ;;  %v960_v20 = vld [vmem:[%s24008_s1 + $0x700] sm:$0xff]  ;;  %24291 = vst [vmem:[#allocation109_spill] sm:$0xff] %v21157_v42  ;;  %v24295_v49 = vld [vmem:[#allocation17_spill] sm:$0xff] }
 0x43e   : > { %v15902_v32 = vpack.c.bf16 %v10266_v18, %v10265_v44  ;;  %v10011_v50 = vmul.f32 %v9755_v59, %v9755_v59  ;;  %v9501_v51 = vadd.f32 %v16313_v16, %v24288_v61  ;;  %v15473_v37 = vpop.f32.mrb[34].mxu0  ;;  %v24290_v18 = vld [vmem:[#allocation116_spill] sm:$0xff]  ;;  %v24293_v33 = vpack.c.bf16 %v20865_v41, %v20873_v24  ;;  %v24296_v24 = vld [vmem:[#allocation119_spill] sm:$0xff]  ;;  %v24339_v42 = vld [vmem:[#allocation141_spill] sm:$0xff] }
 0x43f   : > { %15901 = vmatpush3.bf16.msk.msra.mxu1 %vm20944_vm12, %v24286_v45  ;;  %v10268_v22 = vmul.f32 %v10012_v63, %v9756_v62  ;;  %v9758_v19 = vmax.f32 %v9502_v6, 1e-06  ;;  %v16314_v36 = vadd.f32 %v15473_v37, %v24289_v1  ;;  %v6824_v5 = vpop.f32.mrb[35].mxu0  ;;  %15631 = vmatmul.mubr.msk.f32.gmra.mrb[140].mxu0 %vm1299_vm4, %v12740_v0  ;;  %v12742_v62 = vld [vmem:[%s24008_s1 + $0x1478] sm:$0xff]  ;;  %v24292_v44 = vld [vmem:[#allocation20_spill] sm:$0xff]  ;;  %v21168_v0 = vpop.f32.mrb[153].mxu1 }
 0x440   : > { %15357 = vmatmul.mubr.msk.f32.gmra.mrb[220].mxu1 %vm1299_vm4, %v957_v2  ;;  %v10267_v27 = vmul.f32 %v10011_v50, %v9755_v59  ;;  %v9757_v31 = vmax.f32 %v9501_v51, 1e-06  ;;  %v16315_v47 = vadd.f32 %v6824_v5, %v24290_v18  ;;  %15904 = vmatprep.subr.msk.bf16.mxu1 %vm20944_vm12, %v15902_v32  ;;  %v12743_v16 = vld [vmem:[%s24008_s1 + $0x1480] sm:$0xff]  ;;  %24294 = vst [vmem:[#allocation110_spill] sm:$0xff] %v21168_v0  ;;  %v961_v61 = vld [vmem:[%s24008_s1 + $0x708] sm:$0xff]  ;;  %v21192_v5 = vpop.f32.mrb[154].mxu1 }
 0x441   : > { %15359 = vmatprep.mubr.msk.f32.mxu1 %vm1299_vm4, %v958_v10  ;;  %15633 = vmatprep.mubr.msk.f32.mxu0 %vm1299_vm4, %v12741_v11  ;;  %v10014_v2 = vmul.f32 %v9758_v19, %v9758_v19  ;;  %v9504_v59 = vadd.f32 %v16314_v36, %v24292_v44  ;;  %v962_v36 = vld [vmem:[%s24008_s1 + $0x710] sm:$0xff]  ;;  %24298 = vst [vmem:[#allocation11_spill] sm:$0xff] %v21192_v5  ;;  %v24333_v5 = vld [vmem:[#allocation139_spill] sm:$0xff] }
 0x442   : > { %v15908_v10 = vpack.c.bf16 %v10268_v22, %v10267_v27  ;;  %v10013_v63 = vmul.f32 %v9757_v31, %v9757_v31  ;;  %v9503_v6 = vadd.f32 %v16315_v47, %v24295_v49  ;;  %v15476_v45 = vpop.f32.mrb[36].mxu0  ;;  %v24297_v22 = vld [vmem:[#allocation120_spill] sm:$0xff]  ;;  %v24300_v18 = vpack.c.bf16 %v20895_v39, %v20903_v55  ;;  %v12745_v47 = vld [vmem:[%s24008_s1 + $0x1490] sm:$0xff]  ;;  %v963_v49 = vld [vmem:[%s24008_s1 + $0x718] sm:$0xff] }
 0x443   : > { %15907 = vmatpush3.bf16.msk.msra.mxu1 %vm20944_vm12, %v24293_v33  ;;  %v21172_v11 = vmul.f32 %v10014_v2, %v9758_v19  ;;  %v9760_v32 = vmax.f32 %v9504_v59, 1e-06  ;;  %v16316_v41 = vadd.f32 %v15476_v45, %v24296_v24  ;;  %v6834_v50 = vpop.f32.mrb[37].mxu0  ;;  %15634 = vmatmul.mubr.msk.f32.gmra.mrb[142].mxu0 %vm1299_vm4, %v12742_v62  ;;  %v12744_v19 = vld [vmem:[%s24008_s1 + $0x1488] sm:$0xff]  ;;  %v21203_v62 = vpop.f32.mrb[155].mxu1  ;;  %v24304_v24 = vld [vmem:[#allocation123_spill] sm:$0xff] }
 0x444   : > { %15360 = vmatmul.mubr.msk.f32.gmra.mrb[222].mxu1 %vm1299_vm4, %v959_v34  ;;  %v21180_v51 = vmul.f32 %v10013_v63, %v9757_v31  ;;  %v9759_v37 = vmax.f32 %v9503_v6, 1e-06  ;;  %v16317_v1 = vadd.f32 %v6834_v50, %v24297_v22  ;;  %15910 = vmatprep.subr.msk.bf16.mxu1 %vm20944_vm12, %v15908_v10  ;;  %v24299_v27 = vld [vmem:[#allocation24_spill] sm:$0xff]  ;;  %24301 = vst [vmem:[#allocation10_spill] sm:$0xff] %v21203_v62  ;;  %v24302_v44 = vld [vmem:[#allocation21_spill] sm:$0xff] }
 0x445   : > { %15362 = vmatprep.mubr.msk.f32.mxu1 %vm1299_vm4, %v960_v20  ;;  %15636 = vmatprep.mubr.msk.f32.mxu0 %vm1299_vm4, %v12743_v16  ;;  %v10016_v34 = vmul.f32 %v9760_v32, %v9760_v32  ;;  %v9506_v31 = vadd.f32 %v16316_v41, %v24299_v27  ;;  %v24303_v39 = vld [vmem:[#allocation121_spill] sm:$0xff]  ;;  %v964_v50 = vld [vmem:[%s24008_s1 + $0x720] sm:$0xff] }
 0x446   : > { %v10015_v2 = vmul.f32 %v9759_v37, %v9759_v37  ;;  %v9505_v59 = vadd.f32 %v16317_v1, %v24302_v44  ;;  %v15479_v33 = vpop.f32.mrb[38].mxu0  ;;  %v24306_v1 = vld [vmem:[#allocation28_spill] sm:$0xff]  ;;  %v24345_v54 = vld [vmem:[#allocation145_spill] sm:$0xff] }
 0x447   : > { %15913 = vmatpush3.bf16.msk.msra.mxu1 %vm20944_vm12, %v24300_v18  ;;  %v21209_v16 = vmul.f32 %v10016_v34, %v9760_v32  ;;  %v9762_v55 = vmax.f32 %v9506_v31, 1e-06  ;;  %v16318_v10 = vadd.f32 %v15479_v33, %v24303_v39  ;;  %v6844_v63 = vpop.f32.mrb[39].mxu0  ;;  %15637 = vmatmul.mubr.msk.f32.gmra.mrb[144].mxu0 %vm1299_vm4, %v12744_v19  ;;  %v12746_v32 = vld [vmem:[%s24008_s1 + $0x1498] sm:$0xff]  ;;  %v24308_v31 = vld [vmem:[#allocation25_spill] sm:$0xff] }
 0x448   : > { %15363 = vmatmul.mubr.msk.f32.gmra.mrb[224].mxu1 %vm1299_vm4, %v961_v61  ;;  %v21217_v6 = vmul.f32 %v10015_v2, %v9759_v37  ;;  %v9761_v45 = vmax.f32 %v9505_v59, 1e-06  ;;  %v16319_v41 = vadd.f32 %v6844_v63, %v24304_v24  ;;  %15639 = vmatprep.mubr.msk.f32.mxu0 %vm1299_vm4, %v12745_v47  ;;  %v21227_v61 = vpop.f32.mrb[156].mxu1  ;;  %v12747_v37 = vld [vmem:[%s24008_s1 + $0x14a0] sm:$0xff]  ;;  %v24309_v59 = vld [vmem:[#allocation125_spill] sm:$0xff] }
 0x449   : > { %15365 = vmatprep.mubr.msk.f32.mxu1 %vm1299_vm4, %v962_v36  ;;  %24305 = vst [vmem:[#allocation111_spill] sm:$0xff] %v21227_v61  ;;  %v10018_v22 = vmul.f32 %v9762_v55, %v9762_v55  ;;  %v9508_v19 = vadd.f32 %v16318_v10, %v24306_v1  ;;  %v21233_v36 = vpop.f32.mrb[157].mxu1  ;;  %v965_v10 = vld [vmem:[%s24008_s1 + $0x728] sm:$0xff]  ;;  %v24327_v61 = vld [vmem:[#allocation135_spill] sm:$0xff] }
 0x44a   : > { %24307 = vst [vmem:[#allocation113_spill] sm:$0xff] %v21233_v36  ;;  %v10017_v27 = vmul.f32 %v9761_v45, %v9761_v45  ;;  %v9507_v18 = vadd.f32 %v16319_v41, %v24308_v31  ;;  %v15482_v47 = vpop.f32.mrb[40].mxu0  ;;  %v24310_v41 = vld [vmem:[#allocation126_spill] sm:$0xff]  ;;  %v24315_v34 = vld [vmem:[#allocation129_spill] sm:$0xff] }
 0x44b   : > { %v21239_v2 = vmul.f32 %v10018_v22, %v9762_v55  ;;  %v9764_v44 = vmax.f32 %v9508_v19, 1e-06  ;;  %v16320_v33 = vadd.f32 %v15482_v47, %v24309_v59  ;;  %v6854_v39 = vpop.f32.mrb[41].mxu0  ;;  %15640 = vmatmul.mubr.msk.f32.gmra.mrb[146].mxu0 %vm1299_vm4, %v12746_v32  ;;  %v12748_v55 = vld [vmem:[%s24008_s1 + $0x14a8] sm:$0xff]  ;;  %v21257_v32 = vpop.f32.mrb[158].mxu1 }
 0x44c   : > { %15366 = vmatmul.mubr.msk.f32.gmra.mrb[226].mxu1 %vm1299_vm4, %v963_v49  ;;  %v21247_v63 = vmul.f32 %v10017_v27, %v9761_v45  ;;  %v9763_v24 = vmax.f32 %v9507_v18, 1e-06  ;;  %v16321_v1 = vadd.f32 %v6854_v39, %v24310_v41  ;;  %15642 = vmatprep.mubr.msk.f32.mxu0 %vm1299_vm4, %v12747_v37  ;;  %v966_v49 = vld [vmem:[%s24008_s1 + $0x730] sm:$0xff]  ;;  %24311 = vst [vmem:[#allocation16_spill] sm:$0xff] %v21257_v32  ;;  %v24312_v22 = vld [vmem:[#allocation32_spill] sm:$0xff]  ;;  %v21263_v27 = vpop.f32.mrb[159].mxu1 }
 0x44d   : > { %15368 = vmatprep.mubr.msk.f32.mxu1 %vm1299_vm4, %v964_v50  ;;  %v10020_v50 = vmul.f32 %v9764_v44, %v9764_v44  ;;  %v9510_v19 = vadd.f32 %v16320_v33, %v24312_v22  ;;  %v12749_v45 = vld [vmem:[%s24008_s1 + $0x14b0] sm:$0xff]  ;;  %24313 = vst [vmem:[#allocation13_spill] sm:$0xff] %v21263_v27  ;;  %v967_v37 = vld [vmem:[%s24008_s1 + $0x738] sm:$0xff] }
 0x44e   : > { %v10019_v31 = vmul.f32 %v9763_v24, %v9763_v24  ;;  %v24314_v18 = vld [vmem:[#allocation29_spill] sm:$0xff]  ;;  %v15485_v59 = vpop.f32.mrb[42].mxu0  ;;  %v24321_v32 = vld [vmem:[#allocation131_spill] sm:$0xff] }
 0x44f   : > { %v9509_v47 = vadd.f32 %v16321_v1, %v24314_v18  ;;  %v21269_v39 = vmul.f32 %v10020_v50, %v9764_v44  ;;  %v9766_v41 = vmax.f32 %v9510_v19, 1e-06  ;;  %v16322_v33 = vadd.f32 %v15485_v59, %v24315_v34  ;;  %v6864_v22 = vpop.f32.mrb[43].mxu0  ;;  %15643 = vmatmul.mubr.msk.f32.gmra.mrb[148].mxu0 %vm1299_vm4, %v12748_v55  ;;  %v24316_v18 = vld [vmem:[#allocation130_spill] sm:$0xff]  ;;  %v968_v44 = vld [vmem:[%s24008_s1 + $0x740] sm:$0xff] }
 0x450   : > { %15369 = vmatmul.mubr.msk.f32.gmra.mrb[228].mxu1 %vm1299_vm4, %v965_v10  ;;  %v21277_v20 = vmul.f32 %v10019_v31, %v9763_v24  ;;  %v16323_v27 = vadd.f32 %v6864_v22, %v24316_v18  ;;  %15645 = vmatprep.mubr.msk.f32.mxu0 %vm1299_vm4, %v12749_v45  ;;  %v12750_v34 = vld [vmem:[%s24008_s1 + $0x14b8] sm:$0xff]  ;;  %v21287_v10 = vpop.f32.mrb[160].mxu1  ;;  %v12751_v24 = vld [vmem:[%s24008_s1 + $0x14c0] sm:$0xff]  ;;  %v969_v45 = vld [vmem:[%s24008_s1 + $0x748] sm:$0xff] }
 0x451   : > { %15371 = vmatprep.mubr.msk.f32.mxu1 %vm1299_vm4, %v966_v49  ;;  %v9765_v1 = vmax.f32 %v9509_v47, 1e-06  ;;  %24317 = vst [vmem:[#allocation115_spill] sm:$0xff] %v21287_v10  ;;  %v10022_v55 = vmul.f32 %v9766_v41, %v9766_v41  ;;  %v24318_v49 = vld [vmem:[#allocation36_spill] sm:$0xff]  ;;  %v21293_v19 = vpop.f32.mrb[161].mxu1  ;;  %v24320_v47 = vld [vmem:[#allocation33_spill] sm:$0xff] }
 0x452   : > { %v9512_v50 = vadd.f32 %v16322_v33, %v24318_v49  ;;  %24319 = vst [vmem:[#allocation116_spill] sm:$0xff] %v21293_v19  ;;  %v9511_v59 = vadd.f32 %v16323_v27, %v24320_v47  ;;  %v15488_v22 = vpop.f32.mrb[44].mxu0  ;;  %v24322_v47 = vld [vmem:[#allocation133_spill] sm:$0xff] }
 0x453   : > { %v10021_v31 = vmul.f32 %v9765_v1, %v9765_v1  ;;  %v21299_v18 = vmul.f32 %v10022_v55, %v9766_v41  ;;  %v16324_v33 = vadd.f32 %v15488_v22, %v24321_v32  ;;  %v6874_v49 = vpop.f32.mrb[45].mxu0  ;;  %15646 = vmatmul.mubr.msk.f32.gmra.mrb[150].mxu0 %vm1299_vm4, %v12750_v34  ;;  %v12752_v32 = vld [vmem:[%s24008_s1 + $0x14c8] sm:$0xff]  ;;  %v21317_v41 = vpop.f32.mrb[162].mxu1 }
 0x454   : > { %15372 = vmatmul.mubr.msk.f32.gmra.mrb[230].mxu1 %vm1299_vm4, %v967_v37  ;;  %v9768_v10 = vmax.f32 %v9512_v50, 1e-06  ;;  %v9767_v27 = vmax.f32 %v9511_v59, 1e-06  ;;  %v16325_v36 = vadd.f32 %v6874_v49, %v24322_v47  ;;  %15648 = vmatprep.mubr.msk.f32.mxu0 %vm1299_vm4, %v12751_v24  ;;  %v970_v37 = vld [vmem:[%s24008_s1 + $0x750] sm:$0xff]  ;;  %24323 = vst [vmem:[#allocation20_spill] sm:$0xff] %v21317_v41 }
 0x455   : > { %15374 = vmatprep.mubr.msk.f32.mxu1 %vm1299_vm4, %v968_v44  ;;  %v21307_v19 = vmul.f32 %v10021_v31, %v9765_v1  ;;  %v24324_v44 = vld [vmem:[#allocation40_spill] sm:$0xff]  ;;  %v12753_v1 = vld [vmem:[%s24008_s1 + $0x14d0] sm:$0xff]  ;;  %v21323_v50 = vpop.f32.mrb[163].mxu1  ;;  %v971_v24 = vld [vmem:[%s24008_s1 + $0x758] sm:$0xff] }
 0x456   : > { %v10024_v34 = vmul.f32 %v9768_v10, %v9768_v10  ;;  %v9514_v55 = vadd.f32 %v16324_v33, %v24324_v44  ;;  %24325 = vst [vmem:[#allocation17_spill] sm:$0xff] %v21323_v50  ;;  %v10023_v31 = vmul.f32 %v9767_v27, %v9767_v27  ;;  %v24326_v59 = vld [vmem:[#allocation37_spill] sm:$0xff]  ;;  %v15491_v49 = vpop.f32.mrb[46].mxu0 }
 0x457   : > { %v9513_v22 = vadd.f32 %v16325_v36, %v24326_v59  ;;  %v16326_v33 = vadd.f32 %v15491_v49, %v24327_v61  ;;  %v6884_v44 = vpop.f32.mrb[47].mxu0  ;;  %15649 = vmatmul.mubr.msk.f32.gmra.mrb[152].mxu0 %vm1299_vm4, %v12752_v32  ;;  %v24328_v59 = vld [vmem:[#allocation136_spill] sm:$0xff]  ;;  %v12754_v61 = vld [vmem:[%s24008_s1 + $0x14d8] sm:$0xff] }
 0x458   : > { %15375 = vmatmul.mubr.msk.f32.gmra.mrb[232].mxu1 %vm1299_vm4, %v969_v45  ;;  %v21329_v47 = vmul.f32 %v10024_v34, %v9768_v10  ;;  %v9770_v41 = vmax.f32 %v9514_v55, 1e-06  ;;  %v21337_v50 = vmul.f32 %v10023_v31, %v9767_v27  ;;  %v16327_v62 = vadd.f32 %v6884_v44, %v24328_v59  ;;  %15651 = vmatprep.mubr.msk.f32.mxu0 %vm1299_vm4, %v12753_v1  ;;  %v972_v10 = vld [vmem:[%s24008_s1 + $0x760] sm:$0xff]  ;;  %v21347_v45 = vpop.f32.mrb[164].mxu1  ;;  %v973_v1 = vld [vmem:[%s24008_s1 + $0x768] sm:$0xff] }
 0x459   : > { %15377 = vmatprep.mubr.msk.f32.mxu1 %vm1299_vm4, %v970_v37  ;;  %v9769_v36 = vmax.f32 %v9513_v22, 1e-06  ;;  %24329 = vst [vmem:[#allocation119_spill] sm:$0xff] %v21347_v45  ;;  %v24330_v37 = vld [vmem:[#allocation44_spill] sm:$0xff]  ;;  %v21353_v55 = vpop.f32.mrb[165].mxu1  ;;  %v24332_v22 = vld [vmem:[#allocation41_spill] sm:$0xff] }
 0x45a   : > { %v10026_v32 = vmul.f32 %v9770_v41, %v9770_v41  ;;  %v9516_v34 = vadd.f32 %v16326_v33, %v24330_v37  ;;  %v12755_v27 = vld [vmem:[%s24008_s1 + $0x14e0] sm:$0xff]  ;;  %24331 = vst [vmem:[#allocation120_spill] sm:$0xff] %v21353_v55  ;;  %v9515_v49 = vadd.f32 %v16327_v62, %v24332_v22  ;;  %v15494_v44 = vpop.f32.mrb[48].mxu0 }
 0x45b   : > { %v10025_v31 = vmul.f32 %v9769_v36, %v9769_v36  ;;  %v16328_v33 = vadd.f32 %v15494_v44, %v24333_v5  ;;  %v6894_v37 = vpop.f32.mrb[49].mxu0  ;;  %15652 = vmatmul.mubr.msk.f32.gmra.mrb[154].mxu0 %vm1299_vm4, %v12754_v61  ;;  %v24334_v22 = vld [vmem:[#allocation140_spill] sm:$0xff] }
 0x45c   : > { %15378 = vmatmul.mubr.msk.f32.gmra.mrb[234].mxu1 %vm1299_vm4, %v971_v24  ;;  %v21359_v59 = vmul.f32 %v10026_v32, %v9770_v41  ;;  %v9772_v45 = vmax.f32 %v9516_v34, 1e-06  ;;  %v9771_v62 = vmax.f32 %v9515_v49, 1e-06  ;;  %v16329_v0 = vadd.f32 %v6894_v37, %v24334_v22  ;;  %15654 = vmatprep.mubr.msk.f32.mxu0 %vm1299_vm4, %v12755_v27  ;;  %v12756_v5 = vld [vmem:[%s24008_s1 + $0x14e8] sm:$0xff]  ;;  %v974_v41 = vld [vmem:[%s24008_s1 + $0x770] sm:$0xff] }
 0x45d   : > { %15380 = vmatprep.mubr.msk.f32.mxu1 %vm1299_vm4, %v972_v10  ;;  %v21367_v55 = vmul.f32 %v10025_v31, %v9769_v36  ;;  %v21377_v24 = vpop.f32.mrb[166].mxu1  ;;  %v24336_v10 = vld [vmem:[#allocation14_spill] sm:$0xff]  ;;  %v24338_v49 = vld [vmem:[#allocation12_spill] sm:$0xff] }
 0x45e   : > { %24335 = vst [vmem:[#allocation24_spill] sm:$0xff] %v21377_v24  ;;  %v10028_v61 = vmul.f32 %v9772_v45, %v9772_v45  ;;  %v9518_v32 = vadd.f32 %v16328_v33, %v24336_v10  ;;  %v12757_v36 = vld [vmem:[%s24008_s1 + $0x14f0] sm:$0xff]  ;;  %v21383_v34 = vpop.f32.mrb[167].mxu1  ;;  %v10027_v31 = vmul.f32 %v9771_v62, %v9771_v62  ;;  %v9517_v44 = vadd.f32 %v16329_v0, %v24338_v49  ;;  %v15497_v37 = vpop.f32.mrb[50].mxu0  ;;  %v975_v27 = vld [vmem:[%s24008_s1 + $0x778] sm:$0xff] }
 0x45f   : > { %24337 = vst [vmem:[#allocation21_spill] sm:$0xff] %v21383_v34  ;;  %v16330_v33 = vadd.f32 %v15497_v37, %v24339_v42  ;;  %v6904_v10 = vpop.f32.mrb[51].mxu0  ;;  %15655 = vmatmul.mubr.msk.f32.gmra.mrb[156].mxu0 %vm1299_vm4, %v12756_v5  ;;  %v24340_v49 = vld [vmem:[#allocation143_spill] sm:$0xff] }
 0x460   : > { %15381 = vmatmul.mubr.msk.f32.gmra.mrb[236].mxu1 %vm1299_vm4, %v973_v1  ;;  %v21389_v22 = vmul.f32 %v10028_v61, %v9772_v45  ;;  %v9774_v24 = vmax.f32 %v9518_v32, 1e-06  ;;  %v21397_v34 = vmul.f32 %v10027_v31, %v9771_v62  ;;  %v9773_v0 = vmax.f32 %v9517_v44, 1e-06  ;;  %15657 = vmatprep.mubr.msk.f32.mxu0 %vm1299_vm4, %v12757_v36  ;;  %v12758_v42 = vld [vmem:[%s24008_s1 + $0x14f8] sm:$0xff]  ;;  %v976_v45 = vld [vmem:[%s24008_s1 + $0x780] sm:$0xff] }
 0x461   : > { %15383 = vmatprep.mubr.msk.f32.mxu1 %vm1299_vm4, %v974_v41  ;;  %v16331_v48 = vadd.f32 %v6904_v10, %v24340_v49  ;;  %v21407_v1 = vpop.f32.mrb[168].mxu1  ;;  %v24342_v41 = vld [vmem:[#allocation18_spill] sm:$0xff]  ;;  %v12759_v62 = vld [vmem:[%s24008_s1 + $0x1500] sm:$0xff] }
 0x462   : > { %24341 = vst [vmem:[#allocation121_spill] sm:$0xff] %v21407_v1  ;;  %v10030_v5 = vmul.f32 %v9774_v24, %v9774_v24  ;;  %v9520_v61 = vadd.f32 %v16330_v33, %v24342_v41  ;;  %v21413_v32 = vpop.f32.mrb[169].mxu1  ;;  %v10029_v31 = vmul.f32 %v9773_v0, %v9773_v0  ;;  %v24344_v44 = vld [vmem:[#allocation15_spill] sm:$0xff]  ;;  %v15500_v10 = vpop.f32.mrb[52].mxu0  ;;  %v977_v41 = vld [vmem:[%s24008_s1 + $0x788] sm:$0xff] }
 0x463   : > { %24343 = vst [vmem:[#allocation123_spill] sm:$0xff] %v21413_v32  ;;  %v9519_v37 = vadd.f32 %v16331_v48, %v24344_v44  ;;  %v16332_v57 = vadd.f32 %v15500_v10, %v24345_v54  ;;  %v6914_v33 = vpop.f32.mrb[53].mxu0  ;;  %15658 = vmatmul.mubr.msk.f32.gmra.mrb[158].mxu0 %vm1299_vm4, %v12758_v42  ;;  %v978_v54 = vld [vmem:[%s24008_s1 + $0x790] sm:$0xff] }
 0x464   : > { %15384 = vmatmul.mubr.msk.f32.gmra.mrb[238].mxu1 %vm1299_vm4, %v975_v27  ;;  %v10286_v49 = vmul.f32 %v10030_v5, %v9774_v24  ;;  %v9776_v1 = vmax.f32 %v9520_v61, 1e-06  ;;  %v10285_v36 = vmul.f32 %v10029_v31, %v9773_v0  ;;  %v16333_v48 = vadd.f32 %v6914_v33, %v24346_v13  ;;  %15660 = vmatprep.mubr.msk.f32.mxu0 %vm1299_vm4, %v12759_v62  ;;  %v12760_v24 = vld [vmem:[%s24008_s1 + $0x1508] sm:$0xff]  ;;  %v21433_v27 = vpop.f32.mrb[170].mxu1  ;;  %v12761_v0 = vld [vmem:[%s24008_s1 + $0x1510] sm:$0xff]  ;;  %v24350_v31 = vld [vmem:[#allocation19_spill] sm:$0xff] }
 0x465   : > { %15386 = vmatprep.mubr.msk.f32.mxu1 %vm1299_vm4, %v976_v45  ;;  %v9775_v32 = vmax.f32 %v9519_v37, 1e-06  ;;  %24347 = vst [vmem:[#allocation28_spill] sm:$0xff] %v21433_v27  ;;  %v24348_v45 = vld [vmem:[#allocation22_spill] sm:$0xff]  ;;  %v21439_v13 = vpop.f32.mrb[171].mxu1  ;;  %v24351_v27 = vld [vmem:[#allocation149_spill] sm:$0xff] }
 0x466   : > { %v10032_v42 = vmul.f32 %v9776_v1, %v9776_v1  ;;  %v9522_v5 = vadd.f32 %v16332_v57, %v24348_v45  ;;  %24349 = vst [vmem:[#allocation25_spill] sm:$0xff] %v21439_v13  ;;  %v15914_v61 = vpack.c.bf16 %v10286_v49, %v10285_v36  ;;  %v9521_v44 = vadd.f32 %v16333_v48, %v24350_v31  ;;  %v15503_v37 = vpop.f32.mrb[54].mxu0  ;;  %v979_v57 = vld [vmem:[%s24008_s1 + $0x798] sm:$0xff] }
 0x467   : > { %v10031_v62 = vmul.f32 %v9775_v32, %v9775_v32  ;;  %v16334_v17 = vadd.f32 %v15503_v37, %v24351_v27  ;;  %v6924_v15 = vpop.f32.mrb[55].mxu0  ;;  %15661 = vmatmul.mubr.msk.f32.gmra.mrb[160].mxu0 %vm1299_vm4, %v12760_v24  ;;  %v24352_v48 = vld [vmem:[#allocation150_spill] sm:$0xff]  ;;  %v21463_v24 = vpop.f32.mrb[172].mxu1  ;;  %v24363_v13 = vld [vmem:[#allocation155_spill] sm:$0xff] }
 0x468   : > { %15387 = vmatmul.mubr.msk.f32.gmra.mrb[240].mxu1 %vm1299_vm4, %v977_v41  ;;  %v21443_v10 = vmul.f32 %v10032_v42, %v9776_v1  ;;  %v9778_v33 = vmax.f32 %v9522_v5, 1e-06  ;;  %v9777_v49 = vmax.f32 %v9521_v44, 1e-06  ;;  %v16335_v45 = vadd.f32 %v6924_v15, %v24352_v48  ;;  %15916 = vmatprep.subr.msk.bf16.mxu1 %vm20944_vm12, %v15914_v61  ;;  %v12762_v1 = vld [vmem:[%s24008_s1 + $0x1518] sm:$0xff]  ;;  %v980_v41 = vld [vmem:[%s24008_s1 + $0x7a0] sm:$0xff] }
 0x469   : > { %15389 = vmatprep.mubr.msk.f32.mxu1 %vm1299_vm4, %v978_v54  ;;  %v21451_v36 = vmul.f32 %v10031_v62, %v9775_v32  ;;  %15663 = vmatprep.mubr.msk.f32.mxu0 %vm1299_vm4, %v12761_v0  ;;  %24353 = vst [vmem:[#allocation125_spill] sm:$0xff] %v21463_v24  ;;  %v24354_v54 = vld [vmem:[#allocation26_spill] sm:$0xff]  ;;  %v12763_v15 = vld [vmem:[%s24008_s1 + $0x1520] sm:$0xff]  ;;  %v21469_v42 = vpop.f32.mrb[173].mxu1  ;;  %v981_v5 = vld [vmem:[%s24008_s1 + $0x7a8] sm:$0xff] }
 0x46a   : > { %v10034_v32 = vmul.f32 %v9778_v33, %v9778_v33  ;;  %v9524_v27 = vadd.f32 %v16334_v17, %v24354_v54  ;;  %24355 = vst [vmem:[#allocation126_spill] sm:$0xff] %v21469_v42  ;;  %v10033_v0 = vmul.f32 %v9777_v49, %v9777_v49  ;;  %v24356_v61 = vld [vmem:[#allocation23_spill] sm:$0xff]  ;;  %v15506_v31 = vpop.f32.mrb[56].mxu0 }
 0x46b   : > { %v9523_v62 = vadd.f32 %v16335_v45, %v24356_v61  ;;  %v24357_v48 = vld [vmem:[#allocation151_spill] sm:$0xff]  ;;  %v6934_v54 = vpop.f32.mrb[57].mxu0  ;;  %15664 = vmatmul.mubr.msk.f32.gmra.mrb[162].mxu0 %vm1299_vm4, %v12762_v1  ;;  %v24358_v61 = vld [vmem:[#allocation153_spill] sm:$0xff]  ;;  %v21493_v1 = vpop.f32.mrb[174].mxu1 }
 0x46c   : > { %15390 = vmatmul.mubr.msk.f32.gmra.mrb[242].mxu1 %vm1299_vm4, %v979_v57  ;;  %v21475_v44 = vmul.f32 %v10034_v32, %v9778_v33  ;;  %v9780_v37 = vmax.f32 %v9524_v27, 1e-06  ;;  %v16336_v17 = vadd.f32 %v15506_v31, %v24357_v48  ;;  %v21483_v42 = vmul.f32 %v10033_v0, %v9777_v49  ;;  %15666 = vmatprep.mubr.msk.f32.mxu0 %vm1299_vm4, %v12763_v15  ;;  %v12764_v33 = vld [vmem:[%s24008_s1 + $0x1528] sm:$0xff]  ;;  %v982_v57 = vld [vmem:[%s24008_s1 + $0x7b0] sm:$0xff]  ;;  %v21499_v0 = vpop.f32.mrb[175].mxu1  ;;  %v24362_v31 = vld [vmem:[#allocation27_spill] sm:$0xff] }
 0x46d   : > { %15392 = vmatprep.mubr.msk.f32.mxu1 %vm1299_vm4, %v980_v41  ;;  %v9779_v45 = vmax.f32 %v9523_v62, 1e-06  ;;  %v16337_v24 = vadd.f32 %v6934_v54, %v24358_v61  ;;  %24359 = vst [vmem:[#allocation32_spill] sm:$0xff] %v21493_v1  ;;  %v24360_v32 = vld [vmem:[#allocation30_spill] sm:$0xff]  ;;  %24361 = vst [vmem:[#allocation29_spill] sm:$0xff] %v21499_v0 }
 0x46e   : > { %v10036_v41 = vmul.f32 %v9780_v37, %v9780_v37  ;;  %v9526_v27 = vadd.f32 %v16336_v17, %v24360_v32  ;;  %v12765_v49 = vld [vmem:[%s24008_s1 + $0x1530] sm:$0xff]  ;;  %v15509_v54 = vpop.f32.mrb[58].mxu0  ;;  %v983_v15 = vld [vmem:[%s24008_s1 + $0x7b8] sm:$0xff] }
 0x46f   : > { %v10035_v62 = vmul.f32 %v9779_v45, %v9779_v45  ;;  %v9525_v48 = vadd.f32 %v16337_v24, %v24362_v31  ;;  %v16338_v17 = vadd.f32 %v15509_v54, %v24363_v13  ;;  %v6944_v32 = vpop.f32.mrb[59].mxu0  ;;  %15667 = vmatmul.mubr.msk.f32.gmra.mrb[164].mxu0 %vm1299_vm4, %v12764_v33  ;;  %v24364_v31 = vld [vmem:[#allocation156_spill] sm:$0xff]  ;;  %v12766_v13 = vld [vmem:[%s24008_s1 + $0x1538] sm:$0xff] }
 0x470   : > { %15393 = vmatmul.mubr.msk.f32.gmra.mrb[244].mxu1 %vm1299_vm4, %v981_v5  ;;  %v21505_v61 = vmul.f32 %v10036_v41, %v9780_v37  ;;  %v9782_v1 = vmax.f32 %v9526_v27, 1e-06  ;;  %v16339_v12 = vadd.f32 %v6944_v32, %v24364_v31  ;;  %15669 = vmatprep.mubr.msk.f32.mxu0 %vm1299_vm4, %v12765_v49  ;;  %v984_v5 = vld [vmem:[%s24008_s1 + $0x7c0] sm:$0xff]  ;;  %v21523_v37 = vpop.f32.mrb[176].mxu1  ;;  %v985_v49 = vld [vmem:[%s24008_s1 + $0x7c8] sm:$0xff] }
 0x471   : > { %15395 = vmatprep.mubr.msk.f32.mxu1 %vm1299_vm4, %v982_v57  ;;  %v21513_v0 = vmul.f32 %v10035_v62, %v9779_v45  ;;  %v9781_v24 = vmax.f32 %v9525_v48, 1e-06  ;;  %24365 = vst [vmem:[#allocation129_spill] sm:$0xff] %v21523_v37  ;;  %v24366_v57 = vld [vmem:[#allocation34_spill] sm:$0xff]  ;;  %v12767_v45 = vld [vmem:[%s24008_s1 + $0x1540] sm:$0xff]  ;;  %v21529_v27 = vpop.f32.mrb[177].mxu1 }
 0x472   : > { %v10038_v33 = vmul.f32 %v9782_v1, %v9782_v1  ;;  %v9528_v41 = vadd.f32 %v16338_v17, %v24366_v57  ;;  %24367 = vst [vmem:[#allocation130_spill] sm:$0xff] %v21529_v27  ;;  %v24368_v48 = vld [vmem:[#allocation31_spill] sm:$0xff]  ;;  %v15512_v32 = vpop.f32.mrb[60].mxu0 }
 0x473   : > { %v10037_v62 = vmul.f32 %v9781_v24, %v9781_v24  ;;  %v9527_v54 = vadd.f32 %v16339_v12, %v24368_v48  ;;  %v16340_v17 = vadd.f32 %v15512_v32, %v24369_v14  ;;  %v6954_v57 = vpop.f32.mrb[61].mxu0  ;;  %15670 = vmatmul.mubr.msk.f32.gmra.mrb[166].mxu0 %vm1299_vm4, %v12766_v13  ;;  %v24370_v48 = vld [vmem:[#allocation160_spill] sm:$0xff] }
 0x474   : > { %15396 = vmatmul.mubr.msk.f32.gmra.mrb[246].mxu1 %vm1299_vm4, %v983_v15  ;;  %v21535_v31 = vmul.f32 %v10038_v33, %v9782_v1  ;;  %v9784_v37 = vmax.f32 %v9528_v41, 1e-06  ;;  %v16341_v58 = vadd.f32 %v6954_v57, %v24370_v48  ;;  %15672 = vmatprep.mubr.msk.f32.mxu0 %vm1299_vm4, %v12767_v45  ;;  %v12768_v14 = vld [vmem:[%s24008_s1 + $0x1548] sm:$0xff]  ;;  %v986_v1 = vld [vmem:[%s24008_s1 + $0x7d0] sm:$0xff]  ;;  %v21553_v15 = vpop.f32.mrb[178].mxu1  ;;  %v987_v45 = vld [vmem:[%s24008_s1 + $0x7d8] sm:$0xff] }
 0x475   : > { %15398 = vmatprep.mubr.msk.f32.mxu1 %vm1299_vm4, %v984_v5  ;;  %v21543_v27 = vmul.f32 %v10037_v62, %v9781_v24  ;;  %v9783_v12 = vmax.f32 %v9527_v54, 1e-06  ;;  %24371 = vst [vmem:[#allocation36_spill] sm:$0xff] %v21553_v15  ;;  %v24372_v5 = vld [vmem:[#allocation38_spill] sm:$0xff]  ;;  %v21559_v41 = vpop.f32.mrb[179].mxu1  ;;  %v24374_v54 = vld [vmem:[#allocation35_spill] sm:$0xff] }
 0x476   : > { %v10040_v13 = vmul.f32 %v9784_v37, %v9784_v37  ;;  %v9530_v33 = vadd.f32 %v16340_v17, %v24372_v5  ;;  %v12769_v24 = vld [vmem:[%s24008_s1 + $0x1550] sm:$0xff]  ;;  %24373 = vst [vmem:[#allocation33_spill] sm:$0xff] %v21559_v41  ;;  %v9529_v32 = vadd.f32 %v16341_v58, %v24374_v54  ;;  %v15515_v57 = vpop.f32.mrb[62].mxu0  ;;  %v24376_v54 = vld [vmem:[#allocation163_spill] sm:$0xff] }
 0x477   : > { %v10039_v62 = vmul.f32 %v9783_v12, %v9783_v12  ;;  %v16342_v17 = vadd.f32 %v15515_v57, %v24375_v28  ;;  %v6964_v5 = vpop.f32.mrb[63].mxu0  ;;  %15673 = vmatmul.mubr.msk.f32.gmra.mrb[168].mxu0 %vm1299_vm4, %v12768_v14  ;;  %v12770_v28 = vld [vmem:[%s24008_s1 + $0x1558] sm:$0xff] }
 0x478   : > { %15399 = vmatmul.mubr.msk.f32.gmra.mrb[248].mxu1 %vm1299_vm4, %v985_v49  ;;  %v21565_v48 = vmul.f32 %v10040_v13, %v9784_v37  ;;  %v9786_v15 = vmax.f32 %v9530_v33, 1e-06  ;;  %v9785_v58 = vmax.f32 %v9529_v32, 1e-06  ;;  %v16343_v9 = vadd.f32 %v6964_v5, %v24376_v54  ;;  %15675 = vmatprep.mubr.msk.f32.mxu0 %vm1299_vm4, %v12769_v24  ;;  %v988_v37 = vld [vmem:[%s24008_s1 + $0x7e0] sm:$0xff]  ;;  %v21583_v49 = vpop.f32.mrb[180].mxu1 }
 0x479   : > { %15401 = vmatprep.mubr.msk.f32.mxu1 %vm1299_vm4, %v986_v1  ;;  %v21573_v41 = vmul.f32 %v10039_v62, %v9783_v12  ;;  %24377 = vst [vmem:[#allocation131_spill] sm:$0xff] %v21583_v49  ;;  %v24378_v1 = vld [vmem:[#allocation42_spill] sm:$0xff]  ;;  %v12771_v12 = vld [vmem:[%s24008_s1 + $0x1560] sm:$0xff]  ;;  %v21589_v33 = vpop.f32.mrb[181].mxu1  ;;  %v989_v24 = vld [vmem:[%s24008_s1 + $0x7e8] sm:$0xff] }
 0x47a   : > { %v10042_v14 = vmul.f32 %v9786_v15, %v9786_v15  ;;  %v9532_v13 = vadd.f32 %v16342_v17, %v24378_v1  ;;  %24379 = vst [vmem:[#allocation133_spill] sm:$0xff] %v21589_v33  ;;  %v10041_v62 = vmul.f32 %v9785_v58, %v9785_v58  ;;  %v24380_v32 = vld [vmem:[#allocation39_spill] sm:$0xff]  ;;  %v15518_v5 = vpop.f32.mrb[64].mxu0 }
 0x47b   : > { %v9531_v57 = vadd.f32 %v16343_v9, %v24380_v32  ;;  %v16344_v17 = vadd.f32 %v15518_v5, %v24381_v25  ;;  %v6974_v1 = vpop.f32.mrb[65].mxu0  ;;  %15676 = vmatmul.mubr.msk.f32.gmra.mrb[170].mxu0 %vm1299_vm4, %v12770_v28  ;;  %v24382_v32 = vld [vmem:[#allocation166_spill] sm:$0xff]  ;;  %v12772_v25 = vld [vmem:[%s24008_s1 + $0x1568] sm:$0xff] }
 0x47c   : > { %15402 = vmatmul.mubr.msk.f32.gmra.mrb[250].mxu1 %vm1299_vm4, %v987_v45  ;;  %v21595_v54 = vmul.f32 %v10042_v14, %v9786_v15  ;;  %v9788_v49 = vmax.f32 %v9532_v13, 1e-06  ;;  %v21603_v33 = vmul.f32 %v10041_v62, %v9785_v58  ;;  %v16345_v8 = vadd.f32 %v6974_v1, %v24382_v32  ;;  %15678 = vmatprep.mubr.msk.f32.mxu0 %vm1299_vm4, %v12771_v12  ;;  %v990_v15 = vld [vmem:[%s24008_s1 + $0x7f0] sm:$0xff]  ;;  %v21613_v45 = vpop.f32.mrb[182].mxu1  ;;  %v991_v12 = vld [vmem:[%s24008_s1 + $0x7f8] sm:$0xff] }
 0x47d   : > { %15404 = vmatprep.mubr.msk.f32.mxu1 %vm1299_vm4, %v988_v37  ;;  %v9787_v9 = vmax.f32 %v9531_v57, 1e-06  ;;  %24383 = vst [vmem:[#allocation40_spill] sm:$0xff] %v21613_v45  ;;  %v24384_v37 = vld [vmem:[#allocation48_spill] sm:$0xff]  ;;  %v12773_v58 = vld [vmem:[%s24008_s1 + $0x1570] sm:$0xff]  ;;  %v21619_v13 = vpop.f32.mrb[183].mxu1 }
 0x47e   : > { %v10044_v28 = vmul.f32 %v9788_v49, %v9788_v49  ;;  %v9534_v14 = vadd.f32 %v16344_v17, %v24384_v37  ;;  %24385 = vst [vmem:[#allocation37_spill] sm:$0xff] %v21619_v13  ;;  %v24386_v57 = vld [vmem:[#allocation45_spill] sm:$0xff]  ;;  %v15521_v1 = vpop.f32.mrb[66].mxu0 }
 0x47f   : > { %v10043_v62 = vmul.f32 %v9787_v9, %v9787_v9  ;;  %v9533_v5 = vadd.f32 %v16345_v8, %v24386_v57  ;;  %v16346_v17 = vadd.f32 %v15521_v1, %v24387_v29  ;;  %v6984_v37 = vpop.f32.mrb[67].mxu0  ;;  %15679 = vmatmul.mubr.msk.f32.gmra.mrb[172].mxu0 %vm1299_vm4, %v12772_v25  ;;  %v24388_v57 = vld [vmem:[#allocation170_spill] sm:$0xff] }
 0x480   : > { %15405 = vmatmul.mubr.msk.f32.gmra.mrb[252].mxu1 %vm1299_vm4, %v989_v24  ;;  %v21625_v32 = vmul.f32 %v10044_v28, %v9788_v49  ;;  %v9790_v45 = vmax.f32 %v9534_v14, 1e-06  ;;  %v16347_v4 = vadd.f32 %v6984_v37, %v24388_v57  ;;  %15681 = vmatprep.mubr.msk.f32.mxu0 %vm1299_vm4, %v12773_v58  ;;  %v12774_v29 = vld [vmem:[%s24008_s1 + $0x1578] sm:$0xff]  ;;  %v609_v49 = vld [vmem:[%s24010_s3 + $0x8] sm:$0xff]  ;;  %v21643_v24 = vpop.f32.mrb[184].mxu1 }
 0x481   : > { %15407 = vmatprep.mubr.msk.f32.mxu1 %vm1299_vm4, %v990_v15  ;;  %v21633_v13 = vmul.f32 %v10043_v62, %v9787_v9  ;;  %v9789_v8 = vmax.f32 %v9533_v5, 1e-06  ;;  %24389 = vst [vmem:[#allocation135_spill] sm:$0xff] %v21643_v24  ;;  %v24390_v15 = vld [vmem:[#allocation52_spill] sm:$0xff]  ;;  %v21649_v14 = vpop.f32.mrb[185].mxu1  ;;  %v24392_v5 = vld [vmem:[#allocation49_spill] sm:$0xff] }
 0x482   : > { %v10046_v25 = vmul.f32 %v9790_v45, %v9790_v45  ;;  %v9536_v28 = vadd.f32 %v16346_v17, %v24390_v15  ;;  %v12775_v9 = vld [vmem:[%s24008_s1 + $0x1580] sm:$0xff]  ;;  %24391 = vst [vmem:[#allocation136_spill] sm:$0xff] %v21649_v14  ;;  %v9535_v1 = vadd.f32 %v16347_v4, %v24392_v5  ;;  %v15524_v37 = vpop.f32.mrb[68].mxu0  ;;  %v24394_v4 = vld [vmem:[#allocation173_spill] sm:$0xff] }
 0x483   : > { %v10045_v62 = vmul.f32 %v9789_v8, %v9789_v8  ;;  %v16348_v17 = vadd.f32 %v15524_v37, %v24393_v3  ;;  %v6994_v15 = vpop.f32.mrb[69].mxu0  ;;  %15682 = vmatmul.mubr.msk.f32.gmra.mrb[174].mxu0 %vm1299_vm4, %v12774_v29  ;;  %v608_v14 = vld [vmem:[%s24010_s3] sm:$0xff]  ;;  %v21669_v3 = vpop.f32.mrb[186].mxu1 }
 0x484   : > { %15408 = vmatmul.mubr.msk.f32.gmra.mrb[254].mxu1 %vm1299_vm4, %v991_v12  ;;  %v21655_v57 = vmul.f32 %v10046_v25, %v9790_v45  ;;  %v9792_v24 = vmax.f32 %v9536_v28, 1e-06  ;;  %v9791_v53 = vmax.f32 %v9535_v1, 1e-06  ;;  %v16349_v5 = vadd.f32 %v6994_v15, %v24394_v4  ;;  %15684 = vmatprep.mubr.msk.f32.mxu0 %vm1299_vm4, %v12775_v9  ;;  %v12776_v45 = vld [vmem:[%s24008_s1 + $0x1588] sm:$0xff]  ;;  %24395 = vst [vmem:[#allocation44_spill] sm:$0xff] %v21669_v3 }
 0x485   : > { %10818 = vmatprep.mubr.f32.mxu1 %v609_v49  ;;  %v21662_v58 = vmul.f32 %v10045_v62, %v9789_v8  ;;  %v24396_v29 = vld [vmem:[#allocation56_spill] sm:$0xff]  ;;  %v12777_v25 = vld [vmem:[%s24008_s1 + $0x1590] sm:$0xff]  ;;  %v21675_v8 = vpop.f32.mrb[187].mxu1  ;;  %v24400_v28 = vpack.c.bf16 %v21172_v11, %v21180_v51  ;;  %v12778_v11 = vld [vmem:[%s24008_s1 + $0x1598] sm:$0xff] }
 0x486   : > { %v10048_v12 = vmul.f32 %v9792_v24, %v9792_v24  ;;  %v9538_v49 = vadd.f32 %v16348_v17, %v24396_v29  ;;  %24397 = vst [vmem:[#allocation41_spill] sm:$0xff] %v21675_v8  ;;  %v10047_v62 = vmul.f32 %v9791_v53, %v9791_v53  ;;  %v24398_v9 = vld [vmem:[#allocation53_spill] sm:$0xff]  ;;  %v15527_v37 = vpop.f32.mrb[70].mxu0  ;;  %v24399_v29 = vld [vmem:[#allocation175_spill] sm:$0xff]  ;;  %v21707_v51 = vpop.f32.mrb[188].mxu1 }
 0x487   : > { %v9537_v1 = vadd.f32 %v16349_v5, %v24398_v9  ;;  %v625_v15 = vld [vmem:[%s24010_s3 + $0x88] sm:$0xff]  ;;  %v16350_v3 = vadd.f32 %v15527_v37, %v24399_v29  ;;  %v7004_v26 = vpop.f32.mrb[71].mxu0  ;;  %15685 = vmatmul.mubr.msk.f32.gmra.mrb[176].mxu0 %vm1299_vm4, %v12776_v45  ;;  %v24402_v9 = vpack.c.bf16 %v21443_v10, %v21451_v36  ;;  %24403 = vst [vmem:[#allocation139_spill] sm:$0xff] %v21707_v51  ;;  %v21713_v10 = vpop.f32.mrb[189].mxu1 }
 0x488   : > { %10819 = vmatmul.mubr.f32.vlgmr.msra.gmra.mrb[0].mxu1 %v608_v14  ;;  %v21683_v4 = vmul.f32 %v10048_v12, %v9792_v24  ;;  %v9794_v17 = vmax.f32 %v9538_v49, 1e-06  ;;  %v624_v14 = vld [vmem:[%s24010_s3 + $0x80] sm:$0xff]  ;;  %v21695_v5 = vmul.f32 %v10047_v62, %v9791_v53  ;;  %15687 = vmatprep.mubr.msk.f32.mxu0 %vm1299_vm4, %v12777_v25  ;;  %24405 = vst [vmem:[#allocation140_spill] sm:$0xff] %v21713_v10  ;;  %v24406_v62 = vld [vmem:[#allocation57_spill] sm:$0xff] }
 0x489   : > { %15919 = vmatpush3.bf16.msk.msra.mxu1 %vm20944_vm12, %v24400_v28  ;;  %v9793_v24 = vmax.f32 %v9537_v1, 1e-06  ;;  %v24401_v12 = vld [vmem:[#allocation176_spill] sm:$0xff]  ;;  %10823 = vmatprep.mubr.f32.mxu1 %v625_v15  ;;  %v24408_v36 = vpack.c.bf16 %v21209_v16, %v21217_v6  ;;  %v21745_v6 = vpop.f32.mrb[190].mxu1  ;;  %v24525_v10 = vld [vmem:[#allocation227_spill] sm:$0xff] }
 0x48a   : > { %v16351_v49 = vadd.f32 %v7004_v26, %v24401_v12  ;;  %15922 = vmatprep.subr.msk.bf16.mxu1 %vm20944_vm12, %v24402_v9  ;;  %v10050_v45 = vmul.f32 %v9794_v17, %v9794_v17  ;;  %v24404_v53 = vld [vmem:[#allocation60_spill] sm:$0xff]  ;;  %v15530_v37 = vpop.f32.mrb[72].mxu0  ;;  %v24407_v12 = vld [vmem:[#allocation179_spill] sm:$0xff]  ;;  %24411 = vst [vmem:[#allocation14_spill] sm:$0xff] %v21745_v6 }
 0x48b   : > { %v9540_v28 = vadd.f32 %v16350_v3, %v24404_v53  ;;  %v12779_v26 = vld [vmem:[%s24008_s1 + $0x15a0] sm:$0xff]  ;;  %v10049_v25 = vmul.f32 %v9793_v24, %v9793_v24  ;;  %v641_v29 = vld [vmem:[%s24010_s3 + $0x108] sm:$0xff]  ;;  %v16352_v9 = vadd.f32 %v15530_v37, %v24407_v12  ;;  %v7014_v53 = vpop.f32.mrb[73].mxu0  ;;  %15688 = vmatmul.mubr.msk.f32.gmra.mrb[178].mxu0 %vm1299_vm4, %v12778_v11 }
 0x48c   : > { %v9539_v1 = vadd.f32 %v16351_v49, %v24406_v62  ;;  %10824 = vmatmul.mubr.f32.gmra.mrb[2].mxu1 %v624_v14  ;;  %v21721_v3 = vmul.f32 %v10050_v45, %v9794_v17  ;;  %v640_v14 = vld [vmem:[%s24010_s3 + $0x100] sm:$0xff]  ;;  %v24410_v62 = vpack.c.bf16 %v21475_v44, %v21483_v42  ;;  %15690 = vmatprep.mubr.msk.f32.mxu0 %vm1299_vm4, %v12779_v26  ;;  %v12780_v16 = vld [vmem:[%s24008_s1 + $0x15a8] sm:$0xff]  ;;  %v21751_v42 = vpop.f32.mrb[191].mxu1 }
 0x48d   : > { %v9796_v15 = vmax.f32 %v9540_v28, 1e-06  ;;  %15925 = vmatpush3.bf16.msk.msra.mxu1 %vm20944_vm12, %v24408_v36  ;;  %v21733_v49 = vmul.f32 %v10049_v25, %v9793_v24  ;;  %v24409_v45 = vld [vmem:[#allocation180_spill] sm:$0xff]  ;;  %10828 = vmatprep.mubr.f32.mxu1 %v641_v29  ;;  %v12781_v25 = vld [vmem:[%s24008_s1 + $0x15b0] sm:$0xff]  ;;  %24413 = vst [vmem:[#allocation12_spill] sm:$0xff] %v21751_v42  ;;  %v24416_v44 = vpack.c.bf16 %v21239_v2, %v21247_v63  ;;  %v12782_v2 = vld [vmem:[%s24008_s1 + $0x15b8] sm:$0xff] }
 0x48e   : > { %v9795_v17 = vmax.f32 %v9539_v1, 1e-06  ;;  %v16353_v28 = vadd.f32 %v7014_v53, %v24409_v45  ;;  %15928 = vmatprep.subr.msk.bf16.mxu1 %vm20944_vm12, %v24410_v62  ;;  %v24412_v24 = vld [vmem:[#allocation64_spill] sm:$0xff]  ;;  %v24414_v1 = vld [vmem:[#allocation61_spill] sm:$0xff]  ;;  %v15533_v12 = vpop.f32.mrb[74].mxu0  ;;  %v21783_v63 = vpop.f32.mrb[192].mxu1 }
 0x48f   : > { %v10052_v11 = vmul.f32 %v9796_v15, %v9796_v15  ;;  %v9542_v36 = vadd.f32 %v16352_v9, %v24412_v24  ;;  %v657_v53 = vld [vmem:[%s24010_s3 + $0x188] sm:$0xff]  ;;  %v7024_v24 = vpop.f32.mrb[75].mxu0  ;;  %15691 = vmatmul.mubr.msk.f32.gmra.mrb[180].mxu0 %vm1299_vm4, %v12780_v16  ;;  %24419 = vst [vmem:[#allocation141_spill] sm:$0xff] %v21783_v63 }
 0x490   : > { %v10051_v26 = vmul.f32 %v9795_v17, %v9795_v17  ;;  %v9541_v37 = vadd.f32 %v16353_v28, %v24414_v1  ;;  %10829 = vmatmul.mubr.f32.gmra.mrb[4].mxu1 %v640_v14  ;;  %v24415_v45 = vld [vmem:[#allocation181_spill] sm:$0xff]  ;;  %v656_v14 = vld [vmem:[%s24010_s3 + $0x180] sm:$0xff]  ;;  %v24418_v1 = vpack.c.bf16 %v21505_v61, %v21513_v0  ;;  %15693 = vmatprep.mubr.msk.f32.mxu0 %vm1299_vm4, %v12781_v25  ;;  %v21789_v0 = vpop.f32.mrb[193].mxu1 }
 0x491   : > { %v21759_v9 = vmul.f32 %v10052_v11, %v9796_v15  ;;  %v9798_v29 = vmax.f32 %v9542_v36, 1e-06  ;;  %v16354_v62 = vadd.f32 %v15533_v12, %v24415_v45  ;;  %15931 = vmatpush3.bf16.msk.msra.mxu1 %vm20944_vm12, %v24416_v44  ;;  %v24417_v11 = vld [vmem:[#allocation183_spill] sm:$0xff]  ;;  %10833 = vmatprep.mubr.f32.mxu1 %v657_v53  ;;  %24421 = vst [vmem:[#allocation143_spill] sm:$0xff] %v21789_v0  ;;  %v24520_v63 = vld [vmem:[#allocation225_spill] sm:$0xff] }
 0x492   : > { %v21771_v28 = vmul.f32 %v10051_v26, %v9795_v17  ;;  %v9797_v15 = vmax.f32 %v9541_v37, 1e-06  ;;  %v16355_v36 = vadd.f32 %v7024_v24, %v24417_v11  ;;  %15934 = vmatprep.subr.msk.bf16.mxu1 %vm20944_vm12, %v24418_v1  ;;  %v24420_v17 = vld [vmem:[#allocation67_spill] sm:$0xff]  ;;  %v24422_v37 = vld [vmem:[#allocation65_spill] sm:$0xff]  ;;  %v15536_v45 = vpop.f32.mrb[76].mxu0  ;;  %v24424_v61 = vpack.c.bf16 %v21269_v39, %v21277_v20  ;;  %v21821_v39 = vpop.f32.mrb[194].mxu1 }
 0x493   : > { %v10054_v16 = vmul.f32 %v9798_v29, %v9798_v29  ;;  %v9544_v44 = vadd.f32 %v16354_v62, %v24420_v17  ;;  %v12783_v26 = vld [vmem:[%s24008_s1 + $0x15c0] sm:$0xff]  ;;  %v673_v24 = vld [vmem:[%s24010_s3 + $0x208] sm:$0xff]  ;;  %v7034_v17 = vpop.f32.mrb[77].mxu0  ;;  %15694 = vmatmul.mubr.msk.f32.gmra.mrb[182].mxu0 %vm1299_vm4, %v12782_v2  ;;  %24427 = vst [vmem:[#allocation18_spill] sm:$0xff] %v21821_v39 }
 0x494   : > { %v10053_v25 = vmul.f32 %v9797_v15, %v9797_v15  ;;  %v9543_v12 = vadd.f32 %v16355_v36, %v24422_v37  ;;  %10834 = vmatmul.mubr.f32.gmra.mrb[6].mxu1 %v656_v14  ;;  %v24423_v11 = vld [vmem:[#allocation185_spill] sm:$0xff]  ;;  %v672_v14 = vld [vmem:[%s24010_s3 + $0x200] sm:$0xff]  ;;  %v24426_v37 = vpack.c.bf16 %v21535_v31, %v21543_v27  ;;  %15696 = vmatprep.mubr.msk.f32.mxu0 %vm1299_vm4, %v12783_v26  ;;  %v21827_v27 = vpop.f32.mrb[195].mxu1 }
 0x495   : > { %v21797_v62 = vmul.f32 %v10054_v16, %v9798_v29  ;;  %v9800_v53 = vmax.f32 %v9544_v44, 1e-06  ;;  %v16356_v1 = vadd.f32 %v15536_v45, %v24423_v11  ;;  %15937 = vmatpush3.bf16.msk.msra.mxu1 %vm20944_vm12, %v24424_v61  ;;  %v24425_v16 = vld [vmem:[#allocation186_spill] sm:$0xff]  ;;  %v12784_v20 = vld [vmem:[%s24008_s1 + $0x15c8] sm:$0xff]  ;;  %10838 = vmatprep.mubr.f32.mxu1 %v673_v24  ;;  %24429 = vst [vmem:[#allocation15_spill] sm:$0xff] %v21827_v27 }
 0x496   : > { %v21809_v36 = vmul.f32 %v10053_v25, %v9797_v15  ;;  %v9799_v29 = vmax.f32 %v9543_v12, 1e-06  ;;  %v16357_v44 = vadd.f32 %v7034_v17, %v24425_v16  ;;  %15940 = vmatprep.subr.msk.bf16.mxu1 %vm20944_vm12, %v24426_v37  ;;  %v24428_v15 = vld [vmem:[#allocation71_spill] sm:$0xff]  ;;  %v12785_v25 = vld [vmem:[%s24008_s1 + $0x15d0] sm:$0xff]  ;;  %v15539_v11 = vpop.f32.mrb[78].mxu0  ;;  %v689_v17 = vld [vmem:[%s24010_s3 + $0x288] sm:$0xff]  ;;  %v24432_v31 = vpack.c.bf16 %v21299_v18, %v21307_v19 }
 0x497   : > { %v10056_v2 = vmul.f32 %v9800_v53, %v9800_v53  ;;  %v9546_v61 = vadd.f32 %v16356_v1, %v24428_v15  ;;  %v24430_v12 = vld [vmem:[#allocation70_spill] sm:$0xff]  ;;  %v24431_v16 = vld [vmem:[#allocation189_spill] sm:$0xff]  ;;  %v7044_v15 = vpop.f32.mrb[79].mxu0  ;;  %15697 = vmatmul.mubr.msk.f32.gmra.mrb[184].mxu0 %vm1299_vm4, %v12784_v20  ;;  %v21859_v18 = vpop.f32.mrb[196].mxu1 }
 0x498   : > { %v10055_v26 = vmul.f32 %v9799_v29, %v9799_v29  ;;  %v9545_v45 = vadd.f32 %v16357_v44, %v24430_v12  ;;  %10839 = vmatmul.mubr.f32.gmra.mrb[8].mxu1 %v672_v14  ;;  %v16358_v37 = vadd.f32 %v15539_v11, %v24431_v16  ;;  %v688_v14 = vld [vmem:[%s24010_s3 + $0x280] sm:$0xff]  ;;  %v24434_v12 = vpack.c.bf16 %v21565_v48, %v21573_v41  ;;  %v12786_v19 = vld [vmem:[%s24008_s1 + $0x15d8] sm:$0xff]  ;;  %v21865_v41 = vpop.f32.mrb[197].mxu1 }
 0x499   : > { %v21835_v1 = vmul.f32 %v10056_v2, %v9800_v53  ;;  %v9802_v24 = vmax.f32 %v9546_v61, 1e-06  ;;  %15943 = vmatpush3.bf16.msk.msra.mxu1 %vm20944_vm12, %v24432_v31  ;;  %v24433_v2 = vld [vmem:[#allocation190_spill] sm:$0xff]  ;;  %15699 = vmatprep.mubr.msk.f32.mxu0 %vm1299_vm4, %v12785_v25  ;;  %24435 = vst [vmem:[#allocation145_spill] sm:$0xff] %v21859_v18  ;;  %24437 = vst [vmem:[#allocation146_spill] sm:$0xff] %v21865_v41  ;;  %v24440_v48 = vpack.c.bf16 %v21329_v47, %v21337_v50  ;;  %v12788_v50 = vld [vmem:[%s24008_s1 + $0x15e8] sm:$0xff] }
 0x49a   : > { %v21847_v44 = vmul.f32 %v10055_v26, %v9799_v29  ;;  %v9801_v53 = vmax.f32 %v9545_v45, 1e-06  ;;  %v16359_v61 = vadd.f32 %v7044_v15, %v24433_v2  ;;  %15946 = vmatprep.subr.msk.bf16.mxu1 %vm20944_vm12, %v24434_v12  ;;  %v24436_v29 = vld [vmem:[#allocation75_spill] sm:$0xff]  ;;  %10843 = vmatprep.mubr.f32.mxu1 %v689_v17  ;;  %v24438_v45 = vld [vmem:[#allocation74_spill] sm:$0xff]  ;;  %v15542_v16 = vpop.f32.mrb[80].mxu0  ;;  %v705_v15 = vld [vmem:[%s24010_s3 + $0x308] sm:$0xff] }
 0x49b   : > { %v10058_v20 = vmul.f32 %v9802_v24, %v9802_v24  ;;  %v9548_v31 = vadd.f32 %v16358_v37, %v24436_v29  ;;  %v12787_v26 = vld [vmem:[%s24008_s1 + $0x15e0] sm:$0xff]  ;;  %v7054_v29 = vpop.f32.mrb[81].mxu0  ;;  %15700 = vmatmul.mubr.msk.f32.gmra.mrb[186].mxu0 %vm1299_vm4, %v12786_v19  ;;  %v24443_v19 = vld [vmem:[#allocation46_spill] sm:$0xff] }
 0x49c   : > { %v10057_v25 = vmul.f32 %v9801_v53, %v9801_v53  ;;  %v9547_v11 = vadd.f32 %v16359_v61, %v24438_v45  ;;  %10844 = vmatmul.mubr.f32.gmra.mrb[10].mxu1 %v688_v14  ;;  %v24439_v2 = vld [vmem:[#allocation191_spill] sm:$0xff]  ;;  %v24442_v45 = vpack.c.bf16 %v21595_v54, %v21603_v33  ;;  %15702 = vmatprep.mubr.msk.f32.mxu0 %vm1299_vm4, %v12787_v26  ;;  %v721_v26 = vld [vmem:[%s24010_s3 + $0x388] sm:$0xff] }
 0x49d   : > { %v21873_v37 = vmul.f32 %v10058_v20, %v9802_v24  ;;  %v9804_v17 = vmax.f32 %v9548_v31, 1e-06  ;;  %v16360_v12 = vadd.f32 %v15542_v16, %v24439_v2  ;;  %15949 = vmatpush3.bf16.msk.msra.mxu1 %vm20944_vm12, %v24440_v48  ;;  %v704_v14 = vld [vmem:[%s24010_s3 + $0x300] sm:$0xff]  ;;  %v24441_v20 = vld [vmem:[#allocation193_spill] sm:$0xff]  ;;  %10848 = vmatprep.mubr.f32.mxu1 %v705_v15  ;;  %v24445_v15 = vld [vmem:[#allocation194_spill] sm:$0xff] }
 0x49e   : > { %v21885_v61 = vmul.f32 %v10057_v25, %v9801_v53  ;;  %v9803_v24 = vmax.f32 %v9547_v11, 1e-06  ;;  %v16361_v31 = vadd.f32 %v7054_v29, %v24441_v20  ;;  %15952 = vmatprep.subr.msk.bf16.mxu1 %vm20944_vm12, %v24442_v45  ;;  %v12789_v53 = vld [vmem:[%s24008_s1 + $0x15f0] sm:$0xff]  ;;  %v24444_v25 = vld [vmem:[#allocation43_spill] sm:$0xff]  ;;  %v15545_v16 = vpop.f32.mrb[82].mxu0  ;;  %v24446_v45 = vpack.c.bf16 %v21359_v59, %v21367_v55 }
 0x49f   : > { %v10060_v47 = vmul.f32 %v9804_v17, %v9804_v17  ;;  %v9550_v48 = vadd.f32 %v16360_v12, %v24443_v19  ;;  %v16362_v29 = vadd.f32 %v15545_v16, %v24445_v15  ;;  %v7064_v20 = vpop.f32.mrb[83].mxu0  ;;  %15703 = vmatmul.mubr.msk.f32.gmra.mrb[188].mxu0 %vm1299_vm4, %v12788_v50  ;;  %v12790_v55 = vld [vmem:[%s24008_s1 + $0x15f8] sm:$0xff] }
 0x4a0   : > { %v16001_v33 = vpack.c.bf16 %v21873_v37, %v21885_v61  ;;  %v10059_v54 = vmul.f32 %v9803_v24, %v9803_v24  ;;  %v9549_v11 = vadd.f32 %v16361_v31, %v24444_v25  ;;  %10849 = vmatmul.mubr.f32.gmra.mrb[12].mxu1 %v704_v14  ;;  %v720_v14 = vld [vmem:[%s24010_s3 + $0x380] sm:$0xff]  ;;  %15705 = vmatprep.mubr.msk.f32.mxu0 %vm1299_vm4, %v12789_v53  ;;  %v24449_v50 = vld [vmem:[#allocation50_spill] sm:$0xff] }
 0x4a1   : > { %v21907_v2 = vmul.f32 %v10060_v47, %v9804_v17  ;;  %v9806_v12 = vmax.f32 %v9550_v48, 1e-06  ;;  %15955 = vmatpush3.bf16.msk.msra.mxu1 %vm20944_vm12, %v24446_v45  ;;  %v24447_v47 = vld [vmem:[#allocation195_spill] sm:$0xff]  ;;  %v24448_v48 = vpack.c.bf16 %v21625_v32, %v21633_v13  ;;  %v9552_v25 = vadd.f32 %v16362_v29, %v24449_v50  ;;  %10853 = vmatprep.mubr.f32.mxu1 %v721_v26  ;;  %v24451_v29 = vld [vmem:[#allocation196_spill] sm:$0xff] }
 0x4a2   : > { %v21919_v31 = vmul.f32 %v10059_v54, %v9803_v24  ;;  %v9805_v17 = vmax.f32 %v9549_v11, 1e-06  ;;  %v16363_v19 = vadd.f32 %v7064_v20, %v24447_v47  ;;  %v12791_v24 = vld [vmem:[%s24008_s1 + $0x1600] sm:$0xff]  ;;  %v611_v13 = vld [vmem:[%s24010_s3 + $0x18] sm:$0xff]  ;;  %v15548_v16 = vpop.f32.mrb[84].mxu0  ;;  %v24452_v47 = vpack.c.bf16 %v21389_v22, %v21397_v34 }
 0x4a3   : > { %15958 = vmatprep.subr.msk.bf16.mxu1 %vm20944_vm12, %v24448_v48  ;;  %v10062_v59 = vmul.f32 %v9806_v12, %v9806_v12  ;;  %v24450_v54 = vld [vmem:[#allocation47_spill] sm:$0xff]  ;;  %v9808_v20 = vmax.f32 %v9552_v25, 1e-06  ;;  %v16364_v26 = vadd.f32 %v15548_v16, %v24451_v29  ;;  %v7074_v45 = vpop.f32.mrb[85].mxu0  ;;  %15706 = vmatmul.mubr.msk.f32.gmra.mrb[190].mxu0 %vm1299_vm4, %v12790_v55  ;;  %v610_v48 = vld [vmem:[%s24010_s3 + $0x10] sm:$0xff]  ;;  %v12792_v55 = vld [vmem:[%s24008_s1 + $0x1608] sm:$0xff] }
 0x4a4   : > { %v10061_v53 = vmul.f32 %v9805_v17, %v9805_v17  ;;  %v9551_v11 = vadd.f32 %v16363_v19, %v24450_v54  ;;  %10854 = vmatmul.mubr.f32.gmra.mrb[14].mxu1 %v720_v14  ;;  %v24453_v14 = vld [vmem:[#allocation197_spill] sm:$0xff]  ;;  %15708 = vmatprep.mubr.msk.f32.mxu0 %vm1299_vm4, %v12791_v24  ;;  %v627_v34 = vld [vmem:[%s24010_s3 + $0x98] sm:$0xff] }
 0x4a5   : > { %v10318_v15 = vmul.f32 %v10062_v59, %v9806_v12  ;;  %15961 = vmatpush3.bf16.msk.msra.mxu1 %vm20944_vm12, %v24452_v47  ;;  %v16365_v12 = vadd.f32 %v7074_v45, %v24453_v14  ;;  %10923 = vmatprep.mubr.f32.mxu1 %v611_v13  ;;  %v10064_v22 = vmul.f32 %v9808_v20, %v9808_v20  ;;  %v24454_v59 = vld [vmem:[#allocation54_spill] sm:$0xff] }
 0x4a6   : > { %v10317_v19 = vmul.f32 %v10061_v53, %v9805_v17  ;;  %v9807_v50 = vmax.f32 %v9551_v11, 1e-06  ;;  %v9554_v25 = vadd.f32 %v16364_v26, %v24454_v59  ;;  %v12793_v17 = vld [vmem:[%s24008_s1 + $0x1610] sm:$0xff]  ;;  %v24455_v11 = vld [vmem:[#allocation51_spill] sm:$0xff]  ;;  %v15551_v16 = vpop.f32.mrb[86].mxu0 }
 0x4a7   : > { %v9553_v24 = vadd.f32 %v16365_v12, %v24455_v11  ;;  %v10320_v29 = vmul.f32 %v10064_v22, %v9808_v20  ;;  %v24456_v13 = vld [vmem:[#allocation198_spill] sm:$0xff]  ;;  %v7084_v14 = vpop.f32.mrb[87].mxu0  ;;  %15709 = vmatmul.mubr.msk.f32.gmra.mrb[192].mxu0 %vm1299_vm4, %v12792_v55  ;;  %v12795_v22 = vld [vmem:[%s24008_s1 + $0x1620] sm:$0xff] }
 0x4a8   : > { %v15962_v53 = vpack.c.bf16 %v10318_v15, %v10317_v19  ;;  %v10063_v54 = vmul.f32 %v9807_v50, %v9807_v50  ;;  %10924 = vmatmul.mubr.f32.vlgmr.msra.gmra.mrb[16].mxu1 %v610_v48  ;;  %v9810_v45 = vmax.f32 %v9554_v25, 1e-06  ;;  %v16366_v47 = vadd.f32 %v15551_v16, %v24456_v13  ;;  %v626_v26 = vld [vmem:[%s24010_s3 + $0x90] sm:$0xff]  ;;  %v24457_v15 = vld [vmem:[#allocation199_spill] sm:$0xff]  ;;  %15711 = vmatprep.mubr.msk.f32.mxu0 %vm1299_vm4, %v12793_v17  ;;  %v24461_v13 = vld [vmem:[#allocation200_spill] sm:$0xff] }
 0x4a9   : > { %10928 = vmatprep.mubr.f32.mxu1 %v627_v34  ;;  %v9809_v32 = vmax.f32 %v9553_v24, 1e-06  ;;  %v16367_v19 = vadd.f32 %v7084_v14, %v24457_v15  ;;  %v12794_v20 = vld [vmem:[%s24008_s1 + $0x1618] sm:$0xff] }
 0x4aa   : > { %v10319_v59 = vmul.f32 %v10063_v54, %v9807_v50  ;;  %15964 = vmatprep.subr.msk.bf16.mxu1 %vm20944_vm12, %v15962_v53  ;;  %v643_v48 = vld [vmem:[%s24010_s3 + $0x118] sm:$0xff]  ;;  %v10066_v12 = vmul.f32 %v9810_v45, %v9810_v45  ;;  %v24459_v50 = vpack.c.bf16 %v21655_v57, %v21662_v58  ;;  %v15554_v11 = vpop.f32.mrb[88].mxu0  ;;  %v642_v58 = vld [vmem:[%s24010_s3 + $0x110] sm:$0xff] }
 0x4ab   : > { %v24458_v55 = vld [vmem:[#allocation58_spill] sm:$0xff]  ;;  %v10065_v17 = vmul.f32 %v9809_v32, %v9809_v32  ;;  %v24460_v53 = vld [vmem:[#allocation55_spill] sm:$0xff]  ;;  %v7094_v14 = vpop.f32.mrb[89].mxu0  ;;  %15712 = vmatmul.mubr.msk.f32.gmra.mrb[194].mxu0 %vm1299_vm4, %v12794_v20 }
 0x4ac   : > { %v9556_v34 = vadd.f32 %v16366_v47, %v24458_v55  ;;  %15967 = vmatpush3.bf16.msk.msra.mxu1 %vm20944_vm12, %v24459_v50  ;;  %v15968_v25 = vpack.c.bf16 %v10320_v29, %v10319_v59  ;;  %v9555_v54 = vadd.f32 %v16367_v19, %v24460_v53  ;;  %v10322_v24 = vmul.f32 %v10066_v12, %v9810_v45  ;;  %v24462_v29 = vld [vmem:[#allocation201_spill] sm:$0xff]  ;;  %v24463_v20 = vld [vmem:[#allocation62_spill] sm:$0xff]  ;;  %v24465_v50 = vld [vmem:[#allocation59_spill] sm:$0xff] }
 0x4ad   : > { %10929 = vmatmul.mubr.f32.gmra.mrb[18].mxu1 %v626_v26  ;;  %v16368_v47 = vadd.f32 %v15554_v11, %v24461_v13  ;;  %v10321_v57 = vmul.f32 %v10065_v17, %v9809_v32  ;;  %v16369_v59 = vadd.f32 %v7094_v14, %v24462_v29  ;;  %15714 = vmatprep.mubr.msk.f32.mxu0 %vm1299_vm4, %v12795_v22  ;;  %v12796_v45 = vld [vmem:[%s24008_s1 + $0x1628] sm:$0xff]  ;;  %v659_v26 = vld [vmem:[%s24010_s3 + $0x198] sm:$0xff]  ;;  %v12797_v12 = vld [vmem:[%s24008_s1 + $0x1630] sm:$0xff] }
 0x4ae   : > { %v9812_v16 = vmax.f32 %v9556_v34, 1e-06  ;;  %10933 = vmatprep.mubr.f32.mxu1 %v643_v48  ;;  %v9811_v15 = vmax.f32 %v9555_v54, 1e-06  ;;  %15970 = vmatprep.subr.msk.bf16.mxu1 %vm20944_vm12, %v15968_v25  ;;  %v24464_v32 = vpack.c.bf16 %v21683_v4, %v21695_v5  ;;  %v15557_v25 = vpop.f32.mrb[90].mxu0  ;;  %v24466_v54 = vld [vmem:[#allocation202_spill] sm:$0xff] }
 0x4af   : > { %v9558_v48 = vadd.f32 %v16368_v47, %v24463_v20  ;;  %v15974_v55 = vpack.c.bf16 %v10322_v24, %v10321_v57  ;;  %v9557_v22 = vadd.f32 %v16369_v59, %v24465_v50  ;;  %v16370_v11 = vadd.f32 %v15557_v25, %v24466_v54  ;;  %v7104_v13 = vpop.f32.mrb[91].mxu0  ;;  %15715 = vmatmul.mubr.msk.f32.gmra.mrb[196].mxu0 %vm1299_vm4, %v12796_v45  ;;  %v658_v4 = vld [vmem:[%s24010_s3 + $0x190] sm:$0xff]  ;;  %v24467_v24 = vld [vmem:[#allocation203_spill] sm:$0xff] }
 0x4b0   : > { %v10068_v19 = vmul.f32 %v9812_v16, %v9812_v16  ;;  %15973 = vmatpush3.bf16.msk.msra.mxu1 %vm20944_vm12, %v24464_v32  ;;  %v10067_v34 = vmul.f32 %v9811_v15, %v9811_v15  ;;  %v16371_v14 = vadd.f32 %v7104_v13, %v24467_v24  ;;  %15717 = vmatprep.mubr.msk.f32.mxu0 %vm1299_vm4, %v12797_v12  ;;  %v24468_v29 = vld [vmem:[#allocation66_spill] sm:$0xff]  ;;  %v12799_v45 = vld [vmem:[%s24008_s1 + $0x1640] sm:$0xff]  ;;  %v22054_v13 = vpop.permute.xlu0 %8901 }
 0x4b1   : > { %10934 = vmatmul.mubr.f32.gmra.mrb[20].mxu1 %v642_v58  ;;  %v9814_v53 = vmax.f32 %v9558_v48, 1e-06  ;;  %v9813_v47 = vmax.f32 %v9557_v22, 1e-06  ;;  %15976 = vmatprep.subr.msk.bf16.mxu1 %vm20944_vm12, %v15974_v55  ;;  %v675_v58 = vld [vmem:[%s24010_s3 + $0x218] sm:$0xff]  ;;  %v9560_v59 = vadd.f32 %v16370_v11, %v24468_v29  ;;  %v24474_v24 = vpack.c.bf16 %v21759_v9, %v21771_v28  ;;  %v690_v28 = vld [vmem:[%s24010_s3 + $0x290] sm:$0xff] }
 0x4b2   : > { %v10324_v17 = vmul.f32 %v10068_v19, %v9812_v16  ;;  %10938 = vmatprep.mubr.f32.mxu1 %v659_v26  ;;  %v10323_v5 = vmul.f32 %v10067_v34, %v9811_v15  ;;  %v12798_v16 = vld [vmem:[%s24008_s1 + $0x1638] sm:$0xff]  ;;  %v24469_v15 = vpack.c.bf16 %v21721_v3, %v21733_v49  ;;  %v15560_v32 = vpop.f32.mrb[92].mxu0  ;;  %v24471_v34 = vld [vmem:[#allocation204_spill] sm:$0xff]  ;;  %v674_v3 = vld [vmem:[%s24010_s3 + $0x210] sm:$0xff] }
 0x4b3   : > { %v10070_v57 = vmul.f32 %v9814_v53, %v9814_v53  ;;  %v10069_v19 = vmul.f32 %v9813_v47, %v9813_v47  ;;  %v24470_v20 = vld [vmem:[#allocation63_spill] sm:$0xff]  ;;  %v9816_v55 = vmax.f32 %v9560_v59, 1e-06  ;;  %v16372_v50 = vadd.f32 %v15560_v32, %v24471_v34  ;;  %v7114_v22 = vpop.f32.mrb[93].mxu0  ;;  %15718 = vmatmul.mubr.msk.f32.gmra.mrb[198].mxu0 %vm1299_vm4, %v12798_v16 }
 0x4b4   : > { %15979 = vmatpush3.bf16.msk.msra.mxu1 %vm20944_vm12, %v24469_v15  ;;  %v15980_v26 = vpack.c.bf16 %v10324_v17, %v10323_v5  ;;  %v9559_v48 = vadd.f32 %v16371_v14, %v24470_v20  ;;  %v24472_v17 = vld [vmem:[#allocation205_spill] sm:$0xff]  ;;  %15720 = vmatprep.mubr.msk.f32.mxu0 %vm1299_vm4, %v12799_v45  ;;  %v691_v11 = vld [vmem:[%s24010_s3 + $0x298] sm:$0xff]  ;;  %v22066_v15 = vpop.permute.xlu1 %8906 }
 0x4b5   : > { %10939 = vmatmul.mubr.f32.gmra.mrb[22].mxu1 %v658_v4  ;;  %v10326_v12 = vmul.f32 %v10070_v57, %v9814_v53  ;;  %v10325_v49 = vmul.f32 %v10069_v19, %v9813_v47  ;;  %v16373_v54 = vadd.f32 %v7114_v22, %v24472_v17  ;;  %v12800_v53 = vld [vmem:[%s24008_s1 + $0x1648] sm:$0xff]  ;;  %v10072_v4 = vmul.f32 %v9816_v55, %v9816_v55  ;;  %v12801_v14 = vld [vmem:[%s24008_s1 + $0x1650] sm:$0xff]  ;;  %v12803_v17 = vld [vmem:[%s24008_s1 + $0x1660] sm:$0xff] }
 0x4b6   : > { %10943 = vmatprep.mubr.f32.mxu1 %v675_v58  ;;  %v9815_v25 = vmax.f32 %v9559_v48, 1e-06  ;;  %15982 = vmatprep.subr.msk.bf16.mxu1 %vm20944_vm12, %v15980_v26  ;;  %v24473_v5 = vld [vmem:[#allocation69_spill] sm:$0xff]  ;;  %v24475_v57 = vld [vmem:[#allocation68_spill] sm:$0xff]  ;;  %v15563_v59 = vpop.f32.mrb[94].mxu0  ;;  %v24476_v19 = vld [vmem:[#allocation206_spill] sm:$0xff] }
 0x4b7   : > { %v9562_v47 = vadd.f32 %v16372_v50, %v24473_v5  ;;  %v15986_v16 = vpack.c.bf16 %v10326_v12, %v10325_v49  ;;  %v9561_v29 = vadd.f32 %v16373_v54, %v24475_v57  ;;  %v10328_v45 = vmul.f32 %v10072_v4, %v9816_v55  ;;  %v7124_v9 = vpop.f32.mrb[95].mxu0  ;;  %15721 = vmatmul.mubr.msk.f32.gmra.mrb[200].mxu0 %vm1299_vm4, %v12800_v53  ;;  %v24477_v12 = vld [vmem:[#allocation207_spill] sm:$0xff] }
 0x4b8   : > { %15985 = vmatpush3.bf16.msk.msra.mxu1 %vm20944_vm12, %v24474_v24  ;;  %v10071_v58 = vmul.f32 %v9815_v25, %v9815_v25  ;;  %v16374_v20 = vadd.f32 %v15563_v59, %v24476_v19  ;;  %v16375_v34 = vadd.f32 %v7124_v9, %v24477_v12  ;;  %15723 = vmatprep.mubr.msk.f32.mxu0 %vm1299_vm4, %v12801_v14  ;;  %v12802_v55 = vld [vmem:[%s24008_s1 + $0x1658] sm:$0xff]  ;;  %v24482_v59 = vld [vmem:[#allocation209_spill] sm:$0xff] }
 0x4b9   : > { %10944 = vmatmul.mubr.f32.gmra.mrb[24].mxu1 %v674_v3  ;;  %v9818_v26 = vmax.f32 %v9562_v47, 1e-06  ;;  %v9817_v32 = vmax.f32 %v9561_v29, 1e-06  ;;  %15988 = vmatprep.subr.msk.bf16.mxu1 %vm20944_vm12, %v15986_v16  ;;  %v707_v50 = vld [vmem:[%s24010_s3 + $0x318] sm:$0xff]  ;;  %v24478_v3 = vld [vmem:[#allocation73_spill] sm:$0xff]  ;;  %v22093_v47 = vpop.permute.xlu0 %9071 }
 0x4ba   : > { %10948 = vmatprep.mubr.f32.mxu1 %v691_v11  ;;  %v10327_v48 = vmul.f32 %v10071_v58, %v9815_v25  ;;  %v9564_v49 = vadd.f32 %v16374_v20, %v24478_v3  ;;  %v24479_v25 = vpack.c.bf16 %v21797_v62, %v21809_v36  ;;  %v24480_v11 = vld [vmem:[#allocation72_spill] sm:$0xff]  ;;  %v15566_v5 = vpop.f32.mrb[96].mxu0  ;;  %v706_v36 = vld [vmem:[%s24010_s3 + $0x310] sm:$0xff]  ;;  %v723_v19 = vld [vmem:[%s24010_s3 + $0x398] sm:$0xff]  ;;  %v22110_v20 = vpop.permute.xlu1 %9076 }
 0x4bb   : > { %v10074_v22 = vmul.f32 %v9818_v26, %v9818_v26  ;;  %v10073_v53 = vmul.f32 %v9817_v32, %v9817_v32  ;;  %v9563_v4 = vadd.f32 %v16375_v34, %v24480_v11  ;;  %v24481_v16 = vld [vmem:[#allocation208_spill] sm:$0xff]  ;;  %v7134_v62 = vpop.f32.mrb[97].mxu0  ;;  %15724 = vmatmul.mubr.msk.f32.gmra.mrb[202].mxu0 %vm1299_vm4, %v12802_v55  ;;  %v12805_v12 = vld [vmem:[%s24008_s1 + $0x1670] sm:$0xff] }
 0x4bc   : > { %15991 = vmatpush3.bf16.msk.msra.mxu1 %vm20944_vm12, %v24479_v25  ;;  %v15992_v54 = vpack.c.bf16 %v10328_v45, %v10327_v48  ;;  %v9820_v14 = vmax.f32 %v9564_v49, 1e-06  ;;  %v16376_v58 = vadd.f32 %v15566_v5, %v24481_v16  ;;  %v16377_v45 = vadd.f32 %v7134_v62, %v24482_v59  ;;  %15726 = vmatprep.mubr.msk.f32.mxu0 %vm1299_vm4, %v12803_v17  ;;  %v24486_v17 = vld [vmem:[#allocation210_spill] sm:$0xff]  ;;  %v24488_v62 = vld [vmem:[#allocation83_spill] sm:$0xff] }
 0x4bd   : > { %10949 = vmatmul.mubr.f32.gmra.mrb[26].mxu1 %v690_v28  ;;  %v10330_v24 = vmul.f32 %v10074_v22, %v9818_v26  ;;  %v10329_v57 = vmul.f32 %v10073_v53, %v9817_v32  ;;  %v9819_v29 = vmax.f32 %v9563_v4, 1e-06  ;;  %v12804_v26 = vld [vmem:[%s24008_s1 + $0x1668] sm:$0xff]  ;;  %v24483_v28 = vld [vmem:[#allocation79_spill] sm:$0xff]  ;;  %v24484_v32 = vpack.c.bf16 %v21835_v1, %v21847_v44  ;;  %v722_v1 = vld [vmem:[%s24010_s3 + $0x390] sm:$0xff]  ;;  %v22137_v16 = vpop.permute.xlu0 %8991 }
 0x4be   : > { %10953 = vmatprep.mubr.f32.mxu1 %v707_v50  ;;  %15994 = vmatprep.subr.msk.bf16.mxu1 %vm20944_vm12, %v15992_v54  ;;  %v10076_v9 = vmul.f32 %v9820_v14, %v9820_v14  ;;  %v9566_v48 = vadd.f32 %v16376_v58, %v24483_v28  ;;  %v24485_v50 = vld [vmem:[#allocation78_spill] sm:$0xff]  ;;  %v15569_v3 = vpop.f32.mrb[98].mxu0  ;;  %v24487_v4 = vld [vmem:[#allocation211_spill] sm:$0xff] }
 0x4bf   : > { %v15998_v34 = vpack.c.bf16 %v10330_v24, %v10329_v57  ;;  %v10075_v55 = vmul.f32 %v9819_v29, %v9819_v29  ;;  %v9565_v22 = vadd.f32 %v16377_v45, %v24485_v50  ;;  %v16378_v54 = vadd.f32 %v15569_v3, %v24486_v17  ;;  %v7144_v53 = vpop.f32.mrb[99].mxu0  ;;  %15727 = vmatmul.mubr.msk.f32.gmra.mrb[204].mxu0 %vm1299_vm4, %v12804_v26  ;;  %v12806_v24 = vld [vmem:[%s24008_s1 + $0x1678] sm:$0xff]  ;;  %v12807_v57 = vld [vmem:[%s24008_s1 + $0x1680] sm:$0xff]  ;;  %v12808_v50 = vld [vmem:[%s24008_s1 + $0x1688] sm:$0xff] }
 0x4c0   : > { %15997 = vmatpush3.bf16.msk.msra.mxu1 %vm20944_vm12, %v24484_v32  ;;  %v10332_v49 = vmul.f32 %v10076_v9, %v9820_v14  ;;  %v9822_v25 = vmax.f32 %v9566_v48, 1e-06  ;;  %v16379_v5 = vadd.f32 %v7144_v53, %v24487_v4  ;;  %15729 = vmatprep.mubr.msk.f32.mxu0 %vm1299_vm4, %v12805_v12  ;;  %v613_v14 = vld [vmem:[%s24010_s3 + $0x28] sm:$0xff]  ;;  %v24489_v45 = vld [vmem:[#allocation82_spill] sm:$0xff]  ;;  %v22149_v9 = vpop.permute.xlu1 %8996  ;;  %v24492_v3 = vld [vmem:[#allocation87_spill] sm:$0xff] }
 0x4c1   : > { %10954 = vmatmul.mubr.f32.gmra.mrb[28].mxu1 %v706_v36  ;;  %v10331_v44 = vmul.f32 %v10075_v55, %v9819_v29  ;;  %v9821_v11 = vmax.f32 %v9565_v22, 1e-06  ;;  %16000 = vmatprep.subr.msk.bf16.mxu1 %vm20944_vm12, %v15998_v34  ;;  %v9568_v36 = vadd.f32 %v16378_v54, %v24488_v62  ;;  %v24490_v32 = vld [vmem:[#allocation212_spill] sm:$0xff]  ;;  %v24491_v34 = vld [vmem:[#allocation213_spill] sm:$0xff] }
 0x4c2   : > { %10958 = vmatprep.mubr.f32.mxu1 %v723_v19  ;;  %v10078_v58 = vmul.f32 %v9822_v25, %v9822_v25  ;;  %v9567_v26 = vadd.f32 %v16379_v5, %v24489_v45  ;;  %v15572_v19 = vpop.f32.mrb[100].mxu0  ;;  %v12809_v17 = vld [vmem:[%s24008_s1 + $0x1690] sm:$0xff]  ;;  %v612_v54 = vld [vmem:[%s24010_s3 + $0x20] sm:$0xff]  ;;  %v12810_v45 = vld [vmem:[%s24008_s1 + $0x1698] sm:$0xff] }
 0x4c3   : > { %v16004_v29 = vpack.c.bf16 %v10332_v49, %v10331_v44  ;;  %v10077_v59 = vmul.f32 %v9821_v11, %v9821_v11  ;;  %v9824_v48 = vmax.f32 %v9568_v36, 1e-06  ;;  %v16380_v37 = vadd.f32 %v15572_v19, %v24490_v32  ;;  %v7154_v61 = vpop.f32.mrb[101].mxu0  ;;  %15730 = vmatmul.mubr.msk.f32.gmra.mrb[206].mxu0 %vm1299_vm4, %v12806_v24  ;;  %v24494_v44 = vld [vmem:[#allocation86_spill] sm:$0xff] }
 0x4c4   : > { %16003 = vmatpush3.bf16.msk.msra.mxu1 %vm20944_vm12, %v16001_v33  ;;  %v22151_v28 = vmul.f32 %v10078_v58, %v9822_v25  ;;  %v9823_v12 = vmax.f32 %v9567_v26, 1e-06  ;;  %v16381_v55 = vadd.f32 %v7154_v61, %v24491_v34  ;;  %15732 = vmatprep.mubr.msk.f32.mxu0 %vm1299_vm4, %v12807_v57  ;;  %v24493_v25 = vpack.c.bf16 %v21907_v2, %v21919_v31  ;;  %v629_v2 = vld [vmem:[%s24010_s3 + $0xa8] sm:$0xff]  ;;  %v22182_v31 = vpop.permute.xlu0 %9081  ;;  %v22195_v26 = vpop.permute.xlu1 %9086  ;;  %v628_v61 = vld [vmem:[%s24010_s3 + $0xa0] sm:$0xff] }
 0x4c5   : > { %10959 = vmatmul.mubr.f32.gmra.mrb[30].mxu1 %v722_v1  ;;  %v22155_v33 = vmul.f32 %v10077_v59, %v9821_v11  ;;  %16006 = vmatprep.subr.msk.bf16.mxu1 %vm20944_vm12, %v16004_v29  ;;  %v10080_v22 = vmul.f32 %v9824_v48, %v9824_v48  ;;  %v9570_v49 = vadd.f32 %v16380_v37, %v24492_v3  ;;  %v24497_v29 = vld [vmem:[#allocation215_spill] sm:$0xff]  ;;  %v645_v3 = vld [vmem:[%s24010_s3 + $0x128] sm:$0xff] }
 0x4c6   : > { %11028 = vmatprep.mubr.f32.mxu1 %v613_v14  ;;  %v10079_v1 = vmul.f32 %v9823_v12, %v9823_v12  ;;  %v9569_v11 = vadd.f32 %v16381_v55, %v24494_v44  ;;  %v15575_v4 = vpop.f32.mrb[102].mxu0  ;;  %24495 = vst [vmem:[#allocation22_spill] sm:$0xff] %v22182_v31  ;;  %v24496_v14 = vld [vmem:[#allocation214_spill] sm:$0xff]  ;;  %24498 = vst [vmem:[#allocation19_spill] sm:$0xff] %v22195_v26  ;;  %v12811_v37 = vld [vmem:[%s24008_s1 + $0x16a0] sm:$0xff] }
 0x4c7   : > { %v22184_v5 = vmul.f32 %v10080_v22, %v9824_v48  ;;  %v9826_v24 = vmax.f32 %v9570_v49, 1e-06  ;;  %v16382_v58 = vadd.f32 %v15575_v4, %v24496_v14  ;;  %v7164_v62 = vpop.f32.mrb[103].mxu0  ;;  %15733 = vmatmul.mubr.msk.f32.gmra.mrb[208].mxu0 %vm1299_vm4, %v12808_v50  ;;  %v24499_v48 = vld [vmem:[#allocation91_spill] sm:$0xff]  ;;  %v24500_v55 = vld [vmem:[#allocation90_spill] sm:$0xff]  ;;  %v24502_v4 = vld [vmem:[#allocation217_spill] sm:$0xff] }
 0x4c8   : > { %16009 = vmatpush3.bf16.msk.msra.mxu1 %vm20944_vm12, %v24493_v25  ;;  %v22188_v36 = vmul.f32 %v10079_v1, %v9823_v12  ;;  %v9825_v57 = vmax.f32 %v9569_v11, 1e-06  ;;  %v16383_v59 = vadd.f32 %v7164_v62, %v24497_v29  ;;  %15735 = vmatprep.mubr.msk.f32.mxu0 %vm1299_vm4, %v12809_v17  ;;  %v24501_v17 = vld [vmem:[#allocation216_spill] sm:$0xff]  ;;  %v24503_v62 = vld [vmem:[#allocation95_spill] sm:$0xff]  ;;  %v24511_v12 = vld [vmem:[#allocation221_spill] sm:$0xff] }
 0x4c9   : > { %v10082_v19 = vmul.f32 %v9826_v24, %v9826_v24  ;;  %v9572_v32 = vadd.f32 %v16382_v58, %v24499_v48  ;;  %v12812_v14 = vld [vmem:[%s24008_s1 + $0x16a8] sm:$0xff]  ;;  %v24504_v48 = vld [vmem:[#allocation94_spill] sm:$0xff]  ;;  %v24536_v26 = vld [vmem:[#allocation231_spill] sm:$0xff] }
 0x4ca   : > { %v10081_v34 = vmul.f32 %v9825_v57, %v9825_v57  ;;  %v9571_v50 = vadd.f32 %v16383_v59, %v24500_v55  ;;  %v15578_v22 = vpop.f32.mrb[104].mxu0  ;;  %v644_v59 = vld [vmem:[%s24010_s3 + $0x120] sm:$0xff] }
 0x4cb   : > { %11029 = vmatmul.mubr.f32.vlgmr.msra.gmra.mrb[32].mxu1 %v612_v54  ;;  %v22210_v49 = vmul.f32 %v10082_v19, %v9826_v24  ;;  %v9828_v25 = vmax.f32 %v9572_v32, 1e-06  ;;  %v16384_v54 = vadd.f32 %v15578_v22, %v24501_v17  ;;  %v7174_v1 = vpop.f32.mrb[105].mxu0  ;;  %15736 = vmatmul.mubr.msk.f32.gmra.mrb[210].mxu0 %vm1299_vm4, %v12810_v45  ;;  %v22221_v24 = vpop.permute.xlu0 %9001  ;;  %v24505_v22 = vld [vmem:[#allocation218_spill] sm:$0xff] }
 0x4cc   : > { %11033 = vmatprep.mubr.f32.mxu1 %v629_v2  ;;  %v22214_v44 = vmul.f32 %v10081_v34, %v9825_v57  ;;  %v9827_v11 = vmax.f32 %v9571_v50, 1e-06  ;;  %v16385_v2 = vadd.f32 %v7174_v1, %v24502_v4  ;;  %15738 = vmatprep.mubr.msk.f32.mxu0 %vm1299_vm4, %v12811_v37  ;;  %v12813_v57 = vld [vmem:[%s24008_s1 + $0x16b0] sm:$0xff]  ;;  %v22236_v34 = vpop.permute.xlu1 %9006  ;;  %v24506_v4 = vld [vmem:[#allocation219_spill] sm:$0xff] }
 0x4cd   : > { %v10084_v58 = vmul.f32 %v9828_v25, %v9828_v25  ;;  %v9574_v29 = vadd.f32 %v16384_v54, %v24503_v62  ;;  %v12814_v62 = vld [vmem:[%s24008_s1 + $0x16b8] sm:$0xff] }
 0x4ce   : > { %v10083_v19 = vmul.f32 %v9827_v11, %v9827_v11  ;;  %v9573_v32 = vadd.f32 %v16385_v2, %v24504_v48  ;;  %v15581_v37 = vpop.f32.mrb[106].mxu0  ;;  %v12815_v48 = vld [vmem:[%s24008_s1 + $0x16c0] sm:$0xff] }
 0x4cf   : > { %11034 = vmatmul.mubr.f32.gmra.mrb[34].mxu1 %v628_v61  ;;  %v661_v61 = vld [vmem:[%s24010_s3 + $0x1a8] sm:$0xff]  ;;  %v22238_v55 = vmul.f32 %v10084_v58, %v9828_v25  ;;  %v9830_v50 = vmax.f32 %v9574_v29, 1e-06  ;;  %v7184_v17 = vpop.f32.mrb[107].mxu0  ;;  %15739 = vmatmul.mubr.msk.f32.gmra.mrb[212].mxu0 %vm1299_vm4, %v12812_v14  ;;  %v24507_v58 = vld [vmem:[#allocation99_spill] sm:$0xff] }
 0x4d0   : > { %11038 = vmatprep.mubr.f32.mxu1 %v645_v3  ;;  %v16386_v3 = vadd.f32 %v15581_v37, %v24505_v22  ;;  %v22242_v54 = vmul.f32 %v10083_v19, %v9827_v11  ;;  %v9829_v1 = vmax.f32 %v9573_v32, 1e-06  ;;  %v16387_v2 = vadd.f32 %v7184_v17, %v24506_v4  ;;  %15741 = vmatprep.mubr.msk.f32.mxu0 %vm1299_vm4, %v12813_v57  ;;  %v660_v11 = vld [vmem:[%s24010_s3 + $0x1a0] sm:$0xff]  ;;  %v24508_v19 = vld [vmem:[#allocation98_spill] sm:$0xff]  ;;  %v22262_v22 = vpop.permute.xlu0 %9091 }
 0x4d1   : > { %v10086_v25 = vmul.f32 %v9830_v50, %v9830_v50  ;;  %24509 = vst [vmem:[#allocation149_spill] sm:$0xff] %v22262_v22  ;;  %v24510_v17 = vld [vmem:[#allocation220_spill] sm:$0xff] }
 0x4d2   : > { %v9576_v29 = vadd.f32 %v16386_v3, %v24507_v58  ;;  %v10085_v57 = vmul.f32 %v9829_v1, %v9829_v1  ;;  %v9575_v32 = vadd.f32 %v16387_v2, %v24508_v19  ;;  %v15584_v37 = vpop.f32.mrb[108].mxu0  ;;  %v12816_v19 = vld [vmem:[%s24008_s1 + $0x16c8] sm:$0xff] }
 0x4d3   : > { %11039 = vmatmul.mubr.f32.gmra.mrb[36].mxu1 %v644_v59  ;;  %v677_v59 = vld [vmem:[%s24010_s3 + $0x228] sm:$0xff]  ;;  %v22264_v3 = vmul.f32 %v10086_v25, %v9830_v50  ;;  %v16388_v4 = vadd.f32 %v15584_v37, %v24510_v17  ;;  %v7194_v58 = vpop.f32.mrb[109].mxu0  ;;  %15742 = vmatmul.mubr.msk.f32.gmra.mrb[214].mxu0 %vm1299_vm4, %v12814_v62  ;;  %v22275_v50 = vpop.permute.xlu1 %9096  ;;  %v24516_v62 = vld [vmem:[#allocation223_spill] sm:$0xff] }
 0x4d4   : > { %11043 = vmatprep.mubr.f32.mxu1 %v661_v61  ;;  %v9832_v61 = vmax.f32 %v9576_v29, 1e-06  ;;  %v22268_v45 = vmul.f32 %v10085_v57, %v9829_v1  ;;  %v9831_v14 = vmax.f32 %v9575_v32, 1e-06  ;;  %v16389_v2 = vadd.f32 %v7194_v58, %v24511_v12  ;;  %15744 = vmatprep.mubr.msk.f32.mxu0 %vm1299_vm4, %v12815_v48  ;;  %24512 = vst [vmem:[#allocation150_spill] sm:$0xff] %v22275_v50  ;;  %v24513_v29 = vld [vmem:[#allocation107_spill] sm:$0xff] }
 0x4d5   : > { %v9578_v37 = vadd.f32 %v16388_v4, %v24513_v29  ;;  %v12817_v1 = vld [vmem:[%s24008_s1 + $0x16d0] sm:$0xff]  ;;  %v676_v12 = vld [vmem:[%s24010_s3 + $0x220] sm:$0xff]  ;;  %v693_v17 = vld [vmem:[%s24010_s3 + $0x2a8] sm:$0xff] }
 0x4d6   : > { %v10088_v25 = vmul.f32 %v9832_v61, %v9832_v61  ;;  %v10087_v48 = vmul.f32 %v9831_v14, %v9831_v14  ;;  %v24514_v57 = vld [vmem:[#allocation104_spill] sm:$0xff]  ;;  %v15587_v32 = vpop.f32.mrb[110].mxu0  ;;  %v24515_v29 = vld [vmem:[#allocation222_spill] sm:$0xff] }
 0x4d7   : > { %11044 = vmatmul.mubr.f32.gmra.mrb[38].mxu1 %v660_v11  ;;  %v9577_v11 = vadd.f32 %v16389_v2, %v24514_v57  ;;  %v9834_v58 = vmax.f32 %v9578_v37, 1e-06  ;;  %v7204_v53 = vpop.f32.mrb[111].mxu0  ;;  %15745 = vmatmul.mubr.msk.f32.gmra.mrb[216].mxu0 %vm1299_vm4, %v12816_v19  ;;  %v12818_v2 = vld [vmem:[%s24008_s1 + $0x16d8] sm:$0xff]  ;;  %v24517_v37 = vld [vmem:[#allocation117_spill] sm:$0xff] }
 0x4d8   : > { %11048 = vmatprep.mubr.f32.mxu1 %v677_v59  ;;  %v22290_v4 = vmul.f32 %v10088_v25, %v9832_v61  ;;  %v16390_v59 = vadd.f32 %v15587_v32, %v24515_v29  ;;  %v22294_v41 = vmul.f32 %v10087_v48, %v9831_v14  ;;  %v16391_v27 = vadd.f32 %v7204_v53, %v24516_v62  ;;  %v22301_v61 = vpop.permute.xlu0 %9011  ;;  %v12819_v14 = vld [vmem:[%s24008_s1 + $0x16e0] sm:$0xff]  ;;  %v24518_v62 = vld [vmem:[#allocation114_spill] sm:$0xff]  ;;  %v22316_v32 = vpop.permute.xlu1 %9016 }
 0x4d9   : > { %v9833_v18 = vmax.f32 %v9577_v11, 1e-06  ;;  %15747 = vmatprep.mubr.msk.f32.mxu0 %vm1299_vm4, %v12817_v1  ;;  %v10090_v25 = vmul.f32 %v9834_v58, %v9834_v58  ;;  %v692_v53 = vld [vmem:[%s24010_s3 + $0x2a0] sm:$0xff]  ;;  %v709_v11 = vld [vmem:[%s24010_s3 + $0x328] sm:$0xff]  ;;  %v24535_v50 = vld [vmem:[#allocation230_spill] sm:$0xff] }
 0x4da   : > { %v9580_v57 = vadd.f32 %v16390_v59, %v24517_v37  ;;  %v15590_v48 = vpop.f32.mrb[112].mxu0  ;;  %v24519_v59 = vld [vmem:[#allocation224_spill] sm:$0xff] }
 0x4db   : > { %11049 = vmatmul.mubr.f32.gmra.mrb[40].mxu1 %v676_v12  ;;  %v10089_v1 = vmul.f32 %v9833_v18, %v9833_v18  ;;  %v9579_v12 = vadd.f32 %v16391_v27, %v24518_v62  ;;  %v22318_v29 = vmul.f32 %v10090_v25, %v9834_v58  ;;  %v16392_v37 = vadd.f32 %v15590_v48, %v24519_v59  ;;  %v7214_v39 = vpop.f32.mrb[113].mxu0  ;;  %v12820_v62 = vld [vmem:[%s24008_s1 + $0x16e8] sm:$0xff]  ;;  %v12821_v48 = vld [vmem:[%s24008_s1 + $0x16f0] sm:$0xff] }
 0x4dc   : > { %11053 = vmatprep.mubr.f32.mxu1 %v693_v17  ;;  %v9836_v17 = vmax.f32 %v9580_v57, 1e-06  ;;  %15748 = vmatmul.mubr.msk.f32.gmra.mrb[218].mxu0 %vm1299_vm4, %v12818_v2  ;;  %v16393_v27 = vadd.f32 %v7214_v39, %v24520_v63  ;;  %v24521_v25 = vld [vmem:[#allocation77_spill] sm:$0xff]  ;;  %v24522_v2 = vld [vmem:[#allocation76_spill] sm:$0xff] }
 0x4dd   : > { %v22322_v0 = vmul.f32 %v10089_v1, %v9833_v18  ;;  %v9835_v19 = vmax.f32 %v9579_v12, 1e-06  ;;  %15750 = vmatprep.mubr.msk.f32.mxu0 %vm1299_vm4, %v12819_v14  ;;  %v9582_v57 = vadd.f32 %v16392_v37, %v24521_v25  ;;  %v708_v18 = vld [vmem:[%s24010_s3 + $0x320] sm:$0xff]  ;;  %v22342_v12 = vpop.permute.xlu0 %9101  ;;  %v24524_v37 = vld [vmem:[#allocation226_spill] sm:$0xff] }
 0x4de   : > { %v10092_v58 = vmul.f32 %v9836_v17, %v9836_v17  ;;  %v9581_v14 = vadd.f32 %v16393_v27, %v24522_v2  ;;  %v15593_v1 = vpop.f32.mrb[114].mxu0  ;;  %24523 = vst [vmem:[#allocation26_spill] sm:$0xff] %v22342_v12  ;;  %v12822_v2 = vld [vmem:[%s24008_s1 + $0x16f8] sm:$0xff] }
 0x4df   : > { %11054 = vmatmul.mubr.f32.gmra.mrb[42].mxu1 %v692_v53  ;;  %v10091_v39 = vmul.f32 %v9835_v19, %v9835_v19  ;;  %v725_v53 = vld [vmem:[%s24010_s3 + $0x3a8] sm:$0xff]  ;;  %v16394_v25 = vadd.f32 %v15593_v1, %v24524_v37  ;;  %v7224_v42 = vpop.f32.mrb[115].mxu0 }
 0x4e0   : > { %11058 = vmatprep.mubr.f32.mxu1 %v709_v11  ;;  %v22344_v59 = vmul.f32 %v10092_v58, %v9836_v17  ;;  %v9838_v11 = vmax.f32 %v9582_v57, 1e-06  ;;  %15751 = vmatmul.mubr.msk.f32.gmra.mrb[220].mxu0 %vm1299_vm4, %v12820_v62  ;;  %v9837_v63 = vmax.f32 %v9581_v14, 1e-06  ;;  %v16395_v27 = vadd.f32 %v7224_v42, %v24525_v10  ;;  %v22355_v17 = vpop.permute.xlu1 %9106  ;;  %v24527_v57 = vld [vmem:[#allocation81_spill] sm:$0xff]  ;;  %v724_v10 = vld [vmem:[%s24010_s3 + $0x3a0] sm:$0xff] }
 0x4e1   : > { %v22348_v6 = vmul.f32 %v10091_v39, %v9835_v19  ;;  %15753 = vmatprep.mubr.msk.f32.mxu0 %vm1299_vm4, %v12821_v48  ;;  %24526 = vst [vmem:[#allocation23_spill] sm:$0xff] %v22355_v17  ;;  %v9584_v1 = vadd.f32 %v16394_v25, %v24527_v57  ;;  %v12823_v19 = vld [vmem:[%s24008_s1 + $0x1700] sm:$0xff]  ;;  %v615_v14 = vld [vmem:[%s24010_s3 + $0x38] sm:$0xff]  ;;  %v24530_v17 = vld [vmem:[#allocation229_spill] sm:$0xff] }
 0x4e2   : > { %v10094_v58 = vmul.f32 %v9838_v11, %v9838_v11  ;;  %v10093_v62 = vmul.f32 %v9837_v63, %v9837_v63  ;;  %v24528_v48 = vld [vmem:[#allocation80_spill] sm:$0xff]  ;;  %v15596_v39 = vpop.f32.mrb[116].mxu0 }
 0x4e3   : > { %11059 = vmatmul.mubr.f32.gmra.mrb[44].mxu1 %v708_v18  ;;  %v9583_v18 = vadd.f32 %v16395_v27, %v24528_v48  ;;  %v9840_v25 = vmax.f32 %v9584_v1, 1e-06  ;;  %v24529_v57 = vld [vmem:[#allocation228_spill] sm:$0xff]  ;;  %v22377_v48 = vpop.permute.xlu0 %9021 }
 0x4e4   : > { %11063 = vmatprep.mubr.f32.mxu1 %v725_v53  ;;  %v10350_v37 = vmul.f32 %v10094_v58, %v9838_v11  ;;  %v16396_v51 = vadd.f32 %v15596_v39, %v24529_v57  ;;  %v7234_v53 = vpop.f32.mrb[117].mxu0  ;;  %15754 = vmatmul.mubr.msk.f32.gmra.mrb[222].mxu0 %vm1299_vm4, %v12822_v2  ;;  %v10349_v8 = vmul.f32 %v10093_v62, %v9837_v63  ;;  %v12824_v27 = vld [vmem:[%s24008_s1 + $0x1708] sm:$0xff]  ;;  %v12825_v2 = vld [vmem:[%s24008_s1 + $0x1710] sm:$0xff] }
 0x4e5   : > { %v9839_v12 = vmax.f32 %v9583_v18, 1e-06  ;;  %v16397_v22 = vadd.f32 %v7234_v53, %v24530_v17  ;;  %15756 = vmatprep.mubr.msk.f32.mxu0 %vm1299_vm4, %v12823_v19  ;;  %v10096_v11 = vmul.f32 %v9840_v25, %v9840_v25  ;;  %v24531_v58 = vld [vmem:[#allocation85_spill] sm:$0xff]  ;;  %v22383_v63 = vpop.f32.mrb[198].mxu1  ;;  %v24533_v19 = vld [vmem:[#allocation84_spill] sm:$0xff] }
 0x4e6   : > { %v9586_v1 = vadd.f32 %v16396_v51, %v24531_v58  ;;  %24532 = vst [vmem:[#allocation151_spill] sm:$0xff] %v22383_v63  ;;  %v16010_v17 = vpack.c.bf16 %v10350_v37, %v10349_v8  ;;  %v15599_v39 = vpop.f32.mrb[118].mxu0  ;;  %v22386_v57 = vpop.f32.mrb[199].mxu1  ;;  %v12826_v8 = vld [vmem:[%s24008_s1 + $0x1718] sm:$0xff]  ;;  %v24537_v37 = vld [vmem:[#allocation89_spill] sm:$0xff] }
 0x4e7   : > { %11064 = vmatmul.mubr.f32.gmra.mrb[46].mxu1 %v724_v10  ;;  %v10095_v62 = vmul.f32 %v9839_v12, %v9839_v12  ;;  %v9585_v18 = vadd.f32 %v16397_v22, %v24533_v19  ;;  %24534 = vst [vmem:[#allocation153_spill] sm:$0xff] %v22386_v57  ;;  %v22388_v10 = vpop.permute.xlu1 %9026  ;;  %v10352_v53 = vmul.f32 %v10096_v11, %v9840_v25  ;;  %v7244_v58 = vpop.f32.mrb[119].mxu0 }
 0x4e8   : > { %11133 = vmatprep.mubr.f32.mxu1 %v615_v14  ;;  %v9842_v42 = vmax.f32 %v9586_v1, 1e-06  ;;  %v16398_v51 = vadd.f32 %v15599_v39, %v24535_v50  ;;  %15757 = vmatmul.mubr.msk.f32.gmra.mrb[224].mxu0 %vm1299_vm4, %v12824_v27  ;;  %v16399_v63 = vadd.f32 %v7244_v58, %v24536_v26  ;;  %v24538_v50 = vpack.c.bf16 %v22151_v28, %v22155_v33  ;;  %v12827_v26 = vld [vmem:[%s24008_s1 + $0x1720] sm:$0xff]  ;;  %v22413_v19 = vpop.permute.xlu0 %9111 }
 0x4e9   : > { %v10351_v31 = vmul.f32 %v10095_v62, %v9839_v12  ;;  %v9841_v14 = vmax.f32 %v9585_v18, 1e-06  ;;  %16012 = vmatprep.subr.msk.bf16.mxu1 %vm20944_vm12, %v16010_v17  ;;  %15759 = vmatprep.mubr.msk.f32.mxu0 %vm1299_vm4, %v12825_v2  ;;  %v22408_v12 = vpop.f32.mrb[200].mxu1  ;;  %v24540_v1 = vld [vmem:[#allocation88_spill] sm:$0xff] }
 0x4ea   : > { %v10098_v22 = vmul.f32 %v9842_v42, %v9842_v42  ;;  %v9588_v25 = vadd.f32 %v16398_v51, %v24537_v37  ;;  %16015 = vmatpush3.bf16.msk.msra.mxu1 %vm20944_vm12, %v24538_v50  ;;  %24539 = vst [vmem:[#allocation30_spill] sm:$0xff] %v22408_v12  ;;  %v9587_v2 = vadd.f32 %v16399_v63, %v24540_v1  ;;  %v15602_v17 = vpop.f32.mrb[120].mxu0  ;;  %v22411_v62 = vpop.f32.mrb[201].mxu1  ;;  %v24542_v33 = vld [vmem:[#allocation232_spill] sm:$0xff]  ;;  %v24621_v12 = vld [vmem:[#allocation6_spill] sm:$0xff] }
 0x4eb   : > { %v16016_v27 = vpack.c.bf16 %v10352_v53, %v10351_v31  ;;  %v10097_v11 = vmul.f32 %v9841_v14, %v9841_v14  ;;  %24541 = vst [vmem:[#allocation27_spill] sm:$0xff] %v22411_v62  ;;  %v16400_v39 = vadd.f32 %v15602_v17, %v24542_v33  ;;  %v7254_v51 = vpop.f32.mrb[121].mxu0  ;;  %v12828_v31 = vld [vmem:[%s24008_s1 + $0x1728] sm:$0xff] }
 0x4ec   : > { %v10354_v18 = vmul.f32 %v10098_v22, %v9842_v42  ;;  %v9844_v28 = vmax.f32 %v9588_v25, 1e-06  ;;  %15760 = vmatmul.mubr.msk.f32.gmra.mrb[226].mxu0 %vm1299_vm4, %v12826_v8  ;;  %v9843_v37 = vmax.f32 %v9587_v2, 1e-06  ;;  %v16401_v50 = vadd.f32 %v7254_v51, %v20681_v60  ;;  %v22424_v42 = vpop.permute.xlu1 %9116  ;;  %v24543_v53 = vld [vmem:[#allocation93_spill] sm:$0xff] }
 0x4ed   : > { %v10353_v58 = vmul.f32 %v10097_v11, %v9841_v14  ;;  %16018 = vmatprep.subr.msk.bf16.mxu1 %vm20944_vm12, %v16016_v27  ;;  %15762 = vmatprep.mubr.msk.f32.mxu0 %vm1299_vm4, %v12827_v26  ;;  %v9590_v22 = vadd.f32 %v16400_v39, %v24543_v53  ;;  %v24544_v14 = vpack.c.bf16 %v22184_v5, %v22188_v36  ;;  %v12829_v60 = vld [vmem:[%s24008_s1 + $0x1730] sm:$0xff]  ;;  %v22435_v8 = vpop.f32.mrb[202].mxu1  ;;  %v24546_v27 = vld [vmem:[#allocation92_spill] sm:$0xff] }
 0x4ee   : > { %v10100_v63 = vmul.f32 %v9844_v28, %v9844_v28  ;;  %24545 = vst [vmem:[#allocation155_spill] sm:$0xff] %v22435_v8  ;;  %v10099_v26 = vmul.f32 %v9843_v37, %v9843_v37  ;;  %v9589_v11 = vadd.f32 %v16401_v50, %v24546_v27  ;;  %v15605_v1 = vpop.f32.mrb[122].mxu0  ;;  %v22438_v2 = vpop.f32.mrb[203].mxu1 }
 0x4ef   : > { %16021 = vmatpush3.bf16.msk.msra.mxu1 %vm20944_vm12, %v24544_v14  ;;  %v16022_v25 = vpack.c.bf16 %v10354_v18, %v10353_v58  ;;  %24547 = vst [vmem:[#allocation156_spill] sm:$0xff] %v22438_v2  ;;  %v9846_v33 = vmax.f32 %v9590_v22, 1e-06  ;;  %v16402_v5 = vadd.f32 %v15605_v1, %v20703_v40  ;;  %v7264_v36 = vpop.f32.mrb[123].mxu0  ;;  %v12830_v18 = vld [vmem:[%s24008_s1 + $0x1738] sm:$0xff]  ;;  %v24548_v40 = vld [vmem:[#allocation97_spill] sm:$0xff] }
 0x4f0   : > { %v10356_v17 = vmul.f32 %v10100_v63, %v9844_v28  ;;  %15763 = vmatmul.mubr.msk.f32.gmra.mrb[228].mxu0 %vm1299_vm4, %v12828_v31  ;;  %v10355_v39 = vmul.f32 %v10099_v26, %v9843_v37  ;;  %v9845_v51 = vmax.f32 %v9589_v11, 1e-06  ;;  %v16403_v53 = vadd.f32 %v7264_v36, %v20709_v52  ;;  %v22449_v28 = vpop.permute.xlu0 %9031  ;;  %v12831_v52 = vld [vmem:[%s24008_s1 + $0x1740] sm:$0xff]  ;;  %v22465_v27 = vpop.permute.xlu1 %9036 }
 0x4f1   : > { %16024 = vmatprep.subr.msk.bf16.mxu1 %vm20944_vm12, %v16022_v25  ;;  %15765 = vmatprep.mubr.msk.f32.mxu0 %vm1299_vm4, %v12829_v60  ;;  %v10102_v58 = vmul.f32 %v9846_v33, %v9846_v33  ;;  %v9592_v50 = vadd.f32 %v16402_v5, %v24548_v40  ;;  %v24549_v37 = vpack.c.bf16 %v22210_v49, %v22214_v44  ;;  %v22460_v31 = vpop.f32.mrb[204].mxu1  ;;  %v24551_v14 = vld [vmem:[#allocation96_spill] sm:$0xff] }
 0x4f2   : > { %24550 = vst [vmem:[#allocation34_spill] sm:$0xff] %v22460_v31  ;;  %v16028_v63 = vpack.c.bf16 %v10356_v17, %v10355_v39  ;;  %v10101_v22 = vmul.f32 %v9845_v51, %v9845_v51  ;;  %v9591_v60 = vadd.f32 %v16403_v53, %v24551_v14  ;;  %v15608_v25 = vpop.f32.mrb[124].mxu0  ;;  %v22463_v26 = vpop.f32.mrb[205].mxu1  ;;  %v12832_v17 = vld [vmem:[%s24008_s1 + $0x1748] sm:$0xff]  ;;  %v24553_v39 = vld [vmem:[#allocation102_spill] sm:$0xff] }
 0x4f3   : > { %16027 = vmatpush3.bf16.msk.msra.mxu1 %vm20944_vm12, %v24549_v37  ;;  %24552 = vst [vmem:[#allocation31_spill] sm:$0xff] %v22463_v26  ;;  %v10358_v11 = vmul.f32 %v10102_v58, %v9846_v33  ;;  %v9848_v49 = vmax.f32 %v9592_v50, 1e-06  ;;  %v16404_v44 = vadd.f32 %v15608_v25, %v20733_v56  ;;  %v7274_v1 = vpop.f32.mrb[125].mxu0  ;;  %v24554_v56 = vpack.c.bf16 %v22238_v55, %v22242_v54  ;;  %v24556_v50 = vld [vmem:[#allocation100_spill] sm:$0xff]  ;;  %v24608_v26 = vld [vmem:[#allocation243_spill] sm:$0xff] }
 0x4f4   : > { %15766 = vmatmul.mubr.msk.f32.gmra.mrb[230].mxu0 %vm1299_vm4, %v12830_v18  ;;  %v10357_v5 = vmul.f32 %v10101_v22, %v9845_v51  ;;  %v9847_v36 = vmax.f32 %v9591_v60, 1e-06  ;;  %v16405_v40 = vadd.f32 %v7274_v1, %v20739_v38  ;;  %16030 = vmatprep.subr.msk.bf16.mxu1 %vm20944_vm12, %v16028_v63  ;;  %v12833_v38 = vld [vmem:[%s24008_s1 + $0x1750] sm:$0xff]  ;;  %v22490_v22 = vpop.permute.xlu0 %9121 }
 0x4f5   : > { %15768 = vmatprep.mubr.msk.f32.mxu0 %vm1299_vm4, %v12831_v52  ;;  %v10104_v33 = vmul.f32 %v9848_v49, %v9848_v49  ;;  %v9594_v53 = vadd.f32 %v16404_v44, %v24553_v39  ;;  %v22485_v51 = vpop.f32.mrb[206].mxu1 }
 0x4f6   : > { %24555 = vst [vmem:[#allocation159_spill] sm:$0xff] %v22485_v51  ;;  %v16034_v18 = vpack.c.bf16 %v10358_v11, %v10357_v5  ;;  %v10103_v58 = vmul.f32 %v9847_v36, %v9847_v36  ;;  %v9593_v37 = vadd.f32 %v16405_v40, %v24556_v50  ;;  %v15611_v52 = vpop.f32.mrb[126].mxu0  ;;  %v22488_v63 = vpop.f32.mrb[207].mxu1  ;;  %v12834_v11 = vld [vmem:[%s24008_s1 + $0x1758] sm:$0xff] }
 0x4f7   : > { %16033 = vmatpush3.bf16.msk.msra.mxu1 %vm20944_vm12, %v24554_v56  ;;  %24557 = vst [vmem:[#allocation160_spill] sm:$0xff] %v22488_v63  ;;  %v10360_v14 = vmul.f32 %v10104_v33, %v9848_v49  ;;  %v9850_v55 = vmax.f32 %v9594_v53, 1e-06  ;;  %v16406_v54 = vadd.f32 %v15611_v52, %v20763_v43  ;;  %v7284_v60 = vpop.f32.mrb[127].mxu0  ;;  %v22501_v49 = vpop.permute.xlu1 %9126  ;;  %v24558_v43 = vld [vmem:[#allocation112_spill] sm:$0xff]  ;;  %v24603_v51 = vld [vmem:[#allocation242_spill] sm:$0xff] }
 0x4f8   : > { %15769 = vmatmul.mubr.msk.f32.gmra.mrb[232].mxu0 %vm1299_vm4, %v12832_v17  ;;  %v10359_v25 = vmul.f32 %v10103_v58, %v9847_v36  ;;  %v9849_v44 = vmax.f32 %v9593_v37, 1e-06  ;;  %v16407_v1 = vadd.f32 %v7284_v60, %v20769_v21  ;;  %16036 = vmatprep.subr.msk.bf16.mxu1 %vm20944_vm12, %v16034_v18  ;;  %v24559_v36 = vpack.c.bf16 %v22264_v3, %v22268_v45  ;;  %v12835_v21 = vld [vmem:[%s24008_s1 + $0x1760] sm:$0xff] }
 0x4f9   : > { %15771 = vmatprep.mubr.msk.f32.mxu0 %vm1299_vm4, %v12833_v38  ;;  %v10106_v5 = vmul.f32 %v9850_v55, %v9850_v55  ;;  %v9596_v40 = vadd.f32 %v16406_v54, %v24558_v43  ;;  %v22512_v17 = vpop.f32.mrb[208].mxu1  ;;  %v24561_v53 = vld [vmem:[#allocation108_spill] sm:$0xff] }
 0x4fa   : > { %24560 = vst [vmem:[#allocation38_spill] sm:$0xff] %v22512_v17  ;;  %v16040_v33 = vpack.c.bf16 %v10360_v14, %v10359_v25  ;;  %v10105_v39 = vmul.f32 %v9849_v44, %v9849_v44  ;;  %v9595_v56 = vadd.f32 %v16407_v1, %v24561_v53  ;;  %v15614_v38 = vpop.f32.mrb[128].mxu0  ;;  %v22515_v18 = vpop.f32.mrb[209].mxu1  ;;  %v12836_v14 = vld [vmem:[%s24008_s1 + $0x1768] sm:$0xff] }
 0x4fb   : > { %16039 = vmatpush3.bf16.msk.msra.mxu1 %vm20944_vm12, %v24559_v36  ;;  %24562 = vst [vmem:[#allocation35_spill] sm:$0xff] %v22515_v18  ;;  %v10362_v58 = vmul.f32 %v10106_v5, %v9850_v55  ;;  %v9852_v50 = vmax.f32 %v9596_v40, 1e-06  ;;  %v16408_v45 = vadd.f32 %v15614_v38, %v20793_v35  ;;  %v7294_v3 = vpop.f32.mrb[129].mxu0  ;;  %v22526_v55 = vpop.permute.xlu0 %9041  ;;  %v24563_v35 = vld [vmem:[#allocation127_spill] sm:$0xff]  ;;  %v24566_v43 = vld [vmem:[#allocation124_spill] sm:$0xff] }
 0x4fc   : > { %15772 = vmatmul.mubr.msk.f32.gmra.mrb[234].mxu0 %vm1299_vm4, %v12834_v11  ;;  %v10361_v37 = vmul.f32 %v10105_v39, %v9849_v44  ;;  %v9851_v52 = vmax.f32 %v9595_v56, 1e-06  ;;  %v16409_v54 = vadd.f32 %v7294_v3, %v20799_v46  ;;  %16042 = vmatprep.subr.msk.bf16.mxu1 %vm20944_vm12, %v16040_v33  ;;  %v24564_v44 = vpack.c.bf16 %v22290_v4, %v22294_v41  ;;  %v12837_v46 = vld [vmem:[%s24008_s1 + $0x1770] sm:$0xff]  ;;  %v22542_v33 = vpop.permute.xlu1 %9046 }
 0x4fd   : > { %15774 = vmatprep.mubr.msk.f32.mxu0 %vm1299_vm4, %v12835_v21  ;;  %v10108_v60 = vmul.f32 %v9852_v50, %v9852_v50  ;;  %v9598_v25 = vadd.f32 %v16408_v45, %v24563_v35  ;;  %v24568_v3 = vld [vmem:[#allocation137_spill] sm:$0xff] }
 0x4fe   : > { %v22537_v1 = vpop.f32.mrb[210].mxu1  ;;  %v16046_v11 = vpack.c.bf16 %v10362_v58, %v10361_v37  ;;  %v10107_v5 = vmul.f32 %v9851_v52, %v9851_v52  ;;  %v9597_v40 = vadd.f32 %v16409_v54, %v24566_v43  ;;  %v15617_v36 = vpop.f32.mrb[130].mxu0  ;;  %v12838_v58 = vld [vmem:[%s24008_s1 + $0x1778] sm:$0xff]  ;;  %v24602_v18 = vld [vmem:[#allocation241_spill] sm:$0xff] }
 0x4ff   : > { %16045 = vmatpush3.bf16.msk.msra.mxu1 %vm20944_vm12, %v24564_v44  ;;  %24565 = vst [vmem:[#allocation161_spill] sm:$0xff] %v22537_v1  ;;  %v22540_v21 = vpop.f32.mrb[211].mxu1  ;;  %v10364_v39 = vmul.f32 %v10108_v60, %v9852_v50  ;;  %v9854_v41 = vmax.f32 %v9598_v25, 1e-06  ;;  %v16410_v4 = vadd.f32 %v15617_v36, %v20823_v7  ;;  %v7304_v53 = vpop.f32.mrb[131].mxu0  ;;  %v24569_v7 = vpack.c.bf16 %v22318_v29, %v22322_v0  ;;  %v24571_v60 = vld [vmem:[#allocation134_spill] sm:$0xff] }
 0x500   : > { %24567 = vst [vmem:[#allocation163_spill] sm:$0xff] %v22540_v21  ;;  %15775 = vmatmul.mubr.msk.f32.gmra.mrb[236].mxu0 %vm1299_vm4, %v12836_v14  ;;  %v10363_v56 = vmul.f32 %v10107_v5, %v9851_v52  ;;  %v9853_v38 = vmax.f32 %v9597_v40, 1e-06  ;;  %v16411_v45 = vadd.f32 %v7304_v53, %v20829_v30  ;;  %16048 = vmatprep.subr.msk.bf16.mxu1 %vm20944_vm12, %v16046_v11  ;;  %v12839_v30 = vld [vmem:[%s24008_s1 + $0x1780] sm:$0xff]  ;;  %v24574_v29 = vld [vmem:[#allocation233_spill] sm:$0xff]  ;;  %v22582_v53 = vpop.permute.xlu1 %9136 }
 0x501   : > { %15777 = vmatprep.mubr.msk.f32.mxu0 %vm1299_vm4, %v12837_v46  ;;  %v10110_v50 = vmul.f32 %v9854_v41, %v9854_v41  ;;  %v9600_v37 = vadd.f32 %v16410_v4, %v24568_v3  ;;  %v22567_v46 = vpop.permute.xlu0 %9131  ;;  %24576 = vst [vmem:[#allocation166_spill] sm:$0xff] %v22582_v53  ;;  %v614_v3 = vld [vmem:[%s24010_s3 + $0x30] sm:$0xff] }
 0x502   : > { %v16052_v54 = vpack.c.bf16 %v10364_v39, %v10363_v56  ;;  %v10109_v14 = vmul.f32 %v9853_v38, %v9853_v38  ;;  %v9599_v35 = vadd.f32 %v16411_v45, %v24571_v60  ;;  %v15620_v25 = vpop.f32.mrb[132].mxu0  ;;  %24573 = vst [vmem:[#allocation165_spill] sm:$0xff] %v22567_v46  ;;  %v24575_v39 = vld [vmem:[#allocation234_spill] sm:$0xff]  ;;  %v24577_v45 = vld [vmem:[#allocation147_spill] sm:$0xff] }
 0x503   : > { %16051 = vmatpush3.bf16.msk.msra.mxu1 %vm20944_vm12, %v24569_v7  ;;  %v22562_v52 = vpop.f32.mrb[212].mxu1  ;;  %v22569_v11 = vmul.f32 %v10110_v50, %v9854_v41  ;;  %v9856_v0 = vmax.f32 %v9600_v37, 1e-06  ;;  %v16412_v5 = vadd.f32 %v15620_v25, %v24574_v29  ;;  %v7314_v43 = vpop.f32.mrb[133].mxu0  ;;  %v12840_v41 = vld [vmem:[%s24008_s1 + $0x1788] sm:$0xff]  ;;  %v24582_v29 = vld [vmem:[#allocation235_spill] sm:$0xff] }
 0x504   : > { %24570 = vst [vmem:[#allocation42_spill] sm:$0xff] %v22562_v52  ;;  %v22565_v44 = vpop.f32.mrb[213].mxu1  ;;  %15778 = vmatmul.mubr.msk.f32.gmra.mrb[238].mxu0 %vm1299_vm4, %v12838_v58  ;;  %v22573_v40 = vmul.f32 %v10109_v14, %v9853_v38  ;;  %v9855_v36 = vmax.f32 %v9599_v35, 1e-06  ;;  %v16413_v4 = vadd.f32 %v7314_v43, %v24575_v39  ;;  %16054 = vmatprep.subr.msk.bf16.mxu1 %vm20944_vm12, %v16052_v54  ;;  %v12841_v58 = vld [vmem:[%s24008_s1 + $0x1790] sm:$0xff]  ;;  %v24580_v54 = vld [vmem:[#allocation144_spill] sm:$0xff] }
 0x505   : > { %24572 = vst [vmem:[#allocation39_spill] sm:$0xff] %v22565_v44  ;;  %15780 = vmatprep.mubr.msk.f32.mxu0 %vm1299_vm4, %v12839_v30  ;;  %v10112_v56 = vmul.f32 %v9856_v0, %v9856_v0  ;;  %v9602_v50 = vadd.f32 %v16412_v5, %v24577_v45  ;;  %v24578_v38 = vpack.c.bf16 %v22344_v59, %v22348_v6  ;;  %v631_v59 = vld [vmem:[%s24010_s3 + $0xb8] sm:$0xff] }
 0x506   : > { %v10111_v30 = vmul.f32 %v9855_v36, %v9855_v36  ;;  %v9601_v14 = vadd.f32 %v16413_v4, %v24580_v54  ;;  %v15623_v6 = vpop.f32.mrb[134].mxu0  ;;  %v12842_v54 = vld [vmem:[%s24008_s1 + $0x1798] sm:$0xff] }
 0x507   : > { %16057 = vmatpush3.bf16.msk.msra.mxu1 %vm20944_vm12, %v24578_v38  ;;  %v22596_v37 = vpop.f32.mrb[214].mxu1  ;;  %v22606_v35 = vmul.f32 %v10112_v56, %v9856_v0  ;;  %v9858_v25 = vmax.f32 %v9602_v50, 1e-06  ;;  %v16414_v5 = vadd.f32 %v15623_v6, %v24582_v29  ;;  %v7324_v43 = vpop.f32.mrb[135].mxu0  ;;  %v24583_v38 = vld [vmem:[#allocation236_spill] sm:$0xff]  ;;  %v24584_v50 = vld [vmem:[#allocation157_spill] sm:$0xff] }
 0x508   : > { %24579 = vst [vmem:[#allocation48_spill] sm:$0xff] %v22596_v37  ;;  %v22604_v60 = vpop.f32.mrb[215].mxu1  ;;  %15781 = vmatmul.mubr.msk.f32.gmra.mrb[240].mxu0 %vm1299_vm4, %v12840_v41  ;;  %v22610_v39 = vmul.f32 %v10111_v30, %v9855_v36  ;;  %v9857_v45 = vmax.f32 %v9601_v14, 1e-06  ;;  %v16415_v4 = vadd.f32 %v7324_v43, %v24583_v38  ;;  %v22617_v0 = vpop.permute.xlu0 %9051  ;;  %v12843_v36 = vld [vmem:[%s24008_s1 + $0x17a0] sm:$0xff]  ;;  %v630_v41 = vld [vmem:[%s24010_s3 + $0xb0] sm:$0xff] }
 0x509   : > { %24581 = vst [vmem:[#allocation45_spill] sm:$0xff] %v22604_v60  ;;  %15783 = vmatprep.mubr.msk.f32.mxu0 %vm1299_vm4, %v12841_v58  ;;  %v10114_v56 = vmul.f32 %v9858_v25, %v9858_v25  ;;  %v9604_v6 = vadd.f32 %v16414_v5, %v24584_v50  ;;  %v24586_v14 = vld [vmem:[#allocation154_spill] sm:$0xff]  ;;  %v24588_v60 = vld [vmem:[#allocation237_spill] sm:$0xff]  ;;  %v24595_v52 = vld [vmem:[#allocation239_spill] sm:$0xff] }
 0x50a   : > { %11134 = vmatmul.mubr.f32.vlgmr.msra.gmra.mrb[48].mxu1 %v614_v3  ;;  %v10113_v3 = vmul.f32 %v9857_v45, %v9857_v45  ;;  %v9603_v29 = vadd.f32 %v16415_v4, %v24586_v14  ;;  %v15626_v43 = vpop.f32.mrb[136].mxu0  ;;  %v647_v5 = vld [vmem:[%s24010_s3 + $0x138] sm:$0xff] }
 0x50b   : > { %11138 = vmatprep.mubr.f32.mxu1 %v631_v59  ;;  %v22626_v58 = vpop.f32.mrb[216].mxu1  ;;  %v22636_v59 = vpop.permute.xlu1 %9056  ;;  %v22638_v50 = vmul.f32 %v10114_v56, %v9858_v25  ;;  %v9860_v7 = vmax.f32 %v9604_v6, 1e-06  ;;  %v24589_v14 = vld [vmem:[#allocation238_spill] sm:$0xff]  ;;  %v24590_v56 = vld [vmem:[#allocation167_spill] sm:$0xff] }
 0x50c   : > { %24585 = vst [vmem:[#allocation169_spill] sm:$0xff] %v22626_v58  ;;  %v22634_v38 = vpop.f32.mrb[217].mxu1  ;;  %v16416_v58 = vadd.f32 %v15626_v43, %v24588_v60  ;;  %v7334_v37 = vpop.f32.mrb[137].mxu0  ;;  %15784 = vmatmul.mubr.msk.f32.gmra.mrb[242].mxu0 %vm1299_vm4, %v12842_v54  ;;  %v22642_v30 = vmul.f32 %v10113_v3, %v9857_v45  ;;  %v9859_v4 = vmax.f32 %v9603_v29, 1e-06  ;;  %v12845_v60 = vld [vmem:[%s24008_s1 + $0x17b0] sm:$0xff] }
 0x50d   : > { %24587 = vst [vmem:[#allocation170_spill] sm:$0xff] %v22634_v38  ;;  %v16417_v44 = vadd.f32 %v7334_v37, %v24589_v14  ;;  %15786 = vmatprep.mubr.msk.f32.mxu0 %vm1299_vm4, %v12843_v36  ;;  %v12844_v38 = vld [vmem:[%s24008_s1 + $0x17a8] sm:$0xff]  ;;  %v10116_v25 = vmul.f32 %v9860_v7, %v9860_v7  ;;  %v646_v45 = vld [vmem:[%s24010_s3 + $0x130] sm:$0xff] }
 0x50e   : > { %11139 = vmatmul.mubr.f32.gmra.mrb[50].mxu1 %v630_v41  ;;  %v9606_v6 = vadd.f32 %v16416_v58, %v24590_v56  ;;  %v10115_v36 = vmul.f32 %v9859_v4, %v9859_v4  ;;  %v24592_v3 = vld [vmem:[#allocation164_spill] sm:$0xff]  ;;  %v15629_v29 = vpop.f32.mrb[138].mxu0  ;;  %v663_v58 = vld [vmem:[%s24010_s3 + $0x1b8] sm:$0xff] }
 0x50f   : > { %11143 = vmatprep.mubr.f32.mxu1 %v647_v5  ;;  %v22656_v37 = vpop.f32.mrb[218].mxu1  ;;  %v9605_v41 = vadd.f32 %v16417_v44, %v24592_v3  ;;  %v22666_v5 = vpop.permute.xlu0 %9141  ;;  %v22668_v14 = vmul.f32 %v10116_v25, %v9860_v7  ;;  %v24596_v3 = vld [vmem:[#allocation240_spill] sm:$0xff] }
 0x510   : > { %24591 = vst [vmem:[#allocation52_spill] sm:$0xff] %v22656_v37  ;;  %v22664_v43 = vpop.f32.mrb[219].mxu1  ;;  %24594 = vst [vmem:[#allocation171_spill] sm:$0xff] %v22666_v5  ;;  %v9862_v56 = vmax.f32 %v9606_v6, 1e-06  ;;  %v16418_v37 = vadd.f32 %v15629_v29, %v24595_v52  ;;  %v7344_v21 = vpop.f32.mrb[139].mxu0  ;;  %15787 = vmatmul.mubr.msk.f32.gmra.mrb[244].mxu0 %vm1299_vm4, %v12844_v38  ;;  %v22672_v54 = vmul.f32 %v10115_v36, %v9859_v4 }
 0x511   : > { %24593 = vst [vmem:[#allocation49_spill] sm:$0xff] %v22664_v43  ;;  %v9861_v44 = vmax.f32 %v9605_v41, 1e-06  ;;  %v16419_v1 = vadd.f32 %v7344_v21, %v24596_v3  ;;  %15789 = vmatprep.mubr.msk.f32.mxu0 %vm1299_vm4, %v12845_v60  ;;  %v12846_v43 = vld [vmem:[%s24008_s1 + $0x17b8] sm:$0xff]  ;;  %v22679_v7 = vpop.permute.xlu1 %9146  ;;  %v24598_v6 = vld [vmem:[#allocation177_spill] sm:$0xff]  ;;  %v12847_v38 = vld [vmem:[%s24008_s1 + $0x17c0] sm:$0xff] }
 0x512   : > { %11144 = vmatmul.mubr.f32.gmra.mrb[52].mxu1 %v646_v45  ;;  %24597 = vst [vmem:[#allocation173_spill] sm:$0xff] %v22679_v7  ;;  %v10118_v25 = vmul.f32 %v9862_v56, %v9862_v56  ;;  %v9608_v52 = vadd.f32 %v16418_v37, %v24598_v6  ;;  %v662_v21 = vld [vmem:[%s24010_s3 + $0x1b0] sm:$0xff]  ;;  %v15632_v29 = vpop.f32.mrb[140].mxu0  ;;  %v679_v37 = vld [vmem:[%s24010_s3 + $0x238] sm:$0xff] }
 0x513   : > { %11148 = vmatprep.mubr.f32.mxu1 %v663_v58  ;;  %v22688_v4 = vpop.f32.mrb[220].mxu1  ;;  %v10117_v45 = vmul.f32 %v9861_v44, %v9861_v44  ;;  %v24600_v36 = vld [vmem:[#allocation174_spill] sm:$0xff]  ;;  %v16420_v17 = vadd.f32 %v15632_v29, %v24602_v18  ;;  %v7354_v63 = vpop.f32.mrb[141].mxu0 }
 0x514   : > { %24599 = vst [vmem:[#allocation56_spill] sm:$0xff] %v22688_v4  ;;  %v9607_v41 = vadd.f32 %v16419_v1, %v24600_v36  ;;  %v22696_v3 = vpop.f32.mrb[221].mxu1  ;;  %v22698_v58 = vmul.f32 %v10118_v25, %v9862_v56  ;;  %v9864_v6 = vmax.f32 %v9608_v52, 1e-06  ;;  %15790 = vmatmul.mubr.msk.f32.gmra.mrb[246].mxu0 %vm1299_vm4, %v12846_v43  ;;  %v16421_v1 = vadd.f32 %v7354_v63, %v24603_v51  ;;  %v12848_v36 = vld [vmem:[%s24008_s1 + $0x17c8] sm:$0xff]  ;;  %v22709_v56 = vpop.permute.xlu0 %9061  ;;  %v24604_v52 = vld [vmem:[#allocation187_spill] sm:$0xff] }
 0x515   : > { %24601 = vst [vmem:[#allocation53_spill] sm:$0xff] %v22696_v3  ;;  %v22702_v4 = vmul.f32 %v10117_v45, %v9861_v44  ;;  %15792 = vmatprep.mubr.msk.f32.mxu0 %vm1299_vm4, %v12847_v38  ;;  %v9610_v18 = vadd.f32 %v16420_v17, %v24604_v52  ;;  %v12849_v43 = vld [vmem:[%s24008_s1 + $0x17d0] sm:$0xff]  ;;  %v695_v17 = vld [vmem:[%s24010_s3 + $0x2b8] sm:$0xff] }
 0x516   : > { %v9863_v60 = vmax.f32 %v9607_v41, 1e-06  ;;  %11149 = vmatmul.mubr.f32.gmra.mrb[54].mxu1 %v662_v21  ;;  %v10120_v25 = vmul.f32 %v9864_v6, %v9864_v6  ;;  %v678_v51 = vld [vmem:[%s24010_s3 + $0x230] sm:$0xff]  ;;  %v24606_v21 = vld [vmem:[#allocation184_spill] sm:$0xff]  ;;  %v15635_v41 = vpop.f32.mrb[142].mxu0 }
 0x517   : > { %11153 = vmatprep.mubr.f32.mxu1 %v679_v37  ;;  %v22718_v63 = vpop.f32.mrb[222].mxu1  ;;  %v9609_v45 = vadd.f32 %v16421_v1, %v24606_v21  ;;  %v22728_v37 = vpop.permute.xlu1 %9066  ;;  %v9866_v3 = vmax.f32 %v9610_v18, 1e-06  ;;  %v24609_v21 = vld [vmem:[#allocation244_spill] sm:$0xff]  ;;  %v24629_v5 = vld [vmem:[#allocation106_spill] sm:$0xff] }
 0x518   : > { %24605 = vst [vmem:[#allocation175_spill] sm:$0xff] %v22718_v63  ;;  %v10119_v38 = vmul.f32 %v9863_v60, %v9863_v60  ;;  %v22726_v29 = vpop.f32.mrb[223].mxu1  ;;  %v22730_v52 = vmul.f32 %v10120_v25, %v9864_v6  ;;  %v16422_v63 = vadd.f32 %v15635_v41, %v24608_v26  ;;  %v7364_v31 = vpop.f32.mrb[143].mxu0  ;;  %15793 = vmatmul.mubr.msk.f32.gmra.mrb[248].mxu0 %vm1299_vm4, %v12848_v36  ;;  %v12851_v26 = vld [vmem:[%s24008_s1 + $0x17e0] sm:$0xff]  ;;  %v24630_v7 = vld [vmem:[#allocation142_spill] sm:$0xff] }
 0x519   : > { %24607 = vst [vmem:[#allocation176_spill] sm:$0xff] %v22726_v29  ;;  %v9865_v1 = vmax.f32 %v9609_v45, 1e-06  ;;  %v16423_v2 = vadd.f32 %v7364_v31, %v24609_v21  ;;  %15795 = vmatprep.mubr.msk.f32.mxu0 %vm1299_vm4, %v12849_v43  ;;  %v12850_v29 = vld [vmem:[%s24008_s1 + $0x17d8] sm:$0xff]  ;;  %v10122_v6 = vmul.f32 %v9866_v3, %v9866_v3 }
 0x51a   : > { %v22734_v44 = vmul.f32 %v10119_v38, %v9863_v60  ;;  %11154 = vmatmul.mubr.f32.gmra.mrb[56].mxu1 %v678_v51  ;;  %v9612_v25 = vadd.f32 %v16422_v63, %v22066_v15  ;;  %v694_v60 = vld [vmem:[%s24010_s3 + $0x2b0] sm:$0xff]  ;;  %v15638_v51 = vpop.f32.mrb[144].mxu0  ;;  %v711_v15 = vld [vmem:[%s24010_s3 + $0x338] sm:$0xff]  ;;  %v22758_v38 = vpop.permute.xlu0 %9231 }
 0x51b   : > { %11158 = vmatprep.mubr.f32.mxu1 %v695_v17  ;;  %v22748_v31 = vpop.f32.mrb[224].mxu1  ;;  %v10121_v18 = vmul.f32 %v9865_v1, %v9865_v1  ;;  %v9611_v43 = vadd.f32 %v16423_v2, %v22054_v13  ;;  %24612 = vst [vmem:[#allocation179_spill] sm:$0xff] %v22758_v38  ;;  %v22760_v45 = vmul.f32 %v10122_v6, %v9866_v3  ;;  %v24613_v17 = vld [vmem:[#allocation101_spill] sm:$0xff]  ;;  %v24614_v2 = vld [vmem:[#allocation103_spill] sm:$0xff]  ;;  %v22771_v3 = vpop.permute.xlu1 %9236 }
 0x51c   : > { %24610 = vst [vmem:[#allocation60_spill] sm:$0xff] %v22748_v31  ;;  %v22756_v63 = vpop.f32.mrb[225].mxu1  ;;  %v9868_v41 = vmax.f32 %v9612_v25, 1e-06  ;;  %v16424_v21 = vadd.f32 %v15638_v51, %v24613_v17  ;;  %v7374_v31 = vpop.f32.mrb[145].mxu0  ;;  %15796 = vmatmul.mubr.msk.f32.gmra.mrb[250].mxu0 %vm1299_vm4, %v12850_v29  ;;  %24615 = vst [vmem:[#allocation180_spill] sm:$0xff] %v22771_v3 }
 0x51d   : > { %24611 = vst [vmem:[#allocation57_spill] sm:$0xff] %v22756_v63  ;;  %v22764_v36 = vmul.f32 %v10121_v18, %v9865_v1  ;;  %v9867_v13 = vmax.f32 %v9611_v43, 1e-06  ;;  %v16425_v8 = vadd.f32 %v7374_v31, %v24614_v2  ;;  %15798 = vmatprep.mubr.msk.f32.mxu0 %vm1299_vm4, %v12851_v26  ;;  %v12852_v63 = vld [vmem:[%s24008_s1 + $0x17e8] sm:$0xff]  ;;  %v24616_v25 = vld [vmem:[#allocation122_spill] sm:$0xff]  ;;  %v24620_v38 = vld [vmem:[#allocation7_spill] sm:$0xff] }
 0x51e   : > { %11159 = vmatmul.mubr.f32.gmra.mrb[58].mxu1 %v694_v60  ;;  %v10124_v6 = vmul.f32 %v9868_v41, %v9868_v41  ;;  %v9614_v51 = vadd.f32 %v16424_v21, %v24616_v25  ;;  %v12853_v29 = vld [vmem:[%s24008_s1 + $0x17f0] sm:$0xff]  ;;  %v15641_v17 = vpop.f32.mrb[146].mxu0  ;;  %v727_v21 = vld [vmem:[%s24010_s3 + $0x3b8] sm:$0xff] }
 0x51f   : > { %11163 = vmatprep.mubr.f32.mxu1 %v711_v15  ;;  %v710_v1 = vld [vmem:[%s24010_s3 + $0x330] sm:$0xff]  ;;  %v22780_v26 = vpop.f32.mrb[226].mxu1  ;;  %v10123_v60 = vmul.f32 %v9867_v13, %v9867_v13  ;;  %v16426_v3 = vadd.f32 %v15641_v17, %v24620_v38  ;;  %v7384_v62 = vpop.f32.mrb[147].mxu0 }
 0x520   : > { %24617 = vst [vmem:[#allocation64_spill] sm:$0xff] %v22780_v26  ;;  %v24618_v18 = vld [vmem:[#allocation118_spill] sm:$0xff]  ;;  %v22788_v2 = vpop.f32.mrb[227].mxu1  ;;  %v22790_v15 = vmul.f32 %v10124_v6, %v9868_v41  ;;  %v9870_v25 = vmax.f32 %v9614_v51, 1e-06  ;;  %15799 = vmatmul.mubr.msk.f32.gmra.mrb[252].mxu0 %vm1299_vm4, %v12852_v63  ;;  %v22801_v41 = vpop.permute.xlu0 %9151  ;;  %v24623_v51 = vld [vmem:[#allocation132_spill] sm:$0xff] }
 0x521   : > { %v9613_v43 = vadd.f32 %v16425_v8, %v24618_v18  ;;  %24619 = vst [vmem:[#allocation61_spill] sm:$0xff] %v22788_v2  ;;  %v22794_v26 = vmul.f32 %v10123_v60, %v9867_v13  ;;  %v16427_v8 = vadd.f32 %v7384_v62, %v24621_v12  ;;  %15801 = vmatprep.mubr.msk.f32.mxu0 %vm1299_vm4, %v12853_v29  ;;  %v12854_v18 = vld [vmem:[%s24008_s1 + $0x17f8] sm:$0xff]  ;;  %24622 = vst [vmem:[#allocation181_spill] sm:$0xff] %v22801_v41  ;;  %v726_v63 = vld [vmem:[%s24010_s3 + $0x3b0] sm:$0xff] }
 0x522   : > { %11164 = vmatmul.mubr.f32.gmra.mrb[60].mxu1 %v710_v1  ;;  %v10126_v6 = vmul.f32 %v9870_v25, %v9870_v25  ;;  %v9616_v38 = vadd.f32 %v16426_v3, %v24623_v51  ;;  %v24625_v29 = vld [vmem:[#allocation128_spill] sm:$0xff]  ;;  %v22817_v3 = vpop.permute.xlu1 %9156  ;;  %v24628_v2 = vld [vmem:[#allocation105_spill] sm:$0xff] }
 0x523   : > { %v9869_v31 = vmax.f32 %v9613_v43, 1e-06  ;;  %11168 = vmatprep.mubr.f32.mxu1 %v727_v21  ;;  %v22807_v13 = vpop.f32.mrb[228].mxu1  ;;  %v9615_v60 = vadd.f32 %v16427_v8, %v24625_v29  ;;  %v15644_v43 = vpop.f32.mrb[148].mxu0  ;;  %v617_v1 = vld [vmem:[%s24010_s3 + $0x48] sm:$0xff]  ;;  %24627 = vst [vmem:[#allocation65_spill] sm:$0xff] %v22817_v3 }
 0x524   : > { %24624 = vst [vmem:[#allocation183_spill] sm:$0xff] %v22807_v13  ;;  %v22815_v17 = vpop.f32.mrb[229].mxu1  ;;  %v10382_v21 = vmul.f32 %v10126_v6, %v9870_v25  ;;  %v9872_v51 = vmax.f32 %v9616_v38, 1e-06  ;;  %v16428_v57 = vadd.f32 %v15644_v43, %v24628_v2  ;;  %v7394_v13 = vpop.f32.mrb[149].mxu0  ;;  %15802 = vmatmul.mubr.msk.f32.gmra.mrb[254].mxu0 %vm1299_vm4, %v12854_v18  ;;  %v24632_v25 = vld [vmem:[#allocation138_spill] sm:$0xff] }
 0x525   : > { %v10125_v62 = vmul.f32 %v9869_v31, %v9869_v31  ;;  %24626 = vst [vmem:[#allocation67_spill] sm:$0xff] %v22815_v17  ;;  %v9871_v41 = vmax.f32 %v9615_v60, 1e-06  ;;  %v16429_v8 = vadd.f32 %v7394_v13, %v24629_v5  ;;  %v22828_v43 = vpop.permute.xlu0 %9241 }
 0x526   : > { %11169 = vmatmul.mubr.f32.gmra.mrb[62].mxu1 %v726_v63  ;;  %v10128_v29 = vmul.f32 %v9872_v51, %v9872_v51  ;;  %v9618_v46 = vadd.f32 %v16428_v57, %v24630_v7  ;;  %v15647_v38 = vpop.f32.mrb[150].mxu0  ;;  %24634 = vst [vmem:[#allocation71_spill] sm:$0xff] %v22828_v43  ;;  %v24636_v57 = vld [vmem:[#allocation8_spill] sm:$0xff] }
 0x527   : > { %v10381_v12 = vmul.f32 %v10125_v62, %v9869_v31  ;;  %11238 = vmatprep.mubr.f32.mxu1 %v617_v1  ;;  %v22823_v53 = vpop.f32.mrb[230].mxu1  ;;  %v10127_v3 = vmul.f32 %v9871_v41, %v9871_v41  ;;  %v9617_v6 = vadd.f32 %v16429_v8, %v24632_v25  ;;  %v24635_v62 = vld [vmem:[#allocation9_spill] sm:$0xff]  ;;  %v7404_v63 = vpop.f32.mrb[151].mxu0  ;;  %v24638_v25 = vpack.c.bf16 %v22569_v11, %v22573_v40  ;;  %v24643_v11 = vld [vmem:[#allocation110_spill] sm:$0xff] }
 0x528   : > { %24631 = vst [vmem:[#allocation185_spill] sm:$0xff] %v22823_v53  ;;  %v22826_v2 = vpop.f32.mrb[231].mxu1  ;;  %v10384_v31 = vmul.f32 %v10128_v29, %v9872_v51  ;;  %v9874_v18 = vmax.f32 %v9618_v46, 1e-06  ;;  %v16430_v5 = vadd.f32 %v15647_v38, %v24635_v62  ;;  %v16431_v7 = vadd.f32 %v7404_v63, %v24636_v57  ;;  %v24640_v51 = vld [vmem:[#allocation148_spill] sm:$0xff]  ;;  %v24642_v63 = vld [vmem:[#allocation109_spill] sm:$0xff] }
 0x529   : > { %v16058_v17 = vpack.c.bf16 %v10382_v21, %v10381_v12  ;;  %24633 = vst [vmem:[#allocation186_spill] sm:$0xff] %v22826_v2  ;;  %v10383_v13 = vmul.f32 %v10127_v3, %v9871_v41  ;;  %v9873_v60 = vmax.f32 %v9617_v6, 1e-06  ;;  %v22834_v12 = vpop.permute.xlu1 %9246  ;;  %v24637_v21 = vld [vmem:[#allocation152_spill] sm:$0xff] }
 0x52a   : > { %v10130_v1 = vmul.f32 %v9874_v18, %v9874_v18  ;;  %v9620_v8 = vadd.f32 %v16430_v5, %v24637_v21  ;;  %v9619_v29 = vadd.f32 %v16431_v7, %v24640_v51  ;;  %v15650_v6 = vpop.f32.mrb[152].mxu0  ;;  %v24645_v51 = vpack.c.bf16 %v22606_v35, %v22610_v39 }
 0x52b   : > { %16060 = vmatprep.subr.msk.bf16.mxu1 %vm20944_vm12, %v16058_v17  ;;  %v22842_v46 = vpop.f32.mrb[232].mxu1  ;;  %v16064_v41 = vpack.c.bf16 %v10384_v31, %v10383_v13  ;;  %v10129_v3 = vmul.f32 %v9873_v60, %v9873_v60  ;;  %v16432_v57 = vadd.f32 %v15650_v6, %v24642_v63  ;;  %v7414_v5 = vpop.f32.mrb[153].mxu0  ;;  %v24644_v13 = vld [vmem:[#allocation162_spill] sm:$0xff] }
 0x52c   : > { %16063 = vmatpush3.bf16.msk.msra.mxu1 %vm20944_vm12, %v24638_v25  ;;  %24639 = vst [vmem:[#allocation70_spill] sm:$0xff] %v22842_v46  ;;  %v22845_v38 = vpop.f32.mrb[233].mxu1  ;;  %v10386_v17 = vmul.f32 %v10130_v1, %v9874_v18  ;;  %v9876_v62 = vmax.f32 %v9620_v8, 1e-06  ;;  %v9875_v2 = vmax.f32 %v9619_v29, 1e-06  ;;  %v16433_v40 = vadd.f32 %v7414_v5, %v24643_v11  ;;  %v22851_v25 = vpop.permute.xlu0 %9161 }
 0x52d   : > { %24641 = vst [vmem:[#allocation189_spill] sm:$0xff] %v22845_v38  ;;  %v10385_v21 = vmul.f32 %v10129_v3, %v9873_v60  ;;  %16066 = vmatprep.subr.msk.bf16.mxu1 %vm20944_vm12, %v16064_v41  ;;  %v9622_v7 = vadd.f32 %v16432_v57, %v24644_v13  ;;  %v24647_v8 = vld [vmem:[#allocation158_spill] sm:$0xff]  ;;  %v22864_v41 = vpop.permute.xlu1 %9166  ;;  %v24649_v57 = vld [vmem:[#allocation11_spill] sm:$0xff] }
 0x52e   : > { %v10132_v31 = vmul.f32 %v9876_v62, %v9876_v62  ;;  %v10131_v1 = vmul.f32 %v9875_v2, %v9875_v2  ;;  %v9621_v3 = vadd.f32 %v16433_v40, %v24647_v8  ;;  %v15653_v29 = vpop.f32.mrb[154].mxu0  ;;  %v24650_v38 = vld [vmem:[#allocation10_spill] sm:$0xff]  ;;  %v24652_v8 = vpack.c.bf16 %v22638_v50, %v22642_v30  ;;  %v24715_v46 = vld [vmem:[#allocation19_spill] sm:$0xff] }
 0x52f   : > { %v22859_v18 = vpop.f32.mrb[234].mxu1  ;;  %v16070_v60 = vpack.c.bf16 %v10386_v17, %v10385_v21  ;;  %v9878_v5 = vmax.f32 %v9622_v7, 1e-06  ;;  %v16434_v11 = vadd.f32 %v15653_v29, %v24649_v57  ;;  %v7424_v13 = vpop.f32.mrb[155].mxu0  ;;  %v24651_v21 = vld [vmem:[#allocation172_spill] sm:$0xff] }
 0x530   : > { %16069 = vmatpush3.bf16.msk.msra.mxu1 %vm20944_vm12, %v24645_v51  ;;  %24646 = vst [vmem:[#allocation190_spill] sm:$0xff] %v22859_v18  ;;  %v22862_v6 = vpop.f32.mrb[235].mxu1  ;;  %v10388_v63 = vmul.f32 %v10132_v31, %v9876_v62  ;;  %v10387_v35 = vmul.f32 %v10131_v1, %v9875_v2  ;;  %v9877_v39 = vmax.f32 %v9621_v3, 1e-06  ;;  %v16435_v51 = vadd.f32 %v7424_v13, %v24650_v38  ;;  %v24654_v2 = vld [vmem:[#allocation168_spill] sm:$0xff]  ;;  %v22881_v29 = vpop.permute.xlu0 %9251  ;;  %v24714_v18 = vld [vmem:[#allocation33_spill] sm:$0xff] }
 0x531   : > { %24648 = vst [vmem:[#allocation75_spill] sm:$0xff] %v22862_v6  ;;  %16072 = vmatprep.subr.msk.bf16.mxu1 %vm20944_vm12, %v16070_v60  ;;  %v10134_v17 = vmul.f32 %v9878_v5, %v9878_v5  ;;  %v9624_v40 = vadd.f32 %v16434_v11, %v24651_v21  ;;  %24656 = vst [vmem:[#allocation193_spill] sm:$0xff] %v22881_v29  ;;  %v24657_v11 = vld [vmem:[#allocation111_spill] sm:$0xff]  ;;  %v24658_v6 = vld [vmem:[#allocation113_spill] sm:$0xff] }
 0x532   : > { %v16076_v31 = vpack.c.bf16 %v10388_v63, %v10387_v35  ;;  %v10133_v7 = vmul.f32 %v9877_v39, %v9877_v39  ;;  %v9623_v1 = vadd.f32 %v16435_v51, %v24654_v2  ;;  %v15656_v3 = vpop.f32.mrb[156].mxu0  ;;  %v22887_v63 = vpop.permute.xlu1 %9256  ;;  %v24660_v51 = vld [vmem:[#allocation182_spill] sm:$0xff] }
 0x533   : > { %v22876_v62 = vpop.f32.mrb[236].mxu1  ;;  %v10390_v60 = vmul.f32 %v10134_v17, %v9878_v5  ;;  %v9880_v57 = vmax.f32 %v9624_v40, 1e-06  ;;  %v16436_v13 = vadd.f32 %v15656_v3, %v24657_v11  ;;  %v7434_v21 = vpop.f32.mrb[157].mxu0  ;;  %24659 = vst [vmem:[#allocation46_spill] sm:$0xff] %v22887_v63  ;;  %v24663_v40 = vld [vmem:[#allocation178_spill] sm:$0xff] }
 0x534   : > { %16075 = vmatpush3.bf16.msk.msra.mxu1 %vm20944_vm12, %v24652_v8  ;;  %24653 = vst [vmem:[#allocation74_spill] sm:$0xff] %v22876_v62  ;;  %v22879_v38 = vpop.f32.mrb[237].mxu1  ;;  %v10389_v30 = vmul.f32 %v10133_v7, %v9877_v39  ;;  %v9879_v50 = vmax.f32 %v9623_v1, 1e-06  ;;  %v16437_v8 = vadd.f32 %v7434_v21, %v24658_v6  ;;  %v24665_v11 = vld [vmem:[#allocation16_spill] sm:$0xff] }
 0x535   : > { %24655 = vst [vmem:[#allocation191_spill] sm:$0xff] %v22879_v38  ;;  %16078 = vmatprep.subr.msk.bf16.mxu1 %vm20944_vm12, %v16076_v31  ;;  %v10136_v35 = vmul.f32 %v9880_v57, %v9880_v57  ;;  %v9626_v2 = vadd.f32 %v16436_v13, %v24660_v51  ;;  %v24661_v38 = vpack.c.bf16 %v22668_v14, %v22672_v54  ;;  %v24666_v54 = vld [vmem:[#allocation13_spill] sm:$0xff] }
 0x536   : > { %v16082_v39 = vpack.c.bf16 %v10390_v60, %v10389_v30  ;;  %v10135_v17 = vmul.f32 %v9879_v50, %v9879_v50  ;;  %v9625_v6 = vadd.f32 %v16437_v8, %v24663_v40  ;;  %v15659_v7 = vpop.f32.mrb[158].mxu0  ;;  %v24667_v30 = vld [vmem:[#allocation192_spill] sm:$0xff]  ;;  %v24668_v40 = vpack.c.bf16 %v22698_v58, %v22702_v4 }
 0x537   : > { %v22895_v5 = vpop.f32.mrb[238].mxu1  ;;  %v10392_v31 = vmul.f32 %v10136_v35, %v9880_v57  ;;  %v9882_v3 = vmax.f32 %v9626_v2, 1e-06  ;;  %v16438_v21 = vadd.f32 %v15659_v7, %v24665_v11  ;;  %v7444_v13 = vpop.f32.mrb[159].mxu0  ;;  %v24670_v2 = vld [vmem:[#allocation188_spill] sm:$0xff] }
 0x538   : > { %16081 = vmatpush3.bf16.msk.msra.mxu1 %vm20944_vm12, %v24661_v38  ;;  %24662 = vst [vmem:[#allocation43_spill] sm:$0xff] %v22895_v5  ;;  %v22898_v1 = vpop.f32.mrb[239].mxu1  ;;  %v10391_v51 = vmul.f32 %v10135_v17, %v9879_v50  ;;  %v9881_v62 = vmax.f32 %v9625_v6, 1e-06  ;;  %v16439_v14 = vadd.f32 %v7444_v13, %v24666_v54  ;;  %v22904_v38 = vpop.permute.xlu0 %9171 }
 0x539   : > { %24664 = vst [vmem:[#allocation194_spill] sm:$0xff] %v22898_v1  ;;  %16084 = vmatprep.subr.msk.bf16.mxu1 %vm20944_vm12, %v16082_v39  ;;  %v10138_v60 = vmul.f32 %v9882_v3, %v9882_v3  ;;  %v9628_v8 = vadd.f32 %v16438_v21, %v24667_v30  ;;  %v22917_v39 = vpop.permute.xlu1 %9176  ;;  %v24672_v21 = vld [vmem:[#allocation115_spill] sm:$0xff]  ;;  %v24673_v1 = vld [vmem:[#allocation116_spill] sm:$0xff] }
 0x53a   : > { %v16088_v50 = vpack.c.bf16 %v10392_v31, %v10391_v51  ;;  %v10137_v35 = vmul.f32 %v9881_v62, %v9881_v62  ;;  %v9627_v17 = vadd.f32 %v16439_v14, %v24670_v2  ;;  %v15662_v6 = vpop.f32.mrb[160].mxu0  ;;  %v24674_v14 = vpack.c.bf16 %v22730_v52, %v22734_v44 }
 0x53b   : > { %v22912_v57 = vpop.f32.mrb[240].mxu1  ;;  %v10394_v11 = vmul.f32 %v10138_v60, %v9882_v3  ;;  %v9884_v13 = vmax.f32 %v9628_v8, 1e-06  ;;  %v16440_v54 = vadd.f32 %v15662_v6, %v24672_v21  ;;  %v7454_v30 = vpop.f32.mrb[161].mxu0 }
 0x53c   : > { %16087 = vmatpush3.bf16.msk.msra.mxu1 %vm20944_vm12, %v24668_v40  ;;  %24669 = vst [vmem:[#allocation195_spill] sm:$0xff] %v22912_v57  ;;  %v22915_v7 = vpop.f32.mrb[241].mxu1  ;;  %v10393_v4 = vmul.f32 %v10137_v35, %v9881_v62  ;;  %v9883_v58 = vmax.f32 %v9627_v17, 1e-06  ;;  %v16441_v40 = vadd.f32 %v7454_v30, %v24673_v1  ;;  %v22934_v2 = vpop.permute.xlu0 %9261 }
 0x53d   : > { %24671 = vst [vmem:[#allocation50_spill] sm:$0xff] %v22915_v7  ;;  %16090 = vmatprep.subr.msk.bf16.mxu1 %vm20944_vm12, %v16088_v50  ;;  %v10140_v31 = vmul.f32 %v9884_v13, %v9884_v13  ;;  %v9630_v51 = vadd.f32 %v16440_v54, %v22149_v9  ;;  %24677 = vst [vmem:[#allocation197_spill] sm:$0xff] %v22934_v2  ;;  %v24678_v9 = vld [vmem:[#allocation20_spill] sm:$0xff]  ;;  %v24679_v54 = vld [vmem:[#allocation17_spill] sm:$0xff] }
 0x53e   : > { %v16094_v60 = vpack.c.bf16 %v10394_v11, %v10393_v4  ;;  %v10139_v8 = vmul.f32 %v9883_v58, %v9883_v58  ;;  %v9629_v62 = vadd.f32 %v16441_v40, %v22137_v16  ;;  %v15665_v35 = vpop.f32.mrb[162].mxu0  ;;  %v22940_v11 = vpop.permute.xlu1 %9266  ;;  %v24681_v40 = vpack.c.bf16 %v22760_v45, %v22764_v36  ;;  %v24685_v45 = vld [vmem:[#allocation120_spill] sm:$0xff]  ;;  %v24721_v2 = vld [vmem:[#allocation150_spill] sm:$0xff] }
 0x53f   : > { %v22929_v3 = vpop.f32.mrb[242].mxu1  ;;  %v10396_v50 = vmul.f32 %v10140_v31, %v9884_v13  ;;  %v9886_v17 = vmax.f32 %v9630_v51, 1e-06  ;;  %v16442_v6 = vadd.f32 %v15665_v35, %v24678_v9  ;;  %v7464_v21 = vpop.f32.mrb[163].mxu0  ;;  %24680 = vst [vmem:[#allocation54_spill] sm:$0xff] %v22940_v11  ;;  %v24684_v35 = vld [vmem:[#allocation119_spill] sm:$0xff] }
 0x540   : > { %16093 = vmatpush3.bf16.msk.msra.mxu1 %vm20944_vm12, %v24674_v14  ;;  %24675 = vst [vmem:[#allocation47_spill] sm:$0xff] %v22929_v3  ;;  %v22932_v1 = vpop.f32.mrb[243].mxu1  ;;  %v10395_v44 = vmul.f32 %v10139_v8, %v9883_v58  ;;  %v9885_v52 = vmax.f32 %v9629_v62, 1e-06  ;;  %v16443_v30 = vadd.f32 %v7464_v21, %v24679_v54 }
 0x541   : > { %24676 = vst [vmem:[#allocation196_spill] sm:$0xff] %v22932_v1  ;;  %16096 = vmatprep.subr.msk.bf16.mxu1 %vm20944_vm12, %v16094_v60  ;;  %v10142_v16 = vmul.f32 %v9886_v17, %v9886_v17  ;;  %v9632_v4 = vadd.f32 %v16442_v6, %v22236_v34 }
 0x542   : > { %v16100_v58 = vpack.c.bf16 %v10396_v50, %v10395_v44  ;;  %v10141_v31 = vmul.f32 %v9885_v52, %v9885_v52  ;;  %v9631_v51 = vadd.f32 %v16443_v30, %v22221_v24  ;;  %v15668_v14 = vpop.f32.mrb[164].mxu0  ;;  %v22961_v50 = vpop.permute.xlu0 %9181  ;;  %v632_v30 = vld [vmem:[%s24010_s3 + $0xc0] sm:$0xff] }
 0x543   : > { %v22948_v13 = vpop.f32.mrb[244].mxu1  ;;  %v22953_v60 = vmul.f32 %v10142_v16, %v9886_v17  ;;  %v9888_v62 = vmax.f32 %v9632_v4, 1e-06  ;;  %v16444_v34 = vadd.f32 %v15668_v14, %v24684_v35  ;;  %v7474_v9 = vpop.f32.mrb[165].mxu0  ;;  %v24686_v17 = vpack.c.bf16 %v22790_v15, %v22794_v26 }
 0x544   : > { %16099 = vmatpush3.bf16.msk.msra.mxu1 %vm20944_vm12, %v24681_v40  ;;  %24682 = vst [vmem:[#allocation51_spill] sm:$0xff] %v22948_v13  ;;  %v22951_v8 = vpop.f32.mrb[245].mxu1  ;;  %v22956_v6 = vmul.f32 %v10141_v31, %v9885_v52  ;;  %v9887_v36 = vmax.f32 %v9631_v51, 1e-06  ;;  %v16445_v21 = vadd.f32 %v7474_v9, %v24685_v45  ;;  %v616_v52 = vld [vmem:[%s24010_s3 + $0x40] sm:$0xff]  ;;  %v22982_v15 = vpop.permute.xlu1 %9186  ;;  %v24690_v45 = vld [vmem:[#allocation21_spill] sm:$0xff] }
 0x545   : > { %24683 = vst [vmem:[#allocation198_spill] sm:$0xff] %v22951_v8  ;;  %16102 = vmatprep.subr.msk.bf16.mxu1 %vm20944_vm12, %v16100_v58  ;;  %v10144_v24 = vmul.f32 %v9888_v62, %v9888_v62  ;;  %v9634_v44 = vadd.f32 %v16444_v34, %v22316_v32  ;;  %v633_v32 = vld [vmem:[%s24010_s3 + $0xc8] sm:$0xff] }
 0x546   : > { %v10143_v16 = vmul.f32 %v9887_v36, %v9887_v36  ;;  %v9633_v4 = vadd.f32 %v16445_v21, %v22301_v61  ;;  %v15671_v40 = vpop.f32.mrb[166].mxu0  ;;  %v24689_v51 = vld [vmem:[#allocation24_spill] sm:$0xff] }
 0x547   : > { %v22972_v54 = vpop.f32.mrb[246].mxu1  ;;  %v22984_v58 = vmul.f32 %v10144_v24, %v9888_v62  ;;  %v9890_v31 = vmax.f32 %v9634_v44, 1e-06  ;;  %v16446_v14 = vadd.f32 %v15671_v40, %v24689_v51  ;;  %v7484_v35 = vpop.f32.mrb[167].mxu0  ;;  %v24694_v51 = vld [vmem:[#allocation121_spill] sm:$0xff] }
 0x548   : > { %16105 = vmatpush3.bf16.msk.msra.mxu1 %vm20944_vm12, %v24686_v17  ;;  %24687 = vst [vmem:[#allocation199_spill] sm:$0xff] %v22972_v54  ;;  %v22980_v26 = vpop.f32.mrb[247].mxu1  ;;  %v22987_v34 = vmul.f32 %v10143_v16, %v9887_v36  ;;  %v9889_v9 = vmax.f32 %v9633_v4, 1e-06  ;;  %v16447_v61 = vadd.f32 %v7484_v35, %v24690_v45 }
 0x549   : > { %24688 = vst [vmem:[#allocation58_spill] sm:$0xff] %v22980_v26  ;;  %v10146_v21 = vmul.f32 %v9890_v31, %v9890_v31  ;;  %v9636_v17 = vadd.f32 %v16446_v14, %v22388_v10  ;;  %v23004_v10 = vpop.permute.xlu0 %9271 }
 0x54a   : > { %v10145_v44 = vmul.f32 %v9889_v9, %v9889_v9  ;;  %v9635_v36 = vadd.f32 %v16447_v61, %v22377_v48  ;;  %v15674_v16 = vpop.f32.mrb[168].mxu0  ;;  %24693 = vst [vmem:[#allocation201_spill] sm:$0xff] %v23004_v10  ;;  %v23012_v61 = vpop.permute.xlu1 %9276 }
 0x54b   : > { %11239 = vmatmul.mubr.f32.vlgmr.msra.gmra.mrb[64].mxu1 %v616_v52  ;;  %v22994_v62 = vpop.f32.mrb[248].mxu1  ;;  %v649_v52 = vld [vmem:[%s24010_s3 + $0x148] sm:$0xff]  ;;  %v23006_v40 = vmul.f32 %v10146_v21, %v9890_v31  ;;  %v16448_v14 = vadd.f32 %v15674_v16, %v24694_v51  ;;  %v7494_v35 = vpop.f32.mrb[169].mxu0  ;;  %24696 = vst [vmem:[#allocation62_spill] sm:$0xff] %v23012_v61  ;;  %v648_v31 = vld [vmem:[%s24010_s3 + $0x140] sm:$0xff] }
 0x54c   : > { %11243 = vmatprep.mubr.f32.mxu1 %v633_v32  ;;  %24691 = vst [vmem:[#allocation55_spill] sm:$0xff] %v22994_v62  ;;  %v23002_v4 = vpop.f32.mrb[249].mxu1  ;;  %v9892_v32 = vmax.f32 %v9636_v17, 1e-06  ;;  %v23009_v45 = vmul.f32 %v10145_v44, %v9889_v9  ;;  %v9891_v24 = vmax.f32 %v9635_v36, 1e-06 }
 0x54d   : > { %24692 = vst [vmem:[#allocation200_spill] sm:$0xff] %v23002_v4  ;;  %v24695_v62 = vld [vmem:[#allocation123_spill] sm:$0xff]  ;;  %v9638_v54 = vadd.f32 %v16448_v14, %v22465_v27  ;;  %v24700_v9 = vld [vmem:[#allocation25_spill] sm:$0xff] }
 0x54e   : > { %v16449_v48 = vadd.f32 %v7494_v35, %v24695_v62  ;;  %v10148_v26 = vmul.f32 %v9892_v32, %v9892_v32  ;;  %v10147_v17 = vmul.f32 %v9891_v24, %v9891_v24  ;;  %v15677_v62 = vpop.f32.mrb[170].mxu0 }
 0x54f   : > { %11244 = vmatmul.mubr.f32.gmra.mrb[66].mxu1 %v632_v30  ;;  %v23018_v21 = vpop.f32.mrb[250].mxu1  ;;  %v665_v30 = vld [vmem:[%s24010_s3 + $0x1c8] sm:$0xff]  ;;  %v9894_v16 = vmax.f32 %v9638_v54, 1e-06  ;;  %v7504_v14 = vpop.f32.mrb[171].mxu0 }
 0x550   : > { %11248 = vmatprep.mubr.f32.mxu1 %v649_v52  ;;  %24697 = vst [vmem:[#allocation59_spill] sm:$0xff] %v23018_v21  ;;  %v9637_v44 = vadd.f32 %v16449_v48, %v22449_v28  ;;  %v23026_v36 = vpop.f32.mrb[251].mxu1  ;;  %v23028_v27 = vmul.f32 %v10148_v26, %v9892_v32  ;;  %v24699_v52 = vld [vmem:[#allocation28_spill] sm:$0xff]  ;;  %v23031_v35 = vmul.f32 %v10147_v17, %v9891_v24  ;;  %v23034_v28 = vpop.permute.xlu0 %9191 }
 0x551   : > { %24698 = vst [vmem:[#allocation202_spill] sm:$0xff] %v23026_v36  ;;  %v16450_v51 = vadd.f32 %v15677_v62, %v24699_v52  ;;  %v16451_v4 = vadd.f32 %v7504_v14, %v24700_v9  ;;  %v10150_v48 = vmul.f32 %v9894_v16, %v9894_v16  ;;  %v664_v26 = vld [vmem:[%s24010_s3 + $0x1c0] sm:$0xff]  ;;  %v24703_v52 = vld [vmem:[#allocation125_spill] sm:$0xff]  ;;  %v24704_v36 = vld [vmem:[#allocation126_spill] sm:$0xff] }
 0x552   : > { %v9893_v21 = vmax.f32 %v9637_v44, 1e-06  ;;  %v15680_v9 = vpop.f32.mrb[172].mxu0 }
 0x553   : > { %11249 = vmatmul.mubr.f32.gmra.mrb[68].mxu1 %v648_v31  ;;  %v9640_v8 = vadd.f32 %v16450_v51, %v22542_v33  ;;  %v23040_v54 = vpop.f32.mrb[252].mxu1  ;;  %v9639_v17 = vadd.f32 %v16451_v4, %v22526_v55  ;;  %v681_v31 = vld [vmem:[%s24010_s3 + $0x248] sm:$0xff]  ;;  %v23050_v33 = vpop.permute.xlu1 %9196  ;;  %v23052_v62 = vmul.f32 %v10150_v48, %v9894_v16  ;;  %v16452_v51 = vadd.f32 %v15680_v9, %v24703_v52 }
 0x554   : > { %11253 = vmatprep.mubr.f32.mxu1 %v665_v30  ;;  %24701 = vst [vmem:[#allocation203_spill] sm:$0xff] %v23040_v54  ;;  %v10149_v32 = vmul.f32 %v9893_v21, %v9893_v21  ;;  %v23048_v44 = vpop.f32.mrb[253].mxu1  ;;  %v7514_v14 = vpop.f32.mrb[173].mxu0 }
 0x555   : > { %24702 = vst [vmem:[#allocation66_spill] sm:$0xff] %v23048_v44  ;;  %v9896_v30 = vmax.f32 %v9640_v8, 1e-06  ;;  %v9895_v24 = vmax.f32 %v9639_v17, 1e-06  ;;  %v16453_v55 = vadd.f32 %v7514_v14, %v24704_v36  ;;  %v9642_v13 = vadd.f32 %v16452_v51, %v22636_v59  ;;  %v680_v44 = vld [vmem:[%s24010_s3 + $0x240] sm:$0xff]  ;;  %v23072_v59 = vpop.permute.xlu0 %9281 }
 0x556   : > { %v23055_v54 = vmul.f32 %v10149_v32, %v9893_v21  ;;  %v15683_v32 = vpop.f32.mrb[174].mxu0  ;;  %v697_v36 = vld [vmem:[%s24010_s3 + $0x2c8] sm:$0xff]  ;;  %24707 = vst [vmem:[#allocation205_spill] sm:$0xff] %v23072_v59  ;;  %v728_v59 = vld [vmem:[%s24010_s3 + $0x3c0] sm:$0xff] }
 0x557   : > { %11254 = vmatmul.mubr.f32.gmra.mrb[70].mxu1 %v664_v26  ;;  %v10152_v4 = vmul.f32 %v9896_v30, %v9896_v30  ;;  %v23062_v16 = vpop.f32.mrb[254].mxu1  ;;  %v10151_v48 = vmul.f32 %v9895_v24, %v9895_v24  ;;  %v9641_v21 = vadd.f32 %v16453_v55, %v22617_v0  ;;  %v9898_v9 = vmax.f32 %v9642_v13, 1e-06  ;;  %v7524_v51 = vpop.f32.mrb[175].mxu0 }
 0x558   : > { %11258 = vmatprep.mubr.f32.mxu1 %v681_v31  ;;  %24705 = vst [vmem:[#allocation63_spill] sm:$0xff] %v23062_v16  ;;  %v23070_v26 = vpop.f32.mrb[255].mxu1  ;;  %v24708_v31 = vld [vmem:[#allocation32_spill] sm:$0xff]  ;;  %v24709_v16 = vld [vmem:[#allocation29_spill] sm:$0xff]  ;;  %v23080_v55 = vpop.permute.xlu1 %9286 }
 0x559   : > { %24706 = vst [vmem:[#allocation204_spill] sm:$0xff] %v23070_v26  ;;  %v23074_v17 = vmul.f32 %v10152_v4, %v9896_v30  ;;  %v16454_v52 = vadd.f32 %v15683_v32, %v24708_v31  ;;  %v23077_v14 = vmul.f32 %v10151_v48, %v9895_v24  ;;  %v9897_v8 = vmax.f32 %v9641_v21, 1e-06  ;;  %24710 = vst [vmem:[#allocation69_spill] sm:$0xff] %v23080_v55  ;;  %v696_v30 = vld [vmem:[%s24010_s3 + $0x2c0] sm:$0xff]  ;;  %v24712_v24 = vld [vmem:[#allocation130_spill] sm:$0xff] }
 0x55a   : > { %v16455_v0 = vadd.f32 %v7524_v51, %v24709_v16  ;;  %v10154_v1 = vmul.f32 %v9898_v9, %v9898_v9  ;;  %v15686_v16 = vpop.f32.mrb[176].mxu0 }
 0x55b   : > { %11259 = vmatmul.mubr.f32.gmra.mrb[72].mxu1 %v680_v44  ;;  %v9644_v3 = vadd.f32 %v16454_v52, %v22728_v37  ;;  %v23086_v13 = vpop.f32.mrb[0].mxu1  ;;  %v10153_v4 = vmul.f32 %v9897_v8, %v9897_v8  ;;  %v713_v44 = vld [vmem:[%s24010_s3 + $0x348] sm:$0xff]  ;;  %v7534_v52 = vpop.f32.mrb[177].mxu0 }
 0x55c   : > { %11263 = vmatprep.mubr.f32.mxu1 %v697_v36  ;;  %v9643_v48 = vadd.f32 %v16455_v0, %v22709_v56  ;;  %v23094_v21 = vpop.f32.mrb[1].mxu1  ;;  %v23096_v37 = vmul.f32 %v10154_v1, %v9898_v9  ;;  %v24711_v36 = vld [vmem:[#allocation129_spill] sm:$0xff]  ;;  %v16457_v7 = vadd.f32 %v7534_v52, %v24712_v24  ;;  %v23102_v56 = vpop.permute.xlu0 %9201  ;;  %v712_v1 = vld [vmem:[%s24010_s3 + $0x340] sm:$0xff] }
 0x55d   : > { %v9900_v32 = vmax.f32 %v9644_v3, 1e-06  ;;  %v16456_v31 = vadd.f32 %v15686_v16, %v24711_v36  ;;  %v23099_v51 = vmul.f32 %v10153_v4, %v9897_v8  ;;  %v24713_v36 = vld [vmem:[#allocation36_spill] sm:$0xff] }
 0x55e   : > { %v9899_v26 = vmax.f32 %v9643_v48, 1e-06  ;;  %v9645_v4 = vadd.f32 %v16457_v7, %v22093_v47  ;;  %v15689_v24 = vpop.f32.mrb[178].mxu0 }
 0x55f   : > { %11264 = vmatmul.mubr.f32.gmra.mrb[74].mxu1 %v696_v30  ;;  %v10156_v0 = vmul.f32 %v9900_v32, %v9900_v32  ;;  %v9646_v57 = vadd.f32 %v16456_v31, %v22110_v20  ;;  %v23108_v3 = vpop.f32.mrb[2].mxu1  ;;  %v729_v30 = vld [vmem:[%s24010_s3 + $0x3c8] sm:$0xff]  ;;  %v23118_v20 = vpop.permute.xlu1 %9206  ;;  %v16458_v31 = vadd.f32 %v15689_v24, %v24713_v36  ;;  %v24718_v36 = vld [vmem:[#allocation131_spill] sm:$0xff] }
 0x560   : > { %11268 = vmatprep.mubr.f32.mxu1 %v713_v44  ;;  %v10155_v9 = vmul.f32 %v9899_v26, %v9899_v26  ;;  %v23116_v48 = vpop.f32.mrb[3].mxu1  ;;  %v7544_v52 = vpop.f32.mrb[179].mxu0  ;;  %v9901_v8 = vmax.f32 %v9645_v4, 1e-06 }
 0x561   : > { %v23120_v16 = vmul.f32 %v10156_v0, %v9900_v32  ;;  %v9902_v44 = vmax.f32 %v9646_v57, 1e-06  ;;  %v16459_v47 = vadd.f32 %v7544_v52, %v24714_v18  ;;  %v9648_v53 = vadd.f32 %v16458_v31, %v24715_v46  ;;  %v619_v18 = vld [vmem:[%s24010_s3 + $0x58] sm:$0xff]  ;;  %v23140_v46 = vpop.permute.xlu0 %9291  ;;  %v24719_v57 = vld [vmem:[#allocation133_spill] sm:$0xff] }
 0x562   : > { %v23123_v5 = vmul.f32 %v10155_v9, %v9899_v26  ;;  %v10157_v0 = vmul.f32 %v9901_v8, %v9901_v8  ;;  %v24716_v26 = vld [vmem:[#allocation22_spill] sm:$0xff]  ;;  %v15692_v4 = vpop.f32.mrb[180].mxu0  ;;  %24717 = vst [vmem:[#allocation68_spill] sm:$0xff] %v23140_v46 }
 0x563   : > { %11269 = vmatmul.mubr.f32.gmra.mrb[76].mxu1 %v712_v1  ;;  %v10158_v7 = vmul.f32 %v9902_v44, %v9902_v44  ;;  %v23130_v32 = vpop.f32.mrb[4].mxu1  ;;  %v9647_v9 = vadd.f32 %v16459_v47, %v24716_v26  ;;  %v16460_v31 = vadd.f32 %v15692_v4, %v24718_v36  ;;  %v7554_v52 = vpop.f32.mrb[181].mxu0 }
 0x564   : > { %11273 = vmatprep.mubr.f32.mxu1 %v729_v30  ;;  %v23138_v1 = vpop.f32.mrb[5].mxu1  ;;  %v9904_v30 = vmax.f32 %v9648_v53, 1e-06  ;;  %v10413_v55 = vmul.f32 %v10157_v0, %v9901_v8  ;;  %v16461_v61 = vadd.f32 %v7554_v52, %v24719_v57  ;;  %v23144_v47 = vpop.permute.xlu1 %9296 }
 0x565   : > { %v10414_v24 = vmul.f32 %v10158_v7, %v9902_v44  ;;  %v9903_v10 = vmax.f32 %v9647_v9, 1e-06  ;;  %24720 = vst [vmem:[#allocation206_spill] sm:$0xff] %v23144_v47  ;;  %v9650_v11 = vadd.f32 %v16460_v31, %v24721_v2  ;;  %v24722_v44 = vld [vmem:[#allocation149_spill] sm:$0xff]  ;;  %v24723_v9 = vld [vmem:[#allocation40_spill] sm:$0xff]  ;;  %v23156_v2 = vpop.permute.xlu0 %9211 }
 0x566   : > { %v10160_v26 = vmul.f32 %v9904_v30, %v9904_v30  ;;  %v9649_v53 = vadd.f32 %v16461_v61, %v24722_v44  ;;  %v15695_v7 = vpop.f32.mrb[182].mxu0  ;;  %v24724_v47 = vld [vmem:[#allocation37_spill] sm:$0xff] }
 0x567   : > { %11274 = vmatmul.mubr.f32.gmra.mrb[78].mxu1 %v728_v59  ;;  %v23147_v29 = vpop.f32.mrb[6].mxu1  ;;  %v16106_v63 = vpack.c.bf16 %v10414_v24, %v10413_v55  ;;  %v10159_v46 = vmul.f32 %v9903_v10, %v9903_v10  ;;  %v9906_v0 = vmax.f32 %v9650_v11, 1e-06  ;;  %v16462_v57 = vadd.f32 %v15695_v7, %v24723_v9  ;;  %v7564_v59 = vpop.f32.mrb[183].mxu0  ;;  %v24728_v7 = vld [vmem:[#allocation135_spill] sm:$0xff] }
 0x568   : > { %11343 = vmatprep.mubr.f32.mxu1 %v619_v18  ;;  %v23150_v4 = vpop.f32.mrb[7].mxu1  ;;  %v10416_v8 = vmul.f32 %v10160_v26, %v9904_v30  ;;  %v9905_v52 = vmax.f32 %v9649_v53, 1e-06  ;;  %v16463_v43 = vadd.f32 %v7564_v59, %v24724_v47  ;;  %v24725_v18 = vld [vmem:[#allocation23_spill] sm:$0xff]  ;;  %v24726_v24 = vpack.c.bf16 %v22953_v60, %v22956_v6  ;;  %v24727_v30 = vld [vmem:[#allocation26_spill] sm:$0xff]  ;;  %v24729_v59 = vld [vmem:[#allocation136_spill] sm:$0xff] }
 0x569   : > { %v10415_v36 = vmul.f32 %v10159_v46, %v9903_v10  ;;  %16108 = vmatprep.subr.msk.bf16.mxu1 %vm20944_vm12, %v16106_v63  ;;  %v10162_v55 = vmul.f32 %v9906_v0, %v9906_v0  ;;  %v9652_v61 = vadd.f32 %v16462_v57, %v24725_v18  ;;  %v23169_v63 = vpop.permute.xlu1 %9216 }
 0x56a   : > { %16111 = vmatpush3.bf16.msk.msra.mxu1 %vm20944_vm12, %v24726_v24  ;;  %v10161_v46 = vmul.f32 %v9905_v52, %v9905_v52  ;;  %v9651_v31 = vadd.f32 %v16463_v43, %v24727_v30  ;;  %v15698_v47 = vpop.f32.mrb[184].mxu0  ;;  %v23186_v30 = vpop.permute.xlu0 %9301 }
 0x56b   : > { %v23164_v11 = vpop.f32.mrb[8].mxu1  ;;  %v16112_v10 = vpack.c.bf16 %v10416_v8, %v10415_v36  ;;  %v10418_v44 = vmul.f32 %v10162_v55, %v9906_v0  ;;  %v9908_v53 = vmax.f32 %v9652_v61, 1e-06  ;;  %v16464_v9 = vadd.f32 %v15698_v47, %v24728_v7  ;;  %v7574_v57 = vpop.f32.mrb[185].mxu0 }
 0x56c   : > { %v23167_v26 = vpop.f32.mrb[9].mxu1  ;;  %v10417_v60 = vmul.f32 %v10161_v46, %v9905_v52  ;;  %v9907_v6 = vmax.f32 %v9651_v31, 1e-06  ;;  %v16465_v18 = vadd.f32 %v7574_v57, %v24729_v59  ;;  %v24730_v36 = vpack.c.bf16 %v22984_v58, %v22987_v34 }
 0x56d   : > { %16114 = vmatprep.subr.msk.bf16.mxu1 %vm20944_vm12, %v16112_v10  ;;  %v10164_v8 = vmul.f32 %v9908_v53, %v9908_v53  ;;  %v9654_v43 = vadd.f32 %v16464_v9, %v22424_v42  ;;  %v24731_v42 = vld [vmem:[#allocation44_spill] sm:$0xff]  ;;  %v24732_v9 = vld [vmem:[#allocation41_spill] sm:$0xff]  ;;  %v24733_v59 = vpack.c.bf16 %v23006_v40, %v23009_v45 }
 0x56e   : > { %16117 = vmatpush3.bf16.msk.msra.mxu1 %vm20944_vm12, %v24730_v36  ;;  %v16118_v55 = vpack.c.bf16 %v10418_v44, %v10417_v60  ;;  %v10163_v61 = vmul.f32 %v9907_v6, %v9907_v6  ;;  %v9653_v52 = vadd.f32 %v16465_v18, %v22413_v19  ;;  %v15701_v24 = vpop.f32.mrb[186].mxu0  ;;  %v23192_v44 = vpop.permute.xlu1 %9306  ;;  %v24735_v40 = vld [vmem:[#allocation140_spill] sm:$0xff] }
 0x56f   : > { %v23181_v0 = vpop.f32.mrb[10].mxu1  ;;  %v10420_v10 = vmul.f32 %v10164_v8, %v9908_v53  ;;  %v9910_v31 = vmax.f32 %v9654_v43, 1e-06  ;;  %v16466_v47 = vadd.f32 %v15701_v24, %v24731_v42  ;;  %v7584_v7 = vpop.f32.mrb[187].mxu0 }
 0x570   : > { %v23184_v46 = vpop.f32.mrb[11].mxu1  ;;  %v10419_v58 = vmul.f32 %v10163_v61, %v9907_v6  ;;  %v9909_v34 = vmax.f32 %v9653_v52, 1e-06  ;;  %v16467_v57 = vadd.f32 %v7584_v7, %v24732_v9  ;;  %16120 = vmatprep.subr.msk.bf16.mxu1 %vm20944_vm12, %v16118_v55  ;;  %v24734_v52 = vld [vmem:[#allocation139_spill] sm:$0xff]  ;;  %v23209_v7 = vpop.permute.xlu0 %9221  ;;  %v24737_v9 = vpack.c.bf16 %v23028_v27, %v23031_v35 }
 0x571   : > { %v10166_v19 = vmul.f32 %v9910_v31, %v9910_v31  ;;  %v9656_v60 = vadd.f32 %v16466_v47, %v22501_v49 }
 0x572   : > { %16123 = vmatpush3.bf16.msk.msra.mxu1 %vm20944_vm12, %v24733_v59  ;;  %v16124_v6 = vpack.c.bf16 %v10420_v10, %v10419_v58  ;;  %v10165_v18 = vmul.f32 %v9909_v34, %v9909_v34  ;;  %v9655_v8 = vadd.f32 %v16467_v57, %v22490_v22  ;;  %v15704_v43 = vpop.f32.mrb[188].mxu0  ;;  %v24736_v58 = vld [vmem:[#allocation166_spill] sm:$0xff] }
 0x573   : > { %v23200_v53 = vpop.f32.mrb[12].mxu1  ;;  %v10422_v55 = vmul.f32 %v10166_v19, %v9910_v31  ;;  %v9912_v61 = vmax.f32 %v9656_v60, 1e-06  ;;  %v16468_v24 = vadd.f32 %v15704_v43, %v24734_v52  ;;  %v7594_v49 = vpop.f32.mrb[189].mxu0  ;;  %v24738_v19 = vld [vmem:[#allocation165_spill] sm:$0xff]  ;;  %v24739_v52 = vld [vmem:[#allocation14_spill] sm:$0xff] }
 0x574   : > { %v23203_v36 = vpop.f32.mrb[13].mxu1  ;;  %v10421_v42 = vmul.f32 %v10165_v18, %v9909_v34  ;;  %v9911_v47 = vmax.f32 %v9655_v8, 1e-06  ;;  %v16469_v45 = vadd.f32 %v7594_v49, %v24735_v40  ;;  %16126 = vmatprep.subr.msk.bf16.mxu1 %vm20944_vm12, %v16124_v6  ;;  %v23222_v6 = vpop.permute.xlu1 %9226  ;;  %v24740_v40 = vld [vmem:[#allocation12_spill] sm:$0xff] }
 0x575   : > { %v10168_v10 = vmul.f32 %v9912_v61, %v9912_v61  ;;  %v9658_v22 = vadd.f32 %v16468_v24, %v24736_v58 }
 0x576   : > { %16129 = vmatpush3.bf16.msk.msra.mxu1 %vm20944_vm12, %v24737_v9  ;;  %v16130_v34 = vpack.c.bf16 %v10422_v55, %v10421_v42  ;;  %v10167_v57 = vmul.f32 %v9911_v47, %v9911_v47  ;;  %v9657_v60 = vadd.f32 %v16469_v45, %v24738_v19  ;;  %v15707_v59 = vpop.f32.mrb[190].mxu0  ;;  %v24741_v42 = vld [vmem:[#allocation173_spill] sm:$0xff]  ;;  %v24742_v9 = vpack.c.bf16 %v23052_v62, %v23055_v54 }
 0x577   : > { %v23217_v31 = vpop.f32.mrb[14].mxu1  ;;  %v10424_v8 = vmul.f32 %v10168_v10, %v9912_v61  ;;  %v9914_v43 = vmax.f32 %v9658_v22, 1e-06  ;;  %v16470_v24 = vadd.f32 %v15707_v59, %v24739_v52  ;;  %v7604_v49 = vpop.f32.mrb[191].mxu0 }
 0x578   : > { %v23220_v18 = vpop.f32.mrb[15].mxu1  ;;  %v10423_v27 = vmul.f32 %v10167_v57, %v9911_v47  ;;  %v9913_v35 = vmax.f32 %v9657_v60, 1e-06  ;;  %v16471_v58 = vadd.f32 %v7604_v49, %v24740_v40  ;;  %16132 = vmatprep.subr.msk.bf16.mxu1 %vm20944_vm12, %v16130_v34  ;;  %v24743_v47 = vld [vmem:[#allocation171_spill] sm:$0xff]  ;;  %v23239_v59 = vpop.permute.xlu0 %9391 }
 0x579   : > { %v10170_v55 = vmul.f32 %v9914_v43, %v9914_v43  ;;  %v9660_v45 = vadd.f32 %v16470_v24, %v24741_v42  ;;  %24744 = vst [vmem:[#allocation207_spill] sm:$0xff] %v23239_v59  ;;  %v24745_v24 = vld [vmem:[#allocation141_spill] sm:$0xff]  ;;  %v24746_v42 = vld [vmem:[#allocation143_spill] sm:$0xff]  ;;  %v24749_v59 = vpack.c.bf16 %v23074_v17, %v23077_v14 }
 0x57a   : > { %16135 = vmatpush3.bf16.msk.msra.mxu1 %vm20944_vm12, %v24742_v9  ;;  %v16136_v10 = vpack.c.bf16 %v10424_v8, %v10423_v27  ;;  %v10169_v22 = vmul.f32 %v9913_v35, %v9913_v35  ;;  %v9659_v57 = vadd.f32 %v16471_v58, %v24743_v47  ;;  %v15710_v19 = vpop.f32.mrb[192].mxu0  ;;  %v23245_v8 = vpop.permute.xlu1 %9396  ;;  %v24748_v58 = vld [vmem:[#allocation65_spill] sm:$0xff]  ;;  %v24752_v17 = vld [vmem:[#allocation15_spill] sm:$0xff] }
 0x57b   : > { %v23234_v61 = vpop.f32.mrb[16].mxu1  ;;  %v10426_v34 = vmul.f32 %v10170_v55, %v9914_v43  ;;  %v9916_v52 = vmax.f32 %v9660_v45, 1e-06  ;;  %v16472_v49 = vadd.f32 %v15710_v19, %v24745_v24  ;;  %v7614_v40 = vpop.f32.mrb[193].mxu0  ;;  %24747 = vst [vmem:[#allocation73_spill] sm:$0xff] %v23245_v8  ;;  %v24750_v45 = vld [vmem:[#allocation181_spill] sm:$0xff] }
 0x57c   : > { %v23237_v60 = vpop.f32.mrb[17].mxu1  ;;  %v10425_v54 = vmul.f32 %v10169_v22, %v9913_v35  ;;  %v9915_v62 = vmax.f32 %v9659_v57, 1e-06  ;;  %v16473_v9 = vadd.f32 %v7614_v40, %v24746_v42  ;;  %16138 = vmatprep.subr.msk.bf16.mxu1 %vm20944_vm12, %v16136_v10  ;;  %v24751_v40 = vld [vmem:[#allocation18_spill] sm:$0xff] }
 0x57d   : > { %v10172_v27 = vmul.f32 %v9916_v52, %v9916_v52  ;;  %v9662_v47 = vadd.f32 %v16472_v49, %v24748_v58 }
 0x57e   : > { %16141 = vmatpush3.bf16.msk.msra.mxu1 %vm20944_vm12, %v24749_v59  ;;  %v16142_v35 = vpack.c.bf16 %v10426_v34, %v10425_v54  ;;  %v10171_v55 = vmul.f32 %v9915_v62, %v9915_v62  ;;  %v9661_v22 = vadd.f32 %v16473_v9, %v24750_v45  ;;  %v15713_v57 = vpop.f32.mrb[194].mxu0  ;;  %v23262_v59 = vpop.permute.xlu0 %9311  ;;  %v24753_v9 = vpack.c.bf16 %v23096_v37, %v23099_v51 }
 0x57f   : > { %v10428_v10 = vmul.f32 %v10172_v27, %v9916_v52  ;;  %v9918_v24 = vmax.f32 %v9662_v47, 1e-06  ;;  %v16474_v42 = vadd.f32 %v15713_v57, %v24751_v40  ;;  %v7624_v49 = vpop.f32.mrb[195].mxu0  ;;  %v24754_v57 = vld [vmem:[#allocation145_spill] sm:$0xff] }
 0x580   : > { %v23253_v43 = vpop.f32.mrb[18].mxu1  ;;  %v10427_v58 = vmul.f32 %v10171_v55, %v9915_v62  ;;  %v9917_v8 = vmax.f32 %v9661_v22, 1e-06  ;;  %v16475_v14 = vadd.f32 %v7624_v49, %v24752_v17  ;;  %16144 = vmatprep.subr.msk.bf16.mxu1 %vm20944_vm12, %v16142_v35  ;;  %v23275_v35 = vpop.permute.xlu1 %9316  ;;  %v24755_v49 = vld [vmem:[#allocation146_spill] sm:$0xff] }
 0x581   : > { %v23256_v19 = vpop.f32.mrb[19].mxu1  ;;  %v10174_v34 = vmul.f32 %v9918_v24, %v9918_v24  ;;  %v9664_v54 = vadd.f32 %v16474_v42, %v22864_v41 }
 0x582   : > { %16147 = vmatpush3.bf16.msk.msra.mxu1 %vm20944_vm12, %v24753_v9  ;;  %v16148_v62 = vpack.c.bf16 %v10428_v10, %v10427_v58  ;;  %v10173_v27 = vmul.f32 %v9917_v8, %v9917_v8  ;;  %v9663_v47 = vadd.f32 %v16475_v14, %v22851_v25  ;;  %v15716_v55 = vpop.f32.mrb[196].mxu0  ;;  %v24756_v58 = vpack.c.bf16 %v23120_v16, %v23123_v5  ;;  %v635_v5 = vld [vmem:[%s24010_s3 + $0xd8] sm:$0xff]  ;;  %v23304_v16 = vpop.permute.xlu0 %9401 }
 0x583   : > { %v23277_v22 = vmul.f32 %v10174_v34, %v9918_v24  ;;  %v9920_v41 = vmax.f32 %v9664_v54, 1e-06  ;;  %v16476_v40 = vadd.f32 %v15716_v55, %v24754_v57  ;;  %v7634_v37 = vpop.f32.mrb[197].mxu0  ;;  %24757 = vst [vmem:[#allocation72_spill] sm:$0xff] %v23304_v16 }
 0x584   : > { %v23270_v52 = vpop.f32.mrb[20].mxu1  ;;  %v23280_v51 = vmul.f32 %v10173_v27, %v9917_v8  ;;  %v9919_v42 = vmax.f32 %v9663_v47, 1e-06  ;;  %v16477_v17 = vadd.f32 %v7634_v37, %v24755_v49  ;;  %16150 = vmatprep.subr.msk.bf16.mxu1 %vm20944_vm12, %v16148_v62  ;;  %v618_v8 = vld [vmem:[%s24010_s3 + $0x50] sm:$0xff]  ;;  %v24758_v47 = vld [vmem:[#allocation151_spill] sm:$0xff]  ;;  %v23316_v14 = vpop.permute.xlu1 %9406 }
 0x585   : > { %v23273_v45 = vpop.f32.mrb[21].mxu1  ;;  %v10176_v25 = vmul.f32 %v9920_v41, %v9920_v41  ;;  %v9666_v10 = vadd.f32 %v16476_v40, %v22917_v39  ;;  %v14190_v40 = vadd.f32 %v23094_v21, %v23086_v13  ;;  %v24759_v49 = vld [vmem:[#allocation153_spill] sm:$0xff] }
 0x586   : > { %16153 = vmatpush3.bf16.msk.msra.mxu1 %vm20944_vm12, %v24756_v58  ;;  %v10175_v34 = vmul.f32 %v9919_v42, %v9919_v42  ;;  %v9665_v54 = vadd.f32 %v16477_v17, %v22904_v38  ;;  %v15719_v9 = vpop.f32.mrb[198].mxu0  ;;  %v14246_v58 = vadd.f32 %v23237_v60, %v23234_v61  ;;  %v651_v61 = vld [vmem:[%s24010_s3 + $0x158] sm:$0xff] }
 0x587   : > { %v23306_v62 = vmul.f32 %v10176_v25, %v9920_v41  ;;  %v9922_v27 = vmax.f32 %v9666_v10, 1e-06  ;;  %v16478_v55 = vadd.f32 %v15719_v9, %v24758_v47  ;;  %v7644_v57 = vpop.f32.mrb[199].mxu0  ;;  %v634_v10 = vld [vmem:[%s24010_s3 + $0xd0] sm:$0xff] }
 0x588   : > { %v23294_v24 = vpop.f32.mrb[22].mxu1  ;;  %v23311_v37 = vmul.f32 %v10175_v34, %v9919_v42  ;;  %v9921_v38 = vmax.f32 %v9665_v54, 1e-06  ;;  %v16479_v17 = vadd.f32 %v7644_v57, %v24759_v49  ;;  %v23330_v60 = vadd.f32 %v14246_v58, %v14190_v40  ;;  %v23344_v58 = vpop.permute.xlu0 %9321 }
 0x589   : > { %v23302_v39 = vpop.f32.mrb[23].mxu1  ;;  %11344 = vmatmul.mubr.f32.vlgmr.msra.gmra.mrb[80].mxu1 %v618_v8  ;;  %v10178_v41 = vmul.f32 %v9922_v27, %v9922_v27  ;;  %v9668_v25 = vadd.f32 %v16478_v55, %v22982_v15  ;;  %v14193_v57 = vadd.f32 %v23116_v48, %v23108_v3  ;;  %v14249_v40 = vadd.f32 %v23256_v19, %v23253_v43  ;;  %v667_v43 = vld [vmem:[%s24010_s3 + $0x1d8] sm:$0xff]  ;;  %v24763_v48 = vld [vmem:[#allocation156_spill] sm:$0xff] }
 0x58a   : > { %11348 = vmatprep.mubr.f32.mxu1 %v635_v5  ;;  %v10177_v42 = vmul.f32 %v9921_v38, %v9921_v38  ;;  %v9667_v8 = vadd.f32 %v16479_v17, %v22961_v50  ;;  %v15722_v34 = vpop.f32.mrb[200].mxu0  ;;  %v24760_v5 = vld [vmem:[#allocation30_spill] sm:$0xff]  ;;  %v24761_v17 = vld [vmem:[#allocation27_spill] sm:$0xff] }
 0x58b   : > { %v23334_v54 = vmul.f32 %v10178_v41, %v9922_v27  ;;  %v9924_v9 = vmax.f32 %v9668_v25, 1e-06  ;;  %v16480_v47 = vadd.f32 %v15722_v34, %v24760_v5  ;;  %v7654_v55 = vpop.f32.mrb[201].mxu0  ;;  %v650_v25 = vld [vmem:[%s24010_s3 + $0x150] sm:$0xff]  ;;  %v23358_v19 = vadd.f32 %v14249_v40, %v14193_v57  ;;  %v24762_v5 = vld [vmem:[#allocation155_spill] sm:$0xff] }
 0x58c   : > { %v23322_v13 = vpop.f32.mrb[24].mxu1  ;;  %v23339_v49 = vmul.f32 %v10177_v42, %v9921_v38  ;;  %v9923_v50 = vmax.f32 %v9667_v8, 1e-06  ;;  %v16481_v21 = vadd.f32 %v7654_v55, %v24761_v17  ;;  %v23362_v8 = vpop.permute.xlu1 %9326  ;;  %v14252_v57 = vadd.f32 %v23273_v45, %v23270_v52  ;;  %v683_v52 = vld [vmem:[%s24010_s3 + $0x258] sm:$0xff] }
 0x58d   : > { %v23332_v15 = vpop.f32.mrb[25].mxu1  ;;  %11349 = vmatmul.mubr.f32.gmra.mrb[82].mxu1 %v634_v10  ;;  %v10180_v27 = vmul.f32 %v9924_v9, %v9924_v9  ;;  %v9670_v41 = vadd.f32 %v16480_v47, %v23050_v33 }
 0x58e   : > { %11353 = vmatprep.mubr.f32.mxu1 %v651_v61  ;;  %v10179_v38 = vmul.f32 %v9923_v50, %v9923_v50  ;;  %v9669_v10 = vadd.f32 %v16481_v21, %v23034_v28  ;;  %v15725_v42 = vpop.f32.mrb[202].mxu0  ;;  %v14196_v28 = vadd.f32 %v23138_v1, %v23130_v32 }
 0x58f   : > { %v23364_v34 = vmul.f32 %v10180_v27, %v9924_v9  ;;  %v9926_v61 = vmax.f32 %v9670_v41, 1e-06  ;;  %v16482_v47 = vadd.f32 %v15725_v42, %v24762_v5  ;;  %v7664_v55 = vpop.f32.mrb[203].mxu0  ;;  %v666_v27 = vld [vmem:[%s24010_s3 + $0x1d0] sm:$0xff]  ;;  %v14199_v5 = vadd.f32 %v23150_v4, %v23147_v29 }
 0x590   : > { %v23350_v3 = vpop.f32.mrb[26].mxu1  ;;  %v23369_v21 = vmul.f32 %v10179_v38, %v9923_v50  ;;  %v9925_v17 = vmax.f32 %v9669_v10, 1e-06  ;;  %v16483_v16 = vadd.f32 %v7664_v55, %v24763_v48  ;;  %v23386_v45 = vadd.f32 %v14252_v57, %v14196_v28  ;;  %v24764_v10 = vld [vmem:[#allocation34_spill] sm:$0xff]  ;;  %v24766_v55 = vld [vmem:[#allocation31_spill] sm:$0xff] }
 0x591   : > { %v23360_v33 = vpop.f32.mrb[27].mxu1  ;;  %11354 = vmatmul.mubr.f32.gmra.mrb[84].mxu1 %v650_v25  ;;  %v10182_v40 = vmul.f32 %v9926_v61, %v9926_v61  ;;  %v9672_v9 = vadd.f32 %v16482_v47, %v23118_v20  ;;  %v23395_v47 = vpop.permute.xlu0 %9411  ;;  %v14255_v28 = vadd.f32 %v23302_v39, %v23294_v24  ;;  %v682_v29 = vld [vmem:[%s24010_s3 + $0x250] sm:$0xff]  ;;  %v699_v24 = vld [vmem:[%s24010_s3 + $0x2d8] sm:$0xff] }
 0x592   : > { %11358 = vmatprep.mubr.f32.mxu1 %v667_v43  ;;  %v10181_v1 = vmul.f32 %v9925_v17, %v9925_v17  ;;  %v9671_v50 = vadd.f32 %v16483_v16, %v23102_v56  ;;  %v15728_v25 = vpop.f32.mrb[204].mxu0  ;;  %24765 = vst [vmem:[#allocation208_spill] sm:$0xff] %v23395_v47 }
 0x593   : > { %v23390_v48 = vmul.f32 %v10182_v40, %v9926_v61  ;;  %v9928_v38 = vmax.f32 %v9672_v9, 1e-06  ;;  %v16484_v42 = vadd.f32 %v15728_v25, %v24764_v10  ;;  %v7674_v43 = vpop.f32.mrb[205].mxu0  ;;  %v23402_v61 = vpop.permute.xlu1 %9416  ;;  %v23416_v39 = vadd.f32 %v14255_v28, %v14199_v5 }
 0x594   : > { %v23378_v41 = vpop.f32.mrb[28].mxu1  ;;  %v23397_v56 = vmul.f32 %v10181_v1, %v9925_v17  ;;  %v9927_v16 = vmax.f32 %v9671_v50, 1e-06  ;;  %v16485_v32 = vadd.f32 %v7674_v43, %v24766_v55  ;;  %v14202_v43 = vadd.f32 %v23167_v26, %v23164_v11 }
 0x595   : > { %v23388_v20 = vpop.f32.mrb[29].mxu1  ;;  %11359 = vmatmul.mubr.f32.gmra.mrb[86].mxu1 %v666_v27  ;;  %v10184_v57 = vmul.f32 %v9928_v38, %v9928_v38  ;;  %v9674_v40 = vadd.f32 %v16484_v42, %v23169_v63  ;;  %v14258_v5 = vadd.f32 %v23332_v15, %v23322_v13  ;;  %v715_v13 = vld [vmem:[%s24010_s3 + $0x358] sm:$0xff] }
 0x596   : > { %11363 = vmatprep.mubr.f32.mxu1 %v683_v52  ;;  %v10183_v9 = vmul.f32 %v9927_v16, %v9927_v16  ;;  %v9673_v27 = vadd.f32 %v16485_v32, %v23156_v2  ;;  %v15731_v1 = vpop.f32.mrb[206].mxu0  ;;  %v24767_v52 = vld [vmem:[#allocation159_spill] sm:$0xff]  ;;  %v24768_v32 = vld [vmem:[#allocation160_spill] sm:$0xff] }
 0x597   : > { %v23420_v50 = vmul.f32 %v10184_v57, %v9928_v38  ;;  %v9930_v25 = vmax.f32 %v9674_v40, 1e-06  ;;  %v16486_v10 = vadd.f32 %v15731_v1, %v24767_v52  ;;  %v7684_v42 = vpop.f32.mrb[207].mxu0  ;;  %v698_v57 = vld [vmem:[%s24010_s3 + $0x2d0] sm:$0xff]  ;;  %v23434_v40 = vpop.permute.xlu0 %9331  ;;  %v23442_v15 = vadd.f32 %v14258_v5, %v14202_v43 }
 0x598   : > { %v23408_v4 = vpop.f32.mrb[30].mxu1  ;;  %v23425_v55 = vmul.f32 %v10183_v9, %v9927_v16  ;;  %v9929_v2 = vmax.f32 %v9673_v27, 1e-06  ;;  %v16487_v17 = vadd.f32 %v7684_v42, %v24768_v32  ;;  %v24769_v27 = vld [vmem:[#allocation38_spill] sm:$0xff]  ;;  %v14205_v52 = vadd.f32 %v23184_v46, %v23181_v0  ;;  %v23449_v42 = vpop.permute.xlu1 %9336  ;;  %v24770_v32 = vld [vmem:[#allocation35_spill] sm:$0xff] }
 0x599   : > { %v23418_v63 = vpop.f32.mrb[31].mxu1  ;;  %11364 = vmatmul.mubr.f32.gmra.mrb[88].mxu1 %v682_v29  ;;  %v10186_v28 = vmul.f32 %v9930_v25, %v9930_v25  ;;  %v9676_v38 = vadd.f32 %v16486_v10, %v23222_v6  ;;  %v714_v0 = vld [vmem:[%s24010_s3 + $0x350] sm:$0xff] }
 0x59a   : > { %11368 = vmatprep.mubr.f32.mxu1 %v699_v24  ;;  %v10185_v26 = vmul.f32 %v9929_v2, %v9929_v2  ;;  %v9675_v16 = vadd.f32 %v16487_v17, %v23209_v7  ;;  %v15734_v29 = vpop.f32.mrb[208].mxu0 }
 0x59b   : > { %v23444_v6 = vmul.f32 %v10186_v28, %v9930_v25  ;;  %v9932_v9 = vmax.f32 %v9676_v38, 1e-06  ;;  %v16488_v1 = vadd.f32 %v15734_v29, %v24769_v27  ;;  %v7694_v24 = vpop.f32.mrb[209].mxu0  ;;  %v14261_v25 = vadd.f32 %v23360_v33, %v23350_v3  ;;  %v24771_v28 = vld [vmem:[#allocation180_spill] sm:$0xff]  ;;  %v731_v3 = vld [vmem:[%s24010_s3 + $0x3d8] sm:$0xff] }
 0x59c   : > { %v23451_v7 = vmul.f32 %v10185_v26, %v9929_v2  ;;  %v9931_v17 = vmax.f32 %v9675_v16, 1e-06  ;;  %v16489_v11 = vadd.f32 %v7694_v24, %v24770_v32  ;;  %v24772_v16 = vld [vmem:[#allocation179_spill] sm:$0xff] }
 0x59d   : > { %11369 = vmatmul.mubr.f32.gmra.mrb[90].mxu1 %v698_v57  ;;  %v10188_v5 = vmul.f32 %v9932_v9, %v9932_v9  ;;  %v9678_v38 = vadd.f32 %v16488_v1, %v24771_v28  ;;  %v23466_v33 = vadd.f32 %v14261_v25, %v14205_v52  ;;  %v24773_v1 = vld [vmem:[#allocation161_spill] sm:$0xff]  ;;  %v23473_v28 = vpop.permute.xlu0 %9421  ;;  %v24775_v2 = vld [vmem:[#allocation163_spill] sm:$0xff] }
 0x59e   : > { %v14300_v10 = vpop.f32.mrb[32].mxu1  ;;  %11373 = vmatprep.mubr.f32.mxu1 %v715_v13  ;;  %v10187_v26 = vmul.f32 %v9931_v17, %v9931_v17  ;;  %v9677_v29 = vadd.f32 %v16489_v11, %v24772_v16  ;;  %v15737_v57 = vpop.f32.mrb[210].mxu0  ;;  %24774 = vst [vmem:[#allocation209_spill] sm:$0xff] %v23473_v28 }
 0x59f   : > { %v14301_v43 = vpop.f32.mrb[33].mxu1  ;;  %v23468_v27 = vmul.f32 %v10188_v5, %v9932_v9  ;;  %v9934_v13 = vmax.f32 %v9678_v38, 1e-06  ;;  %v16490_v24 = vadd.f32 %v15737_v57, %v24773_v1  ;;  %v7704_v32 = vpop.f32.mrb[211].mxu0  ;;  %v14264_v9 = vadd.f32 %v23388_v20, %v23378_v41  ;;  %v24776_v41 = vld [vmem:[#allocation71_spill] sm:$0xff] }
 0x5a0   : > { %v14302_v46 = vadd.f32 %v14301_v43, %v14300_v10  ;;  %v14208_v10 = vadd.f32 %v23203_v36, %v23200_v53  ;;  %v23475_v11 = vmul.f32 %v10187_v26, %v9931_v17  ;;  %v9933_v16 = vmax.f32 %v9677_v29, 1e-06  ;;  %v730_v53 = vld [vmem:[%s24010_s3 + $0x3d0] sm:$0xff]  ;;  %v23487_v38 = vpop.permute.xlu1 %9426 }
 0x5a1   : > { %v16491_v47 = vadd.f32 %v7704_v32, %v24775_v2  ;;  %11374 = vmatmul.mubr.f32.gmra.mrb[92].mxu1 %v714_v0  ;;  %v10190_v25 = vmul.f32 %v9934_v13, %v9934_v13  ;;  %v9680_v5 = vadd.f32 %v16490_v24, %v22834_v12  ;;  %v621_v12 = vld [vmem:[%s24010_s3 + $0x68] sm:$0xff]  ;;  %v14211_v24 = vadd.f32 %v23220_v18, %v23217_v31  ;;  %v24778_v0 = vld [vmem:[#allocation39_spill] sm:$0xff] }
 0x5a2   : > { %v14303_v43 = vpop.f32.mrb[34].mxu1  ;;  %11378 = vmatprep.mubr.f32.mxu1 %v731_v3  ;;  %v23485_v36 = vadd.f32 %v14302_v46, %v23330_v60  ;;  %v10189_v2 = vmul.f32 %v9933_v16, %v9933_v16  ;;  %v15740_v26 = vpop.f32.mrb[212].mxu0  ;;  %v23495_v29 = vadd.f32 %v14264_v9, %v14208_v10  ;;  %v24777_v60 = vld [vmem:[#allocation42_spill] sm:$0xff] }
 0x5a3   : > { %v14304_v52 = vpop.f32.mrb[35].mxu1  ;;  %v9679_v20 = vadd.f32 %v16491_v47, %v24776_v41  ;;  %v10446_v57 = vmul.f32 %v10190_v25, %v9934_v13  ;;  %v9936_v3 = vmax.f32 %v9680_v5, 1e-06  ;;  %v16492_v46 = vadd.f32 %v15740_v26, %v24777_v60  ;;  %v7714_v1 = vpop.f32.mrb[213].mxu0  ;;  %v24779_v9 = vld [vmem:[#allocation46_spill] sm:$0xff] }
 0x5a4   : > { %v14305_v17 = vadd.f32 %v14304_v52, %v14303_v43  ;;  %v10445_v43 = vmul.f32 %v10189_v2, %v9933_v16  ;;  %v16493_v47 = vadd.f32 %v7714_v1, %v24778_v0  ;;  %v14267_v41 = vadd.f32 %v23418_v63, %v23408_v4  ;;  %v23507_v26 = vpop.permute.xlu0 %9341  ;;  %v24780_v16 = vld [vmem:[#allocation193_spill] sm:$0xff]  ;;  %v24781_v63 = vld [vmem:[#allocation48_spill] sm:$0xff] }
 0x5a5   : > { %v9935_v52 = vmax.f32 %v9679_v20, 1e-06  ;;  %11379 = vmatmul.mubr.f32.gmra.mrb[94].mxu1 %v730_v53  ;;  %v10192_v10 = vmul.f32 %v9936_v3, %v9936_v3  ;;  %v9682_v13 = vadd.f32 %v16492_v46, %v24779_v9 }
 0x5a6   : > { %v14306_v32 = vpop.f32.mrb[36].mxu1  ;;  %11448 = vmatprep.mubr.f32.mxu1 %v621_v12  ;;  %v23505_v25 = vadd.f32 %v14305_v17, %v23358_v19  ;;  %v16154_v31 = vpack.c.bf16 %v10446_v57, %v10445_v43  ;;  %v9681_v2 = vadd.f32 %v16493_v47, %v24780_v16  ;;  %v15743_v0 = vpop.f32.mrb[214].mxu0  ;;  %v23510_v53 = vadd.f32 %v14267_v41, %v14211_v24  ;;  %v24782_v57 = vld [vmem:[#allocation45_spill] sm:$0xff] }
 0x5a7   : > { %v14307_v28 = vpop.f32.mrb[37].mxu1  ;;  %v10191_v18 = vmul.f32 %v9935_v52, %v9935_v52  ;;  %v10448_v20 = vmul.f32 %v10192_v10, %v9936_v3  ;;  %v9938_v4 = vmax.f32 %v9682_v13, 1e-06  ;;  %v16494_v60 = vadd.f32 %v15743_v0, %v24781_v63  ;;  %v7724_v1 = vpop.f32.mrb[215].mxu0  ;;  %v24783_v3 = vld [vmem:[#allocation54_spill] sm:$0xff] }
 0x5a8   : > { %v14308_v5 = vadd.f32 %v14307_v28, %v14306_v32  ;;  %v23516_v17 = vpop.permute.xlu1 %9346  ;;  %v9937_v46 = vmax.f32 %v9681_v2, 1e-06  ;;  %v16495_v32 = vadd.f32 %v7724_v1, %v24782_v57  ;;  %16156 = vmatprep.subr.msk.bf16.mxu1 %vm20944_vm12, %v16154_v31  ;;  %v24784_v41 = vpack.c.bf16 %v23277_v22, %v23280_v51  ;;  %v24786_v2 = vld [vmem:[#allocation169_spill] sm:$0xff]  ;;  %v24787_v51 = vld [vmem:[#allocation170_spill] sm:$0xff] }
 0x5a9   : > { %v10447_v28 = vmul.f32 %v10191_v18, %v9935_v52  ;;  %v10194_v43 = vmul.f32 %v9938_v4, %v9938_v4  ;;  %v9684_v47 = vadd.f32 %v16494_v60, %v24783_v3  ;;  %v24785_v52 = vld [vmem:[#allocation197_spill] sm:$0xff] }
 0x5aa   : > { %v23514_v12 = vadd.f32 %v14308_v5, %v23386_v45  ;;  %v14309_v19 = vpop.f32.mrb[38].mxu1  ;;  %16159 = vmatpush3.bf16.msk.msra.mxu1 %vm20944_vm12, %v24784_v41  ;;  %v10193_v9 = vmul.f32 %v9937_v46, %v9937_v46  ;;  %v9683_v13 = vadd.f32 %v16495_v32, %v24785_v52  ;;  %v15746_v5 = vpop.f32.mrb[216].mxu0  ;;  %v24791_v52 = vld [vmem:[#allocation52_spill] sm:$0xff] }
 0x5ab   : > { %v14310_v24 = vpop.f32.mrb[39].mxu1  ;;  %v16160_v10 = vpack.c.bf16 %v10448_v20, %v10447_v28  ;;  %v10450_v18 = vmul.f32 %v10194_v43, %v9938_v4  ;;  %v9940_v16 = vmax.f32 %v9684_v47, 1e-06  ;;  %v16496_v31 = vadd.f32 %v15746_v5, %v24786_v2  ;;  %v7734_v0 = vpop.f32.mrb[217].mxu0  ;;  %v24788_v4 = vld [vmem:[#allocation62_spill] sm:$0xff]  ;;  %v24790_v47 = vld [vmem:[#allocation201_spill] sm:$0xff] }
 0x5ac   : > { %v14311_v45 = vadd.f32 %v14310_v24, %v14309_v19  ;;  %v10449_v1 = vmul.f32 %v10193_v9, %v9937_v46  ;;  %v9939_v22 = vmax.f32 %v9683_v13, 1e-06  ;;  %v16497_v57 = vadd.f32 %v7734_v0, %v24787_v51  ;;  %v23535_v19 = vpop.permute.xlu0 %9431  ;;  %v23543_v46 = vpop.permute.xlu1 %9436  ;;  %v24792_v0 = vld [vmem:[#allocation49_spill] sm:$0xff] }
 0x5ad   : > { %16162 = vmatprep.subr.msk.bf16.mxu1 %vm20944_vm12, %v16160_v10  ;;  %v10196_v28 = vmul.f32 %v9940_v16, %v9940_v16  ;;  %v9686_v32 = vadd.f32 %v16496_v31, %v24788_v4  ;;  %v24789_v24 = vpack.c.bf16 %v23306_v62, %v23311_v37  ;;  %v24793_v51 = vld [vmem:[#allocation69_spill] sm:$0xff] }
 0x5ae   : > { %v23530_v63 = vadd.f32 %v14311_v45, %v23416_v39  ;;  %v14312_v60 = vpop.f32.mrb[40].mxu1  ;;  %v16166_v43 = vpack.c.bf16 %v10450_v18, %v10449_v1  ;;  %v10195_v3 = vmul.f32 %v9939_v22, %v9939_v22  ;;  %v9685_v41 = vadd.f32 %v16497_v57, %v24790_v47 }
 0x5af   : > { %v14313_v20 = vpop.f32.mrb[41].mxu1  ;;  %16165 = vmatpush3.bf16.msk.msra.mxu1 %vm20944_vm12, %v24789_v24  ;;  %v15749_v45 = vpop.f32.mrb[218].mxu0  ;;  %v10452_v10 = vmul.f32 %v10196_v28, %v9940_v16  ;;  %v9942_v9 = vmax.f32 %v9686_v32, 1e-06  ;;  %v24794_v16 = vpack.c.bf16 %v23334_v54, %v23339_v49 }
 0x5b0   : > { %v14314_v39 = vadd.f32 %v14313_v20, %v14312_v60  ;;  %v16498_v13 = vadd.f32 %v15749_v45, %v24791_v52  ;;  %v7744_v5 = vpop.f32.mrb[219].mxu0  ;;  %v10451_v37 = vmul.f32 %v10195_v3, %v9939_v22  ;;  %v9941_v31 = vmax.f32 %v9685_v41, 1e-06  ;;  %16168 = vmatprep.subr.msk.bf16.mxu1 %vm20944_vm12, %v16166_v43  ;;  %v24795_v22 = vld [vmem:[#allocation205_spill] sm:$0xff]  ;;  %v24796_v3 = vld [vmem:[#allocation56_spill] sm:$0xff]  ;;  %v23564_v52 = vpop.permute.xlu1 %9356 }
 0x5b1   : > { %v16499_v60 = vadd.f32 %v7744_v5, %v24792_v0  ;;  %v10198_v1 = vmul.f32 %v9942_v9, %v9942_v9 }
 0x5b2   : > { %v23548_v2 = vadd.f32 %v14314_v39, %v23442_v15  ;;  %v14315_v62 = vpop.f32.mrb[42].mxu1  ;;  %v9688_v57 = vadd.f32 %v16498_v13, %v24793_v51  ;;  %v16172_v20 = vpack.c.bf16 %v10452_v10, %v10451_v37  ;;  %v10197_v28 = vmul.f32 %v9941_v31, %v9941_v31  ;;  %v24797_v13 = vld [vmem:[#allocation53_spill] sm:$0xff]  ;;  %v24798_v37 = vld [vmem:[#allocation206_spill] sm:$0xff] }
 0x5b3   : > { %v14316_v18 = vpop.f32.mrb[43].mxu1  ;;  %16171 = vmatpush3.bf16.msk.msra.mxu1 %vm20944_vm12, %v24794_v16  ;;  %v9687_v4 = vadd.f32 %v16499_v60, %v24795_v22  ;;  %v15752_v32 = vpop.f32.mrb[220].mxu0  ;;  %v10454_v24 = vmul.f32 %v10198_v1, %v9942_v9  ;;  %v24800_v1 = vld [vmem:[#allocation68_spill] sm:$0xff] }
 0x5b4   : > { %v14317_v15 = vadd.f32 %v14316_v18, %v14315_v62  ;;  %v9944_v39 = vmax.f32 %v9688_v57, 1e-06  ;;  %v16500_v43 = vadd.f32 %v15752_v32, %v24796_v3  ;;  %v7754_v47 = vpop.f32.mrb[221].mxu0  ;;  %v10453_v54 = vmul.f32 %v10197_v28, %v9941_v31  ;;  %16174 = vmatprep.subr.msk.bf16.mxu1 %vm20944_vm12, %v16172_v20  ;;  %v23569_v62 = vpop.permute.xlu0 %9351  ;;  %v24801_v20 = vld [vmem:[#allocation175_spill] sm:$0xff] }
 0x5b5   : > { %v9943_v49 = vmax.f32 %v9687_v4, 1e-06  ;;  %v16501_v5 = vadd.f32 %v7754_v47, %v24797_v13 }
 0x5b6   : > { %v23562_v41 = vadd.f32 %v14317_v15, %v23466_v33  ;;  %v14318_v45 = vpop.f32.mrb[44].mxu1  ;;  %v10200_v9 = vmul.f32 %v9944_v39, %v9944_v39  ;;  %v9690_v0 = vadd.f32 %v16500_v43, %v24798_v37  ;;  %v24799_v33 = vpack.c.bf16 %v23364_v34, %v23369_v21  ;;  %v24802_v21 = vld [vmem:[#allocation176_spill] sm:$0xff] }
 0x5b7   : > { %v14319_v10 = vpop.f32.mrb[45].mxu1  ;;  %v16178_v31 = vpack.c.bf16 %v10454_v24, %v10453_v54  ;;  %v10199_v18 = vmul.f32 %v9943_v49, %v9943_v49  ;;  %v9689_v51 = vadd.f32 %v16501_v5, %v24800_v1  ;;  %v15755_v57 = vpop.f32.mrb[222].mxu0 }
 0x5b8   : > { %16177 = vmatpush3.bf16.msk.msra.mxu1 %vm20944_vm12, %v24799_v33  ;;  %v14320_v60 = vadd.f32 %v14319_v10, %v14318_v45  ;;  %v10456_v16 = vmul.f32 %v10200_v9, %v9944_v39  ;;  %v9946_v15 = vmax.f32 %v9690_v0, 1e-06  ;;  %v16502_v28 = vadd.f32 %v15755_v57, %v24801_v20  ;;  %v7764_v22 = vpop.f32.mrb[223].mxu0  ;;  %v23591_v54 = vpop.permute.xlu1 %9446  ;;  %v24804_v33 = vld [vmem:[#allocation60_spill] sm:$0xff] }
 0x5b9   : > { %v10455_v3 = vmul.f32 %v10199_v18, %v9943_v49  ;;  %v9945_v34 = vmax.f32 %v9689_v51, 1e-06  ;;  %v16503_v43 = vadd.f32 %v7764_v22, %v24802_v21  ;;  %16180 = vmatprep.subr.msk.bf16.mxu1 %vm20944_vm12, %v16178_v31  ;;  %v24803_v39 = vpack.c.bf16 %v23390_v48, %v23397_v56  ;;  %v23594_v9 = vpop.permute.xlu0 %9441  ;;  %v24805_v18 = vld [vmem:[#allocation57_spill] sm:$0xff] }
 0x5ba   : > { %v23580_v4 = vadd.f32 %v14320_v60, %v23495_v29  ;;  %v14321_v32 = vpop.f32.mrb[46].mxu1  ;;  %v10202_v47 = vmul.f32 %v9946_v15, %v9946_v15  ;;  %v9692_v45 = vadd.f32 %v16502_v28, %v23192_v44  ;;  %v24806_v57 = vpack.c.bf16 %v23420_v50, %v23425_v55 }
 0x5bb   : > { %v14322_v24 = vpop.f32.mrb[47].mxu1  ;;  %v16184_v49 = vpack.c.bf16 %v10456_v16, %v10455_v3  ;;  %v10201_v13 = vmul.f32 %v9945_v34, %v9945_v34  ;;  %v9691_v5 = vadd.f32 %v16503_v43, %v23186_v30  ;;  %v15758_v10 = vpop.f32.mrb[224].mxu0 }
 0x5bc   : > { %16183 = vmatpush3.bf16.msk.msra.mxu1 %vm20944_vm12, %v24803_v39  ;;  %v14323_v29 = vadd.f32 %v14322_v24, %v14321_v32  ;;  %v10458_v37 = vmul.f32 %v10202_v47, %v9946_v15  ;;  %v9948_v0 = vmax.f32 %v9692_v45, 1e-06  ;;  %v16504_v44 = vadd.f32 %v15758_v10, %v24804_v33  ;;  %v7774_v60 = vpop.f32.mrb[225].mxu0  ;;  %v24807_v32 = vld [vmem:[#allocation64_spill] sm:$0xff]  ;;  %v23611_v21 = vpop.permute.xlu1 %9366  ;;  %v24808_v24 = vld [vmem:[#allocation61_spill] sm:$0xff] }
 0x5bd   : > { %v10457_v56 = vmul.f32 %v10201_v13, %v9945_v34  ;;  %v9947_v31 = vmax.f32 %v9691_v5, 1e-06  ;;  %v16505_v1 = vadd.f32 %v7774_v60, %v24805_v18  ;;  %16186 = vmatprep.subr.msk.bf16.mxu1 %vm20944_vm12, %v16184_v49  ;;  %v23616_v50 = vpop.permute.xlu0 %9361  ;;  %v24809_v45 = vpack.c.bf16 %v23444_v6, %v23451_v7  ;;  %v24811_v60 = vld [vmem:[#allocation67_spill] sm:$0xff] }
 0x5be   : > { %v23598_v48 = vadd.f32 %v14323_v29, %v23510_v53  ;;  %v10204_v51 = vmul.f32 %v9948_v0, %v9948_v0  ;;  %v9694_v30 = vadd.f32 %v16504_v44, %v23275_v35 }
 0x5bf   : > { %v16190_v16 = vpack.c.bf16 %v10458_v37, %v10457_v56  ;;  %v10203_v15 = vmul.f32 %v9947_v31, %v9947_v31  ;;  %v9693_v53 = vadd.f32 %v16505_v1, %v23262_v59  ;;  %v15761_v20 = vpop.f32.mrb[226].mxu0  ;;  %v24810_v37 = vld [vmem:[#allocation183_spill] sm:$0xff] }
 0x5c0   : > { %16189 = vmatpush3.bf16.msk.msra.mxu1 %vm20944_vm12, %v24806_v57  ;;  %v10460_v28 = vmul.f32 %v10204_v51, %v9948_v0  ;;  %v9950_v22 = vmax.f32 %v9694_v30, 1e-06  ;;  %v16506_v3 = vadd.f32 %v15761_v20, %v24807_v32  ;;  %v7784_v34 = vpop.f32.mrb[227].mxu0  ;;  %v23642_v18 = vpop.permute.xlu1 %9456  ;;  %v24814_v32 = vld [vmem:[#allocation186_spill] sm:$0xff] }
 0x5c1   : > { %v10459_v43 = vmul.f32 %v10203_v15, %v9947_v31  ;;  %v9949_v35 = vmax.f32 %v9693_v53, 1e-06  ;;  %v16507_v47 = vadd.f32 %v7784_v34, %v24808_v24  ;;  %16192 = vmatprep.subr.msk.bf16.mxu1 %vm20944_vm12, %v16190_v16  ;;  %v620_v31 = vld [vmem:[%s24010_s3 + $0x60] sm:$0xff]  ;;  %v24813_v15 = vld [vmem:[#allocation185_spill] sm:$0xff] }
 0x5c2   : > { %v10206_v55 = vmul.f32 %v9950_v22, %v9950_v22  ;;  %v9696_v59 = vadd.f32 %v16506_v3, %v23362_v8 }
 0x5c3   : > { %v16196_v39 = vpack.c.bf16 %v10460_v28, %v10459_v43  ;;  %v10205_v29 = vmul.f32 %v9949_v35, %v9949_v35  ;;  %v9695_v49 = vadd.f32 %v16507_v47, %v23344_v58  ;;  %v15764_v13 = vpop.f32.mrb[228].mxu0  ;;  %v24812_v58 = vpack.c.bf16 %v23468_v27, %v23475_v11  ;;  %v23650_v27 = vpop.permute.xlu0 %9451  ;;  %v636_v43 = vld [vmem:[%s24010_s3 + $0xe0] sm:$0xff] }
 0x5c4   : > { %16195 = vmatpush3.bf16.msk.msra.mxu1 %vm20944_vm12, %v24809_v45  ;;  %v23625_v5 = vmul.f32 %v10206_v55, %v9950_v22  ;;  %v9952_v10 = vmax.f32 %v9696_v59, 1e-06  ;;  %v16508_v0 = vadd.f32 %v15764_v13, %v24810_v37  ;;  %v7794_v33 = vpop.f32.mrb[229].mxu0  ;;  %v653_v59 = vld [vmem:[%s24010_s3 + $0x168] sm:$0xff]  ;;  %v9377_v13 = vpop.permute.xlu1 %9376 }
 0x5c5   : > { %v23628_v44 = vmul.f32 %v10205_v29, %v9949_v35  ;;  %v9951_v8 = vmax.f32 %v9695_v49, 1e-06  ;;  %v16509_v56 = vadd.f32 %v7794_v33, %v24811_v60  ;;  %16198 = vmatprep.subr.msk.bf16.mxu1 %vm20944_vm12, %v16196_v39 }
 0x5c6   : > { %v10208_v6 = vmul.f32 %v9952_v10, %v9952_v10  ;;  %v9698_v7 = vadd.f32 %v16508_v0, %v23449_v42  ;;  %v637_v42 = vld [vmem:[%s24010_s3 + $0xe8] sm:$0xff] }
 0x5c7   : > { %v16205_v1 = vpack.c.bf16 %v23625_v5, %v23628_v44  ;;  %v10207_v51 = vmul.f32 %v9951_v8, %v9951_v8  ;;  %v9697_v30 = vadd.f32 %v16509_v56, %v23434_v40  ;;  %v15767_v57 = vpop.f32.mrb[230].mxu0  ;;  %v24816_v0 = vld [vmem:[#allocation189_spill] sm:$0xff]  ;;  %v652_v56 = vld [vmem:[%s24010_s3 + $0x160] sm:$0xff] }
 0x5c8   : > { %16201 = vmatpush3.bf16.msk.msra.mxu1 %vm20944_vm12, %v24812_v58  ;;  %v23652_v11 = vmul.f32 %v10208_v6, %v9952_v10  ;;  %v9954_v16 = vmax.f32 %v9698_v7, 1e-06  ;;  %v16510_v53 = vadd.f32 %v15767_v57, %v24813_v15  ;;  %v7804_v20 = vpop.f32.mrb[231].mxu0  ;;  %v24837_v44 = vld [vmem:[#allocation200_spill] sm:$0xff] }
 0x5c9   : > { %v23655_v28 = vmul.f32 %v10207_v51, %v9951_v8  ;;  %v9953_v22 = vmax.f32 %v9697_v30, 1e-06  ;;  %v16511_v3 = vadd.f32 %v7804_v20, %v24814_v32  ;;  %v9372_v8 = vpop.permute.xlu0 %9371  ;;  %v669_v51 = vld [vmem:[%s24010_s3 + $0x1e8] sm:$0xff]  ;;  %v24818_v20 = vld [vmem:[#allocation75_spill] sm:$0xff] }
 0x5ca   : > { %v10210_v40 = vmul.f32 %v9954_v16, %v9954_v16  ;;  %v9700_v34 = vadd.f32 %v16510_v53, %v23516_v17  ;;  %v24815_v17 = vld [vmem:[#allocation70_spill] sm:$0xff] }
 0x5cb   : > { %11449 = vmatmul.mubr.f32.vlgmr.msra.gmra.mrb[96].mxu1 %v620_v31  ;;  %v16211_v35 = vpack.c.bf16 %v23652_v11, %v23655_v28  ;;  %v10209_v24 = vmul.f32 %v9953_v22, %v9953_v22  ;;  %v9699_v47 = vadd.f32 %v16511_v3, %v23507_v26  ;;  %v15770_v55 = vpop.f32.mrb[232].mxu0  ;;  %v668_v3 = vld [vmem:[%s24010_s3 + $0x1e0] sm:$0xff]  ;;  %v24839_v28 = vld [vmem:[#allocation202_spill] sm:$0xff] }
 0x5cc   : > { %11453 = vmatprep.mubr.f32.mxu1 %v637_v42  ;;  %v23668_v45 = vmul.f32 %v10210_v40, %v9954_v16  ;;  %v9956_v39 = vmax.f32 %v9700_v34, 1e-06  ;;  %v16512_v29 = vadd.f32 %v15770_v55, %v24815_v17  ;;  %v7814_v49 = vpop.f32.mrb[233].mxu0  ;;  %v23694_v40 = vpop.permute.xlu1 %9466  ;;  %v685_v55 = vld [vmem:[%s24010_s3 + $0x268] sm:$0xff]  ;;  %v24819_v17 = vld [vmem:[#allocation74_spill] sm:$0xff] }
 0x5cd   : > { %v23671_v10 = vmul.f32 %v10209_v24, %v9953_v22  ;;  %v9955_v37 = vmax.f32 %v9699_v47, 1e-06  ;;  %v16513_v33 = vadd.f32 %v7814_v49, %v24816_v0 }
 0x5ce   : > { %v10212_v26 = vmul.f32 %v9956_v39, %v9956_v39  ;;  %v9702_v60 = vadd.f32 %v16512_v29, %v23564_v52  ;;  %v24817_v52 = vld [vmem:[#allocation190_spill] sm:$0xff] }
 0x5cf   : > { %11454 = vmatmul.mubr.f32.gmra.mrb[98].mxu1 %v636_v43  ;;  %v10211_v7 = vmul.f32 %v9955_v37, %v9955_v37  ;;  %v9701_v58 = vadd.f32 %v16513_v33, %v23569_v62  ;;  %v15773_v31 = vpop.f32.mrb[234].mxu0  ;;  %v24820_v33 = vld [vmem:[#allocation191_spill] sm:$0xff] }
 0x5d0   : > { %11458 = vmatprep.mubr.f32.mxu1 %v653_v59  ;;  %v23684_v30 = vmul.f32 %v10212_v26, %v9956_v39  ;;  %v9958_v57 = vmax.f32 %v9702_v60, 1e-06  ;;  %v16514_v42 = vadd.f32 %v15773_v31, %v24817_v52  ;;  %v7824_v16 = vpop.f32.mrb[235].mxu0  ;;  %v23702_v59 = vpop.permute.xlu0 %9461 }
 0x5d1   : > { %v23687_v15 = vmul.f32 %v10211_v7, %v9955_v37  ;;  %v9957_v53 = vmax.f32 %v9701_v58, 1e-06  ;;  %v16515_v22 = vadd.f32 %v7824_v16, %v24818_v20  ;;  %v24821_v16 = vld [vmem:[#allocation43_spill] sm:$0xff]  ;;  %v9387_v20 = vpop.permute.xlu1 %9386 }
 0x5d2   : > { %v10214_v32 = vmul.f32 %v9958_v57, %v9958_v57  ;;  %v9704_v62 = vadd.f32 %v16514_v42, %v23611_v21 }
 0x5d3   : > { %11459 = vmatmul.mubr.f32.gmra.mrb[100].mxu1 %v652_v56  ;;  %v10213_v43 = vmul.f32 %v9957_v53, %v9957_v53  ;;  %v9703_v24 = vadd.f32 %v16515_v22, %v23616_v50  ;;  %v15776_v47 = vpop.f32.mrb[236].mxu0  ;;  %v684_v56 = vld [vmem:[%s24010_s3 + $0x260] sm:$0xff] }
 0x5d4   : > { %11463 = vmatprep.mubr.f32.mxu1 %v669_v51  ;;  %v23704_v21 = vmul.f32 %v10214_v32, %v9958_v57  ;;  %v9960_v39 = vmax.f32 %v9704_v62, 1e-06  ;;  %v16516_v29 = vadd.f32 %v15776_v47, %v24819_v17  ;;  %v7834_v49 = vpop.f32.mrb[237].mxu0  ;;  %v701_v57 = vld [vmem:[%s24010_s3 + $0x2e8] sm:$0xff]  ;;  %v24822_v62 = vld [vmem:[#allocation194_spill] sm:$0xff]  ;;  %v700_v47 = vld [vmem:[%s24010_s3 + $0x2e0] sm:$0xff] }
 0x5d5   : > { %v23707_v37 = vmul.f32 %v10213_v43, %v9957_v53  ;;  %v9959_v0 = vmax.f32 %v9703_v24, 1e-06  ;;  %v16517_v26 = vadd.f32 %v7834_v49, %v24820_v33  ;;  %v9382_v43 = vpop.permute.xlu0 %9381  ;;  %v717_v49 = vld [vmem:[%s24010_s3 + $0x368] sm:$0xff] }
 0x5d6   : > { %v10216_v50 = vmul.f32 %v9960_v39, %v9960_v39  ;;  %v9706_v60 = vadd.f32 %v16516_v29, %v9377_v13 }
 0x5d7   : > { %11464 = vmatmul.mubr.f32.gmra.mrb[102].mxu1 %v668_v3  ;;  %v10215_v58 = vmul.f32 %v9959_v0, %v9959_v0  ;;  %v9705_v31 = vadd.f32 %v16517_v26, %v9372_v8  ;;  %v15779_v51 = vpop.f32.mrb[238].mxu0  ;;  %v24823_v26 = vld [vmem:[#allocation195_spill] sm:$0xff] }
 0x5d8   : > { %11468 = vmatprep.mubr.f32.mxu1 %v685_v55  ;;  %v23718_v52 = vmul.f32 %v10216_v50, %v9960_v39  ;;  %v9962_v42 = vmax.f32 %v9706_v60, 1e-06  ;;  %v16518_v13 = vadd.f32 %v15779_v51, %v24821_v16  ;;  %v7844_v53 = vpop.f32.mrb[239].mxu0  ;;  %v24824_v51 = vld [vmem:[#allocation50_spill] sm:$0xff] }
 0x5d9   : > { %v23721_v22 = vmul.f32 %v10215_v58, %v9959_v0  ;;  %v9961_v32 = vmax.f32 %v9705_v31, 1e-06  ;;  %v16519_v3 = vadd.f32 %v7844_v53, %v24822_v62  ;;  %v24825_v53 = vld [vmem:[#allocation73_spill] sm:$0xff] }
 0x5da   : > { %v10218_v8 = vmul.f32 %v9962_v42, %v9962_v42  ;;  %v9708_v24 = vadd.f32 %v16518_v13, %v9387_v20 }
 0x5db   : > { %11469 = vmatmul.mubr.f32.gmra.mrb[104].mxu1 %v684_v56  ;;  %v10217_v39 = vmul.f32 %v9961_v32, %v9961_v32  ;;  %v9707_v17 = vadd.f32 %v16519_v3, %v9382_v43  ;;  %v15782_v29 = vpop.f32.mrb[240].mxu0 }
 0x5dc   : > { %11473 = vmatprep.mubr.f32.mxu1 %v701_v57  ;;  %v23732_v0 = vmul.f32 %v10218_v8, %v9962_v42  ;;  %v9964_v33 = vmax.f32 %v9708_v24, 1e-06  ;;  %v16520_v50 = vadd.f32 %v15782_v29, %v24823_v26  ;;  %v7854_v60 = vpop.f32.mrb[241].mxu0  ;;  %v716_v42 = vld [vmem:[%s24010_s3 + $0x360] sm:$0xff] }
 0x5dd   : > { %v14356_v56 = vpop.f32.mrb[48].mxu1  ;;  %v23735_v58 = vmul.f32 %v10217_v39, %v9961_v32  ;;  %v9963_v31 = vmax.f32 %v9707_v17, 1e-06  ;;  %v16521_v57 = vadd.f32 %v7854_v60, %v24824_v51  ;;  %v24826_v32 = vld [vmem:[#allocation207_spill] sm:$0xff] }
 0x5de   : > { %v14357_v16 = vpop.f32.mrb[49].mxu1  ;;  %v10220_v13 = vmul.f32 %v9964_v33, %v9964_v33  ;;  %v9710_v20 = vadd.f32 %v16520_v50, %v24825_v53  ;;  %v24827_v29 = vld [vmem:[#allocation47_spill] sm:$0xff] }
 0x5df   : > { %11474 = vmatmul.mubr.f32.gmra.mrb[106].mxu1 %v700_v47  ;;  %v14358_v62 = vadd.f32 %v14357_v16, %v14356_v56  ;;  %v10219_v43 = vmul.f32 %v9963_v31, %v9963_v31  ;;  %v9709_v8 = vadd.f32 %v16521_v57, %v24826_v32  ;;  %v15785_v24 = vpop.f32.mrb[242].mxu0  ;;  %v733_v47 = vld [vmem:[%s24010_s3 + $0x3e8] sm:$0xff] }
 0x5e0   : > { %11478 = vmatprep.mubr.f32.mxu1 %v717_v49  ;;  %v23748_v39 = vmul.f32 %v10220_v13, %v9964_v33  ;;  %v9966_v17 = vmax.f32 %v9710_v20, 1e-06  ;;  %v16522_v49 = vadd.f32 %v15785_v24, %v24827_v29  ;;  %v7864_v26 = vpop.f32.mrb[243].mxu0  ;;  %v24828_v16 = vld [vmem:[#allocation196_spill] sm:$0xff] }
 0x5e1   : > { %v23752_v50 = vadd.f32 %v14358_v62, %v23485_v36  ;;  %v14359_v60 = vpop.f32.mrb[50].mxu1  ;;  %v23754_v56 = vmul.f32 %v10219_v43, %v9963_v31  ;;  %v9965_v51 = vmax.f32 %v9709_v8, 1e-06  ;;  %v16523_v57 = vadd.f32 %v7864_v26, %v24828_v16  ;;  %v732_v33 = vld [vmem:[%s24010_s3 + $0x3e0] sm:$0xff] }
 0x5e2   : > { %v14360_v53 = vpop.f32.mrb[51].mxu1  ;;  %v10222_v32 = vmul.f32 %v9966_v17, %v9966_v17  ;;  %v9712_v3 = vadd.f32 %v16522_v49, %v23316_v14  ;;  %v24829_v31 = vld [vmem:[#allocation72_spill] sm:$0xff]  ;;  %v24830_v14 = vld [vmem:[#allocation51_spill] sm:$0xff] }
 0x5e3   : > { %11479 = vmatmul.mubr.f32.gmra.mrb[108].mxu1 %v716_v42  ;;  %v14361_v13 = vadd.f32 %v14360_v53, %v14359_v60  ;;  %v10221_v20 = vmul.f32 %v9965_v51, %v9965_v51  ;;  %v9711_v62 = vadd.f32 %v16523_v57, %v24829_v31  ;;  %v15788_v43 = vpop.f32.mrb[244].mxu0  ;;  %v623_v42 = vld [vmem:[%s24010_s3 + $0x78] sm:$0xff] }
 0x5e4   : > { %11483 = vmatprep.mubr.f32.mxu1 %v733_v47  ;;  %v10478_v8 = vmul.f32 %v10222_v32, %v9966_v17  ;;  %v9968_v24 = vmax.f32 %v9712_v3, 1e-06  ;;  %v16524_v47 = vadd.f32 %v15788_v43, %v24830_v14  ;;  %v7874_v29 = vpop.f32.mrb[245].mxu0  ;;  %v24831_v53 = vld [vmem:[#allocation198_spill] sm:$0xff]  ;;  %v24832_v32 = vld [vmem:[#allocation208_spill] sm:$0xff] }
 0x5e5   : > { %v23769_v49 = vadd.f32 %v14361_v13, %v23505_v25  ;;  %v14362_v26 = vpop.f32.mrb[52].mxu1  ;;  %v10477_v60 = vmul.f32 %v10221_v20, %v9965_v51  ;;  %v9967_v16 = vmax.f32 %v9711_v62, 1e-06  ;;  %v16525_v36 = vadd.f32 %v7874_v29, %v24831_v53  ;;  %v24833_v13 = vld [vmem:[#allocation199_spill] sm:$0xff]  ;;  %v24834_v53 = vld [vmem:[#allocation58_spill] sm:$0xff] }
 0x5e6   : > { %v14363_v57 = vpop.f32.mrb[53].mxu1  ;;  %v10224_v31 = vmul.f32 %v9968_v24, %v9968_v24  ;;  %v9714_v55 = vadd.f32 %v16524_v47, %v23402_v61 }
 0x5e7   : > { %11484 = vmatmul.mubr.f32.gmra.mrb[110].mxu1 %v732_v33  ;;  %v14364_v7 = vadd.f32 %v14363_v57, %v14362_v26  ;;  %v16202_v17 = vpack.c.bf16 %v10478_v8, %v10477_v60  ;;  %v10223_v3 = vmul.f32 %v9967_v16, %v9967_v16  ;;  %v9713_v43 = vadd.f32 %v16525_v36, %v24832_v32  ;;  %v15791_v14 = vpop.f32.mrb[246].mxu0  ;;  %v24836_v57 = vld [vmem:[#allocation55_spill] sm:$0xff] }
 0x5e8   : > { %11553 = vmatprep.mubr.f32.mxu1 %v623_v42  ;;  %v10480_v34 = vmul.f32 %v10224_v31, %v9968_v24  ;;  %v9970_v25 = vmax.f32 %v9714_v55, 1e-06  ;;  %v16526_v6 = vadd.f32 %v15791_v14, %v24833_v13  ;;  %v7884_v51 = vpop.f32.mrb[247].mxu0  ;;  %v24835_v24 = vld [vmem:[#allocation209_spill] sm:$0xff] }
 0x5e9   : > { %v23776_v20 = vadd.f32 %v14364_v7, %v23514_v12  ;;  %v14365_v33 = vpop.f32.mrb[54].mxu1  ;;  %v10479_v62 = vmul.f32 %v10223_v3, %v9967_v16  ;;  %v9969_v29 = vmax.f32 %v9713_v43, 1e-06  ;;  %v16527_v61 = vadd.f32 %v7884_v51, %v24834_v53  ;;  %16204 = vmatprep.subr.msk.bf16.mxu1 %vm20944_vm12, %v16202_v17 }
 0x5ea   : > { %v14366_v42 = vpop.f32.mrb[55].mxu1  ;;  %v10226_v8 = vmul.f32 %v9970_v25, %v9970_v25  ;;  %v9716_v36 = vadd.f32 %v16526_v6, %v23487_v38  ;;  %16207 = vmatpush3.bf16.msk.msra.mxu1 %vm20944_vm12, %v16205_v1 }
 0x5eb   : > { %v14367_v12 = vadd.f32 %v14366_v42, %v14365_v33  ;;  %v16208_v7 = vpack.c.bf16 %v10480_v34, %v10479_v62  ;;  %v10225_v55 = vmul.f32 %v9969_v29, %v9969_v29  ;;  %v9715_v47 = vadd.f32 %v16527_v61, %v24835_v24  ;;  %v15794_v26 = vpop.f32.mrb[248].mxu0 }
 0x5ec   : > { %v10482_v60 = vmul.f32 %v10226_v8, %v9970_v25  ;;  %v9972_v16 = vmax.f32 %v9716_v36, 1e-06  ;;  %v16528_v31 = vadd.f32 %v15794_v26, %v24836_v57  ;;  %v7894_v17 = vpop.f32.mrb[249].mxu0  ;;  %v24841_v57 = vld [vmem:[#allocation203_spill] sm:$0xff] }
 0x5ed   : > { %v23790_v3 = vadd.f32 %v14367_v12, %v23530_v63  ;;  %v14368_v38 = vpop.f32.mrb[56].mxu1  ;;  %v10481_v6 = vmul.f32 %v10225_v55, %v9969_v29  ;;  %v9971_v5 = vmax.f32 %v9715_v47, 1e-06  ;;  %v16529_v32 = vadd.f32 %v7894_v17, %v24837_v44  ;;  %16210 = vmatprep.subr.msk.bf16.mxu1 %vm20944_vm12, %v16208_v7  ;;  %v24838_v29 = vld [vmem:[#allocation59_spill] sm:$0xff] }
 0x5ee   : > { %v14369_v1 = vpop.f32.mrb[57].mxu1  ;;  %v10228_v34 = vmul.f32 %v9972_v16, %v9972_v16  ;;  %v9718_v43 = vadd.f32 %v16528_v31, %v23543_v46  ;;  %16213 = vmatpush3.bf16.msk.msra.mxu1 %vm20944_vm12, %v16211_v35  ;;  %v24840_v7 = vpack.c.bf16 %v23668_v45, %v23671_v10  ;;  %v24842_v10 = vld [vmem:[#allocation66_spill] sm:$0xff] }
 0x5ef   : > { %v14370_v63 = vadd.f32 %v14369_v1, %v14368_v38  ;;  %v16214_v14 = vpack.c.bf16 %v10482_v60, %v10481_v6  ;;  %v10227_v25 = vmul.f32 %v9971_v5, %v9971_v5  ;;  %v9717_v13 = vadd.f32 %v16529_v32, %v23535_v19  ;;  %v15797_v51 = vpop.f32.mrb[250].mxu0 }
 0x5f0   : > { %v10484_v33 = vmul.f32 %v10228_v34, %v9972_v16  ;;  %v9974_v62 = vmax.f32 %v9718_v43, 1e-06  ;;  %v16530_v53 = vadd.f32 %v15797_v51, %v24838_v29  ;;  %v7904_v61 = vpop.f32.mrb[251].mxu0  ;;  %v24843_v1 = vpack.c.bf16 %v23684_v30, %v23687_v15  ;;  %v24844_v51 = vld [vmem:[#allocation63_spill] sm:$0xff]  ;;  %v24845_v15 = vld [vmem:[#allocation204_spill] sm:$0xff] }
 0x5f1   : > { %v23804_v42 = vadd.f32 %v14370_v63, %v23548_v2  ;;  %v14371_v46 = vpop.f32.mrb[58].mxu1  ;;  %v10483_v8 = vmul.f32 %v10227_v25, %v9971_v5  ;;  %v9973_v11 = vmax.f32 %v9717_v13, 1e-06  ;;  %v16531_v36 = vadd.f32 %v7904_v61, %v24839_v28  ;;  %16216 = vmatprep.subr.msk.bf16.mxu1 %vm20944_vm12, %v16214_v14 }
 0x5f2   : > { %v14372_v35 = vpop.f32.mrb[59].mxu1  ;;  %v10230_v12 = vmul.f32 %v9974_v62, %v9974_v62  ;;  %v9720_v19 = vadd.f32 %v16530_v53, %v23591_v54  ;;  %16219 = vmatpush3.bf16.msk.msra.mxu1 %vm20944_vm12, %v24840_v7 }
 0x5f3   : > { %v14373_v2 = vadd.f32 %v14372_v35, %v14371_v46  ;;  %v16220_v55 = vpack.c.bf16 %v10484_v33, %v10483_v8  ;;  %v10229_v24 = vmul.f32 %v9973_v11, %v9973_v11  ;;  %v9719_v47 = vadd.f32 %v16531_v36, %v23594_v9  ;;  %v15800_v26 = vpop.f32.mrb[252].mxu0 }
 0x5f4   : > { %v10486_v60 = vmul.f32 %v10230_v12, %v9974_v62  ;;  %v9976_v16 = vmax.f32 %v9720_v19, 1e-06  ;;  %v16532_v31 = vadd.f32 %v15800_v26, %v24841_v57  ;;  %v7914_v17 = vpop.f32.mrb[253].mxu0  ;;  %v686_v57 = vld [vmem:[%s24010_s3 + $0x270] sm:$0xff] }
 0x5f5   : > { %v23818_v38 = vadd.f32 %v14373_v2, %v23562_v41  ;;  %v14374_v54 = vpop.f32.mrb[60].mxu1  ;;  %v10485_v6 = vmul.f32 %v10229_v24, %v9973_v11  ;;  %v9975_v45 = vmax.f32 %v9719_v47, 1e-06  ;;  %v16533_v5 = vadd.f32 %v7914_v17, %v24842_v10  ;;  %16222 = vmatprep.subr.msk.bf16.mxu1 %vm20944_vm12, %v16220_v55  ;;  %v702_v17 = vld [vmem:[%s24010_s3 + $0x2f0] sm:$0xff] }
 0x5f6   : > { %v14375_v44 = vpop.f32.mrb[61].mxu1  ;;  %v10232_v32 = vmul.f32 %v9976_v16, %v9976_v16  ;;  %v9722_v9 = vadd.f32 %v16532_v31, %v23642_v18  ;;  %16225 = vmatpush3.bf16.msk.msra.mxu1 %vm20944_vm12, %v24843_v1  ;;  %v24846_v11 = vpack.c.bf16 %v23704_v21, %v23707_v37  ;;  %v24847_v21 = vpack.c.bf16 %v23718_v52, %v23721_v22  ;;  %v622_v22 = vld [vmem:[%s24010_s3 + $0x70] sm:$0xff]  ;;  %v703_v31 = vld [vmem:[%s24010_s3 + $0x2f8] sm:$0xff] }
 0x5f7   : > { %v14376_v41 = vadd.f32 %v14375_v44, %v14374_v54  ;;  %v16226_v34 = vpack.c.bf16 %v10486_v60, %v10485_v6  ;;  %v10231_v43 = vmul.f32 %v9975_v45, %v9975_v45  ;;  %v9721_v63 = vadd.f32 %v16533_v5, %v23650_v27  ;;  %v15803_v14 = vpop.f32.mrb[254].mxu0  ;;  %v670_v60 = vld [vmem:[%s24010_s3 + $0x1f0] sm:$0xff]  ;;  %v719_v54 = vld [vmem:[%s24010_s3 + $0x378] sm:$0xff] }
 0x5f8   : > { %v10488_v25 = vmul.f32 %v10232_v32, %v9976_v16  ;;  %v9978_v13 = vmax.f32 %v9722_v9, 1e-06  ;;  %v16534_v33 = vadd.f32 %v15803_v14, %v24844_v51  ;;  %v7924_v62 = vpop.f32.mrb[255].mxu0  ;;  %v24849_v52 = vpack.c.bf16 %v23748_v39, %v23754_v56  ;;  %v655_v39 = vld [vmem:[%s24010_s3 + $0x178] sm:$0xff]  ;;  %v718_v10 = vld [vmem:[%s24010_s3 + $0x370] sm:$0xff] }
 0x5f9   : > { %v23832_v29 = vadd.f32 %v14376_v41, %v23580_v4  ;;  %v14377_v18 = vpop.f32.mrb[62].mxu1  ;;  %v10487_v53 = vmul.f32 %v10231_v43, %v9975_v45  ;;  %v9977_v30 = vmax.f32 %v9721_v63, 1e-06  ;;  %v16535_v61 = vadd.f32 %v7924_v62, %v24845_v15  ;;  %16228 = vmatprep.subr.msk.bf16.mxu1 %vm20944_vm12, %v16226_v34  ;;  %v671_v56 = vld [vmem:[%s24010_s3 + $0x1f8] sm:$0xff]  ;;  %v734_v41 = vld [vmem:[%s24010_s3 + $0x3f0] sm:$0xff] }
 0x5fa   : > { %v14378_v46 = vpop.f32.mrb[63].mxu1  ;;  %v10234_v8 = vmul.f32 %v9978_v13, %v9978_v13  ;;  %v9724_v27 = vadd.f32 %v16534_v33, %v23694_v40  ;;  %16231 = vmatpush3.bf16.msk.msra.mxu1 %vm20944_vm12, %v24846_v11  ;;  %v687_v16 = vld [vmem:[%s24010_s3 + $0x278] sm:$0xff] }
 0x5fb   : > { %v14379_v4 = vadd.f32 %v14378_v46, %v14377_v18  ;;  %v16232_v28 = vpack.c.bf16 %v10488_v25, %v10487_v53  ;;  %v10233_v36 = vmul.f32 %v9977_v30, %v9977_v30  ;;  %v9723_v35 = vadd.f32 %v16535_v61, %v23702_v59  ;;  %v735_v44 = vld [vmem:[%s24010_s3 + $0x3f8] sm:$0xff] }
 0x5fc   : > { %v10490_v12 = vmul.f32 %v10234_v8, %v9978_v13  ;;  %v9980_v19 = vmax.f32 %v9724_v27, 1e-06 }
 0x5fd   : > { %v23845_v7 = vadd.f32 %v14379_v4, %v23598_v48  ;;  %v10489_v2 = vmul.f32 %v10233_v36, %v9977_v30  ;;  %v9979_v55 = vmax.f32 %v9723_v35, 1e-06  ;;  %16234 = vmatprep.subr.msk.bf16.mxu1 %vm20944_vm12, %v16232_v28  ;;  %v24848_v48 = vpack.c.bf16 %v23732_v0, %v23735_v58  ;;  %v639_v0 = vld [vmem:[%s24010_s3 + $0xf8] sm:$0xff]  ;;  %v638_v58 = vld [vmem:[%s24010_s3 + $0xf0] sm:$0xff] }
 0x5fe   : > { %v10236_v40 = vmul.f32 %v9980_v19, %v9980_v19  ;;  %16237 = vmatpush3.bf16.msk.msra.mxu1 %vm20944_vm12, %v24847_v21 }
 0x5ff   : > { %v16238_v37 = vpack.c.bf16 %v10490_v12, %v10489_v2  ;;  %v10235_v24 = vmul.f32 %v9979_v55, %v9979_v55 }
 0x600   : > { %v10492_v59 = vmul.f32 %v10236_v40, %v9980_v19 }
 0x601   : > { %v10491_v47 = vmul.f32 %v10235_v24, %v9979_v55  ;;  %16240 = vmatprep.subr.msk.bf16.mxu1 %vm20944_vm12, %v16238_v37 }
 0x602   : > { %16243 = vmatpush3.bf16.msk.msra.mxu1 %vm20944_vm12, %v24848_v48 }
 0x603   : > { %v16244_v26 = vpack.c.bf16 %v10492_v59, %v10491_v47 }
 0x605   : > { %16246 = vmatprep.subr.msk.bf16.mxu1 %vm20944_vm12, %v16244_v26 }
 0x606   : > { %16249 = vmatpush3.bf16.msk.msra.mxu1 %vm20944_vm12, %v24849_v52 }
 0x609   : > { %11554 = vmatmul.mubr.f32.vlgmr.msra.gmra.mrb[112].mxu1 %v622_v22 }
 0x60a   : > { %11558 = vmatprep.mubr.f32.mxu1 %v639_v0 }
 0x60d   : > { %11559 = vmatmul.mubr.f32.gmra.mrb[114].mxu1 %v638_v58 }
 0x60e   : > { %11563 = vmatprep.mubr.f32.mxu1 %v655_v39 }
 0x611   : > { %11564 = vmatmul.mubr.f32.gmra.mrb[116].mxu1 %v654_v23 }
 0x612   : > { %11568 = vmatprep.mubr.f32.mxu1 %v671_v56 }
 0x615   : > { %11569 = vmatmul.mubr.f32.gmra.mrb[118].mxu1 %v670_v60 }
 0x616   : > { %11573 = vmatprep.mubr.f32.mxu1 %v687_v16 }
 0x619   : > { %11574 = vmatmul.mubr.f32.gmra.mrb[120].mxu1 %v686_v57 }
 0x61a   : > { %11578 = vmatprep.mubr.f32.mxu1 %v703_v31 }
 0x61d   : > { %11579 = vmatmul.mubr.f32.gmra.mrb[122].mxu1 %v702_v17 }
 0x61e   : > { %v14412_v6 = vpop.f32.mrb[64].mxu1  ;;  %11583 = vmatprep.mubr.f32.mxu1 %v719_v54 }
 0x61f   : > { %v14413_v45 = vpop.f32.mrb[65].mxu1 }
 0x620   : > { %v14414_v5 = vadd.f32 %v14413_v45, %v14412_v6 }
 0x621   : > { %11584 = vmatmul.mubr.f32.gmra.mrb[124].mxu1 %v718_v10 }
 0x622   : > { %v11241_v32 = vadd.f32 %v14414_v5, %v23752_v50  ;;  %v14415_v9 = vpop.f32.mrb[66].mxu1  ;;  %11588 = vmatprep.mubr.f32.mxu1 %v735_v44  ;;  %v24850_v44 = vmov 0.0  }
 0x623   : > { %v14416_v1 = vpop.f32.mrb[67].mxu1 }
 0x624   : > { %v14417_v34 = vadd.f32 %v14416_v1, %v14415_v9 }
 0x625   : > { %11589 = vmatmul.mubr.f32.gmra.mrb[126].mxu1 %v734_v41 }
 0x626   : > { %v11246_v43 = vadd.f32 %v14417_v34, %v23769_v49  ;;  %v14418_v63 = vpop.f32.mrb[68].mxu1  ;;  %15820 = vmatprep.mubr.msk.f32.mxu1 %vm16965_vm13, %v24850_v44 }
 0x627   : > { %v14419_v14 = vpop.f32.mrb[69].mxu1 }
 0x628   : > { %v14420_v25 = vadd.f32 %v14419_v14, %v14418_v63 }
 0x62a   : > { %v11251_v13 = vadd.f32 %v14420_v25, %v23776_v20  ;;  %v14421_v51 = vpop.f32.mrb[70].mxu1 }
 0x62b   : > { %v14422_v33 = vpop.f32.mrb[71].mxu1 }
 0x62c   : > { %v14423_v50 = vadd.f32 %v14422_v33, %v14421_v51 }
 0x62e   : > { %v11256_v62 = vadd.f32 %v14423_v50, %v23790_v3  ;;  %v14424_v18 = vpop.f32.mrb[72].mxu1 }
 0x62f   : > { %v14425_v53 = vpop.f32.mrb[73].mxu1 }
 0x630   : > { %v14426_v30 = vadd.f32 %v14425_v53, %v14424_v18 }
 0x632   : > { %v11261_v15 = vadd.f32 %v14426_v30, %v23804_v42  ;;  %v14427_v61 = vpop.f32.mrb[74].mxu1 }
 0x633   : > { %v14428_v46 = vpop.f32.mrb[75].mxu1 }
 0x634   : > { %v14429_v8 = vadd.f32 %v14428_v46, %v14427_v61 }
 0x636   : > { %v11266_v49 = vadd.f32 %v14429_v8, %v23818_v38  ;;  %v14430_v27 = vpop.f32.mrb[76].mxu1 }
 0x637   : > { %v14431_v11 = vpop.f32.mrb[77].mxu1 }
 0x638   : > { %v14432_v4 = vadd.f32 %v14431_v11, %v14430_v27 }
 0x63a   : > { %v11271_v20 = vadd.f32 %v14432_v4, %v23832_v29  ;;  %v14433_v28 = vpop.f32.mrb[78].mxu1  ;;  %v16964_v29 = vmov 0.0|0.0  }
 0x63b   : > { %v14434_v36 = vpop.f32.mrb[79].mxu1  ;;  %16250 = vmatprep.subr.bf16.mxu1 %v16964_v29 }
 0x63c   : > { %v14435_v35 = vadd.f32 %v14434_v36, %v14433_v28 }
 0x63e   : > { %v11276_v3 = vadd.f32 %v14435_v35, %v23845_v7 }
 0x65c   : > { %v14468_v12 = vpop.f32.mrb[80].mxu1 }
 0x65d   : > { %v14469_v19 = vpop.f32.mrb[81].mxu1 }
 0x65e   : > { %v14470_v2 = vadd.f32 %v14469_v19, %v14468_v12 }
 0x660   : > { %v11346_v55 = vadd.f32 %v14470_v2, %v11241_v32  ;;  %v14471_v42 = vpop.f32.mrb[82].mxu1 }
 0x661   : > { %v14472_v40 = vpop.f32.mrb[83].mxu1 }
 0x662   : > { %v14473_v21 = vadd.f32 %v14472_v40, %v14471_v42 }
 0x664   : > { %v11351_v37 = vadd.f32 %v14473_v21, %v11246_v43  ;;  %v14474_v24 = vpop.f32.mrb[84].mxu1 }
 0x665   : > { %v14475_v38 = vpop.f32.mrb[85].mxu1 }
 0x666   : > { %v14476_v59 = vadd.f32 %v14475_v38, %v14474_v24 }
 0x668   : > { %v11356_v47 = vadd.f32 %v14476_v59, %v11251_v13  ;;  %v14477_v48 = vpop.f32.mrb[86].mxu1 }
 0x669   : > { %v14478_v26 = vpop.f32.mrb[87].mxu1 }
 0x66a   : > { %v14479_v52 = vadd.f32 %v14478_v26, %v14477_v48 }
 0x66c   : > { %v11361_v22 = vadd.f32 %v14479_v52, %v11256_v62  ;;  %v14480_v7 = vpop.f32.mrb[88].mxu1 }
 0x66d   : > { %v14481_v0 = vpop.f32.mrb[89].mxu1 }
 0x66e   : > { %v14482_v58 = vadd.f32 %v14481_v0, %v14480_v7 }
 0x670   : > { %v11366_v39 = vadd.f32 %v14482_v58, %v11261_v15  ;;  %v14483_v23 = vpop.f32.mrb[90].mxu1 }
 0x671   : > { %v14484_v56 = vpop.f32.mrb[91].mxu1 }
 0x672   : > { %v14485_v60 = vadd.f32 %v14484_v56, %v14483_v23 }
 0x674   : > { %v11371_v16 = vadd.f32 %v14485_v60, %v11266_v49  ;;  %v14486_v57 = vpop.f32.mrb[92].mxu1 }
 0x675   : > { %v14487_v31 = vpop.f32.mrb[93].mxu1 }
 0x676   : > { %v14488_v17 = vadd.f32 %v14487_v31, %v14486_v57 }
 0x678   : > { %v11376_v54 = vadd.f32 %v14488_v17, %v11271_v20  ;;  %v14489_v6 = vpop.f32.mrb[94].mxu1 }
 0x679   : > { %v14490_v45 = vpop.f32.mrb[95].mxu1 }
 0x67a   : > { %v14491_v10 = vadd.f32 %v14490_v45, %v14489_v6 }
 0x67c   : > { %v11381_v5 = vadd.f32 %v14491_v10, %v11276_v3 }
 0x69e   : > { %v14524_v32 = vpop.f32.mrb[96].mxu1 }
 0x69f   : > { %v14525_v9 = vpop.f32.mrb[97].mxu1 }
 0x6a0   : > { %v14526_v1 = vadd.f32 %v14525_v9, %v14524_v32 }
 0x6a2   : > { %v11451_v41 = vadd.f32 %v14526_v1, %v11346_v55  ;;  %v14527_v34 = vpop.f32.mrb[98].mxu1 }
 0x6a3   : > { %v14528_v43 = vpop.f32.mrb[99].mxu1 }
 0x6a4   : > { %v14529_v63 = vadd.f32 %v14528_v43, %v14527_v34 }
 0x6a6   : > { %v11456_v14 = vadd.f32 %v14529_v63, %v11351_v37  ;;  %v14530_v25 = vpop.f32.mrb[100].mxu1  ;;  %v16966_v63 = vmov 1.0  }
 0x6a7   : > { %v14531_v13 = vpop.f32.mrb[101].mxu1 }
 0x6a8   : > { %v14532_v51 = vadd.f32 %v14531_v13, %v14530_v25  ;;  %v11671_v25 = vld [vmem:[%s24011_s4 + $0x8] sm:$0xff]  ;;  %v11672_v13 = vld [vmem:[%s24011_s4 + $0x10] sm:$0xff] }
 0x6aa   : > { %v11461_v33 = vadd.f32 %v14532_v51, %v11356_v47  ;;  %v14533_v50 = vpop.f32.mrb[102].mxu1 }
 0x6ab   : > { %v14534_v62 = vpop.f32.mrb[103].mxu1 }
 0x6ac   : > { %v14535_v18 = vadd.f32 %v14534_v62, %v14533_v50  ;;  %v11675_v62 = vld [vmem:[%s24011_s4 + $0x28] sm:$0xff] }
 0x6ae   : > { %v11466_v53 = vadd.f32 %v14535_v18, %v11361_v22  ;;  %v14536_v30 = vpop.f32.mrb[104].mxu1 }
 0x6af   : > { %v14537_v15 = vpop.f32.mrb[105].mxu1 }
 0x6b0   : > { %v14538_v61 = vadd.f32 %v14537_v15, %v14536_v30  ;;  %v11677_v30 = vld [vmem:[%s24011_s4 + $0x38] sm:$0xff] }
 0x6b2   : > { %v11471_v46 = vadd.f32 %v14538_v61, %v11366_v39  ;;  %v14539_v8 = vpop.f32.mrb[106].mxu1 }
 0x6b3   : > { %v14540_v49 = vpop.f32.mrb[107].mxu1 }
 0x6b4   : > { %v14541_v27 = vadd.f32 %v14540_v49, %v14539_v8 }
 0x6b6   : > { %v11476_v11 = vadd.f32 %v14541_v27, %v11371_v16  ;;  %v14542_v4 = vpop.f32.mrb[108].mxu1 }
 0x6b7   : > { %v14543_v20 = vpop.f32.mrb[109].mxu1 }
 0x6b8   : > { %v14544_v28 = vadd.f32 %v14543_v20, %v14542_v4 }
 0x6ba   : > { %v11481_v36 = vadd.f32 %v14544_v28, %v11376_v54  ;;  %v14545_v35 = vpop.f32.mrb[110].mxu1 }
 0x6bb   : > { %v14546_v3 = vpop.f32.mrb[111].mxu1 }
 0x6bc   : > { %v14547_v12 = vadd.f32 %v14546_v3, %v14545_v35 }
 0x6be   : > { %v11486_v19 = vadd.f32 %v14547_v12, %v11381_v5 }
 0x6dc   : > { %v14580_v2 = vpop.f32.mrb[112].mxu1 }
 0x6dd   : > { %v14581_v55 = vpop.f32.mrb[113].mxu1 }
 0x6de   : > { %v14582_v42 = vadd.f32 %v14581_v55, %v14580_v2 }
 0x6e0   : > { %v11556_v40 = vadd.f32 %v14582_v42, %v11451_v41  ;;  %v14583_v21 = vpop.f32.mrb[114].mxu1 }
 0x6e1   : > { %v14584_v37 = vpop.f32.mrb[115].mxu1 }
 0x6e2   : > { %v14585_v24 = vadd.f32 %v14584_v37, %v14583_v21 }
 0x6e4   : > { %v11561_v38 = vadd.f32 %v14585_v24, %v11456_v14  ;;  %v14586_v59 = vpop.f32.mrb[116].mxu1  ;;  %v11670_v14 = vld [vmem:[%s24011_s4] sm:$0xff] }
 0x6e5   : > { %v14587_v47 = vpop.f32.mrb[117].mxu1  ;;  %v16263_v51 = vpack.c.bf16 %v11671_v25, %v11670_v14 }
 0x6e6   : > { %v16251_v48 = vpack.c.bf16 %v11561_v38, %v11556_v40  ;;  %v14588_v26 = vadd.f32 %v14587_v47, %v14586_v59 }
 0x6e8   : > { %v11566_v52 = vadd.f32 %v14588_v26, %v11461_v33  ;;  %v14589_v22 = vpop.f32.mrb[118].mxu1  ;;  %16252 = vmatpush3.bf16.xpose.msra.mxu1 %v16251_v48  ;;  %v11673_v33 = vld [vmem:[%s24011_s4 + $0x18] sm:$0xff] }
 0x6e9   : > { %v14590_v7 = vpop.f32.mrb[119].mxu1  ;;  %16253 = vmatprep.subr.bf16.mxu1 %v16964_v29  ;;  %v16266_v50 = vpack.c.bf16 %v11673_v33, %v11672_v13 }
 0x6ea   : > { %v14591_v0 = vadd.f32 %v14590_v7, %v14589_v22 }
 0x6ec   : > { %v11571_v58 = vadd.f32 %v14591_v0, %v11466_v53  ;;  %v14592_v39 = vpop.f32.mrb[120].mxu1  ;;  %v11676_v53 = vld [vmem:[%s24011_s4 + $0x30] sm:$0xff] }
 0x6ed   : > { %v14593_v23 = vpop.f32.mrb[121].mxu1  ;;  %v16272_v15 = vpack.c.bf16 %v11677_v30, %v11676_v53 }
 0x6ee   : > { %v16254_v56 = vpack.c.bf16 %v11571_v58, %v11566_v52  ;;  %v14594_v60 = vadd.f32 %v14593_v23, %v14592_v39 }
 0x6f0   : > { %v11576_v16 = vadd.f32 %v14594_v60, %v11471_v46  ;;  %v14595_v57 = vpop.f32.mrb[122].mxu1  ;;  %16255 = vmatpush3.bf16.xpose.msra.mxu1 %v16254_v56 }
 0x6f1   : > { %v14596_v31 = vpop.f32.mrb[123].mxu1  ;;  %16256 = vmatprep.subr.bf16.mxu1 %v16964_v29 }
 0x6f2   : > { %v14597_v17 = vadd.f32 %v14596_v31, %v14595_v57 }
 0x6f4   : > { %v11581_v54 = vadd.f32 %v14597_v17, %v11476_v11  ;;  %v14598_v6 = vpop.f32.mrb[124].mxu1 }
 0x6f5   : > { %v14599_v45 = vpop.f32.mrb[125].mxu1 }
 0x6f6   : > { %v16257_v10 = vpack.c.bf16 %v11581_v54, %v11576_v16  ;;  %v14600_v5 = vadd.f32 %v14599_v45, %v14598_v6 }
 0x6f8   : > { %v11586_v32 = vadd.f32 %v14600_v5, %v11481_v36  ;;  %v14601_v9 = vpop.f32.mrb[126].mxu1  ;;  %16258 = vmatpush3.bf16.xpose.msra.mxu1 %v16257_v10 }
 0x6f9   : > { %v14602_v1 = vpop.f32.mrb[127].mxu1  ;;  %16259 = vmatprep.subr.bf16.mxu1 %v16964_v29 }
 0x6fa   : > { %v14603_v41 = vadd.f32 %v14602_v1, %v14601_v9 }
 0x6fc   : > { %v11591_v34 = vadd.f32 %v14603_v41, %v11486_v19 }
 0x6fe   : > { %v16260_v43 = vpack.c.bf16 %v11591_v34, %v11586_v32 }
 0x700   : > { %16261 = vmatpush3.bf16.xpose.msra.mxu1 %v16260_v43 }
 0x701   : > { %16262 = vmatprep.subr.bf16.mxu1 %v16964_v29 }
 0x707   : > { %15821 = vmatmul.mubr.f32.vlgmr.msra.gmra.mrb[128].mxu1 %v16966_v63 }
 0x708   : > { %15839 = vmatprep.mubr.msk.f32.mxu1 %vm16965_vm13, %v24850_v44  ;;  %16264 = vmatpush3.bf16.msra.mxu1 %v16263_v51  ;;  %v11674_v44 = vld [vmem:[%s24011_s4 + $0x20] sm:$0xff] }
 0x709   : > { %16265 = vmatprep.subr.bf16.mxu1 %v16964_v29  ;;  %v16269_v18 = vpack.c.bf16 %v11675_v62, %v11674_v44 }
 0x70c   : > { %16267 = vmatpush3.bf16.msra.mxu1 %v16266_v50 }
 0x70d   : > { %16268 = vmatprep.subr.bf16.mxu1 %v16964_v29 }
 0x710   : > { %16270 = vmatpush3.bf16.msra.mxu1 %v16269_v18 }
 0x711   : > { %16271 = vmatprep.subr.bf16.mxu1 %v16964_v29  ;;  %v11678_v29 = vld [vmem:[%s24012_s5] sm:$0x1] }
 0x714   : > { %16273 = vmatpush3.bf16.msra.mxu1 %v16272_v15 }
 0x7da   : > { %v11660_v61 = vpop.f32.mrb[128].mxu1 }
 0x7db   : > { %v11664_v46 = vmul.f32 0.0018382353, %v11660_v61  ;;  %v15822_v8 = vpop.f32.mrb[129].mxu1 }
 0x7dd   : > { %16891 = vlog2.f32 %v11664_v46 }
 0x7e7   : > { %v16892_v49 = vpop.eup %16891 }
 0x7e8   : > { %v11666_v27 = vmul.f32 0.6931472, %v16892_v49 }
 0x7ea   : > { %v11667_v11 = vmul.f32 0.33333334, %v11666_v27 }
 0x7ec   : > { %v11668_v4 = vmul.f32 1.442695, %v11667_v11 }
 0x7ee   : > { %16893 = vpow2.f32 %v11668_v4 }
 0x7f8   : > { %v16894_v20 = vpop.eup %16893 }
 0x7f9   : > { %15840 = vmatmul.mubr.msk.f32.vlgmr.msra.gmra.mrb[130].mxu1 %vm11679_vm14, %v16894_v20 }
 0x8cc   : > { %v11749_v28 = vpop.f32.mrb[130].mxu1 }
 0x8cd   : > { %v11750_v36 = vadd.f32 %v11749_v28, %v11678_v29  ;;  %v15841_v35 = vpop.f32.mrb[131].mxu1 }
 0x8cf   : > { %11753 = vst [vmem:[%s243_s18] sm:$0x1] %v11750_v36 }
 0x8d0   : > { %16908 = shalt.err (!%p16905_p3)
}
 0x8d1   : > { %s16909_s13 = scalar_lea.hbm %s23965_s28, 16  ;;  %s16913_s11 = scalar_lea.hbm %s24013_s6, 64 }
 0x8d2   : > { %p16910_p4 = scmp.ne.s32.totalorder %s23965_s28, %s16909_s13  ;;  %p16914_p9 = scmp.lt.u32.totalorder %s23965_s28, %s24013_s6 }
 0x8d3   : > { %p16915_p10 = scmp.lt.u32.totalorder %s16913_s11, %s16909_s13  ;;  %p16917_p12 = scmp.lt.u32.totalorder %s16909_s13, %s23965_s28 }
 0x8d4   : > { %p16911_p7 = pnand %p16910_p4, %p17041_p5 }
 0x8d5   : > { %p16916_p11 = por %p16915_p10, %p16914_p9 }
 0x8d6   : > { %p16912_p8 = pneg %p16911_p7 }
 0x8d7   : > { %p16918_p13 = por %p16917_p12, %p16916_p11 }
 0x8d9   : > { %p16919_p0 = pnand %p16918_p13, %p16912_p8 }
 0x8db   : > { %16922 = shalt.err (!%p16919_p0)
}
 0x8dc   : > { %16794 = dma.vmem_to_hbm [thread:$0]  (%p17041_p5), %s23967_s19, 16, %s23965_s28, %s11755_s29  }
 0x8dd PF: > { %p16800_p1 = scmp.ge.s32.totalorder %s16957_s24, 2  ;;  %s11779_s18 = sand.u32 1, %s16945_s21  }
 0x8de   : > { %s11780_s20 = scalar_lea.sflag [#allocation4], %s11779_s18 }
 0x8df   : > { %p16797_p2 = pnand %p16800_p1, %p17045_p6 }
 0x8e1   : > { %16940 = dma.done.wait (!%p16797_p2), %s11780_s20, 16  }
 0x8e2   : > { %16942 = vsyncadd (!%p16797_p2), %s11780_s20, 4294967280  ;;  %p16_p3 = scmp.ge.s32.totalorder %s17028_s27, 6   ;;  %s24851_s21 = smov %s16949_s22 }
 0x8e3   : > { %s24852_s22 = smov %s16953_s23  ;;  %s24853_s23 = smov %s17039_s30 }
 0x8e4   : > { %s24854_s24 = smov %s17028_s27  ;;  %18 = sbr.rel (!%p16_p3) target bundleno = 3 (0x3), region = 81 }
 0x8eb   :  { %11784 = vsyncpa [#allocation4], 1 }
 0x8ec   :  { %11786 = vsyncpa [#allocation4 + $0x1], 1 }

</bundles_post_ra>
